<compile_context>
chip_gen: v5e
topology: v5e:2x2
jax: 0.10.0
libtpu: 0.0.40
codegen_flags: <defaults>
</compile_context>

<pallas_src>
import functools

import jax
import jax.numpy as jnp
from jax.experimental import pallas as pl
from jax.experimental.pallas import tpu as pltpu


CIN = 10          # 3 (I) + 3 (R) + 3 (Rm) + 1 (guide_map)
CIN_PAD = 16      # channel-pad layer-1 input (padded weight rows are zero)
HIDDEN = 32
COUT = 3


# ----------------------------------------------------------------------------
# Fused kernel: 3x (3x3 "same" conv) for one batch element, all in VMEM.
#   x_ref : (1, H+2, W+2, CIN_PAD)   zero-padded NHWC input (VMEM)
#   w*_ref: (9*Cin, Cout) bf16       im2col weights
#   b*_ref: (1, Cout) f32            biases
#   o_ref : (1, H, W, COUT) f32      NHWC output
#   hp_ref: (H+2, W+2, HIDDEN) f32   scratch for the padded intermediate
# ----------------------------------------------------------------------------
def fused_kmap_kernel(x_ref, w1_ref, b1_ref, w2_ref, b2_ref, w3_ref, b3_ref,
                      o_ref, hp_ref, *, H, W):
    HW = H * W

    def im2col(xp, cin):
        # xp: (H+2, W+2, cin) f32 -> (HW, 9*cin) bf16 patch (tap-major order).
        cols = []
        for kh in range(3):
            for kw in range(3):
                cols.append(xp[kh:kh + H, kw:kw + W, :].reshape(HW, cin))
        return jnp.concatenate(cols, axis=1).astype(jnp.bfloat16)

    def dense(patch, w_ref, b_ref):
        # single MXU matmul, f32 accumulation, f32 bias add.
        return jnp.dot(patch, w_ref[...],
                       preferred_element_type=jnp.float32) + b_ref[...]

    # ---- layer 1: CIN_PAD -> HIDDEN, ReLU ----------------------------------
    h = jnp.maximum(dense(im2col(x_ref[0], CIN_PAD), w1_ref, b1_ref), 0.0)

    # ---- layer 2: HIDDEN -> HIDDEN, ReLU (intermediate stays in VMEM) ------
    hp_ref[...] = jnp.zeros_like(hp_ref)                      # zero halo
    hp_ref[pl.ds(1, H), pl.ds(1, W), :] = h.reshape(H, W, HIDDEN)
    h = jnp.maximum(dense(im2col(hp_ref[...], HIDDEN), w2_ref, b2_ref), 0.0)

    # ---- layer 3: HIDDEN -> COUT, sigmoid ----------------------------------
    # halo border of hp_ref is still zero; only the interior is rewritten.
    hp_ref[pl.ds(1, H), pl.ds(1, W), :] = h.reshape(H, W, HIDDEN)
    k = jax.nn.sigmoid(dense(im2col(hp_ref[...], HIDDEN), w3_ref, b3_ref))

    o_ref[...] = k.reshape(1, H, W, COUT).astype(o_ref.dtype)


def kmap_fused(x_padded, params):
    """x_padded: (N, H+2, W+2, CIN_PAD) f32, already zero padded."""
    N, Hp, Wp, _ = x_padded.shape
    H, W = Hp - 2, Wp - 2

    kernel = functools.partial(fused_kmap_kernel, H=H, W=W)

    return pl.pallas_call(
        kernel,
        out_shape=jax.ShapeDtypeStruct((N, H, W, COUT), jnp.float32),
        grid=(N,),
        in_specs=[
            pl.BlockSpec((1, Hp, Wp, CIN_PAD), lambda n: (n, 0, 0, 0)),
            pl.BlockSpec((9 * CIN_PAD, HIDDEN), lambda n: (0, 0)),
            pl.BlockSpec((1, HIDDEN), lambda n: (0, 0)),
            pl.BlockSpec((9 * HIDDEN, HIDDEN), lambda n: (0, 0)),
            pl.BlockSpec((1, HIDDEN), lambda n: (0, 0)),
            pl.BlockSpec((9 * HIDDEN, COUT), lambda n: (0, 0)),
            pl.BlockSpec((1, COUT), lambda n: (0, 0)),
        ],
        out_specs=pl.BlockSpec((1, H, W, COUT), lambda n: (n, 0, 0, 0)),
        scratch_shapes=[pltpu.VMEM((Hp, Wp, HIDDEN), jnp.float32)],
        compiler_params=pltpu.CompilerParams(
            dimension_semantics=("parallel",)),
    )(x_padded, params["w1"], params["b1"], params["w2"], params["b2"],
      params["w3"], params["b3"])


# ----------------------------------------------------------------------------
# Parameter init (deterministic, PyTorch-conv-like uniform scaling), stored
# directly in the kernel's im2col layout: weights (9*Cin_pad, Cout) bf16.
# ----------------------------------------------------------------------------
def init_params(key):
    ks = jax.random.split(key, 6)

    def conv_init(kw_, kb_, c_in, c_in_pad, c_out):
        bound = (1.0 / (c_in * 9)) ** 0.5
        w = jax.random.uniform(kw_, (3, 3, c_in, c_out), jnp.float32,
                               -bound, bound)
        # zero-pad input channels and flatten (kh, kw, ci) -> rows, matching
        # the kernel's im2col column order (tap-major, channel-minor).
        w = jnp.pad(w, ((0, 0), (0, 0), (0, c_in_pad - c_in), (0, 0)))
        w = w.reshape(9 * c_in_pad, c_out).astype(jnp.bfloat16)
        b = jax.random.uniform(kb_, (1, c_out), jnp.float32, -bound, bound)
        return w, b

    w1, b1 = conv_init(ks[0], ks[1], CIN, CIN_PAD, HIDDEN)
    w2, b2 = conv_init(ks[2], ks[3], HIDDEN, HIDDEN, HIDDEN)
    w3, b3 = conv_init(ks[4], ks[5], HIDDEN, HIDDEN, COUT)
    return dict(w1=w1, b1=b1, w2=w2, b2=b2, w3=w3, b3=b3)


# ----------------------------------------------------------------------------
# K_fit_model.forward(I, R, Rm, guide_map) -> Kmap
#   I, R, Rm : (N, 3, H, W)   NCHW
#   guide_map: (N, 1, H, W)   NCHW
#   Kmap     : (N, 3, H, W)   NCHW
# ----------------------------------------------------------------------------
@jax.jit
def k_fit_model_forward(I, R, Rm, guide_map, params):
    x = jnp.concatenate([I, R, Rm, guide_map], axis=1)        # (N, 10, H, W)
    x = jnp.transpose(x, (0, 2, 3, 1))                        # NCHW -> NHWC
    # single pad: +1 spatial halo and channel pad 10 -> 16 (the padded weight
    # rows are zero, so the result is unchanged).
    x = jnp.pad(x, ((0, 0), (1, 1), (1, 1), (0, CIN_PAD - CIN)))
    k = kmap_fused(x, params)                                 # (N, H, W, 3)
    return jnp.transpose(k, (0, 3, 1, 2))                     # NHWC -> NCHW


if __name__ == "__main__":
    N, H, W = 2, 16, 16

    key = jax.random.PRNGKey(0)
    k_i, k_r, k_rm, k_g, k_p = jax.random.split(key, 5)

    I = jax.random.uniform(k_i, (N, 3, H, W), jnp.float32)
    R = jax.random.uniform(k_r, (N, 3, H, W), jnp.float32)
    Rm = jax.random.uniform(k_rm, (N, 3, H, W), jnp.float32)
    guide_map = jax.random.uniform(k_g, (N, 1, H, W), jnp.float32)

    params = init_params(k_p)

    kmap = k_fit_model_forward(I, R, Rm, guide_map, params)
    jax.block_until_ready(kmap)

    assert kmap.shape == (N, 3, H, W), kmap.shape
    assert bool(jnp.all(jnp.isfinite(kmap)))
    assert bool(jnp.all((kmap >= 0.0) & (kmap <= 1.0)))
    print("KERNEL_OK")
</pallas_src>

<mosaic_0001>
module attributes {stable_mosaic.version = 11 : i64} {
  func.func @fused_kmap_kernel(%arg0: i32, %arg1: memref<1x18x18x16xf32, #tpu.memory_space<vmem>>, %arg2: memref<144x32xbf16, #tpu.memory_space<vmem>>, %arg3: memref<1x32xf32, #tpu.memory_space<vmem>>, %arg4: memref<288x32xbf16, #tpu.memory_space<vmem>>, %arg5: memref<1x32xf32, #tpu.memory_space<vmem>>, %arg6: memref<288x3xbf16, #tpu.memory_space<vmem>>, %arg7: memref<1x3xf32, #tpu.memory_space<vmem>>, %arg8: memref<1x16x16x3xf32, #tpu.memory_space<vmem>>, %arg9: memref<18x18x32xf32, #tpu.memory_space<vmem>>) attributes {dimension_semantics = [#tpu.dimension_semantics<parallel>], iteration_bounds = array<i64: 2>, scalar_prefetch = 0 : i64, scratch_operands = 1 : i64, tpu.core_type = #tpu.core_type<tc>, window_params = [{transform_indices = @transform_0, window_bounds = array<i64: 1, 18, 18, 16>}, {pipeline_mode = #tpu.pipeline_mode<synchronous>, transform_indices = @transform_1, window_bounds = array<i64: 144, 32>}, {pipeline_mode = #tpu.pipeline_mode<synchronous>, transform_indices = @transform_2, window_bounds = array<i64: 1, 32>}, {pipeline_mode = #tpu.pipeline_mode<synchronous>, transform_indices = @transform_3, window_bounds = array<i64: 288, 32>}, {pipeline_mode = #tpu.pipeline_mode<synchronous>, transform_indices = @transform_4, window_bounds = array<i64: 1, 32>}, {pipeline_mode = #tpu.pipeline_mode<synchronous>, transform_indices = @transform_5, window_bounds = array<i64: 288, 3>}, {pipeline_mode = #tpu.pipeline_mode<synchronous>, transform_indices = @transform_6, window_bounds = array<i64: 1, 3>}, {transform_indices = @transform_7, window_bounds = array<i64: 1, 16, 16, 3>}]} {
    %c0 = arith.constant 0 : index
    %c0_0 = arith.constant 0 : index
    %c0_1 = arith.constant 0 : index
    %c0_2 = arith.constant 0 : index
    %0 = vector.load %arg1[%c0, %c0_0, %c0_1, %c0_2] : memref<1x18x18x16xf32, #tpu.memory_space<vmem>>, vector<1x18x18x16xf32>
    %1 = vector.shape_cast %0 : vector<1x18x18x16xf32> to vector<18x18x16xf32>
    %2 = vector.extract_strided_slice %1 {offsets = [0, 0, 0], sizes = [16, 16, 16], strides = [1, 1, 1]} : vector<18x18x16xf32> to vector<16x16x16xf32>
    %3 = vector.shape_cast %2 : vector<16x16x16xf32> to vector<256x16xf32>
    %4 = vector.extract_strided_slice %1 {offsets = [0, 1, 0], sizes = [16, 16, 16], strides = [1, 1, 1]} : vector<18x18x16xf32> to vector<16x16x16xf32>
    %5 = vector.shape_cast %4 : vector<16x16x16xf32> to vector<256x16xf32>
    %6 = vector.extract_strided_slice %1 {offsets = [0, 2, 0], sizes = [16, 16, 16], strides = [1, 1, 1]} : vector<18x18x16xf32> to vector<16x16x16xf32>
    %7 = vector.shape_cast %6 : vector<16x16x16xf32> to vector<256x16xf32>
    %8 = vector.extract_strided_slice %1 {offsets = [1, 0, 0], sizes = [16, 16, 16], strides = [1, 1, 1]} : vector<18x18x16xf32> to vector<16x16x16xf32>
    %9 = vector.shape_cast %8 : vector<16x16x16xf32> to vector<256x16xf32>
    %10 = vector.extract_strided_slice %1 {offsets = [1, 1, 0], sizes = [16, 16, 16], strides = [1, 1, 1]} : vector<18x18x16xf32> to vector<16x16x16xf32>
    %11 = vector.shape_cast %10 : vector<16x16x16xf32> to vector<256x16xf32>
    %12 = vector.extract_strided_slice %1 {offsets = [1, 2, 0], sizes = [16, 16, 16], strides = [1, 1, 1]} : vector<18x18x16xf32> to vector<16x16x16xf32>
    %13 = vector.shape_cast %12 : vector<16x16x16xf32> to vector<256x16xf32>
    %14 = vector.extract_strided_slice %1 {offsets = [2, 0, 0], sizes = [16, 16, 16], strides = [1, 1, 1]} : vector<18x18x16xf32> to vector<16x16x16xf32>
    %15 = vector.shape_cast %14 : vector<16x16x16xf32> to vector<256x16xf32>
    %16 = vector.extract_strided_slice %1 {offsets = [2, 1, 0], sizes = [16, 16, 16], strides = [1, 1, 1]} : vector<18x18x16xf32> to vector<16x16x16xf32>
    %17 = vector.shape_cast %16 : vector<16x16x16xf32> to vector<256x16xf32>
    %18 = vector.extract_strided_slice %1 {offsets = [2, 2, 0], sizes = [16, 16, 16], strides = [1, 1, 1]} : vector<18x18x16xf32> to vector<16x16x16xf32>
    %19 = vector.shape_cast %18 : vector<16x16x16xf32> to vector<256x16xf32>
    %20 = tpu.concatenate %3, %5, %7, %9, %11, %13, %15, %17, %19 in 1 : vector<256x16xf32>, vector<256x16xf32>, vector<256x16xf32>, vector<256x16xf32>, vector<256x16xf32>, vector<256x16xf32>, vector<256x16xf32>, vector<256x16xf32>, vector<256x16xf32> -> vector<256x144xf32>
    %21 = arith.truncf %20 : vector<256x144xf32> to vector<256x144xbf16>
    %c0_3 = arith.constant 0 : index
    %c0_4 = arith.constant 0 : index
    %22 = vector.load %arg2[%c0_3, %c0_4] : memref<144x32xbf16, #tpu.memory_space<vmem>>, vector<144x32xbf16>
    %cst = arith.constant dense<0.000000e+00> : vector<256x32xf32>
    %23 = tpu.matmul %21, %22, %cst {dimension_numbers = #tpu.dot_dimension_numbers<[1], [0], [0], [1], [0, 0, 1, 1], [], []>} : vector<256x144xbf16>, vector<144x32xbf16>, vector<256x32xf32> -> vector<256x32xf32>
    %c0_5 = arith.constant 0 : index
    %c0_6 = arith.constant 0 : index
    %24 = vector.load %arg3[%c0_5, %c0_6] : memref<1x32xf32, #tpu.memory_space<vmem>>, vector<1x32xf32>
    %25 = vector.broadcast %24 : vector<1x32xf32> to vector<256x32xf32>
    %26 = arith.addf %23, %25 : vector<256x32xf32>
    %cst_7 = arith.constant 0.000000e+00 : f32
    %27 = vector.broadcast %cst_7 : f32 to vector<256x32xf32>
    %28 = arith.maximumf %26, %27 : vector<256x32xf32>
    %cst_8 = arith.constant 0.000000e+00 : f32
    %29 = vector.broadcast %cst_8 : f32 to vector<18x18x32xf32>
    %c0_9 = arith.constant 0 : index
    %c0_10 = arith.constant 0 : index
    %c0_11 = arith.constant 0 : index
    %30 = vector.load %arg9[%c0_9, %c0_10, %c0_11] : memref<18x18x32xf32, #tpu.memory_space<vmem>>, vector<18x18x32xf32>
    tpu.vector_store %arg9[%c0_9, %c0_10, %c0_11], %29 {strides = array<i32>} : memref<18x18x32xf32, #tpu.memory_space<vmem>>, vector<18x18x32xf32>,
    %31 = vector.shape_cast %28 : vector<256x32xf32> to vector<16x16x32xf32>
    %c1 = arith.constant 1 : index
    %c1_12 = arith.constant 1 : index
    %c0_13 = arith.constant 0 : index
    %32 = vector.load %arg9[%c1, %c1_12, %c0_13] : memref<18x18x32xf32, #tpu.memory_space<vmem>>, vector<16x16x32xf32>
    tpu.vector_store %arg9[%c1, %c1_12, %c0_13], %31 {strides = array<i32>} : memref<18x18x32xf32, #tpu.memory_space<vmem>>, vector<16x16x32xf32>,
    %c0_14 = arith.constant 0 : index
    %c0_15 = arith.constant 0 : index
    %c0_16 = arith.constant 0 : index
    %33 = vector.load %arg9[%c0_14, %c0_15, %c0_16] : memref<18x18x32xf32, #tpu.memory_space<vmem>>, vector<18x18x32xf32>
    %34 = vector.extract_strided_slice %33 {offsets = [0, 0, 0], sizes = [16, 16, 32], strides = [1, 1, 1]} : vector<18x18x32xf32> to vector<16x16x32xf32>
    %35 = vector.shape_cast %34 : vector<16x16x32xf32> to vector<256x32xf32>
    %36 = vector.extract_strided_slice %33 {offsets = [0, 1, 0], sizes = [16, 16, 32], strides = [1, 1, 1]} : vector<18x18x32xf32> to vector<16x16x32xf32>
    %37 = vector.shape_cast %36 : vector<16x16x32xf32> to vector<256x32xf32>
    %38 = vector.extract_strided_slice %33 {offsets = [0, 2, 0], sizes = [16, 16, 32], strides = [1, 1, 1]} : vector<18x18x32xf32> to vector<16x16x32xf32>
    %39 = vector.shape_cast %38 : vector<16x16x32xf32> to vector<256x32xf32>
    %40 = vector.extract_strided_slice %33 {offsets = [1, 0, 0], sizes = [16, 16, 32], strides = [1, 1, 1]} : vector<18x18x32xf32> to vector<16x16x32xf32>
    %41 = vector.shape_cast %40 : vector<16x16x32xf32> to vector<256x32xf32>
    %42 = vector.extract_strided_slice %33 {offsets = [1, 1, 0], sizes = [16, 16, 32], strides = [1, 1, 1]} : vector<18x18x32xf32> to vector<16x16x32xf32>
    %43 = vector.shape_cast %42 : vector<16x16x32xf32> to vector<256x32xf32>
    %44 = vector.extract_strided_slice %33 {offsets = [1, 2, 0], sizes = [16, 16, 32], strides = [1, 1, 1]} : vector<18x18x32xf32> to vector<16x16x32xf32>
    %45 = vector.shape_cast %44 : vector<16x16x32xf32> to vector<256x32xf32>
    %46 = vector.extract_strided_slice %33 {offsets = [2, 0, 0], sizes = [16, 16, 32], strides = [1, 1, 1]} : vector<18x18x32xf32> to vector<16x16x32xf32>
    %47 = vector.shape_cast %46 : vector<16x16x32xf32> to vector<256x32xf32>
    %48 = vector.extract_strided_slice %33 {offsets = [2, 1, 0], sizes = [16, 16, 32], strides = [1, 1, 1]} : vector<18x18x32xf32> to vector<16x16x32xf32>
    %49 = vector.shape_cast %48 : vector<16x16x32xf32> to vector<256x32xf32>
    %50 = vector.extract_strided_slice %33 {offsets = [2, 2, 0], sizes = [16, 16, 32], strides = [1, 1, 1]} : vector<18x18x32xf32> to vector<16x16x32xf32>
    %51 = vector.shape_cast %50 : vector<16x16x32xf32> to vector<256x32xf32>
    %52 = tpu.concatenate %35, %37, %39, %41, %43, %45, %47, %49, %51 in 1 : vector<256x32xf32>, vector<256x32xf32>, vector<256x32xf32>, vector<256x32xf32>, vector<256x32xf32>, vector<256x32xf32>, vector<256x32xf32>, vector<256x32xf32>, vector<256x32xf32> -> vector<256x288xf32>
    %53 = arith.truncf %52 : vector<256x288xf32> to vector<256x288xbf16>
    %c0_17 = arith.constant 0 : index
    %c0_18 = arith.constant 0 : index
    %54 = vector.load %arg4[%c0_17, %c0_18] : memref<288x32xbf16, #tpu.memory_space<vmem>>, vector<288x32xbf16>
    %cst_19 = arith.constant dense<0.000000e+00> : vector<256x32xf32>
    %55 = tpu.matmul %53, %54, %cst_19 {dimension_numbers = #tpu.dot_dimension_numbers<[1], [0], [0], [1], [0, 0, 1, 1], [], []>} : vector<256x288xbf16>, vector<288x32xbf16>, vector<256x32xf32> -> vector<256x32xf32>
    %c0_20 = arith.constant 0 : index
    %c0_21 = arith.constant 0 : index
    %56 = vector.load %arg5[%c0_20, %c0_21] : memref<1x32xf32, #tpu.memory_space<vmem>>, vector<1x32xf32>
    %57 = vector.broadcast %56 : vector<1x32xf32> to vector<256x32xf32>
    %58 = arith.addf %55, %57 : vector<256x32xf32>
    %cst_22 = arith.constant 0.000000e+00 : f32
    %59 = vector.broadcast %cst_22 : f32 to vector<256x32xf32>
    %60 = arith.maximumf %58, %59 : vector<256x32xf32>
    %61 = vector.shape_cast %60 : vector<256x32xf32> to vector<16x16x32xf32>
    %c1_23 = arith.constant 1 : index
    %c1_24 = arith.constant 1 : index
    %c0_25 = arith.constant 0 : index
    %62 = vector.load %arg9[%c1_23, %c1_24, %c0_25] : memref<18x18x32xf32, #tpu.memory_space<vmem>>, vector<16x16x32xf32>
    tpu.vector_store %arg9[%c1_23, %c1_24, %c0_25], %61 {strides = array<i32>} : memref<18x18x32xf32, #tpu.memory_space<vmem>>, vector<16x16x32xf32>,
    %c0_26 = arith.constant 0 : index
    %c0_27 = arith.constant 0 : index
    %c0_28 = arith.constant 0 : index
    %63 = vector.load %arg9[%c0_26, %c0_27, %c0_28] : memref<18x18x32xf32, #tpu.memory_space<vmem>>, vector<18x18x32xf32>
    %64 = vector.extract_strided_slice %63 {offsets = [0, 0, 0], sizes = [16, 16, 32], strides = [1, 1, 1]} : vector<18x18x32xf32> to vector<16x16x32xf32>
    %65 = vector.shape_cast %64 : vector<16x16x32xf32> to vector<256x32xf32>
    %66 = vector.extract_strided_slice %63 {offsets = [0, 1, 0], sizes = [16, 16, 32], strides = [1, 1, 1]} : vector<18x18x32xf32> to vector<16x16x32xf32>
    %67 = vector.shape_cast %66 : vector<16x16x32xf32> to vector<256x32xf32>
    %68 = vector.extract_strided_slice %63 {offsets = [0, 2, 0], sizes = [16, 16, 32], strides = [1, 1, 1]} : vector<18x18x32xf32> to vector<16x16x32xf32>
    %69 = vector.shape_cast %68 : vector<16x16x32xf32> to vector<256x32xf32>
    %70 = vector.extract_strided_slice %63 {offsets = [1, 0, 0], sizes = [16, 16, 32], strides = [1, 1, 1]} : vector<18x18x32xf32> to vector<16x16x32xf32>
    %71 = vector.shape_cast %70 : vector<16x16x32xf32> to vector<256x32xf32>
    %72 = vector.extract_strided_slice %63 {offsets = [1, 1, 0], sizes = [16, 16, 32], strides = [1, 1, 1]} : vector<18x18x32xf32> to vector<16x16x32xf32>
    %73 = vector.shape_cast %72 : vector<16x16x32xf32> to vector<256x32xf32>
    %74 = vector.extract_strided_slice %63 {offsets = [1, 2, 0], sizes = [16, 16, 32], strides = [1, 1, 1]} : vector<18x18x32xf32> to vector<16x16x32xf32>
    %75 = vector.shape_cast %74 : vector<16x16x32xf32> to vector<256x32xf32>
    %76 = vector.extract_strided_slice %63 {offsets = [2, 0, 0], sizes = [16, 16, 32], strides = [1, 1, 1]} : vector<18x18x32xf32> to vector<16x16x32xf32>
    %77 = vector.shape_cast %76 : vector<16x16x32xf32> to vector<256x32xf32>
    %78 = vector.extract_strided_slice %63 {offsets = [2, 1, 0], sizes = [16, 16, 32], strides = [1, 1, 1]} : vector<18x18x32xf32> to vector<16x16x32xf32>
    %79 = vector.shape_cast %78 : vector<16x16x32xf32> to vector<256x32xf32>
    %80 = vector.extract_strided_slice %63 {offsets = [2, 2, 0], sizes = [16, 16, 32], strides = [1, 1, 1]} : vector<18x18x32xf32> to vector<16x16x32xf32>
    %81 = vector.shape_cast %80 : vector<16x16x32xf32> to vector<256x32xf32>
    %82 = tpu.concatenate %65, %67, %69, %71, %73, %75, %77, %79, %81 in 1 : vector<256x32xf32>, vector<256x32xf32>, vector<256x32xf32>, vector<256x32xf32>, vector<256x32xf32>, vector<256x32xf32>, vector<256x32xf32>, vector<256x32xf32>, vector<256x32xf32> -> vector<256x288xf32>
    %83 = arith.truncf %82 : vector<256x288xf32> to vector<256x288xbf16>
    %c0_29 = arith.constant 0 : index
    %c0_30 = arith.constant 0 : index
    %84 = vector.load %arg6[%c0_29, %c0_30] : memref<288x3xbf16, #tpu.memory_space<vmem>>, vector<288x3xbf16>
    %cst_31 = arith.constant dense<0.000000e+00> : vector<256x3xf32>
    %85 = tpu.matmul %83, %84, %cst_31 {dimension_numbers = #tpu.dot_dimension_numbers<[1], [0], [0], [1], [0, 0, 1, 1], [], []>} : vector<256x288xbf16>, vector<288x3xbf16>, vector<256x3xf32> -> vector<256x3xf32>
    %c0_32 = arith.constant 0 : index
    %c0_33 = arith.constant 0 : index
    %86 = vector.load %arg7[%c0_32, %c0_33] : memref<1x3xf32, #tpu.memory_space<vmem>>, vector<1x3xf32>
    %87 = vector.broadcast %86 : vector<1x3xf32> to vector<256x3xf32>
    %88 = arith.addf %85, %87 : vector<256x3xf32>
    %89 = arith.negf %88 : vector<256x3xf32>
    %90 = math.exp %89 : vector<256x3xf32>
    %cst_34 = arith.constant 1.000000e+00 : f32
    %91 = vector.broadcast %cst_34 : f32 to vector<256x3xf32>
    %92 = arith.addf %91, %90 : vector<256x3xf32>
    %93 = arith.divf %91, %92 : vector<256x3xf32>
    %94 = vector.shape_cast %93 : vector<256x3xf32> to vector<1x16x16x3xf32>
    %c0_35 = arith.constant 0 : index
    %c0_36 = arith.constant 0 : index
    %c0_37 = arith.constant 0 : index
    %c0_38 = arith.constant 0 : index
    %95 = vector.load %arg8[%c0_35, %c0_36, %c0_37, %c0_38] : memref<1x16x16x3xf32, #tpu.memory_space<vmem>>, vector<1x16x16x3xf32>
    tpu.vector_store %arg8[%c0_35, %c0_36, %c0_37, %c0_38], %94 {strides = array<i32>} : memref<1x16x16x3xf32, #tpu.memory_space<vmem>>, vector<1x16x16x3xf32>,
    return
  }
  func.func @transform_0(%arg0: i32) -> (i32, i32, i32, i32) {
    %c0_i32 = arith.constant 0 : i32
    %c0_i32_0 = arith.constant 0 : i32
    %c0_i32_1 = arith.constant 0 : i32
    %c0_i32_2 = arith.constant 0 : i32
    return %arg0, %c0_i32, %c0_i32_0, %c0_i32_1 : i32, i32, i32, i32
  }
  func.func @transform_1(%arg0: i32) -> (i32, i32) {
    %c0_i32 = arith.constant 0 : i32
    %c0_i32_0 = arith.constant 0 : i32
    %c0_i32_1 = arith.constant 0 : i32
    return %c0_i32, %c0_i32_0 : i32, i32
  }
  func.func @transform_2(%arg0: i32) -> (i32, i32) {
    %c0_i32 = arith.constant 0 : i32
    %c0_i32_0 = arith.constant 0 : i32
    %c0_i32_1 = arith.constant 0 : i32
    return %c0_i32, %c0_i32_0 : i32, i32
  }
  func.func @transform_3(%arg0: i32) -> (i32, i32) {
    %c0_i32 = arith.constant 0 : i32
    %c0_i32_0 = arith.constant 0 : i32
    %c0_i32_1 = arith.constant 0 : i32
    return %c0_i32, %c0_i32_0 : i32, i32
  }
  func.func @transform_4(%arg0: i32) -> (i32, i32) {
    %c0_i32 = arith.constant 0 : i32
    %c0_i32_0 = arith.constant 0 : i32
    %c0_i32_1 = arith.constant 0 : i32
    return %c0_i32, %c0_i32_0 : i32, i32
  }
  func.func @transform_5(%arg0: i32) -> (i32, i32) {
    %c0_i32 = arith.constant 0 : i32
    %c0_i32_0 = arith.constant 0 : i32
    %c0_i32_1 = arith.constant 0 : i32
    return %c0_i32, %c0_i32_0 : i32, i32
  }
  func.func @transform_6(%arg0: i32) -> (i32, i32) {
    %c0_i32 = arith.constant 0 : i32
    %c0_i32_0 = arith.constant 0 : i32
    %c0_i32_1 = arith.constant 0 : i32
    return %c0_i32, %c0_i32_0 : i32, i32
  }
  func.func @transform_7(%arg0: i32) -> (i32, i32, i32, i32) {
    %c0_i32 = arith.constant 0 : i32
    %c0_i32_0 = arith.constant 0 : i32
    %c0_i32_1 = arith.constant 0 : i32
    %c0_i32_2 = arith.constant 0 : i32
    return %arg0, %c0_i32, %c0_i32_0, %c0_i32_1 : i32, i32, i32, i32
  }
}

</mosaic_0001>

<bundles_post_ra>
// kernel: k_fit_model_forward.1
= control target key start
LH: loop header
LB: loop body
LE: loop exit
PB: predicated region body
PF: predicated region fallthrough
CT: control target
= control target key end

     0   :  { %s8112_s24 = smov 0   ;;  %s12649_s0 = inlined_call_operand.vmem [shape: f32[2,18,18,16], index: 0, kind: input, shape index: {}]   ;;  %s12650_s1 = inlined_call_operand.vmem [shape: bf16[144,32], index: 1, kind: input, shape index: {}]   ;;  %s12651_s2 = inlined_call_operand.vmem [shape: f32[1,32], index: 2, kind: input, shape index: {}]   ;;  %s12652_s3 = inlined_call_operand.vmem [shape: bf16[288,32], index: 3, kind: input, shape index: {}]   ;;  %s12653_s4 = inlined_call_operand.vmem [shape: f32[1,32], index: 4, kind: input, shape index: {}]   ;;  %s12654_s5 = inlined_call_operand.vmem [shape: bf16[288,3], index: 5, kind: input, shape index: {}]   ;;  %s12655_s6 = inlined_call_operand.vmem [shape: f32[1,3], index: 6, kind: input, shape index: {}]   ;;  %s12656_s7 = inlined_call_operand.vmem [shape: f32[2,16,16,3], index: 7, kind: output, shape index: {}]  }
   0x1 LB: > { %s5981_s25 = sadd.s32 4294967295, %s8062_s24   ;;  %p5985_p0 = scmp.ge.s32.totalorder %s8062_s24, 1  ;;  %s8062_s24 = sphi %s8112_s24, %s17_s24  }
   0x2   : > { %p237_p1 = scmp.lt.s32.totalorder %s8062_s24, 3 }
   0x4   : > { %p238_p2 = pnand %p5985_p0, %p237_p1 }
   0x6   : > { %241 = sbr.rel (%p238_p2) target bundleno = 1583 (0x62f), region = 48 }
   0xb   : > { %p269_p3 = scmp.lt.s32.totalorder %s5981_s25, 1  ;;  %vm382_vm0 = vcmask 1046528   ;;  %s8064_s30 = smov 16   ;;  %vm463_vm1 = vcmask 1045504   ;;  %vm1274_vm2 = vcmask 130048   ;;  %vm1307_vm3 = vcmask 261120  }
   0xc   : > { %s8065_s8 = smov 32   ;;  %s8066_s9 = smov 48   ;;  %vm1340_vm4 = vcmask 392192   ;;  %vm1373_vm5 = vcmask 523264   ;;  %vm1439_vm6 = vcmask 785408   ;;  %vm1406_vm7 = vcmask 654336  }
   0xd   : > { %s13051_s25 = smov (!%p269_p3, %s5981_s25), 1  ;;  %s8067_s10 = smov 64   ;;  %vm1472_vm8 = vcmask 916480   ;;  %vm1873_vm9 = vcmask 254976   ;;  %vm5893_vm11 = vcmask 23552  }
   0xe   : > { %s6297_s26 = smul.u32 432, %s13051_s25  ;;  %s8068_s11 = smov 80  }
   0xf   : > { %s8069_s12 = smov 96   ;;  %s8070_s13 = smov 112  }
  0x10   : > { %s8126_s29 = scalar_lea.vmem %s12649_s0, %s6297_s26 }
  0x11   : > { %v8129_v0 = vld [vmem:[%s8126_s29 + $0x60] sm:$0xff]  ;;  %v8132_v1 = vld [vmem:[%s8126_s29 + $0x68] sm:$0xff]  ;;  %v8135_v2 = vld [vmem:[%s8126_s29 + $0x70] sm:$0x3] }
  0x12   : > { %v403_v3 = vrot.slane %v8129_v0, 1  ;;  %v404_v4 = vrot.slane %v8132_v1, 1  ;;  %v406_v5 = vrot.slane %v8135_v2, 1  ;;  %v8141_v6 = vld [vmem:[%s8126_s29 + $0x30] sm:$0xff]  ;;  %v8144_v7 = vld [vmem:[%s8126_s29 + $0x38] sm:$0xff]  ;;  %v8152_v11 = vld [vmem:[%s8126_s29] sm:$0xff] }
  0x13   : > { %v8147_v8 = vld [vmem:[%s8126_s29 + $0x40] sm:$0x3]  ;;  %v393_v9 = vrot.slane %v8141_v6, 1  ;;  %v394_v10 = vrot.slane %v8144_v7, 1  ;;  %v8155_v12 = vld [vmem:[%s8126_s29 + $0x8] sm:$0xff]  ;;  %v8164_v17 = vld [vmem:[%s8126_s29 + $0x78] sm:$0xff] }
  0x14   : > { %v405_v13 = vsel %vm382_vm0, %v403_v3, %v404_v4  ;;  %v407_v14 = vsel %vm382_vm0, %v404_v4, %v406_v5  ;;  %v396_v15 = vrot.slane %v8147_v8, 1  ;;  %v8161_v16 = vld [vmem:[%s8126_s29 + $0x10] sm:$0x3]  ;;  %v8167_v18 = vld [vmem:[%s8126_s29 + $0x80] sm:$0xff]  ;;  %v383_v21 = vrot.slane %v8152_v11, 1  ;;  %v8178_v24 = vld [vmem:[%s8126_s29 + $0x48] sm:$0xff] }
  0x15   : > { %v8169_v19 = vpack.i.bf16 %v407_v14, %v405_v13  ;;  %v395_v20 = vsel %vm382_vm0, %v393_v9, %v394_v10  ;;  %v384_v22 = vrot.slane %v8155_v12, 1  ;;  %v8175_v23 = vld [vmem:[%s8126_s29 + $0x88] sm:$0x3]  ;;  %v8181_v25 = vld [vmem:[%s8126_s29 + $0x50] sm:$0xff]  ;;  %v386_v27 = vrot.slane %v8161_v16, 1  ;;  %v8190_v30 = vld [vmem:[%s8126_s29 + $0x18] sm:$0xff] }
  0x16   : > { %v397_v26 = vsel %vm382_vm0, %v394_v10, %v396_v15  ;;  %v408_v28 = vrot.slane %v8164_v17, 1  ;;  %v8187_v29 = vld [vmem:[%s8126_s29 + $0x58] sm:$0x3]  ;;  %v409_v33 = vrot.slane %v8167_v18, 1  ;;  %v411_v34 = vrot.slane %v8175_v23, 1  ;;  %v8200_v35 = vld [vmem:[%s8126_s29 + $0x20] sm:$0xff] }
  0x17   : > { %12786 = vst [vmem:[#allocation3_spill] sm:$0xff] %v8169_v19  ;;  %6335 = vrot.lane.b32.xlu2 %v8169_v19, %s8064_s30  ;;  %v8194_v31 = vpack.i.bf16 %v397_v26, %v395_v20  ;;  %v385_v32 = vsel %vm382_vm0, %v383_v21, %v384_v22  ;;  %v8203_v36 = vld [vmem:[%s8126_s29 + $0x28] sm:$0x3]  ;;  %v387_v37 = vsel %vm382_vm0, %v384_v22, %v386_v27  ;;  %v398_v38 = vrot.slane %v8178_v24, 1  ;;  %v8210_v41 = vld [vmem:[%s8126_s29 + $0xc0] sm:$0xff]  ;;  %v8236_v56 = vld [vmem:[%s8126_s29 + $0xb0] sm:$0xff] }
  0x18   : > { %v399_v39 = vrot.slane %v8181_v25, 1  ;;  %v401_v40 = vrot.slane %v8187_v29, 1  ;;  %v8213_v42 = vld [vmem:[%s8126_s29 + $0xc8] sm:$0xff]  ;;  %v6314_v43 = vpack.i.bf16 %v387_v37, %v385_v32  ;;  %v410_v44 = vsel %vm382_vm0, %v408_v28, %v409_v33  ;;  %v8221_v47 = vld [vmem:[%s8126_s29 + $0xd0] sm:$0x3]  ;;  %v8250_v63 = vld [vmem:[%s8126_s29 + $0x98] sm:$0xff] }
  0x19   : > { %12787 = vst [vmem:[#allocation4_spill] sm:$0xff] %v8194_v31  ;;  %6325 = vrot.lane.b32.xlu1 %v8194_v31, %s8064_s30  ;;  %v412_v45 = vsel %vm382_vm0, %v409_v33, %v411_v34  ;;  %v388_v46 = vrot.slane %v8190_v30, 1  ;;  %v389_v50 = vrot.slane %v8200_v35, 1  ;;  %v8227_v51 = vld [vmem:[%s8126_s29 + $0xa8] sm:$0xff]  ;;  %v391_v53 = vrot.slane %v8203_v36, 1  ;;  %v8247_v62 = vld [vmem:[%s8126_s29 + $0x90] sm:$0xff] }
  0x1a   : > { %v400_v48 = vsel %vm382_vm0, %v398_v38, %v399_v39  ;;  %v402_v49 = vsel %vm382_vm0, %v399_v39, %v401_v40  ;;  %6315 = vrot.lane.b32.xlu0 %v6314_v43, %s8064_s30  ;;  %v8230_v52 = vpack.i.bf16 %v412_v45, %v410_v44  ;;  %v423_v54 = vrot.slane %v8210_v41, 1  ;;  %v8239_v57 = vld [vmem:[%s8126_s29 + $0xb8] sm:$0x3]  ;;  %v8253_v3 = vld [vmem:[%s8126_s29 + $0xa0] sm:$0x3]  ;;  %v8268_v22 = vld [vmem:[%s8126_s29 + $0x108] sm:$0xff] }
  0x1b   : > { %v424_v55 = vrot.slane %v8213_v42, 1  ;;  %v390_v58 = vsel %vm382_vm0, %v388_v46, %v389_v50  ;;  %v426_v59 = vrot.slane %v8221_v47, 1  ;;  %v8243_v60 = vpack.i.bf16 %v402_v49, %v400_v48  ;;  %v8271_v26 = vld [vmem:[%s8126_s29 + $0x110] sm:$0xff]  ;;  %v8276_v27 = vld [vmem:[%s8126_s29 + $0x118] sm:$0x3]  ;;  %v8304_v49 = vld [vmem:[%s8126_s29 + $0xe0] sm:$0xff] }
  0x1c   : > { %12788 = vst [vmem:[#allocation5_spill] sm:$0xff] %v8230_v52  ;;  %v392_v61 = vsel %vm382_vm0, %v389_v50, %v391_v53  ;;  %v418_v4 = vrot.slane %v8227_v51, 1  ;;  %v419_v5 = vrot.slane %v8236_v56, 1  ;;  %v421_v9 = vrot.slane %v8239_v57, 1  ;;  %v8287_v38 = vld [vmem:[%s8126_s29 + $0xf0] sm:$0xff]  ;;  %v8290_v39 = vld [vmem:[%s8126_s29 + $0xf8] sm:$0xff] }
  0x1d   : > { %v8260_v10 = vpack.i.bf16 %v392_v61, %v390_v58  ;;  %v425_v13 = vsel %vm382_vm0, %v423_v54, %v424_v55  ;;  %v427_v14 = vsel %vm382_vm0, %v424_v55, %v426_v59  ;;  %v413_v15 = vrot.slane %v8247_v62, 1  ;;  %v8293_v40 = vld [vmem:[%s8126_s29 + $0x100] sm:$0x3]  ;;  %v8301_v48 = vld [vmem:[%s8126_s29 + $0xd8] sm:$0xff]  ;;  %v8307_v50 = vld [vmem:[%s8126_s29 + $0xe8] sm:$0x3] }
  0x1e   : > { %v414_v20 = vrot.slane %v8250_v63, 1  ;;  %v416_v21 = vrot.slane %v8253_v3, 1  ;;  %v420_v28 = vsel %vm382_vm0, %v418_v4, %v419_v5  ;;  %v422_v32 = vsel %vm382_vm0, %v419_v5, %v421_v9 }
  0x1f   : > { %6340 = vrot.lane.b32.xlu2 %v8230_v52, %s8064_s30  ;;  %12789 = vst [vmem:[#allocation6_spill] sm:$0xff] %v8260_v10  ;;  %v8282_v33 = vpack.i.bf16 %v427_v14, %v425_v13  ;;  %v438_v34 = vrot.slane %v8268_v22, 1  ;;  %v439_v37 = vrot.slane %v8271_v26, 1  ;;  %v441_v45 = vrot.slane %v8276_v27, 1  ;;  %v8322_v13 = vld [vmem:[%s8126_s29 + $0x150] sm:$0xff]  ;;  %v8325_v14 = vld [vmem:[%s8126_s29 + $0x158] sm:$0xff] }
  0x20   : > { %v415_v43 = vsel %vm382_vm0, %v413_v15, %v414_v20  ;;  %v417_v44 = vsel %vm382_vm0, %v414_v20, %v416_v21  ;;  %v8298_v46 = vpack.i.bf16 %v422_v32, %v420_v28  ;;  %v433_v53 = vrot.slane %v8287_v38, 1  ;;  %v8330_v15 = vld [vmem:[%s8126_s29 + $0x160] sm:$0x3] }
  0x21   : > { %6330 = vrot.lane.b32.xlu1 %v8243_v60, %s8064_s30  ;;  %12790 = vst [vmem:[#allocation7_spill] sm:$0xff] %v8282_v33  ;;  %v434_v54 = vrot.slane %v8290_v39, 1  ;;  %v436_v55 = vrot.slane %v8293_v40, 1  ;;  %v8314_v58 = vpack.i.bf16 %v417_v44, %v415_v43  ;;  %v440_v59 = vsel %vm382_vm0, %v438_v34, %v439_v37  ;;  %v8344_v43 = vld [vmem:[%s8126_s29 + $0x140] sm:$0xff]  ;;  %v8347_v44 = vld [vmem:[%s8126_s29 + $0x148] sm:$0x3] }
  0x22   : > { %6320 = vrot.lane.b32.xlu0 %v8260_v10, %s8064_s30  ;;  %12791 = vst [vmem:[#allocation8_spill] sm:$0xff] %v8298_v46  ;;  %v442_v61 = vsel %vm382_vm0, %v439_v37, %v441_v45  ;;  %v428_v4 = vrot.slane %v8301_v48, 1  ;;  %v429_v5 = vrot.slane %v8304_v49, 1  ;;  %v431_v9 = vrot.slane %v8307_v50, 1  ;;  %v8341_v37 = vld [vmem:[%s8126_s29 + $0x138] sm:$0xff] }
  0x23   : > { %12792 = vst [vmem:[#allocation9_spill] sm:$0xff] %v8314_v58  ;;  %v435_v20 = vsel %vm382_vm0, %v433_v53, %v434_v54  ;;  %v437_v21 = vsel %vm382_vm0, %v434_v54, %v436_v55  ;;  %v8336_v28 = vpack.i.bf16 %v442_v61, %v440_v59  ;;  %v453_v32 = vrot.slane %v8322_v13, 1  ;;  %v8355_v59 = vld [vmem:[%s8126_s29 + $0x120] sm:$0xff]  ;;  %v8358_v61 = vld [vmem:[%s8126_s29 + $0x128] sm:$0xff] }
  0x24   : > { %v454_v34 = vrot.slane %v8325_v14, 1  ;;  %v430_v45 = vsel %vm382_vm0, %v428_v4, %v429_v5  ;;  %v432_v53 = vsel %vm382_vm0, %v429_v5, %v431_v9  ;;  %v456_v54 = vrot.slane %v8330_v15, 1 }
  0x25   : > { %12793 = vst [vmem:[#allocation10_spill] sm:$0xff] %v8336_v28  ;;  %v8352_v55 = vpack.i.bf16 %v437_v21, %v435_v20  ;;  %v449_v19 = vrot.slane %v8344_v43, 1  ;;  %v451_v52 = vrot.slane %v8347_v44, 1  ;;  %v8368_v4 = vpack.i.bf16 %v432_v53, %v430_v45 }
  0x26   : > { %v455_v5 = vsel %vm382_vm0, %v453_v32, %v454_v34  ;;  %v457_v9 = vsel %vm382_vm0, %v454_v34, %v456_v54  ;;  %v443_v20 = vrot.slane %v8355_v59, 1  ;;  %v444_v21 = vrot.slane %v8358_v61, 1 }
  0x27   : > { %6355 = vrot.lane.b32.xlu2 %v8282_v33, %s8064_s30  ;;  %12794 = vst [vmem:[#allocation11_spill] sm:$0xff] %v8352_v55  ;;  %v448_v33 = vrot.slane %v8341_v37, 1  ;;  %v452_v45 = vsel %vm382_vm0, %v449_v19, %v451_v52  ;;  %v8381_v32 = vpack.i.bf16 %v457_v9, %v455_v5  ;;  %v469_v34 = vrot.slane %v8190_v30, 2  ;;  %v8397_v52 = vld [vmem:[%s8126_s29 + $0x178] sm:$0x3] }
  0x28   : > { %12795 = vst [vmem:[#allocation12_spill] sm:$0xff] %v8368_v4  ;;  %v470_v53 = vrot.slane %v8200_v35, 2  ;;  %v445_v54 = vsel %vm382_vm0, %v443_v20, %v444_v21  ;;  %v467_v5 = vrot.slane %v8161_v16, 2  ;;  %v464_v9 = vrot.slane %v8152_v11, 2 }
  0x29   : > { %6350 = vrot.lane.b32.xlu1 %v8298_v46, %s8064_s30  ;;  %v8361_v46 = vld [vmem:[%s8126_s29 + $0x130] sm:$0x3]  ;;  %v487_v16 = vrot.slane %v8135_v2, 2  ;;  %v482_v2 = vrot.slane %v8187_v29, 2 }
  0x2a   : > { %6345 = vrot.lane.b32.xlu0 %v8314_v58, %s8064_s30  ;;  %v446_v58 = vrot.slane %v8361_v46, 1 }
  0x2c   : > { %v447_v10 = vsel %vm382_vm0, %v444_v21, %v446_v58 }
  0x2d   : > { %v8404_v58 = vpack.i.bf16 %v447_v10, %v445_v54  ;;  %v485_v54 = vrot.slane %v8132_v1, 2 }
  0x2f   : > { %6370 = vrot.lane.b32.xlu2 %v8336_v28, %s8064_s30  ;;  %v450_v28 = vsel %vm382_vm0, %v448_v33, %v449_v19  ;;  %v8391_v33 = vld [vmem:[%s8126_s29 + $0x168] sm:$0xff]  ;;  %v8394_v19 = vld [vmem:[%s8126_s29 + $0x170] sm:$0xff] }
  0x30   : > { %v8388_v31 = vpack.i.bf16 %v452_v45, %v450_v28  ;;  %v458_v20 = vrot.slane %v8391_v33, 1  ;;  %v459_v21 = vrot.slane %v8394_v19, 1  ;;  %v461_v45 = vrot.slane %v8397_v52, 1 }
  0x31   : > { %6365 = vrot.lane.b32.xlu1 %v8352_v55, %s8064_s30  ;;  %v472_v55 = vrot.slane %v8203_v36, 2  ;;  %v471_v36 = vsel %vm463_vm1, %v469_v34, %v470_v53 }
  0x32   : > { %6360 = vrot.lane.b32.xlu0 %v8368_v4, %s8064_s30  ;;  %12796 = vst [vmem:[#allocation13_spill] sm:$0xff] %v8388_v31  ;;  %v465_v4 = vrot.slane %v8155_v12, 2  ;;  %v462_v34 = vsel %vm382_vm0, %v459_v21, %v461_v45  ;;  %v475_v45 = vrot.slane %v8144_v7, 2 }
  0x33   : > { %v473_v28 = vsel %vm463_vm1, %v470_v53, %v472_v55  ;;  %v460_v55 = vsel %vm382_vm0, %v458_v20, %v459_v21  ;;  %v484_v53 = vrot.slane %v8129_v0, 2  ;;  %v8436_v20 = vsel %vm463_vm1, %v485_v54, %v487_v16 }
  0x34   : > { %v466_v11 = vsel %vm463_vm1, %v464_v9, %v465_v4  ;;  %v468_v12 = vsel %vm463_vm1, %v465_v4, %v467_v5  ;;  %v8418_v10 = vpack.i.bf16 %v473_v28, %v471_v36  ;;  %v479_v9 = vrot.slane %v8178_v24, 2  ;;  %12798 = vst [vmem:[#allocation15_spill] sm:$0xff] %v8436_v20 }
  0x35   : > { %v480_v4 = vrot.slane %v8181_v25, 2  ;;  %v477_v5 = vrot.slane %v8147_v8, 2  ;;  %v8430_v36 = vpack.i.bf16 %v462_v34, %v460_v55  ;;  %v8433_v28 = vsel %vm463_vm1, %v484_v53, %v485_v54 }
  0x36   : > { %12797 = vst [vmem:[#allocation14_spill] sm:$0xff] %v8433_v28  ;;  %v474_v21 = vrot.slane %v8141_v6, 2  ;;  %v500_v55 = vrot.slane %v8236_v56, 2  ;;  %v502_v34 = vrot.slane %v8239_v57, 2  ;;  %v494_v54 = vrot.slane %v8247_v62, 2 }
  0x37   : > { %6385 = vrot.lane.b32.xlu2 %v8381_v32, %s8064_s30  ;;  %v8442_v8 = vsel %vm463_vm1, %v479_v9, %v480_v4  ;;  %v8445_v29 = vsel %vm463_vm1, %v480_v4, %v482_v2  ;;  %v495_v9 = vrot.slane %v8250_v63, 2  ;;  %v497_v4 = vrot.slane %v8253_v3, 2 }
  0x38   : > { %12799 = vst [vmem:[#allocation16_spill] sm:$0xff] %v8445_v29  ;;  %v8455_v16 = vsel %vm463_vm1, %v474_v21, %v475_v45  ;;  %v8464_v53 = vpack.i.bf16 %v8445_v29, %v8442_v8  ;;  %v8480_v21 = vsel %vm463_vm1, %v500_v55, %v502_v34  ;;  %v509_v29 = vrot.slane %v8301_v48, 2 }
  0x39   : > { %6380 = vrot.lane.b32.xlu1 %v8388_v31, %s8064_s30  ;;  %v6394_v31 = vpack.i.bf16 %v468_v12, %v466_v11  ;;  %v8451_v11 = vpack.i.bf16 %v8436_v20, %v8433_v28  ;;  %v499_v12 = vrot.slane %v8227_v51, 2  ;;  %12801 = vst [vmem:[#allocation18_spill] sm:$0xff] %v8480_v21  ;;  %v492_v20 = vrot.slane %v8175_v23, 2 }
  0x3a   : > { %6375 = vrot.lane.b32.xlu0 %v8404_v58, %s8064_s30  ;;  %v8487_v3 = vsel %vm463_vm1, %v494_v54, %v495_v9  ;;  %v8490_v28 = vsel %vm463_vm1, %v495_v9, %v497_v4  ;;  %v515_v23 = vrot.slane %v8290_v39, 2  ;;  %v517_v9 = vrot.slane %v8293_v40, 2 }
  0x3b   : > { %v8477_v57 = vsel %vm463_vm1, %v499_v12, %v500_v55  ;;  %12802 = vst [vmem:[#allocation19_spill] sm:$0xff] %v8487_v3  ;;  %v514_v55 = vrot.slane %v8287_v38, 2  ;;  %v8509_v4 = vpack.i.bf16 %v8490_v28, %v8487_v3  ;;  %v507_v3 = vrot.slane %v8221_v47, 2 }
  0x3c   : > { %12800 = vst [vmem:[#allocation17_spill] sm:$0xff] %v8477_v57  ;;  %v8496_v12 = vpack.i.bf16 %v8480_v21, %v8477_v57  ;;  %v510_v21 = vrot.slane %v8304_v49, 2  ;;  %v512_v57 = vrot.slane %v8307_v50, 2  ;;  %v8524_v40 = vsel %vm463_vm1, %v515_v23, %v517_v9 }
  0x3d   : > { %12803 = vst [vmem:[#allocation20_spill] sm:$0xff] %v8490_v28  ;;  %v505_v28 = vrot.slane %v8213_v42, 2  ;;  %v530_v47 = vrot.slane %v8344_v43, 2 }
  0x3e   : > { %12807 = vst [vmem:[#allocation24_spill] sm:$0xff] %v8524_v40  ;;  %v8532_v50 = vsel %vm463_vm1, %v509_v29, %v510_v21 }
  0x3f   : > { %6400 = vrot.lane.b32.xlu2 %v8418_v10, %s8065_s8  ;;  %12808 = vst [vmem:[#allocation25_spill] sm:$0xff] %v8532_v50  ;;  %v8549_v29 = vsel %vm463_vm1, %v505_v28, %v507_v3  ;;  %v519_v3 = vrot.slane %v8268_v22, 2 }
  0x40   : > { %12810 = vst [vmem:[#allocation27_spill] sm:$0xff] %v8549_v29 }
  0x41   : > { %6395 = vrot.lane.b32.xlu1 %v6394_v31, %s8065_s8  ;;  %v8458_v31 = vsel %vm463_vm1, %v475_v45, %v477_v5  ;;  %v489_v5 = vrot.slane %v8164_v17, 2  ;;  %v490_v45 = vrot.slane %v8167_v18, 2 }
  0x42   : > { %6390 = vrot.lane.b32.xlu0 %v8430_v36, %s8064_s30  ;;  %v8473_v2 = vpack.i.bf16 %v8458_v31, %v8455_v16 }
  0x43   : > { %v8501_v34 = vsel %vm463_vm1, %v489_v5, %v490_v45  ;;  %v8504_v54 = vsel %vm463_vm1, %v490_v45, %v492_v20  ;;  %v8521_v20 = vsel %vm463_vm1, %v514_v55, %v515_v23  ;;  %v504_v45 = vrot.slane %v8210_v41, 2 }
  0x44   : > { %12804 = vst [vmem:[#allocation21_spill] sm:$0xff] %v8501_v34  ;;  %v8518_v5 = vpack.i.bf16 %v8504_v54, %v8501_v34  ;;  %v8541_v55 = vpack.i.bf16 %v8524_v40, %v8521_v20  ;;  %v529_v23 = vrot.slane %v8341_v37, 2  ;;  %v524_v34 = vrot.slane %v8355_v59, 2 }
  0x45   : > { %12805 = vst [vmem:[#allocation22_spill] sm:$0xff] %v8504_v54  ;;  %v8535_v54 = vsel %vm463_vm1, %v510_v21, %v512_v57  ;;  %v8546_v9 = vsel %vm463_vm1, %v504_v45, %v505_v28  ;;  %v532_v57 = vrot.slane %v8347_v44, 2  ;;  %v525_v40 = vrot.slane %v8358_v61, 2 }
  0x46   : > { %12806 = vst [vmem:[#allocation23_spill] sm:$0xff] %v8521_v20  ;;  %v8554_v21 = vpack.i.bf16 %v8535_v54, %v8532_v50  ;;  %v527_v20 = vrot.slane %v8361_v46, 2  ;;  %v8563_v45 = vpack.i.bf16 %v8549_v29, %v8546_v9  ;;  %v8566_v28 = vsel %vm463_vm1, %v529_v23, %v530_v47 }
  0x47   : > { %6415 = vrot.lane.b32.xlu2 %v8451_v11, %s8065_s8  ;;  %12809 = vst [vmem:[#allocation26_spill] sm:$0xff] %v8535_v54  ;;  %v8569_v44 = vsel %vm463_vm1, %v530_v47, %v532_v57  ;;  %v520_v54 = vrot.slane %v8271_v26, 2  ;;  %v522_v50 = vrot.slane %v8276_v27, 2  ;;  %v8577_v46 = vsel %vm463_vm1, %v524_v34, %v525_v40 }
  0x48   : > { %12811 = vst [vmem:[#allocation28_spill] sm:$0xff] %v8566_v28  ;;  %v8580_v29 = vsel %vm463_vm1, %v525_v40, %v527_v20  ;;  %v8586_v23 = vpack.i.bf16 %v8569_v44, %v8566_v28  ;;  %v539_v20 = vrot.slane %v8391_v33, 2  ;;  %v540_v40 = vrot.slane %v8394_v19, 2 }
  0x49   : > { %6410 = vrot.lane.b32.xlu1 %v8464_v53, %s8065_s8  ;;  %12812 = vst [vmem:[#allocation29_spill] sm:$0xff] %v8569_v44  ;;  %v8589_v47 = vsel %vm463_vm1, %v519_v3, %v520_v54  ;;  %v8592_v27 = vsel %vm463_vm1, %v520_v54, %v522_v50  ;;  %v8596_v34 = vpack.i.bf16 %v8580_v29, %v8577_v46  ;;  %v542_v57 = vrot.slane %v8397_v52, 2 }
  0x4a   : > { %6405 = vrot.lane.b32.xlu0 %v8473_v2, %s8065_s8  ;;  %12813 = vst [vmem:[#allocation30_spill] sm:$0xff] %v8577_v46  ;;  %v8605_v3 = vpack.i.bf16 %v8592_v27, %v8589_v47  ;;  %v534_v54 = vrot.slane %v8322_v13, 2  ;;  %v535_v50 = vrot.slane %v8325_v14, 2  ;;  %v537_v44 = vrot.slane %v8330_v15, 2 }
  0x4b   : > { %12814 = vst [vmem:[#allocation31_spill] sm:$0xff] %v8580_v29  ;;  %v8613_v28 = vsel %vm463_vm1, %v539_v20, %v540_v40  ;;  %v8616_v52 = vsel %vm463_vm1, %v540_v40, %v542_v57  ;;  %v6474_v29 = vpack.i.bf16 %v8200_v35, %v8190_v30  ;;  %v8643_v30 = vpack.i.bf16 %v8132_v1, %v8129_v0  ;;  %v12833_v40 = vld [vmem:[#allocation5_spill] sm:$0xff]  ;;  %v12834_v57 = vld [vmem:[#allocation3_spill] sm:$0xff] }
  0x4c   : > { %12815 = vst [vmem:[#allocation32_spill] sm:$0xff] %v8589_v47  ;;  %v8623_v46 = vsel %vm463_vm1, %v534_v54, %v535_v50  ;;  %v8626_v15 = vsel %vm463_vm1, %v535_v50, %v537_v44  ;;  %v8647_v35 = vpack.i.bf16 %v8181_v25, %v8178_v24  ;;  %v8663_v0 = vpack.i.bf16 %v8236_v56, %v8227_v51 }
  0x4d   : > { %12816 = vst [vmem:[#allocation33_spill] sm:$0xff] %v8592_v27  ;;  %v8630_v27 = vpack.i.bf16 %v8616_v52, %v8613_v28  ;;  %v8635_v20 = vpack.i.bf16 %v8626_v15, %v8623_v46  ;;  %v8667_v1 = vpack.i.bf16 %v8250_v63, %v8247_v62  ;;  %v8683_v24 = vpack.i.bf16 %v8290_v39, %v8287_v38  ;;  %v8719_v62 = vld [vmem:[%s8126_s29 + $0x188] sm:$0xff] }
  0x4e   : > { %12817 = vst [vmem:[#allocation34_spill] sm:$0xff] %v8613_v28  ;;  %v8687_v25 = vpack.i.bf16 %v8304_v49, %v8301_v48  ;;  %v8703_v51 = vpack.i.bf16 %v8344_v43, %v8341_v37  ;;  %v8707_v56 = vpack.i.bf16 %v8358_v61, %v8355_v59  ;;  %v8743_v48 = vpack.i.bf16 %v8325_v14, %v8322_v13  ;;  %v12828_v59 = vld [vmem:[#allocation4_spill] sm:$0xff]  ;;  %v12829_v14 = vld [vmem:[#allocation6_spill] sm:$0xff] }
  0x4f   : > { %6430 = vrot.lane.b32.xlu2 %v8496_v12, %s8065_s8  ;;  %12818 = vst [vmem:[#allocation35_spill] sm:$0xff] %v8616_v52 }
  0x50   : > { %12819 = vst [vmem:[#allocation36_spill] sm:$0xff] %v8623_v46  ;;  %v330_v46 = vld [vmem:[%s8126_s29 + $0x190] sm:$0x3] }
  0x51   : > { %6425 = vrot.lane.b32.xlu1 %v8509_v4, %s8065_s8  ;;  %12820 = vst [vmem:[#allocation37_spill] sm:$0xff] %v8626_v15 }
  0x52   : > { %6420 = vrot.lane.b32.xlu0 %v8518_v5, %s8065_s8 }
  0x57   : > { %6445 = vrot.lane.b32.xlu2 %v8541_v55, %s8065_s8 }
  0x59   : > { %6440 = vrot.lane.b32.xlu1 %v8554_v21, %s8065_s8 }
  0x5a   : > { %6435 = vrot.lane.b32.xlu0 %v8563_v45, %s8065_s8 }
  0x5f   : > { %6460 = vrot.lane.b32.xlu2 %v8586_v23, %s8065_s8 }
  0x61   : > { %6455 = vrot.lane.b32.xlu1 %v8596_v34, %s8065_s8 }
  0x62   : > { %6450 = vrot.lane.b32.xlu0 %v8605_v3, %s8065_s8 }
  0x67   : > { %6475 = vrot.lane.b32.xlu2 %v6474_v29, %s8066_s9  ;;  %v8653_v29 = vpack.i.bf16 %v8144_v7, %v8141_v6  ;;  %v8673_v6 = vpack.i.bf16 %v8167_v18, %v8164_v17  ;;  %v8693_v17 = vpack.i.bf16 %v8213_v42, %v8210_v41  ;;  %v8713_v41 = vpack.i.bf16 %v8271_v26, %v8268_v22  ;;  %v8716_v42 = vld [vmem:[%s8126_s29 + $0x180] sm:$0xff] }
  0x68   : > { %v8731_v39 = vpack.i.bf16 %v8719_v62, %v8716_v42  ;;  %v8737_v26 = vpack.i.bf16 %v8394_v19, %v8391_v33  ;;  %v12832_v19 = vld [vmem:[#allocation9_spill] sm:$0xff] }
  0x69   : > { %6470 = vrot.lane.b32.xlu1 %v8630_v27, %s8065_s8 }
  0x6a   : > { %6465 = vrot.lane.b32.xlu0 %v8635_v20, %s8065_s8 }
  0x6f   : > { %6490 = vrot.lane.b32.xlu2 %v8643_v30, %s8066_s9 }
  0x71   : > { %6485 = vrot.lane.b32.xlu1 %v8647_v35, %s8066_s9  ;;  %v8657_v44 = vpop.permute.xlu2 %6335 }
  0x72   : > { %12821 = vst [vmem:[#allocation38_spill] sm:$0xff] %v8657_v44  ;;  %6480 = vrot.lane.b32.xlu0 %v8653_v29, %s8066_s9 }
  0x77   : > { %6505 = vrot.lane.b32.xlu2 %v8663_v0, %s8066_s9 }
  0x79   : > { %6500 = vrot.lane.b32.xlu1 %v8667_v1, %s8066_s9  ;;  %v8677_v7 = vpop.permute.xlu2 %6340 }
  0x7a   : > { %12822 = vst [vmem:[#allocation39_spill] sm:$0xff] %v8677_v7  ;;  %6495 = vrot.lane.b32.xlu0 %v8673_v6, %s8066_s9 }
  0x7f   : > { %6520 = vrot.lane.b32.xlu2 %v8683_v24, %s8066_s9 }
  0x81   : > { %6515 = vrot.lane.b32.xlu1 %v8687_v25, %s8066_s9  ;;  %v8697_v18 = vpop.permute.xlu2 %6355 }
  0x82   : > { %12823 = vst [vmem:[#allocation40_spill] sm:$0xff] %v8697_v18  ;;  %6510 = vrot.lane.b32.xlu0 %v8693_v17, %s8066_s9  ;;  %v12840_v18 = vld [vmem:[#allocation8_spill] sm:$0xff] }
  0x87   : > { %6535 = vrot.lane.b32.xlu2 %v8703_v51, %s8066_s9 }
  0x89   : > { %6530 = vrot.lane.b32.xlu1 %v8707_v56, %s8066_s9  ;;  %v8723_v63 = vpop.permute.xlu2 %6370 }
  0x8a   : > { %12824 = vst [vmem:[#allocation41_spill] sm:$0xff] %v8723_v63  ;;  %6525 = vrot.lane.b32.xlu0 %v8713_v41, %s8066_s9  ;;  %v12839_v63 = vld [vmem:[#allocation7_spill] sm:$0xff] }
  0x8b   : > { %v8727_v38 = vpop.permute.xlu1 %6325 }
  0x8c   : > { %12825 = vst [vmem:[#allocation42_spill] sm:$0xff] %v8727_v38  ;;  %v8733_v22 = vpop.permute.xlu0 %6315 }
  0x8f   : > { %6550 = vrot.lane.b32.xlu2 %v8731_v39, %s8066_s9 }
  0x91   : > { %6545 = vrot.lane.b32.xlu1 %v8737_v26, %s8066_s9  ;;  %v8747_v49 = vpop.permute.xlu2 %6385 }
  0x92   : > { %12826 = vst [vmem:[#allocation43_spill] sm:$0xff] %v8747_v49  ;;  %6540 = vrot.lane.b32.xlu0 %v8743_v48, %s8066_s9 }
  0x93   : > { %v8751_v37 = vpop.permute.xlu1 %6330 }
  0x94   : > { %12827 = vst [vmem:[#allocation44_spill] sm:$0xff] %v8751_v37  ;;  %v8753_v43 = vpop.permute.xlu0 %6320 }
  0x97   : > { %6565 = vrot.lane.b32.xlu2 %v8243_v60, %s8067_s10 }
  0x99   : > { %6560 = vrot.lane.b32.xlu1 %v12828_v59, %s8067_s10  ;;  %v8759_v13 = vpop.permute.xlu2 %6400 }
  0x9a   : > { %6555 = vrot.lane.b32.xlu0 %v12829_v14, %s8067_s10  ;;  %v12838_v14 = vld [vmem:[#allocation12_spill] sm:$0xff] }
  0x9b   : > { %v8763_v61 = vpop.permute.xlu1 %6350 }
  0x9c   : > { %12830 = vst [vmem:[#allocation4_spill] sm:$0xff] %v8763_v61  ;;  %v8765_v33 = vpop.permute.xlu0 %6345 }
  0x9d   : > { %12831 = vst [vmem:[#allocation6_spill] sm:$0xff] %v8765_v33 }
  0x9f   : > { %6580 = vrot.lane.b32.xlu2 %v12832_v19, %s8067_s10 }
  0xa1   : > { %6575 = vrot.lane.b32.xlu1 %v12833_v40, %s8067_s10  ;;  %v8775_v50 = vpop.permute.xlu2 %6415 }
  0xa2   : > { %6570 = vrot.lane.b32.xlu0 %v12834_v57, %s8067_s10  ;;  %12836 = vst [vmem:[#allocation5_spill] sm:$0xff] %v8775_v50  ;;  %v12848_v50 = vld [vmem:[#allocation13_spill] sm:$0xff] }
  0xa3   : > { %v8773_v54 = vpop.permute.xlu1 %6365 }
  0xa4   : > { %12835 = vst [vmem:[#allocation9_spill] sm:$0xff] %v8773_v54  ;;  %v8777_v49 = vpop.permute.xlu0 %6360  ;;  %v12844_v54 = vld [vmem:[#allocation10_spill] sm:$0xff] }
  0xa5   : > { %12837 = vst [vmem:[#allocation3_spill] sm:$0xff] %v8777_v49  ;;  %v12845_v49 = vld [vmem:[#allocation11_spill] sm:$0xff] }
  0xa7   : > { %6595 = vrot.lane.b32.xlu2 %v12838_v14, %s8067_s10 }
  0xa9   : > { %6590 = vrot.lane.b32.xlu1 %v12839_v63, %s8067_s10  ;;  %v8787_v52 = vpop.permute.xlu2 %6430 }
  0xaa   : > { %6585 = vrot.lane.b32.xlu0 %v12840_v18, %s8067_s10  ;;  %12842 = vst [vmem:[#allocation7_spill] sm:$0xff] %v8787_v52  ;;  %v550_v52 = vrot.slane %v330_v46, 1 }
  0xab   : > { %v8785_v61 = vpop.permute.xlu1 %6380 }
  0xac   : > { %12841 = vst [vmem:[#allocation12_spill] sm:$0xff] %v8785_v61  ;;  %v8789_v28 = vpop.permute.xlu0 %6375  ;;  %v547_v61 = vrot.slane %v8716_v42, 1 }
  0xad   : > { %12843 = vst [vmem:[#allocation8_spill] sm:$0xff] %v8789_v28  ;;  %v548_v28 = vrot.slane %v8719_v62, 1 }
  0xaf   : > { %6610 = vrot.lane.b32.xlu2 %v8404_v58, %s8067_s10 }
  0xb1   : > { %6605 = vrot.lane.b32.xlu1 %v12844_v54, %s8067_s10  ;;  %v8802_v7 = vpop.permute.xlu2 %6445 }
  0xb2   : > { %6600 = vrot.lane.b32.xlu0 %v12845_v49, %s8067_s10  ;;  %12847 = vst [vmem:[#allocation11_spill] sm:$0xff] %v8802_v7  ;;  %v551_v7 = vsel %vm382_vm0, %v548_v28, %v550_v52  ;;  %v555_v52 = vrot.slane %v330_v46, 2 }
  0xb3   : > { %v8797_v33 = vpop.permute.xlu1 %6395 }
  0xb4   : > { %v8799_v15 = vpop.permute.xlu0 %6390 }
  0xb5   : > { %12846 = vst [vmem:[#allocation10_spill] sm:$0xff] %v8799_v15  ;;  %v549_v15 = vsel %vm382_vm0, %v547_v61, %v548_v28  ;;  %v552_v28 = vrot.slane %v8716_v42, 2 }
  0xb6   : > { %v8820_v47 = vpack.i.bf16 %v551_v7, %v549_v15 }
  0xb7   : > { %6625 = vrot.lane.b32.xlu2 %v8430_v36, %s8067_s10 }
  0xb9   : > { %6620 = vrot.lane.b32.xlu1 %v8381_v32, %s8067_s10  ;;  %v8822_v38 = vpop.permute.xlu2 %6460 }
  0xba   : > { %6615 = vrot.lane.b32.xlu0 %v12848_v50, %s8067_s10  ;;  %12850 = vst [vmem:[#allocation45_spill] sm:$0xff] %v8822_v38 }
  0xbb   : > { %v8812_v44 = vpop.permute.xlu1 %6410 }
  0xbc   : > { %12849 = vst [vmem:[#allocation13_spill] sm:$0xff] %v8812_v44  ;;  %v8816_v37 = vpop.permute.xlu0 %6405 }
  0xbf   : > { %6640 = vrot.lane.b32.xlu2 %v8473_v2, %s8068_s11  ;;  %v553_v2 = vrot.slane %v8719_v62, 2 }
  0xc1   : > { %6635 = vrot.lane.b32.xlu1 %v8418_v10, %s8068_s11  ;;  %v8839_v10 = vsel %vm463_vm1, %v552_v28, %v553_v2  ;;  %v8842_v15 = vsel %vm463_vm1, %v553_v2, %v555_v52  ;;  %v8846_v38 = vpop.permute.xlu2 %6475  ;;  %v8940_v28 = vld [vmem:[%s8126_s29 + $0x198] sm:$0xff]  ;;  %v8943_v2 = vld [vmem:[%s8126_s29 + $0x1a0] sm:$0xff] }
  0xc2   : > { %6630 = vrot.lane.b32.xlu0 %v8820_v47, %s8067_s10  ;;  %12863 = vst [vmem:[#allocation58_spill] sm:$0xff] %v8940_v28  ;;  %v6260_v52 = vld [vmem:[%s12650_s1 + $0x40] sm:$0xff] }
  0xc3   : > { %v8828_v44 = vpop.permute.xlu1 %6425  ;;  %1757 = vmatpush.bf16.msra.mxu1 %v6260_v52  ;;  %v560_v52 = vrot.slane %v8940_v28, 1 }
  0xc4   : > { %v8830_v61 = vpop.permute.xlu0 %6420 }
  0xc7   : > { %6655 = vrot.lane.b32.xlu2 %v8518_v5, %s8068_s11 }
  0xc9   : > { %6650 = vrot.lane.b32.xlu1 %v8451_v11, %s8068_s11  ;;  %v8862_v42 = vpop.permute.xlu2 %6490 }
  0xca   : > { %6645 = vrot.lane.b32.xlu0 %v8464_v53, %s8068_s11 }
  0xcb   : > { %v8850_v5 = vpop.permute.xlu1 %6440 }
  0xcc   : > { %12851 = vst [vmem:[#allocation46_spill] sm:$0xff] %v8850_v5  ;;  %v8852_v46 = vpop.permute.xlu0 %6435 }
  0xcf   : > { %6670 = vrot.lane.b32.xlu2 %v8563_v45, %s8068_s11 }
  0xd1   : > { %6665 = vrot.lane.b32.xlu1 %v8496_v12, %s8068_s11 }
  0xd2   : > { %6660 = vrot.lane.b32.xlu0 %v8509_v4, %s8068_s11  ;;  %v8876_v4 = vpop.permute.xlu2 %6505 }
  0xd3   : > { %v8860_v11 = vpop.permute.xlu1 %6455 }
  0xd4   : > { %12852 = vst [vmem:[#allocation47_spill] sm:$0xff] %v8860_v11  ;;  %v8864_v62 = vpop.permute.xlu0 %6450 }
  0xd5   : > { %12853 = vst [vmem:[#allocation48_spill] sm:$0xff] %v8864_v62  ;;  %v6317_v62 = vunpack.i.l.bf16 %v8733_v22 }
  0xd7   : > { %6685 = vrot.lane.b32.xlu2 %v8605_v3, %s8068_s11 }
  0xd9   : > { %6680 = vrot.lane.b32.xlu1 %v8541_v55, %s8068_s11 }
  0xda   : > { %6675 = vrot.lane.b32.xlu0 %v8554_v21, %s8068_s11  ;;  %v6709_v21 = vpack.i.bf16 %v8842_v15, %v8839_v10  ;;  %v8892_v3 = vpop.permute.xlu2 %6520 }
  0xdb   : > { %v8872_v53 = vpop.permute.xlu1 %6470  ;;  %12856 = vst [vmem:[#allocation51_spill] sm:$0xff] %v8892_v3  ;;  %v7966_v3 = vld [vmem:[%s8126_s29] sm:$0xff] }
  0xdc   : > { %12854 = vst [vmem:[#allocation49_spill] sm:$0xff] %v8872_v53  ;;  %v8874_v12 = vpop.permute.xlu0 %6465  ;;  %v12876_v53 = vld [vmem:[#allocation22_spill] sm:$0xff] }
  0xdd   : > { %12855 = vst [vmem:[#allocation50_spill] sm:$0xff] %v8874_v12 }
  0xdf   : > { %6700 = vrot.lane.b32.xlu2 %v8635_v20, %s8068_s11 }
  0xe1   : > { %6695 = vrot.lane.b32.xlu1 %v8586_v23, %s8068_s11 }
  0xe2   : > { %6690 = vrot.lane.b32.xlu0 %v8596_v34, %s8068_s11  ;;  %v8905_v20 = vpop.permute.xlu2 %6535 }
  0xe3   : > { %v8884_v45 = vpop.permute.xlu1 %6485  ;;  %12857 = vst [vmem:[#allocation52_spill] sm:$0xff] %v8905_v20 }
  0xe4   : > { %v8886_v55 = vpop.permute.xlu0 %6480 }
  0xe7   : > { %6715 = vrot.lane.b32.xlu2 %v8653_v29, %s8069_s12 }
  0xe9   : > { %6710 = vrot.lane.b32.xlu1 %v6709_v21, %s8068_s11 }
  0xea   : > { %6705 = vrot.lane.b32.xlu0 %v8630_v27, %s8068_s11 }
  0xeb   : > { %v8897_v23 = vpop.permute.xlu1 %6500 }
  0xec   : > { %v8899_v34 = vpop.permute.xlu0 %6495 }
  0xef   : > { %6730 = vrot.lane.b32.xlu2 %v8673_v6, %s8069_s12  ;;  %v8921_v6 = vpop.permute.xlu2 %6550 }
  0xf0   : > { %12859 = vst [vmem:[#allocation54_spill] sm:$0xff] %v8921_v6 }
  0xf1   : > { %6725 = vrot.lane.b32.xlu1 %v8643_v30, %s8069_s12 }
  0xf2   : > { %6720 = vrot.lane.b32.xlu0 %v8647_v35, %s8069_s12 }
  0xf3   : > { %v8909_v29 = vpop.permute.xlu1 %6515 }
  0xf4   : > { %v8911_v27 = vpop.permute.xlu0 %6510 }
  0xf7   : > { %6745 = vrot.lane.b32.xlu2 %v8693_v17, %s8069_s12 }
  0xf9   : > { %6740 = vrot.lane.b32.xlu1 %v8663_v0, %s8069_s12 }
  0xfa   : > { %6735 = vrot.lane.b32.xlu0 %v8667_v1, %s8069_s12  ;;  %v8935_v1 = vpop.permute.xlu2 %6565 }
  0xfb   : > { %v8919_v30 = vpop.permute.xlu1 %6530 }
  0xfc   : > { %12858 = vst [vmem:[#allocation53_spill] sm:$0xff] %v8919_v30  ;;  %v8923_v35 = vpop.permute.xlu0 %6525  ;;  %v6318_v30 = vunpack.i.h.bf16 %v8733_v22  ;;  %v7965_v22 = vld [vmem:[%s8126_s29 + $0x8] sm:$0xff] }
  0xfd   : > { %12860 = vst [vmem:[#allocation55_spill] sm:$0xff] %v8923_v35 }
  0xff   : > { %6760 = vrot.lane.b32.xlu2 %v8713_v41, %s8069_s12 }
 0x101   : > { %6755 = vrot.lane.b32.xlu1 %v8683_v24, %s8069_s12 }
 0x102   : > { %6750 = vrot.lane.b32.xlu0 %v8687_v25, %s8069_s12  ;;  %v6789_v25 = vpack.i.bf16 %v8943_v2, %v8940_v28 }
 0x103   : > { %v8931_v17 = vpop.permute.xlu1 %6545 }
 0x104   : > { %12861 = vst [vmem:[#allocation56_spill] sm:$0xff] %v8931_v17  ;;  %v8933_v0 = vpop.permute.xlu0 %6540 }
 0x105   : > { %12862 = vst [vmem:[#allocation57_spill] sm:$0xff] %v8933_v0  ;;  %v6256_v0 = vld [vmem:[%s12650_s1 + $0x20] sm:$0xff] }
 0x107   : > { %6775 = vrot.lane.b32.xlu2 %v8743_v48, %s8069_s12  ;;  %v8956_v48 = vpop.permute.xlu2 %6580 }
 0x109   : > { %6770 = vrot.lane.b32.xlu1 %v8703_v51, %s8069_s12 }
 0x10a   : > { %6765 = vrot.lane.b32.xlu0 %v8707_v56, %s8069_s12 }
 0x10b   : > { %v8949_v24 = vpop.permute.xlu1 %6560 }
 0x10c   : > { %v8953_v41 = vpop.permute.xlu0 %6555 }
 0x10f   : > { %6790 = vrot.lane.b32.xlu2 %v6789_v25, %s8069_s12 }
 0x111   : > { %6785 = vrot.lane.b32.xlu1 %v8731_v39, %s8069_s12  ;;  %v1506_v39 = vpack.c.bf16 %v8458_v31, %v8455_v16 }
 0x112   : > { %6780 = vrot.lane.b32.xlu0 %v8737_v26, %s8069_s12  ;;  %v8975_v26 = vpop.permute.xlu2 %6595 }
 0x113   : > { %v8962_v51 = vpop.permute.xlu1 %6575  ;;  %6025 = vmatmul.msk.bf16.vlgmr.msra.gmra.mxu1 %vm1274_vm2, %v1506_v39  ;;  %v12873_v39 = vld [vmem:[#allocation14_spill] sm:$0xff] }
 0x114   : > { %v8964_v56 = vpop.permute.xlu0 %6570 }
 0x117   : > { %6805 = vrot.lane.b32.xlu2 %v12834_v57, %s8070_s13 }
 0x119   : > { %6800 = vrot.lane.b32.xlu1 %v8243_v60, %s8070_s13 }
 0x11a   : > { %6795 = vrot.lane.b32.xlu0 %v12828_v59, %s8070_s13  ;;  %v8992_v16 = vpop.permute.xlu2 %6610  ;;  %v12867_v59 = vld [vmem:[#allocation16_spill] sm:$0xff] }
 0x11b   : > { %v8979_v21 = vpop.permute.xlu1 %6590  ;;  %12865 = vst [vmem:[#allocation60_spill] sm:$0xff] %v8992_v16  ;;  %v1508_v25 = vpack.c.bf16 %v12867_v59, %v8442_v8 }
 0x11c   : > { %v8982_v57 = vpop.permute.xlu0 %6585 }
 0x11f   : > { %6820 = vrot.lane.b32.xlu2 %v12840_v18, %s8070_s13 }
 0x121   : > { %6815 = vrot.lane.b32.xlu1 %v12832_v19, %s8070_s13 }
 0x122   : > { %6810 = vrot.lane.b32.xlu0 %v12833_v40, %s8070_s13  ;;  %v9009_v40 = vpop.permute.xlu2 %6625 }
 0x123   : > { %v8990_v60 = vpop.permute.xlu1 %6605  ;;  %6026 = vmatmul.msk.bf16.gmra.mxu1 %vm1274_vm2, %v1508_v25  ;;  %12870 = vst [vmem:[#allocation63_spill] sm:$0xff] %v9009_v40 }
 0x124   : > { %12864 = vst [vmem:[#allocation59_spill] sm:$0xff] %v8990_v60  ;;  %v8994_v31 = vpop.permute.xlu0 %6600  ;;  %v12893_v60 = vld [vmem:[#allocation26_spill] sm:$0xff] }
 0x125   : > { %12866 = vst [vmem:[#allocation61_spill] sm:$0xff] %v8994_v31  ;;  %v1276_v31 = vsel %vm1274_vm2, %v7965_v22, %v6318_v30 }
 0x127   : > { %6835 = vrot.lane.b32.xlu2 %v12845_v49, %s8070_s13  ;;  %v9022_v49 = vld [vmem:[%s8126_s29 + $0x1a8] sm:$0x3] }
 0x128   : > { %12872 = vst [vmem:[#allocation65_spill] sm:$0xff] %v9022_v49 }
 0x129   : > { %6830 = vrot.lane.b32.xlu1 %v12838_v14, %s8070_s13  ;;  %v561_v14 = vrot.slane %v8943_v2, 1 }
 0x12a   : > { %6825 = vrot.lane.b32.xlu0 %v12839_v63, %s8070_s13  ;;  %v9031_v25 = vpop.permute.xlu2 %6640 }
 0x12b   : > { %v9004_v18 = vpop.permute.xlu1 %6620 }
 0x12c   : > { %12868 = vst [vmem:[#allocation16_spill] sm:$0xff] %v9004_v18  ;;  %v9007_v19 = vpop.permute.xlu0 %6615 }
 0x12d   : > { %12869 = vst [vmem:[#allocation62_spill] sm:$0xff] %v9007_v19 }
 0x12f   : > { %6850 = vrot.lane.b32.xlu2 %v12848_v50, %s8070_s13  ;;  %v563_v50 = vrot.slane %v9022_v49, 1 }
 0x131   : > { %6845 = vrot.lane.b32.xlu1 %v8404_v58, %s8070_s13  ;;  %v12874_v58 = vld [vmem:[#allocation15_spill] sm:$0xff]  ;;  %v564_v7 = vsel %vm382_vm0, %v561_v14, %v563_v50 }
 0x132   : > { %6840 = vrot.lane.b32.xlu0 %v12844_v54, %s8070_s13  ;;  %v1510_v59 = vpack.c.bf16 %v12874_v58, %v12873_v39  ;;  %v9044_v39 = vpop.permute.xlu2 %6655 }
 0x133   : > { %v9017_v8 = vpop.permute.xlu1 %6635 }
 0x134   : > { %v9019_v63 = vpop.permute.xlu0 %6630  ;;  %6027 = vmatmul.msk.bf16.gmra.mxu1 %vm1274_vm2, %v1510_v59  ;;  %v6638_v5 = vunpack.i.h.bf16 %v9017_v8 }
 0x135   : > { %12871 = vst [vmem:[#allocation64_spill] sm:$0xff] %v9019_v63 }
 0x137   : > { %6865 = vrot.lane.b32.xlu2 %v8820_v47, %s8070_s13  ;;  %v562_v47 = vsel %vm382_vm0, %v560_v52, %v561_v14 }
 0x138   : > { %v6869_v6 = vpack.i.bf16 %v564_v7, %v562_v47  ;;  %v6259_v7 = vld [vmem:[%s12650_s1 + $0x38] sm:$0xff]  ;;  %v12881_v47 = vld [vmem:[#allocation19_spill] sm:$0xff] }
 0x139   : > { %6860 = vrot.lane.b32.xlu1 %v8430_v36, %s8070_s13  ;;  %1661 = vmatpush.bf16.msra.mxu0 %v6259_v7 }
 0x13a   : > { %6855 = vrot.lane.b32.xlu0 %v8381_v32, %s8070_s13  ;;  %v12875_v32 = vld [vmem:[#allocation21_spill] sm:$0xff]  ;;  %v9056_v14 = vpop.permute.xlu2 %6670 }
 0x13b   : > { %v9037_v54 = vpop.permute.xlu1 %6650  ;;  %v1512_v40 = vpack.c.bf16 %v12876_v53, %v12875_v32  ;;  %v6258_v53 = vld [vmem:[%s12650_s1 + $0x30] sm:$0xff]  ;;  %v12882_v32 = vld [vmem:[#allocation20_spill] sm:$0xff] }
 0x13c   : > { %v9042_v63 = vpop.permute.xlu0 %6645  ;;  %v1514_v12 = vpack.c.bf16 %v12882_v32, %v12881_v47 }
 0x13d   : > { %1662 = vmatpush.bf16.msra.mxu0 %v6258_v53  ;;  %v6255_v53 = vld [vmem:[%s12650_s1 + $0x18] sm:$0xff] }
 0x142   : > { %6870 = vrot.lane.b32.xlu0 %v6869_v6, %s8070_s13  ;;  %v9070_v59 = vpop.permute.xlu2 %6685 }
 0x143   : > { %v9047_v58 = vpop.permute.xlu1 %6665  ;;  %12880 = vst [vmem:[#allocation22_spill] sm:$0xff] %v9070_v59  ;;  %v12892_v59 = vld [vmem:[#allocation25_spill] sm:$0xff] }
 0x144   : > { %v9049_v36 = vpop.permute.xlu0 %6660  ;;  %6028 = vmatmul.msk.bf16.gmra.mxu1 %vm1274_vm2, %v1512_v40  ;;  %v6257_v40 = vld [vmem:[%s12650_s1 + $0x28] sm:$0xff]  ;;  %v1520_v35 = vpack.c.bf16 %v12893_v60, %v12892_v59 }
 0x145   : > { %1663 = vmatpush.bf16.msra.mxu0 %v6257_v40  ;;  %v12886_v40 = vld [vmem:[#allocation17_spill] sm:$0xff] }
 0x149   : > { %1664 = vmatpush.bf16.msra.mxu0 %v6256_v0  ;;  %v6253_v0 = vld [vmem:[%s12650_s1 + $0x8] sm:$0xff] }
 0x14b   : > { %v9053_v17 = vpop.permute.xlu1 %6680 }
 0x14c   : > { %12877 = vst [vmem:[#allocation14_spill] sm:$0xff] %v9053_v17  ;;  %v9058_v52 = vpop.permute.xlu0 %6675 }
 0x14d   : > { %1665 = vmatpush.bf16.msra.mxu0 %v6255_v53 }
 0x153   : > { %v9063_v6 = vpop.permute.xlu1 %6695 }
 0x154   : > { %12878 = vst [vmem:[#allocation15_spill] sm:$0xff] %v9063_v6  ;;  %v9065_v50 = vpop.permute.xlu0 %6690  ;;  %6029 = vmatmul.msk.bf16.gmra.mxu1 %vm1274_vm2, %v1514_v12  ;;  %v9088_v6 = vpop.permute.xlu2 %6700  ;;  %v6254_v12 = vld [vmem:[%s12650_s1 + $0x10] sm:$0xff] }
 0x155   : > { %12879 = vst [vmem:[#allocation21_spill] sm:$0xff] %v9065_v50  ;;  %1666 = vmatpush.bf16.msra.mxu0 %v6254_v12  ;;  %v12888_v50 = vld [vmem:[#allocation27_spill] sm:$0xff] }
 0x156   : > { %12885 = vst [vmem:[#allocation66_spill] sm:$0xff] %v9088_v6  ;;  %v6252_v6 = vld [vmem:[%s12650_s1] sm:$0xff] }
 0x159   : > { %1667 = vmatpush.bf16.msra.mxu0 %v6253_v0 }
 0x15b   : > { %v9077_v18 = vpop.permute.xlu1 %6710 }
 0x15c   : > { %12883 = vst [vmem:[#allocation19_spill] sm:$0xff] %v9077_v18  ;;  %v9080_v7 = vpop.permute.xlu0 %6705  ;;  %v12887_v18 = vld [vmem:[#allocation18_spill] sm:$0xff]  ;;  %v6716_v19 = vpop.permute.xlu2 %6715 }
 0x15d   : > { %12884 = vst [vmem:[#allocation20_spill] sm:$0xff] %v9080_v7  ;;  %v1516_v7 = vpack.c.bf16 %v12887_v18, %v12886_v40  ;;  %1668 = vmatpush.bf16.msra.mxu0 %v6252_v6  ;;  %v1518_v18 = vpack.c.bf16 %v12888_v50, %v8546_v9  ;;  %v6398_v9 = vunpack.i.h.bf16 %v8797_v33  ;;  %v6397_v50 = vunpack.i.l.bf16 %v8797_v33 }
 0x15e   : > { %v1275_v33 = vsel %vm1274_vm2, %v7966_v3, %v6317_v62  ;;  %v6718_v49 = vunpack.i.h.bf16 %v6716_v19  ;;  %v6717_v28 = vunpack.i.l.bf16 %v6716_v19 }
 0x15f   : > { %v1308_v60 = vsel %vm1307_vm3, %v1275_v33, %v6397_v50  ;;  %v1309_v59 = vsel %vm1307_vm3, %v1276_v31, %v6398_v9  ;;  %v6322_v33 = vunpack.i.l.bf16 %v8753_v43 }
 0x163   : > { %v9090_v47 = vpop.permute.xlu1 %6725 }
 0x164   : > { %v9092_v32 = vpop.permute.xlu0 %6720  ;;  %6030 = vmatmul.msk.bf16.gmra.mxu1 %vm1274_vm2, %v1516_v7  ;;  %v9110_v12 = vpop.permute.xlu2 %6730 }
 0x16b   : > { %v9108_v20 = vpop.permute.xlu1 %6740 }
 0x16c   : > { %v9103_v53 = vpop.permute.xlu0 %6735  ;;  %v9121_v0 = vpop.permute.xlu2 %6745 }
 0x173   : > { %v9116_v40 = vpop.permute.xlu1 %6755 }
 0x174   : > { %v9112_v11 = vpop.permute.xlu0 %6750  ;;  %6031 = vmatmul.msk.bf16.gmra.mxu1 %vm1274_vm2, %v1518_v18  ;;  %v6478_v18 = vunpack.i.h.bf16 %v8846_v38  ;;  %v9137_v17 = vpop.permute.xlu2 %6760 }
 0x175   : > { %12894 = vst [vmem:[#allocation25_spill] sm:$0xff] %v9137_v17 }
 0x176   : > { %v1342_v17 = vsel %vm1340_vm4, %v1309_v59, %v6478_v18 }
 0x17b   : > { %v9123_v16 = vpop.permute.xlu1 %6770 }
 0x17c   : > { %v9119_v7 = vpop.permute.xlu0 %6765  ;;  %12890 = vst [vmem:[#allocation18_spill] sm:$0xff] %v9123_v16  ;;  %v6558_v16 = vunpack.i.h.bf16 %v8953_v41  ;;  %v9161_v22 = vpop.permute.xlu2 %6775 }
 0x17d   : > { %12889 = vst [vmem:[#allocation17_spill] sm:$0xff] %v9119_v7  ;;  %v6477_v7 = vunpack.i.l.bf16 %v8846_v38  ;;  %v6637_v38 = vunpack.i.l.bf16 %v9017_v8 }
 0x17e   : > { %v1375_v3 = vsel %vm1373_vm5, %v1342_v17, %v6558_v16 }
 0x183   : > { %v9152_v30 = vpop.permute.xlu1 %6785 }
 0x184   : > { %v9125_v6 = vpop.permute.xlu0 %6780  ;;  %6032 = vmatmul.msk.bf16.gmra.mxu1 %vm1274_vm2, %v1520_v35 }
 0x185   : > { %12891 = vst [vmem:[#allocation27_spill] sm:$0xff] %v9125_v6  ;;  %v6557_v6 = vunpack.i.l.bf16 %v8953_v41  ;;  %v1341_v41 = vsel %vm1340_vm4, %v1308_v60, %v6477_v7  ;;  %v1408_v7 = vsel %vm1406_vm7, %v1375_v3, %v6638_v5  ;;  %v6403_v5 = vunpack.i.h.bf16 %v8759_v13  ;;  %v7967_v60 = vld [vmem:[%s8126_s29 + $0x20] sm:$0xff] }
 0x186   : > { %v1441_v18 = vsel %vm1439_vm6, %v1408_v7, %v6718_v49  ;;  %v6483_v49 = vunpack.i.h.bf16 %v8886_v55 }
 0x187   : > { %v1374_v62 = vsel %vm1373_vm5, %v1341_v41, %v6557_v6  ;;  %v6323_v6 = vunpack.i.h.bf16 %v8753_v43  ;;  %v6563_v41 = vunpack.i.h.bf16 %v8949_v24  ;;  %v6643_v43 = vunpack.i.h.bf16 %v9031_v25 }
 0x188   : > { %v1407_v19 = vsel %vm1406_vm7, %v1374_v62, %v6637_v38  ;;  %v6482_v38 = vunpack.i.l.bf16 %v8886_v55  ;;  %v6562_v62 = vunpack.i.l.bf16 %v8949_v24 }
 0x189   : > { %v1440_v9 = vsel %vm1439_vm6, %v1407_v19, %v6717_v28  ;;  %v6402_v28 = vunpack.i.l.bf16 %v8759_v13  ;;  %v1278_v59 = vsel %vm1274_vm2, %v7967_v60, %v6323_v6  ;;  %v12895_v13 = vld [vmem:[#allocation23_spill] sm:$0xff]  ;;  %v12896_v19 = vld [vmem:[#allocation24_spill] sm:$0xff] }
 0x18a   : > { %v1522_v7 = vpack.c.bf16 %v12896_v19, %v12895_v13  ;;  %v6487_v13 = vunpack.i.l.bf16 %v8884_v45  ;;  %v7969_v19 = vld [vmem:[%s8126_s29 + $0x38] sm:$0xff] }
 0x18b   : > { %v6801_v3 = vpop.permute.xlu1 %6800 }
 0x18c   : > { %v6796_v8 = vpop.permute.xlu0 %6795  ;;  %v6802_v6 = vunpack.i.l.bf16 %v6801_v3 }
 0x18d   : > { %v6798_v50 = vunpack.i.h.bf16 %v6796_v8  ;;  %v6797_v31 = vunpack.i.l.bf16 %v6796_v8  ;;  %v7968_v8 = vld [vmem:[%s8126_s29 + $0x18] sm:$0xff] }
 0x18f   : > { %v1473_v35 = vsel %vm1472_vm8, %v1440_v9, %v6797_v31  ;;  %v1474_v17 = vsel %vm1472_vm8, %v1441_v18, %v6798_v50  ;;  %v1277_v50 = vsel %vm1274_vm2, %v7968_v8, %v6322_v33  ;;  %v6642_v31 = vunpack.i.l.bf16 %v9031_v25 }
 0x190   : > { %v1505_v16 = vpack.c.bf16 %v1474_v17, %v1473_v35  ;;  %v1310_v55 = vsel %vm1307_vm3, %v1277_v50, %v6402_v28  ;;  %v1311_v9 = vsel %vm1307_vm3, %v1278_v59, %v6403_v5  ;;  %v6723_v18 = vunpack.i.h.bf16 %v9092_v32  ;;  %v9189_v5 = vpop.permute.xlu2 %6790 }
 0x191   : > { %v6722_v35 = vunpack.i.l.bf16 %v9092_v32  ;;  %v1343_v24 = vsel %vm1340_vm4, %v1310_v55, %v6482_v38  ;;  %v1344_v17 = vsel %vm1340_vm4, %v1311_v9, %v6483_v49  ;;  %v6408_v50 = vunpack.i.h.bf16 %v8816_v37 }
 0x192   : > { %1669 = vmatmul.bf16.vlgmr.msra.gmra.mxu0 %v1505_v16  ;;  %v6803_v16 = vunpack.i.h.bf16 %v6801_v3  ;;  %v1376_v33 = vsel %vm1373_vm5, %v1343_v24, %v6562_v62  ;;  %v1377_v25 = vsel %vm1373_vm5, %v1344_v17, %v6563_v41  ;;  %v12897_v41 = vld [vmem:[#allocation42_spill] sm:$0xff]  ;;  %v6568_v55 = vunpack.i.h.bf16 %v8935_v1 }
 0x193   : > { %v1409_v60 = vsel %vm1406_vm7, %v1376_v33, %v6642_v31  ;;  %v1410_v28 = vsel %vm1406_vm7, %v1377_v25, %v6643_v43  ;;  %v6328_v3 = vunpack.i.h.bf16 %v12897_v41  ;;  %v6327_v8 = vunpack.i.l.bf16 %v12897_v41  ;;  %v12899_v33 = vld [vmem:[#allocation33_spill] sm:$0xff] }
 0x194   : > { %6033 = vmatmul.msk.bf16.gmra.mxu1 %vm1274_vm2, %v1522_v7  ;;  %v1442_v32 = vsel %vm1439_vm6, %v1409_v60, %v6722_v35  ;;  %v1443_v38 = vsel %vm1439_vm6, %v1410_v28, %v6723_v18  ;;  %v6407_v43 = vunpack.i.l.bf16 %v8816_v37  ;;  %v6488_v31 = vunpack.i.h.bf16 %v8884_v45  ;;  %v7970_v35 = vld [vmem:[%s8126_s29 + $0x30] sm:$0xff]  ;;  %v9209_v37 = vpop.f32.mrf.mxu1 }
 0x195   : > { %v1475_v49 = vsel %vm1472_vm8, %v1442_v32, %v6802_v6  ;;  %v1476_v59 = vsel %vm1472_vm8, %v1443_v38, %v6803_v16  ;;  %v1280_v7 = vsel %vm1274_vm2, %v7969_v19, %v6328_v3  ;;  %v6567_v9 = vunpack.i.l.bf16 %v8935_v1  ;;  %v12898_v6 = vld [vmem:[#allocation32_spill] sm:$0xff] }
 0x196   : > { %v1507_v62 = vpack.c.bf16 %v1476_v59, %v1475_v49  ;;  %v1279_v24 = vsel %vm1274_vm2, %v7970_v35, %v6327_v8  ;;  %v6648_v17 = vunpack.i.h.bf16 %v9042_v63  ;;  %v6647_v16 = vunpack.i.l.bf16 %v9042_v63  ;;  %v12900_v19 = vld [vmem:[#allocation44_spill] sm:$0xff] }
 0x197   : > { %v1524_v45 = vpack.c.bf16 %v12899_v33, %v12898_v6  ;;  %v1313_v25 = vsel %vm1307_vm3, %v1280_v7, %v6408_v50  ;;  %v1312_v60 = vsel %vm1307_vm3, %v1279_v24, %v6407_v43  ;;  %v6728_v28 = vunpack.i.h.bf16 %v9090_v47 }
 0x198   : > { %v6806_v18 = vpop.permute.xlu2 %6805  ;;  %v6727_v1 = vunpack.i.l.bf16 %v9090_v47  ;;  %v1345_v32 = vsel %vm1340_vm4, %v1312_v60, %v6487_v13  ;;  %v1346_v38 = vsel %vm1340_vm4, %v1313_v25, %v6488_v31  ;;  %v6333_v7 = vunpack.i.h.bf16 %v12900_v19  ;;  %v6811_v25 = vpop.permute.xlu0 %6810  ;;  %v7972_v60 = vld [vmem:[%s8126_s29 + $0x48] sm:$0xff] }
 0x199   : > { %v6808_v49 = vunpack.i.h.bf16 %v6806_v18  ;;  %v6807_v59 = vunpack.i.l.bf16 %v6806_v18  ;;  %v1378_v63 = vsel %vm1373_vm5, %v1345_v32, %v6567_v9  ;;  %v12901_v9 = vld [vmem:[#allocation13_spill] sm:$0xff]  ;;  %v6493_v24 = vunpack.i.h.bf16 %v8862_v42 }
 0x19a   : > { %v1411_v41 = vsel %vm1406_vm7, %v1378_v63, %v6647_v16  ;;  %v6413_v18 = vunpack.i.h.bf16 %v12901_v9  ;;  %v6412_v35 = vunpack.i.l.bf16 %v12901_v9  ;;  %v7971_v16 = vld [vmem:[%s8126_s29 + $0x50] sm:$0xff]  ;;  %v6573_v33 = vunpack.i.h.bf16 %v8964_v56 }
 0x19b   : > { %v1444_v8 = vsel %vm1439_vm6, %v1411_v41, %v6727_v1  ;;  %v1282_v6 = vsel %vm1274_vm2, %v7971_v16, %v6333_v7  ;;  %v6653_v1 = vunpack.i.h.bf16 %v9037_v54  ;;  %v6652_v32 = vunpack.i.l.bf16 %v9037_v54  ;;  %v12905_v16 = vld [vmem:[#allocation5_spill] sm:$0xff] }
 0x19c   : > { %v1477_v50 = vsel %vm1472_vm8, %v1444_v8, %v6807_v59  ;;  %v9228_v13 = vpop.f32.mrf.mxu1  ;;  %v6732_v41 = vunpack.i.l.bf16 %v9110_v12  ;;  %v6813_v8 = vunpack.i.h.bf16 %v6811_v25 }
 0x1a2   : > { %1674 = vmatmul.bf16.gmra.mxu0 %v1507_v62  ;;  %v1379_v62 = vsel %vm1373_vm5, %v1346_v38, %v6568_v55  ;;  %v6332_v55 = vunpack.i.l.bf16 %v12900_v19  ;;  %v12902_v38 = vld [vmem:[#allocation30_spill] sm:$0xff] }
 0x1a3   : > { %v1412_v3 = vsel %vm1406_vm7, %v1379_v62, %v6648_v17  ;;  %v6492_v17 = vunpack.i.l.bf16 %v8862_v42  ;;  %v1315_v42 = vsel %vm1307_vm3, %v1282_v6, %v6413_v18  ;;  %v6733_v62 = vunpack.i.h.bf16 %v9110_v12 }
 0x1a4   : > { %6034 = vmatmul.msk.bf16.gmra.mxu1 %vm1274_vm2, %v1524_v45  ;;  %v1445_v47 = vsel %vm1439_vm6, %v1412_v3, %v6728_v28  ;;  %v6572_v45 = vunpack.i.l.bf16 %v8964_v56  ;;  %v1281_v28 = vsel %vm1274_vm2, %v7972_v60, %v6332_v55  ;;  %v1348_v3 = vsel %vm1340_vm4, %v1315_v42, %v6493_v24  ;;  %v9256_v19 = vpop.f32.mrf.mxu1  ;;  %v7974_v60 = vld [vmem:[%s8126_s29 + $0x60] sm:$0xff]  ;;  %v6816_v42 = vpop.permute.xlu1 %6815 }
 0x1a5   : > { %v1478_v43 = vsel %vm1472_vm8, %v1445_v47, %v6808_v49  ;;  %v12903_v49 = vld [vmem:[#allocation31_spill] sm:$0xff]  ;;  %v1314_v63 = vsel %vm1307_vm3, %v1281_v28, %v6412_v35  ;;  %v6812_v47 = vunpack.i.l.bf16 %v6811_v25  ;;  %v12904_v35 = vld [vmem:[#allocation38_spill] sm:$0xff]  ;;  %v6418_v6 = vunpack.i.h.bf16 %v12905_v16 }
 0x1a6   : > { %v1509_v31 = vpack.c.bf16 %v1478_v43, %v1477_v50  ;;  %v1526_v59 = vpack.c.bf16 %v12903_v49, %v12902_v38  ;;  %v1347_v56 = vsel %vm1340_vm4, %v1314_v63, %v6492_v17  ;;  %v1381_v50 = vsel %vm1373_vm5, %v1348_v3, %v6573_v33 }
 0x1a7   : > { %v1380_v54 = vsel %vm1373_vm5, %v1347_v56, %v6572_v45  ;;  %v6338_v24 = vunpack.i.h.bf16 %v12904_v35  ;;  %v6337_v17 = vunpack.i.l.bf16 %v12904_v35  ;;  %v6417_v33 = vunpack.i.l.bf16 %v12905_v16  ;;  %v7973_v45 = vld [vmem:[%s8126_s29 + $0x68] sm:$0xff]  ;;  %v12907_v56 = vld [vmem:[#allocation29_spill] sm:$0xff]  ;;  %v12908_v16 = vld [vmem:[#allocation39_spill] sm:$0xff] }
 0x1a8   : > { %v1413_v43 = vsel %vm1406_vm7, %v1380_v54, %v6652_v32  ;;  %v6497_v32 = vunpack.i.l.bf16 %v8899_v34  ;;  %v6578_v49 = vunpack.i.h.bf16 %v8962_v51  ;;  %v6658_v63 = vunpack.i.h.bf16 %v9044_v39 }
 0x1a9   : > { %v1446_v12 = vsel %vm1439_vm6, %v1413_v43, %v6732_v41  ;;  %v1284_v25 = vsel %vm1274_vm2, %v7973_v45, %v6338_v24  ;;  %v1283_v28 = vsel %vm1274_vm2, %v7974_v60, %v6337_v17  ;;  %v12906_v41 = vld [vmem:[#allocation28_spill] sm:$0xff]  ;;  %v6818_v43 = vunpack.i.h.bf16 %v6816_v42 }
 0x1aa   : > { %v1479_v55 = vsel %vm1472_vm8, %v1446_v12, %v6812_v47  ;;  %v1528_v3 = vpack.c.bf16 %v12907_v56, %v12906_v41  ;;  %v1316_v47 = vsel %vm1307_vm3, %v1283_v28, %v6417_v33  ;;  %v6342_v33 = vunpack.i.l.bf16 %v12908_v16 }
 0x1ab   : > { %v6423_v45 = vunpack.i.h.bf16 %v8830_v61  ;;  %v6503_v60 = vunpack.i.h.bf16 %v8897_v23  ;;  %v6502_v28 = vunpack.i.l.bf16 %v8897_v23  ;;  %v6663_v41 = vunpack.i.h.bf16 %v9049_v36 }
 0x1ac   : > { %v9273_v38 = vpop.f32.mrf.mxu1  ;;  %v6662_v56 = vunpack.i.l.bf16 %v9049_v36 }
 0x1b2   : > { %1679 = vmatmul.bf16.gmra.mxu0 %v1509_v31  ;;  %v1414_v31 = vsel %vm1406_vm7, %v1381_v50, %v6653_v1  ;;  %v6498_v1 = vunpack.i.h.bf16 %v8899_v34  ;;  %v6738_v34 = vunpack.i.h.bf16 %v9103_v53  ;;  %v6737_v50 = vunpack.i.l.bf16 %v9103_v53 }
 0x1b3   : > { %v1447_v7 = vsel %vm1439_vm6, %v1414_v31, %v6733_v62  ;;  %v6657_v62 = vunpack.i.l.bf16 %v9044_v39  ;;  %v6817_v31 = vunpack.i.l.bf16 %v6816_v42  ;;  %v6821_v42 = vpop.permute.xlu2 %6820 }
 0x1b4   : > { %6035 = vmatmul.msk.bf16.gmra.mxu1 %vm1274_vm2, %v1526_v59  ;;  %v1480_v9 = vsel %vm1472_vm8, %v1447_v7, %v6813_v8  ;;  %v6577_v59 = vunpack.i.l.bf16 %v8962_v51  ;;  %v1317_v8 = vsel %vm1307_vm3, %v1284_v25, %v6418_v6  ;;  %v1349_v51 = vsel %vm1340_vm4, %v1316_v47, %v6497_v32  ;;  %v9296_v24 = vpop.f32.mrf.mxu1 }
 0x1b5   : > { %v1511_v18 = vpack.c.bf16 %v1480_v9, %v1479_v55  ;;  %v1350_v54 = vsel %vm1340_vm4, %v1317_v8, %v6498_v1  ;;  %v6343_v6 = vunpack.i.h.bf16 %v12908_v16  ;;  %v6422_v25 = vunpack.i.l.bf16 %v8830_v61  ;;  %v7975_v1 = vld [vmem:[%s8126_s29 + $0x80] sm:$0xff]  ;;  %v12909_v61 = vld [vmem:[#allocation36_spill] sm:$0xff] }
 0x1b6   : > { %v1382_v12 = vsel %vm1373_vm5, %v1349_v51, %v6577_v59  ;;  %v1383_v39 = vsel %vm1373_vm5, %v1350_v54, %v6578_v49  ;;  %v6583_v49 = vunpack.i.h.bf16 %v8956_v48  ;;  %v6582_v59 = vunpack.i.l.bf16 %v8956_v48 }
 0x1b7   : > { %v1415_v7 = vsel %vm1406_vm7, %v1382_v12, %v6657_v62  ;;  %v1416_v55 = vsel %vm1406_vm7, %v1383_v39, %v6658_v63  ;;  %v1286_v32 = vsel %vm1274_vm2, %v7975_v1, %v6343_v6  ;;  %v7976_v63 = vld [vmem:[%s8126_s29 + $0x78] sm:$0xff]  ;;  %v6823_v51 = vunpack.i.h.bf16 %v6821_v42 }
 0x1b8   : > { %v1448_v9 = vsel %vm1439_vm6, %v1415_v7, %v6737_v50  ;;  %v1449_v53 = vsel %vm1439_vm6, %v1416_v55, %v6738_v34  ;;  %v1285_v62 = vsel %vm1274_vm2, %v7976_v63, %v6342_v33  ;;  %v1319_v23 = vsel %vm1307_vm3, %v1286_v32, %v6423_v45 }
 0x1b9   : > { %v1482_v35 = vsel %vm1472_vm8, %v1449_v53, %v6818_v43  ;;  %v1318_v47 = vsel %vm1307_vm3, %v1285_v62, %v6422_v25  ;;  %v6743_v34 = vunpack.i.h.bf16 %v9108_v20  ;;  %v6742_v50 = vunpack.i.l.bf16 %v9108_v20 }
 0x1ba   : > { %v1351_v48 = vsel %vm1340_vm4, %v1318_v47, %v6502_v28  ;;  %v1352_v54 = vsel %vm1340_vm4, %v1319_v23, %v6503_v60  ;;  %v6822_v43 = vunpack.i.l.bf16 %v6821_v42  ;;  %v6428_v33 = vunpack.i.h.bf16 %v8828_v44  ;;  %v7977_v28 = vld [vmem:[%s8126_s29 + $0x98] sm:$0xff]  ;;  %v7978_v42 = vld [vmem:[%s8126_s29 + $0x90] sm:$0xff] }
 0x1bb   : > { %v1384_v36 = vsel %vm1373_vm5, %v1351_v48, %v6582_v59  ;;  %v1385_v12 = vsel %vm1373_vm5, %v1352_v54, %v6583_v49  ;;  %v6427_v45 = vunpack.i.l.bf16 %v8828_v44  ;;  %v6508_v25 = vunpack.i.h.bf16 %v8876_v4  ;;  %v6826_v59 = vpop.permute.xlu0 %6825  ;;  %v12912_v44 = vld [vmem:[#allocation34_spill] sm:$0xff] }
 0x1bc   : > { %v1417_v39 = vsel %vm1406_vm7, %v1384_v36, %v6662_v56  ;;  %v1418_v7 = vsel %vm1406_vm7, %v1385_v12, %v6663_v41  ;;  %v6507_v60 = vunpack.i.l.bf16 %v8876_v4  ;;  %v6588_v32 = vunpack.i.h.bf16 %v8982_v57  ;;  %v12913_v56 = vld [vmem:[#allocation35_spill] sm:$0xff] }
 0x1bd   : > { %v1450_v20 = vsel %vm1439_vm6, %v1417_v39, %v6742_v50  ;;  %v1451_v55 = vsel %vm1439_vm6, %v1418_v7, %v6743_v34  ;;  %v6587_v49 = vunpack.i.l.bf16 %v8982_v57  ;;  %v6668_v62 = vunpack.i.h.bf16 %v9047_v58 }
 0x1be   : > { %v1484_v53 = vsel %vm1472_vm8, %v1451_v55, %v6823_v51  ;;  %v6667_v41 = vunpack.i.l.bf16 %v9047_v58  ;;  %v6747_v23 = vunpack.i.l.bf16 %v9121_v0  ;;  %v6828_v34 = vunpack.i.h.bf16 %v6826_v59 }
 0x1bf   : > { %v6827_v50 = vunpack.i.l.bf16 %v6826_v59  ;;  %v6673_v59 = vunpack.i.h.bf16 %v9056_v14 }
 0x1c2   : > { %1684 = vmatmul.bf16.gmra.mxu0 %v1511_v18  ;;  %v1481_v18 = vsel %vm1472_vm8, %v1448_v9, %v6817_v31  ;;  %v9320_v31 = vpop.f32.mrf.mxu1  ;;  %v1483_v9 = vsel %vm1472_vm8, %v1450_v20, %v6822_v43  ;;  %v12914_v20 = vld [vmem:[#allocation4_spill] sm:$0xff] }
 0x1c3   : > { %v1513_v17 = vpack.c.bf16 %v1482_v35, %v1481_v18  ;;  %v1515_v18 = vpack.c.bf16 %v1484_v53, %v1483_v9  ;;  %v12911_v35 = vld [vmem:[#allocation6_spill] sm:$0xff]  ;;  %v6353_v55 = vunpack.i.h.bf16 %v12914_v20  ;;  %v6352_v9 = vunpack.i.l.bf16 %v12914_v20  ;;  %v12915_v53 = vld [vmem:[#allocation7_spill] sm:$0xff] }
 0x1c4   : > { %6036 = vmatmul.msk.bf16.gmra.mxu1 %vm1274_vm2, %v1528_v3  ;;  %v12910_v3 = vld [vmem:[#allocation37_spill] sm:$0xff]  ;;  %v6347_v16 = vunpack.i.l.bf16 %v12911_v35  ;;  %v6598_v20 = vunpack.i.h.bf16 %v8975_v26 }
 0x1c5   : > { %v1530_v8 = vpack.c.bf16 %v12910_v3, %v12909_v61  ;;  %v1532_v61 = vpack.c.bf16 %v12913_v56, %v12912_v44 }
 0x1c6   : > { %v1287_v63 = vsel %vm1274_vm2, %v7978_v42, %v6347_v16  ;;  %v6672_v42 = vunpack.i.l.bf16 %v9056_v14 }
 0x1c7   : > { %v1320_v4 = vsel %vm1307_vm3, %v1287_v63, %v6427_v45 }
 0x1c8   : > { %v1353_v57 = vsel %vm1340_vm4, %v1320_v4, %v6507_v60  ;;  %v6512_v60 = vunpack.i.l.bf16 %v8911_v27 }
 0x1c9   : > { %v1386_v48 = vsel %vm1373_vm5, %v1353_v57, %v6587_v49  ;;  %v6831_v49 = vpop.permute.xlu1 %6830 }
 0x1ca   : > { %v9333_v6 = vpop.f32.mrf.mxu1  ;;  %v1419_v54 = vsel %vm1406_vm7, %v1386_v48, %v6667_v41  ;;  %v6753_v41 = vunpack.i.h.bf16 %v9112_v11  ;;  %v6833_v56 = vunpack.i.h.bf16 %v6831_v49  ;;  %v12917_v48 = vld [vmem:[#allocation40_spill] sm:$0xff] }
 0x1d2   : > { %1689 = vmatmul.bf16.gmra.mxu0 %v1513_v17  ;;  %v6348_v17 = vunpack.i.h.bf16 %v12911_v35  ;;  %v9362_v36 = vpop.f32.mrf.mxu1  ;;  %v6432_v35 = vunpack.i.l.bf16 %v12915_v53 }
 0x1d4   : > { %6037 = vmatmul.msk.bf16.gmra.mxu1 %vm1274_vm2, %v1530_v8  ;;  %v1288_v1 = vsel %vm1274_vm2, %v7977_v28, %v6348_v17  ;;  %v6748_v8 = vunpack.i.h.bf16 %v9121_v0  ;;  %v1452_v0 = vsel %vm1439_vm6, %v1419_v54, %v6747_v23  ;;  %v7979_v17 = vld [vmem:[%s8126_s29 + $0xb0] sm:$0xff]  ;;  %v8071_v28 = vmov 0.0  }
 0x1d5   : > { %v1321_v3 = vsel %vm1307_vm3, %v1288_v1, %v6428_v33  ;;  %v1485_v12 = vsel %vm1472_vm8, %v1452_v0, %v6827_v50  ;;  %v1290_v16 = vsel %vm1274_vm2, %v7979_v17, %v6353_v55  ;;  %v7980_v33 = vld [vmem:[%s8126_s29 + $0xa8] sm:$0xff]  ;;  %1875 = vst.msk [vmem:[#allocation2 + $0x18] sm:$0xff] %vm1307_vm3, %v8071_v28  ;;  %v6593_v1 = vunpack.i.h.bf16 %v8979_v21 }
 0x1d6   : > { %v1354_v47 = vsel %vm1340_vm4, %v1321_v3, %v6508_v25  ;;  %v1289_v45 = vsel %vm1274_vm2, %v7980_v33, %v6352_v9  ;;  %v6513_v25 = vunpack.i.h.bf16 %v8911_v27  ;;  %1876 = vst.msk [vmem:[#allocation2 + $0x20] sm:$0xff] %vm1307_vm3, %v8071_v28  ;;  %v12916_v23 = vpack.c.bf16 %v8842_v15, %v8839_v10  ;;  %v6836_v9 = vpop.permute.xlu2 %6835 }
 0x1d7   : > { %v1387_v58 = vsel %vm1373_vm5, %v1354_v47, %v6588_v32  ;;  %v6592_v32 = vunpack.i.l.bf16 %v8979_v21  ;;  %1871 = vst.msk [vmem:[#allocation2] sm:$0xff] %vm1307_vm3, %v8071_v28  ;;  %v6752_v21 = vunpack.i.l.bf16 %v9112_v11  ;;  %v6357_v54 = vunpack.i.l.bf16 %v12917_v48 }
 0x1d8   : > { %v1420_v51 = vsel %vm1406_vm7, %v1387_v58, %v6668_v62  ;;  %v1322_v62 = vsel %vm1307_vm3, %v1289_v45, %v6432_v35  ;;  %1872 = vst.msk [vmem:[#allocation2 + $0x8] sm:$0xff] %vm1307_vm3, %v8071_v28  ;;  %v6358_v58 = vunpack.i.h.bf16 %v12917_v48  ;;  %v6437_v0 = vunpack.i.l.bf16 %v8852_v46 }
 0x1d9   : > { %v1453_v43 = vsel %vm1439_vm6, %v1420_v51, %v6748_v8  ;;  %v1355_v14 = vsel %vm1340_vm4, %v1322_v62, %v6512_v60  ;;  %1878 = vst.msk [vmem:[#allocation2 + $0x30] sm:$0xff] %vm1307_vm3, %v8071_v28  ;;  %v6438_v51 = vunpack.i.h.bf16 %v8852_v46  ;;  %v6597_v55 = vunpack.i.l.bf16 %v8975_v26  ;;  %v7982_v46 = vld [vmem:[%s8126_s29 + $0xc0] sm:$0xff] }
 0x1da   : > { %v1486_v39 = vsel %vm1472_vm8, %v1453_v43, %v6828_v34  ;;  %v9384_v63 = vpop.f32.mrf.mxu1  ;;  %v1388_v4 = vsel %vm1373_vm5, %v1355_v14, %v6592_v32  ;;  %1879 = vst.msk [vmem:[#allocation2 + $0x38] sm:$0xff] %vm1307_vm3, %v8071_v28  ;;  %v6518_v43 = vunpack.i.h.bf16 %v8909_v29  ;;  %v6677_v35 = vunpack.i.l.bf16 %v9058_v52  ;;  %v12918_v32 = vld [vmem:[#allocation58_spill] sm:$0xff] }
 0x1db   : > { %v1517_v7 = vpack.c.bf16 %v1486_v39, %v1485_v12  ;;  %v1421_v11 = vsel %vm1406_vm7, %v1388_v4, %v6672_v42  ;;  %1881 = vst.msk [vmem:[#allocation2 + $0x48] sm:$0xff] %vm1307_vm3, %v8071_v28  ;;  %v6517_v12 = vunpack.i.l.bf16 %v8909_v29  ;;  %v7981_v39 = vld [vmem:[%s8126_s29 + $0xc8] sm:$0xff]  ;;  %v6678_v29 = vunpack.i.h.bf16 %v9058_v52 }
 0x1dc   : > { %v1454_v57 = vsel %vm1439_vm6, %v1421_v11, %v6752_v21  ;;  %1882 = vst.msk [vmem:[#allocation2 + $0x50] sm:$0xff] %vm1307_vm3, %v8071_v28  ;;  %v566_v26 = vrot.slane %v8943_v2, 2  ;;  %v6757_v33 = vunpack.i.l.bf16 %v9116_v40  ;;  %v6838_v60 = vunpack.i.h.bf16 %v6836_v9 }
 0x1dd   : > { %1884 = vst.msk [vmem:[#allocation2 + $0x60] sm:$0xff] %vm1307_vm3, %v8071_v28  ;;  %v6837_v52 = vunpack.i.l.bf16 %v6836_v9 }
 0x1de   : > { %1885 = vst.msk [vmem:[#allocation2 + $0x68] sm:$0xff] %vm1307_vm3, %v8071_v28 }
 0x1df   : > { %1887 = vst.msk [vmem:[#allocation2 + $0x78] sm:$0xff] %vm1307_vm3, %v8071_v28 }
 0x1e0   : > { %1888 = vst.msk [vmem:[#allocation2 + $0x80] sm:$0xff] %vm1307_vm3, %v8071_v28 }
 0x1e1   : > { %1890 = vst.msk [vmem:[#allocation2 + $0x90] sm:$0xff] %vm1307_vm3, %v8071_v28 }
 0x1e2   : > { %1694 = vmatmul.bf16.gmra.mxu0 %v1515_v18  ;;  %v6433_v18 = vunpack.i.h.bf16 %v12915_v53  ;;  %v9424_v15 = vpop.f32.mrf.mxu1  ;;  %1891 = vst.msk [vmem:[#allocation2 + $0x98] sm:$0xff] %vm1307_vm3, %v8071_v28  ;;  %v1291_v53 = vsel %vm1274_vm2, %v7982_v46, %v6357_v54 }
 0x1e3   : > { %1893 = vst.msk [vmem:[#allocation2 + $0xa8] sm:$0xff] %vm1307_vm3, %v8071_v28  ;;  %v1324_v17 = vsel %vm1307_vm3, %v1291_v53, %v6437_v0  ;;  %v6841_v53 = vpop.permute.xlu0 %6840 }
 0x1e4   : > { %6038 = vmatmul.msk.bf16.gmra.mxu1 %vm1274_vm2, %v1532_v61  ;;  %v1323_v27 = vsel %vm1307_vm3, %v1290_v16, %v6433_v18  ;;  %v6832_v61 = vunpack.i.l.bf16 %v6831_v49  ;;  %1894 = vst.msk [vmem:[#allocation2 + $0xb0] sm:$0xff] %vm1307_vm3, %v8071_v28  ;;  %v6758_v16 = vunpack.i.h.bf16 %v9116_v40  ;;  %v1357_v45 = vsel %vm1340_vm4, %v1324_v17, %v6517_v12  ;;  %v7983_v12 = vld [vmem:[%s8126_s29 + $0xe0] sm:$0xff] }
 0x1e5   : > { %v1356_v44 = vsel %vm1340_vm4, %v1323_v27, %v6513_v25  ;;  %1896 = vst.msk [vmem:[#allocation2 + $0xc0] sm:$0xff] %vm1307_vm3, %v8071_v28  ;;  %v565_v49 = vrot.slane %v12918_v32, 2  ;;  %v6843_v32 = vunpack.i.h.bf16 %v6841_v53 }
 0x1e6   : > { %v1389_v3 = vsel %vm1373_vm5, %v1356_v44, %v6593_v1  ;;  %v1487_v34 = vsel %vm1472_vm8, %v1454_v57, %v6832_v61  ;;  %1897 = vst.msk [vmem:[#allocation2 + $0xc8] sm:$0xff] %vm1307_vm3, %v8071_v28  ;;  %v1390_v1 = vsel %vm1373_vm5, %v1357_v45, %v6597_v55  ;;  %v12920_v57 = vld [vmem:[#allocation3_spill] sm:$0xff]  ;;  %v12923_v55 = vld [vmem:[#allocation61_spill] sm:$0xff] }
 0x1e7   : > { %v1422_v8 = vsel %vm1406_vm7, %v1389_v3, %v6673_v59  ;;  %1899 = vst.msk [vmem:[#allocation2 + $0xd8] sm:$0xff] %vm1307_vm3, %v8071_v28  ;;  %v12919_v59 = vld [vmem:[#allocation65_spill] sm:$0xff]  ;;  %v1423_v27 = vsel %vm1406_vm7, %v1390_v1, %v6677_v35  ;;  %v567_v61 = vsel %vm463_vm1, %v565_v49, %v566_v26  ;;  %v6603_v9 = vunpack.i.h.bf16 %v12923_v55  ;;  %v12924_v35 = vld [vmem:[#allocation14_spill] sm:$0xff] }
 0x1e8   : > { %v1455_v47 = vsel %vm1439_vm6, %v1422_v8, %v6753_v41  ;;  %1900 = vst.msk [vmem:[#allocation2 + $0xe0] sm:$0xff] %vm1307_vm3, %v8071_v28  ;;  %v568_v40 = vrot.slane %v12919_v59, 2  ;;  %v9480_v41 = vld [vmem:[%s12651_s2] ss:$0 sm:$0xff]  ;;  %v1456_v21 = vsel %vm1439_vm6, %v1423_v27, %v6757_v33  ;;  %v6602_v46 = vunpack.i.l.bf16 %v12923_v55  ;;  %v12929_v55 = vld [vmem:[#allocation59_spill] sm:$0xff] }
 0x1e9   : > { %v1488_v50 = vsel %vm1472_vm8, %v1455_v47, %v6833_v56  ;;  %1902 = vst.msk [vmem:[#allocation2 + $0xf0] sm:$0xff] %vm1307_vm3, %v8071_v28  ;;  %v1489_v14 = vsel %vm1472_vm8, %v1456_v21, %v6837_v52  ;;  %v6363_v47 = vunpack.i.h.bf16 %v12920_v57  ;;  %v6683_v17 = vunpack.i.h.bf16 %v12924_v35  ;;  %v12925_v45 = vld [vmem:[#allocation25_spill] sm:$0xff] }
 0x1ea   : > { %v1519_v10 = vpack.c.bf16 %v1488_v50, %v1487_v34  ;;  %1903 = vst.msk [vmem:[#allocation2 + $0xf8] sm:$0xff] %vm1307_vm3, %v8071_v28  ;;  %v9471_v42 = vpop.f32.mrf.mxu1  ;;  %v569_v4 = vsel %vm463_vm1, %v566_v26, %v568_v40  ;;  %v6362_v34 = vunpack.i.l.bf16 %v12920_v57  ;;  %v6682_v26 = vunpack.i.l.bf16 %v12924_v35  ;;  %v12926_v59 = vld [vmem:[#allocation9_spill] sm:$0xff] }
 0x1eb   : > { %1905 = vst.msk [vmem:[#allocation2 + $0x108] sm:$0xff] %vm1307_vm3, %v8071_v28  ;;  %v1536_v11 = vpack.c.bf16 %v569_v4, %v567_v61  ;;  %v6842_v49 = vunpack.i.l.bf16 %v6841_v53  ;;  %v6367_v40 = vunpack.i.l.bf16 %v12926_v59  ;;  %v6277_v57 = vld [vmem:[%s12652_s3 + $0x80] sm:$0xff] }
 0x1ec   : > { %1906 = vst.msk [vmem:[#allocation2 + $0x110] sm:$0xff] %vm1307_vm3, %v8071_v28 }
 0x1ed   : > { %1908 = vst.msk [vmem:[#allocation2 + $0x120] sm:$0xff] %vm1307_vm3, %v8071_v28 }
 0x1ee   : > { %1909 = vst.msk [vmem:[#allocation2 + $0x128] sm:$0xff] %vm1307_vm3, %v8071_v28 }
 0x1ef   : > { %1911 = vst.msk [vmem:[#allocation2 + $0x138] sm:$0xff] %vm1307_vm3, %v8071_v28 }
 0x1f0   : > { %1912 = vst.msk [vmem:[#allocation2 + $0x140] sm:$0xff] %vm1307_vm3, %v8071_v28 }
 0x1f1   : > { %1914 = vst.msk [vmem:[#allocation2 + $0x150] sm:$0xff] %vm1307_vm3, %v8071_v28 }
 0x1f2   : > { %1699 = vmatmul.bf16.gmra.mxu0 %v1517_v7  ;;  %v1292_v7 = vsel %vm1274_vm2, %v7981_v39, %v6358_v58  ;;  %1915 = vst.msk [vmem:[#allocation2 + $0x158] sm:$0xff] %vm1307_vm3, %v8071_v28  ;;  %v1294_v39 = vsel %vm1274_vm2, %v7983_v12, %v6363_v47  ;;  %v7985_v47 = vld [vmem:[%s8126_s29 + $0xf0] sm:$0xff] }
 0x1f3   : > { %v1325_v18 = vsel %vm1307_vm3, %v1292_v7, %v6438_v51  ;;  %1917 = vst.msk [vmem:[#allocation2 + $0x168] sm:$0xff] %vm1307_vm3, %v8071_v28  ;;  %v12922_v51 = vld [vmem:[#allocation51_spill] sm:$0xff]  ;;  %v7984_v7 = vld [vmem:[%s8126_s29 + $0xd8] sm:$0xff] }
 0x1f4   : > { %6039 = vmatmul.msk.bf16.gmra.mxu1 %vm1274_vm2, %v12916_v23  ;;  %v1358_v25 = vsel %vm1340_vm4, %v1325_v18, %v6518_v43  ;;  %1918 = vst.msk [vmem:[#allocation2 + $0x170] sm:$0xff] %vm1307_vm3, %v8071_v28  ;;  %v6523_v0 = vunpack.i.h.bf16 %v12922_v51  ;;  %v6522_v43 = vunpack.i.l.bf16 %v12922_v51  ;;  %v6278_v18 = vld [vmem:[%s12652_s3 + $0x88] sm:$0xff] }
 0x1f5   : > { %v1391_v2 = vsel %vm1373_vm5, %v1358_v25, %v6598_v20  ;;  %1920 = vst.msk [vmem:[#allocation2 + $0x180] sm:$0xff] %vm1307_vm3, %v8071_v28  ;;  %v1293_v20 = vsel %vm1274_vm2, %v7984_v7, %v6362_v34  ;;  %v6763_v25 = vunpack.i.h.bf16 %v12925_v45  ;;  %3507 = vmatpush.bf16.msrb.mxu1 %v6278_v18  ;;  %v1295_v34 = vsel %vm1274_vm2, %v7985_v47, %v6367_v40 }
 0x1f6   : > { %v1424_v62 = vsel %vm1406_vm7, %v1391_v2, %v6678_v29  ;;  %1921 = vst.msk [vmem:[#allocation2 + $0x188] sm:$0xff] %vm1307_vm3, %v8071_v28 }
 0x1f7   : > { %v1457_v44 = vsel %vm1439_vm6, %v1424_v62, %v6758_v16  ;;  %1923 = vst.msk [vmem:[#allocation2 + $0x198] sm:$0xff] %vm1307_vm3, %v8071_v28 }
 0x1f8   : > { %v1490_v56 = vsel %vm1472_vm8, %v1457_v44, %v6838_v60  ;;  %v6762_v60 = vunpack.i.l.bf16 %v12925_v45  ;;  %1924 = vst.msk [vmem:[#allocation2 + $0x1a0] sm:$0xff] %vm1307_vm3, %v8071_v28 }
 0x1f9   : > { %v1521_v23 = vpack.c.bf16 %v1490_v56, %v1489_v14  ;;  %1877 = vst.msk [vmem:[#allocation2 + $0x28] sm:$0x3] %vm1873_vm9, %v8071_v28  ;;  %v6368_v56 = vunpack.i.h.bf16 %v12926_v59  ;;  %3508 = vmatpush.bf16.msrb.mxu1 %v6277_v57 }
 0x1fa   : > { %1874 = vst.msk [vmem:[#allocation2 + $0x10] sm:$0x3] %vm1873_vm9, %v8071_v28 }
 0x1fb   : > { %1880 = vst.msk [vmem:[#allocation2 + $0x40] sm:$0x3] %vm1873_vm9, %v8071_v28 }
 0x1fc   : > { %1883 = vst.msk [vmem:[#allocation2 + $0x58] sm:$0x3] %vm1873_vm9, %v8071_v28 }
 0x1fd   : > { %1886 = vst.msk [vmem:[#allocation2 + $0x70] sm:$0x3] %vm1873_vm9, %v8071_v28 }
 0x1fe   : > { %1889 = vst.msk [vmem:[#allocation2 + $0x88] sm:$0x3] %vm1873_vm9, %v8071_v28 }
 0x1ff   : > { %1892 = vst.msk [vmem:[#allocation2 + $0xa0] sm:$0x3] %vm1873_vm9, %v8071_v28 }
 0x200   : > { %1895 = vst.msk [vmem:[#allocation2 + $0xb8] sm:$0x3] %vm1873_vm9, %v8071_v28 }
 0x201   : > { %1898 = vst.msk [vmem:[#allocation2 + $0xd0] sm:$0x3] %vm1873_vm9, %v8071_v28 }
 0x202   : > { %1704 = vmatmul.bf16.gmra.mxu0 %v1519_v10  ;;  %v12921_v10 = vld [vmem:[#allocation46_spill] sm:$0xff]  ;;  %1901 = vst.msk [vmem:[#allocation2 + $0xe8] sm:$0x3] %vm1873_vm9, %v8071_v28 }
 0x203   : > { %v6442_v48 = vunpack.i.l.bf16 %v12921_v10  ;;  %v6443_v58 = vunpack.i.h.bf16 %v12921_v10  ;;  %1904 = vst.msk [vmem:[#allocation2 + $0x100] sm:$0x3] %vm1873_vm9, %v8071_v28 }
 0x204   : > { %6040 = vmatmul.msk.bf16.gmra.mxu1 %vm1274_vm2, %v1536_v11  ;;  %v9561_v11 = vld [vmem:[#allocation2 + $0x8] sm:$0xff]  ;;  %1907 = vst.msk [vmem:[#allocation2 + $0x118] sm:$0x3] %vm1873_vm9, %v8071_v28 }
 0x205   : > { %v1326_v29 = vsel %vm1307_vm3, %v1293_v20, %v6442_v48  ;;  %v1327_v33 = vsel %vm1307_vm3, %v1294_v39, %v6443_v58  ;;  %v12928_v58 = vld [vmem:[#allocation55_spill] sm:$0xff]  ;;  %v2062_v12 = vrot.slane %v9561_v11, 1  ;;  %v7986_v39 = vld [vmem:[%s8126_s29 + $0xf8] sm:$0xff]  ;;  %1910 = vst.msk [vmem:[#allocation2 + $0x130] sm:$0x3] %vm1873_vm9, %v8071_v28 }
 0x206   : > { %v1359_v1 = vsel %vm1340_vm4, %v1326_v29, %v6522_v43  ;;  %v1360_v2 = vsel %vm1340_vm4, %v1327_v33, %v6523_v0  ;;  %v1296_v7 = vsel %vm1274_vm2, %v7986_v39, %v6368_v56  ;;  %v6528_v20 = vunpack.i.h.bf16 %v12928_v58  ;;  %v1961_v29 = vld [vmem:[#allocation2 + $0x10] sm:$0x3]  ;;  %v12931_v56 = vld [vmem:[#allocation17_spill] sm:$0xff]  ;;  %1913 = vst.msk [vmem:[#allocation2 + $0x148] sm:$0x3] %vm1873_vm9, %v8071_v28 }
 0x207   : > { %v1392_v27 = vsel %vm1373_vm5, %v1359_v1, %v6602_v46  ;;  %v1393_v62 = vsel %vm1373_vm5, %v1360_v2, %v6603_v9  ;;  %v6607_v9 = vunpack.i.l.bf16 %v12929_v55  ;;  %v2064_v33 = vrot.slane %v1961_v29, 1  ;;  %1916 = vst.msk [vmem:[#allocation2 + $0x160] sm:$0x3] %vm1873_vm9, %v8071_v28 }
 0x208   : > { %v1425_v44 = vsel %vm1406_vm7, %v1392_v27, %v6682_v26  ;;  %v1426_v14 = vsel %vm1406_vm7, %v1393_v62, %v6683_v17  ;;  %v6846_v27 = vpop.permute.xlu1 %6845  ;;  %1919 = vst.msk [vmem:[#allocation2 + $0x178] sm:$0x3] %vm1873_vm9, %v8071_v28 }
 0x209   : > { %v1458_v4 = vsel %vm1439_vm6, %v1425_v44, %v6762_v60  ;;  %v2065_v40 = vsel %vm382_vm0, %v2062_v12, %v2064_v33  ;;  %1922 = vst.msk [vmem:[#allocation2 + $0x190] sm:$0x3] %vm1873_vm9, %v8071_v28  ;;  %v12934_v33 = vld [vmem:[#allocation53_spill] sm:$0xff] }
 0x20a   : > { %1925 = vst.msk [vmem:[#allocation2 + $0x1a8] sm:$0x3] %vm1873_vm9, %v8071_v28  ;;  %v12933_v28 = vld [vmem:[#allocation48_spill] sm:$0xff] }
 0x20f   : > { %v1670_v3 = vpop.f32.mrf.mxu0 }
 0x210   : > { %v1671_v8 = vadd.f32 %v9480_v41, %v1670_v3  ;;  %v9559_v3 = vld [vmem:[#allocation2] sm:$0xff] }
 0x211   : > { %v2061_v43 = vrot.slane %v9559_v3, 1 }
 0x212   : > { %v1760_v50 = vadd.f32 %v9209_v37, %v1671_v8  ;;  %1709 = vmatmul.bf16.gmra.mxu0 %v1521_v23  ;;  %v9517_v37 = vpop.f32.mrf.mxu1  ;;  %v1491_v8 = vsel %vm1472_vm8, %v1458_v4, %v6842_v49 }
 0x214   : > { %v1839_v54 = vmax.f32 %v1760_v50, 0.0  ;;  %v12927_v50 = vld [vmem:[#allocation11_spill] sm:$0xff] }
 0x215   : > { %v6447_v10 = vunpack.i.l.bf16 %v12927_v50  ;;  %v6448_v48 = vunpack.i.h.bf16 %v12927_v50  ;;  %v6848_v50 = vunpack.i.h.bf16 %v6846_v27 }
 0x216   : > { %1927 = vst.msk [vmem:[#allocation2 + $0x19] sm:$0xff] %vm1307_vm3, %v1839_v54  ;;  %v6527_v54 = vunpack.i.l.bf16 %v12928_v58 }
 0x217   : > { %v1672_v16 = vpop.f32.mrf.mxu0  ;;  %v1328_v18 = vsel %vm1307_vm3, %v1295_v34, %v6447_v10  ;;  %v1329_v35 = vsel %vm1307_vm3, %v1296_v7, %v6448_v48  ;;  %v2144_v34 = vrot.slane %v1961_v29, 2  ;;  %v6847_v10 = vunpack.i.l.bf16 %v6846_v27 }
 0x218   : > { %v1673_v52 = vadd.f32 %v9480_v41, %v1672_v16  ;;  %v1361_v17 = vsel %vm1340_vm4, %v1328_v18, %v6527_v54  ;;  %v2063_v16 = vsel %vm382_vm0, %v2061_v43, %v2062_v12  ;;  %v1362_v45 = vsel %vm1340_vm4, %v1329_v35, %v6528_v20 }
 0x219   : > { %v1394_v60 = vsel %vm1373_vm5, %v1361_v17, %v6607_v9  ;;  %v6453_v29 = vunpack.i.h.bf16 %v12933_v28  ;;  %v6452_v35 = vunpack.i.l.bf16 %v12933_v28 }
 0x21a   : > { %v1762_v21 = vadd.f32 %v9228_v13, %v1673_v52  ;;  %v1459_v13 = vsel %vm1439_vm6, %v1426_v14, %v6763_v25  ;;  %v9578_v51 = vpop.f32.mrf.mxu1  ;;  %v6608_v25 = vunpack.i.h.bf16 %v12929_v55  ;;  %v12930_v52 = vld [vmem:[#allocation22_spill] sm:$0xff]  ;;  %v6874_v14 = vpack.i.bf16 %v2065_v40, %v2063_v16 }
 0x21b   : > { %v1492_v23 = vsel %vm1472_vm8, %v1459_v13, %v6843_v32  ;;  %v6688_v1 = vunpack.i.h.bf16 %v12930_v52  ;;  %v6687_v2 = vunpack.i.l.bf16 %v12930_v52  ;;  %v2141_v13 = vrot.slane %v9559_v3, 2 }
 0x21c   : > { %v1840_v61 = vmax.f32 %v1762_v21, 0.0  ;;  %v1523_v46 = vpack.c.bf16 %v1492_v23, %v1491_v8  ;;  %v2142_v8 = vrot.slane %v9561_v11, 2  ;;  %6875 = vrot.lane.b32.xlu1 %v6874_v14, %s8065_s8  ;;  %v1395_v58 = vsel %vm1373_vm5, %v1362_v45, %v6608_v25 }
 0x21d   : > { %v9598_v26 = vld [vmem:[#allocation2 + $0x18] sm:$0xff]  ;;  %v1428_v43 = vsel %vm1406_vm7, %v1395_v58, %v6688_v1  ;;  %v6533_v45 = vunpack.i.h.bf16 %v12934_v33  ;;  %v6532_v25 = vunpack.i.l.bf16 %v12934_v33  ;;  %v7987_v1 = vld [vmem:[%s8126_s29 + $0x110] sm:$0xff] }
 0x21e   : > { %1928 = vst.msk [vmem:[#allocation2 + $0x21] sm:$0xff] %vm1307_vm3, %v1840_v61  ;;  %v2066_v62 = vrot.slane %v9598_v26, 1  ;;  %v6768_v61 = vunpack.i.h.bf16 %v12931_v56  ;;  %v2143_v20 = vsel %vm463_vm1, %v2141_v13, %v2142_v8 }
 0x21f   : > { %v1675_v0 = vpop.f32.mrf.mxu0 }
 0x220   : > { %v1676_v53 = vadd.f32 %v9480_v41, %v1675_v0  ;;  %v1427_v0 = vsel %vm1406_vm7, %v1394_v60, %v6687_v2  ;;  %v1461_v7 = vsel %vm1439_vm6, %v1428_v43, %v6768_v61  ;;  %v12935_v61 = vld [vmem:[#allocation60_spill] sm:$0xff] }
 0x221   : > { %v1494_v9 = vsel %vm1472_vm8, %v1461_v7, %v6848_v50 }
 0x222   : > { %1714 = vmatmul.bf16.gmra.mxu0 %v1523_v46  ;;  %v1765_v32 = vadd.f32 %v9256_v19, %v1676_v53  ;;  %v6767_v19 = vunpack.i.l.bf16 %v12931_v56  ;;  %v9639_v11 = vpop.f32.mrf.mxu1  ;;  %v12932_v46 = vld [vmem:[#allocation41_spill] sm:$0xff] }
 0x223   : > { %v6373_v53 = vunpack.i.h.bf16 %v12932_v46  ;;  %v6372_v18 = vunpack.i.l.bf16 %v12932_v46 }
 0x224   : > { %v1841_v3 = vmax.f32 %v1765_v32, 0.0  ;;  %v1460_v12 = vsel %vm1439_vm6, %v1427_v0, %v6767_v19  ;;  %v7988_v32 = vld [vmem:[%s8126_s29 + $0x108] sm:$0xff]  ;;  %v6613_v19 = vunpack.i.h.bf16 %v12935_v61 }
 0x225   : > { %v9611_v49 = vld [vmem:[#allocation2 + $0x20] sm:$0xff]  ;;  %v9613_v59 = vld [vmem:[#allocation2 + $0x28] sm:$0x3]  ;;  %v1493_v55 = vsel %vm1472_vm8, %v1460_v12, %v6847_v10  ;;  %v1298_v2 = vsel %vm1274_vm2, %v7987_v1, %v6373_v53  ;;  %v1297_v40 = vsel %vm1274_vm2, %v7988_v32, %v6372_v18 }
 0x226   : > { %v2067_v21 = vrot.slane %v9611_v49, 1  ;;  %v2069_v44 = vrot.slane %v9613_v59, 1  ;;  %1929 = vst.msk [vmem:[#allocation2 + $0x31] sm:$0xff] %vm1307_vm3, %v1841_v3  ;;  %v1525_v52 = vpack.c.bf16 %v1494_v9, %v1493_v55  ;;  %v2147_v1 = vrot.slane %v9611_v49, 2 }
 0x227   : > { %v1677_v4 = vpop.f32.mrf.mxu0 }
 0x228   : > { %v1678_v23 = vadd.f32 %v9480_v41, %v1677_v4  ;;  %v9631_v57 = vsel %vm382_vm0, %v2066_v62, %v2067_v21  ;;  %v9634_v47 = vsel %vm382_vm0, %v2067_v21, %v2069_v44  ;;  %v1331_v62 = vsel %vm1307_vm3, %v1298_v2, %v6453_v29  ;;  %v6851_v4 = vpop.permute.xlu2 %6850 }
 0x229   : > { %v6879_v48 = vpack.i.bf16 %v9634_v47, %v9631_v57  ;;  %v1330_v21 = vsel %vm1307_vm3, %v1297_v40, %v6452_v35  ;;  %v1364_v56 = vsel %vm1340_vm4, %v1331_v62, %v6533_v45  ;;  %v6852_v28 = vunpack.i.l.bf16 %v6851_v4 }
 0x22a   : > { %v1767_v54 = vadd.f32 %v9273_v38, %v1678_v23  ;;  %v2145_v38 = vsel %vm463_vm1, %v2142_v8, %v2144_v34  ;;  %v9676_v44 = vpop.f32.mrf.mxu1  ;;  %v1363_v14 = vsel %vm1340_vm4, %v1330_v21, %v6532_v25  ;;  %v12936_v23 = vld [vmem:[#allocation21_spill] sm:$0xff]  ;;  %v1397_v33 = vsel %vm1373_vm5, %v1364_v56, %v6613_v19  ;;  %v12938_v56 = vld [vmem:[#allocation8_spill] sm:$0xff]  ;;  %v12939_v19 = vld [vmem:[#allocation47_spill] sm:$0xff] }
 0x22b   : > { %6880 = vrot.lane.b32.xlu2 %v6879_v48, %s8065_s8  ;;  %v6889_v16 = vpack.i.bf16 %v2145_v38, %v2143_v20  ;;  %v6693_v34 = vunpack.i.h.bf16 %v12936_v23  ;;  %v6692_v12 = vunpack.i.l.bf16 %v12936_v23  ;;  %v6853_v38 = vunpack.i.h.bf16 %v6851_v4 }
 0x22c   : > { %v1842_v39 = vmax.f32 %v1767_v54, 0.0  ;;  %v2149_v2 = vrot.slane %v9613_v59, 2  ;;  %v6377_v59 = vunpack.i.l.bf16 %v12938_v56  ;;  %v6458_v4 = vunpack.i.h.bf16 %v12939_v19 }
 0x22d   : > { %v9682_v8 = vld [vmem:[#allocation2 + $0x30] sm:$0xff] }
 0x22e   : > { %1930 = vst.msk [vmem:[#allocation2 + $0x39] sm:$0xff] %vm1307_vm3, %v1842_v39  ;;  %v2151_v3 = vrot.slane %v9682_v8, 2  ;;  %v2071_v48 = vrot.slane %v9682_v8, 1  ;;  %v12937_v39 = vld [vmem:[#allocation18_spill] sm:$0xff] }
 0x22f   : > { %v1680_v17 = vpop.f32.mrf.mxu0  ;;  %v6773_v7 = vunpack.i.h.bf16 %v12937_v39  ;;  %v6772_v20 = vunpack.i.l.bf16 %v12937_v39  ;;  %v7989_v39 = vld [vmem:[%s8126_s29 + $0x128] sm:$0xff] }
 0x230   : > { %v1681_v60 = vadd.f32 %v9480_v41, %v1680_v17 }
 0x232   : > { %v1770_v27 = vadd.f32 %v9296_v24, %v1681_v60  ;;  %1719 = vmatmul.bf16.gmra.mxu0 %v1525_v52  ;;  %v6612_v24 = vunpack.i.l.bf16 %v12935_v61  ;;  %v1430_v52 = vsel %vm1406_vm7, %v1397_v33, %v6693_v34  ;;  %v6378_v61 = vunpack.i.h.bf16 %v12938_v56 }
 0x233   : > { %6890 = vrot.lane.b32.xlu2 %v6889_v16, %s8067_s10  ;;  %v1463_v40 = vsel %vm1439_vm6, %v1430_v52, %v6773_v7  ;;  %v2150_v34 = vsel %vm463_vm1, %v2147_v1, %v2149_v2 }
 0x234   : > { %v1843_v13 = vmax.f32 %v1770_v27, 0.0  ;;  %v1396_v16 = vsel %vm1373_vm5, %v1363_v14, %v6612_v24  ;;  %v9725_v27 = vpop.f32.mrf.mxu1  ;;  %v1496_v21 = vsel %vm1472_vm8, %v1463_v40, %v6853_v38  ;;  %v2146_v14 = vrot.slane %v9598_v26, 2 }
 0x235   : > { %v9686_v50 = vld [vmem:[#allocation2 + $0x38] sm:$0xff]  ;;  %v1967_v10 = vld [vmem:[#allocation2 + $0x40] sm:$0x3]  ;;  %v1429_v60 = vsel %vm1406_vm7, %v1396_v16, %v6692_v12  ;;  %v1300_v7 = vsel %vm1274_vm2, %v7989_v39, %v6378_v61 }
 0x236   : > { %1931 = vst.msk [vmem:[#allocation2 + $0x49] sm:$0xff] %vm1307_vm3, %v1843_v13  ;;  %v2152_v58 = vrot.slane %v9686_v50, 2  ;;  %v2154_v54 = vrot.slane %v1967_v10, 2  ;;  %v2072_v0 = vrot.slane %v9686_v50, 1  ;;  %v2074_v43 = vrot.slane %v1967_v10, 1  ;;  %v12940_v10 = vld [vmem:[#allocation52_spill] sm:$0xff] }
 0x237   : > { %v1682_v55 = vpop.f32.mrf.mxu0  ;;  %v6457_v13 = vunpack.i.l.bf16 %v12939_v19  ;;  %v2148_v23 = vsel %vm463_vm1, %v2146_v14, %v2147_v1  ;;  %v12942_v14 = vld [vmem:[#allocation15_spill] sm:$0xff]  ;;  %v6777_v19 = vunpack.i.l.bf16 %v9161_v22  ;;  %v12945_v39 = vld [vmem:[#allocation12_spill] sm:$0xff] }
 0x238   : > { %v1683_v9 = vadd.f32 %v9480_v41, %v1682_v55  ;;  %v2153_v46 = vsel %vm463_vm1, %v2151_v3, %v2152_v58  ;;  %v2155_v53 = vsel %vm463_vm1, %v2152_v58, %v2154_v54  ;;  %v9700_v18 = vsel %vm382_vm0, %v2071_v48, %v2072_v0 }
 0x239   : > { %v9702_v29 = vpack.i.bf16 %v2155_v53, %v2153_v46  ;;  %v3081_v35 = vpack.c.bf16 %v2155_v53, %v2153_v46  ;;  %v9705_v17 = vsel %vm382_vm0, %v2072_v0, %v2074_v43  ;;  %v6538_v3 = vunpack.i.h.bf16 %v12940_v10  ;;  %v12941_v0 = vld [vmem:[#allocation62_spill] sm:$0xff] }
 0x23a   : > { %v1772_v45 = vadd.f32 %v9320_v31, %v1683_v9  ;;  %v9712_v25 = vpack.i.bf16 %v9705_v17, %v9700_v18  ;;  %v1462_v31 = vsel %vm1439_vm6, %v1429_v60, %v6772_v20  ;;  %v6537_v48 = vunpack.i.l.bf16 %v12940_v10  ;;  %v7990_v20 = vld [vmem:[%s8126_s29 + $0x120] sm:$0xff] }
 0x23b   : > { %6900 = vrot.lane.b32.xlu1 %v9702_v29, %s8067_s10  ;;  %6113 = vmatmul.msk.bf16.vlgmr.msrb.gmra.mxu1 %vm1307_vm3, %v3081_v35  ;;  %v1495_v62 = vsel %vm1472_vm8, %v1462_v31, %v6852_v28  ;;  %v6618_v43 = vunpack.i.h.bf16 %v12941_v0  ;;  %v6617_v12 = vunpack.i.l.bf16 %v12941_v0  ;;  %v1299_v38 = vsel %vm1274_vm2, %v7990_v20, %v6377_v59 }
 0x23c   : > { %v1844_v32 = vmax.f32 %v1772_v45, 0.0  ;;  %6885 = vrot.lane.b32.xlu0 %v9712_v25, %s8065_s8  ;;  %v1527_v54 = vpack.c.bf16 %v1496_v21, %v1495_v62  ;;  %v9747_v9 = vpack.i.bf16 %v2150_v34, %v2148_v23  ;;  %v1332_v53 = vsel %vm1307_vm3, %v1299_v38, %v6457_v13 }
 0x23d   : > { %v9749_v46 = vld [vmem:[#allocation2 + $0x48] sm:$0xff]  ;;  %v1333_v28 = vsel %vm1307_vm3, %v1300_v7, %v6458_v4  ;;  %v1365_v35 = vsel %vm1340_vm4, %v1332_v53, %v6537_v48  ;;  %v6698_v56 = vunpack.i.h.bf16 %v12942_v14  ;;  %v6697_v61 = vunpack.i.l.bf16 %v12942_v14  ;;  %v9766_v4 = vpop.f32.mrf.mxu1 }
 0x23e   : > { %1932 = vst.msk [vmem:[#allocation2 + $0x51] sm:$0xff] %vm1307_vm3, %v1844_v32  ;;  %v1366_v16 = vsel %vm1340_vm4, %v1333_v28, %v6538_v3  ;;  %v1398_v45 = vsel %vm1373_vm5, %v1365_v35, %v6617_v12  ;;  %v2076_v1 = vrot.slane %v9749_v46, 1  ;;  %v2156_v2 = vrot.slane %v9749_v46, 2  ;;  %v6856_v32 = vpop.permute.xlu0 %6855  ;;  %v12946_v35 = vld [vmem:[#allocation45_spill] sm:$0xff] }
 0x23f   : > { %v1685_v24 = vpop.f32.mrf.mxu0  ;;  %v6778_v59 = vunpack.i.h.bf16 %v9161_v22  ;;  %v6858_v3 = vunpack.i.h.bf16 %v6856_v32  ;;  %v6857_v48 = vunpack.i.l.bf16 %v6856_v32  ;;  %v6383_v7 = vunpack.i.h.bf16 %v12945_v39  ;;  %v7992_v32 = vld [vmem:[%s8126_s29 + $0x138] sm:$0xff] }
 0x240   : > { %v1686_v58 = vadd.f32 %v9480_v41, %v1685_v24  ;;  %v1431_v20 = vsel %vm1406_vm7, %v1398_v45, %v6697_v61 }
 0x242   : > { %v1775_v55 = vadd.f32 %v9333_v6, %v1686_v58  ;;  %1724 = vmatmul.bf16.gmra.mxu0 %v1527_v54  ;;  %v1399_v6 = vsel %vm1373_vm5, %v1366_v16, %v6618_v43  ;;  %v6904_v43 = vpack.i.bf16 %v9611_v49, %v9598_v26  ;;  %v1464_v26 = vsel %vm1439_vm6, %v1431_v20, %v6777_v19 }
 0x243   : > { %v1432_v38 = vsel %vm1406_vm7, %v1399_v6, %v6698_v56  ;;  %v1497_v53 = vsel %vm1472_vm8, %v1464_v26, %v6857_v48  ;;  %v6463_v16 = vunpack.i.h.bf16 %v12946_v35  ;;  %v6462_v6 = vunpack.i.l.bf16 %v12946_v35  ;;  %v12950_v26 = vld [vmem:[#allocation27_spill] sm:$0xff] }
 0x244   : > { %v1845_v33 = vmax.f32 %v1775_v55, 0.0  ;;  %6895 = vrot.lane.b32.xlu0 %v9747_v9, %s8067_s10  ;;  %v6382_v55 = vunpack.i.l.bf16 %v12945_v39  ;;  %v1465_v49 = vsel %vm1439_vm6, %v1432_v38, %v6778_v59  ;;  %v9814_v56 = vpack.i.bf16 %v9686_v50, %v9682_v8  ;;  %v12948_v50 = vld [vmem:[#allocation16_spill] sm:$0xff] }
 0x245   : > { %v1969_v60 = vld [vmem:[#allocation2 + $0x50] sm:$0xff]  ;;  %v1970_v52 = vld [vmem:[#allocation2 + $0x58] sm:$0x3]  ;;  %v1498_v28 = vsel %vm1472_vm8, %v1465_v49, %v6858_v3  ;;  %v9810_v14 = vpop.f32.mrf.mxu1  ;;  %v6623_v3 = vunpack.i.h.bf16 %v12948_v50  ;;  %v6622_v48 = vunpack.i.l.bf16 %v12948_v50  ;;  %v6783_v49 = vunpack.i.h.bf16 %v12950_v26 }
 0x246   : > { %1933 = vst.msk [vmem:[#allocation2 + $0x61] sm:$0xff] %vm1307_vm3, %v1845_v33  ;;  %v2077_v31 = vrot.slane %v1969_v60, 1  ;;  %v2079_v40 = vrot.slane %v1970_v52, 1  ;;  %v2157_v62 = vrot.slane %v1969_v60, 2  ;;  %v2159_v21 = vrot.slane %v1970_v52, 2  ;;  %v7991_v33 = vld [vmem:[%s8126_s29 + $0x140] sm:$0xff] }
 0x247   : > { %v1687_v13 = vpop.f32.mrf.mxu0  ;;  %v1302_v45 = vsel %vm1274_vm2, %v7991_v33, %v6383_v7  ;;  %v12947_v52 = vld [vmem:[#allocation57_spill] sm:$0xff]  ;;  %v12953_v50 = vld [vmem:[#allocation43_spill] sm:$0xff] }
 0x248   : > { %v1688_v24 = vadd.f32 %v9480_v41, %v1687_v13  ;;  %v9770_v23 = vsel %vm382_vm0, %v2076_v1, %v2077_v31  ;;  %v9773_v34 = vsel %vm382_vm0, %v2077_v31, %v2079_v40  ;;  %v2158_v10 = vsel %vm463_vm1, %v2156_v2, %v2157_v62 }
 0x249   : > { %12943 = vst [vmem:[#allocation26_spill] sm:$0xff] %v9770_v23  ;;  %v9778_v58 = vpack.i.bf16 %v9773_v34, %v9770_v23  ;;  %v2160_v22 = vsel %vm463_vm1, %v2157_v62, %v2159_v21  ;;  %v6543_v1 = vunpack.i.h.bf16 %v12947_v52  ;;  %v1301_v31 = vsel %vm1274_vm2, %v7992_v32, %v6382_v55 }
 0x24a   : > { %12944 = vst [vmem:[#allocation23_spill] sm:$0xff] %v9773_v34  ;;  %v1777_v54 = vadd.f32 %v9362_v36, %v1688_v24  ;;  %v3084_v0 = vpack.c.bf16 %v2160_v22, %v2158_v10  ;;  %v9784_v12 = vpack.i.bf16 %v2160_v22, %v2158_v10  ;;  %v6542_v40 = vunpack.i.l.bf16 %v12947_v52 }
 0x24b   : > { %6910 = vrot.lane.b32.xlu1 %v9778_v58, %s8065_s8  ;;  %v1529_v21 = vpack.c.bf16 %v1498_v28, %v1497_v53  ;;  %v1335_v61 = vsel %vm1307_vm3, %v1302_v45, %v6463_v16  ;;  %v1334_v13 = vsel %vm1307_vm3, %v1301_v31, %v6462_v6  ;;  %v9825_v10 = vpack.i.bf16 %v1969_v60, %v9749_v46 }
 0x24c   : > { %v1846_v36 = vmax.f32 %v1777_v54, 0.0  ;;  %6114 = vmatmul.msk.bf16.gmra.mxu1 %vm1307_vm3, %v3084_v0  ;;  %6905 = vrot.lane.b32.xlu0 %v6904_v43, %s8069_s12  ;;  %v1368_v24 = vsel %vm1340_vm4, %v1335_v61, %v6543_v1  ;;  %v1367_v8 = vsel %vm1340_vm4, %v1334_v13, %v6542_v40  ;;  %v12949_v54 = vld [vmem:[#allocation66_spill] sm:$0xff]  ;;  %v6782_v53 = vunpack.i.l.bf16 %v12950_v26 }
 0x24d   : > { %6920 = vrot.lane.b32.xlu2 %v9784_v12, %s8067_s10  ;;  %v9818_v19 = vld [vmem:[#allocation2 + $0x60] sm:$0xff]  ;;  %v6703_v0 = vunpack.i.h.bf16 %v12949_v54  ;;  %v6702_v43 = vunpack.i.l.bf16 %v12949_v54  ;;  %v1400_v31 = vsel %vm1373_vm5, %v1367_v8, %v6622_v48  ;;  %v1401_v40 = vsel %vm1373_vm5, %v1368_v24, %v6623_v3  ;;  %v9859_v13 = vpop.f32.mrf.mxu1 }
 0x24e   : > { %1934 = vst.msk [vmem:[#allocation2 + $0x69] sm:$0xff] %vm1307_vm3, %v1846_v36  ;;  %v2161_v46 = vrot.slane %v9818_v19, 2  ;;  %v2081_v60 = vrot.slane %v9818_v19, 1  ;;  %v6387_v3 = vunpack.i.l.bf16 %v12953_v50 }
 0x24f   : > { %v1690_v2 = vpop.f32.mrf.mxu0  ;;  %v1433_v61 = vsel %vm1406_vm7, %v1400_v31, %v6702_v43  ;;  %v12955_v43 = vld [vmem:[#allocation56_spill] sm:$0xff]  ;;  %v6866_v31 = vpop.permute.xlu2 %6865 }
 0x250   : > { %v1691_v62 = vadd.f32 %v9480_v41, %v1690_v2 }
 0x252   : > { %v1780_v59 = vadd.f32 %v9384_v63, %v1691_v62  ;;  %1729 = vmatmul.bf16.gmra.mxu0 %v1529_v21  ;;  %v6861_v63 = vpop.permute.xlu1 %6860 }
 0x253   : > { %6915 = vrot.lane.b32.xlu1 %v9814_v56, %s8069_s12  ;;  %v6863_v28 = vunpack.i.h.bf16 %v6861_v63  ;;  %v6862_v35 = vunpack.i.l.bf16 %v6861_v63  ;;  %v6388_v63 = vunpack.i.h.bf16 %v12953_v50 }
 0x254   : > { %v1847_v22 = vmax.f32 %v1780_v59, 0.0  ;;  %v1434_v59 = vsel %vm1406_vm7, %v1401_v40, %v6703_v0 }
 0x255   : > { %6925 = vrot.lane.b32.xlu2 %v9825_v10, %s8069_s12  ;;  %v1972_v39 = vld [vmem:[#allocation2 + $0x68] sm:$0xff]  ;;  %v1973_v7 = vld [vmem:[#allocation2 + $0x70] sm:$0x3]  ;;  %v1467_v24 = vsel %vm1439_vm6, %v1434_v59, %v6783_v49  ;;  %v7994_v49 = vld [vmem:[%s8126_s29 + $0x158] sm:$0xff]  ;;  %v9898_v59 = vpop.f32.mrf.mxu1 }
 0x256   : > { %1935 = vst.msk [vmem:[#allocation2 + $0x79] sm:$0xff] %vm1307_vm3, %v1847_v22  ;;  %v2162_v20 = vrot.slane %v1972_v39, 2  ;;  %v2164_v38 = vrot.slane %v1973_v7, 2  ;;  %v2082_v55 = vrot.slane %v1972_v39, 1  ;;  %v2084_v36 = vrot.slane %v1973_v7, 1  ;;  %v12954_v22 = vld [vmem:[#allocation50_spill] sm:$0xff] }
 0x257   : > { %v1692_v16 = vpop.f32.mrf.mxu0  ;;  %v6467_v54 = vunpack.i.l.bf16 %v12954_v22  ;;  %v6468_v0 = vunpack.i.h.bf16 %v12954_v22  ;;  %v6547_v7 = vunpack.i.l.bf16 %v12955_v43  ;;  %v9883_v26 = vpack.i.bf16 %v1972_v39, %v9818_v19  ;;  %v12956_v19 = vld [vmem:[#allocation63_spill] sm:$0xff] }
 0x258   : > { %v1693_v33 = vadd.f32 %v9480_v41, %v1692_v16  ;;  %v2163_v45 = vsel %vm463_vm1, %v2161_v46, %v2162_v20  ;;  %v2165_v6 = vsel %vm463_vm1, %v2162_v20, %v2164_v38  ;;  %v9843_v52 = vsel %vm382_vm0, %v2081_v60, %v2082_v55 }
 0x259   : > { %12951 = vst [vmem:[#allocation24_spill] sm:$0xff] %v9843_v52  ;;  %v3087_v1 = vpack.c.bf16 %v2165_v6, %v2163_v45  ;;  %v9845_v2 = vpack.i.bf16 %v2165_v6, %v2163_v45  ;;  %v9848_v32 = vsel %vm382_vm0, %v2082_v55, %v2084_v36  ;;  %v6548_v60 = vunpack.i.h.bf16 %v12955_v43  ;;  %v7993_v55 = vld [vmem:[%s8126_s29 + $0x150] sm:$0xff] }
 0x25a   : > { %12952 = vst [vmem:[#allocation42_spill] sm:$0xff] %v9848_v32  ;;  %v1782_v62 = vadd.f32 %v9424_v15, %v1693_v33  ;;  %v9855_v21 = vpack.i.bf16 %v9848_v32, %v9843_v52  ;;  %v1466_v15 = vsel %vm1439_vm6, %v1433_v61, %v6782_v53  ;;  %v1303_v36 = vsel %vm1274_vm2, %v7993_v55, %v6387_v3 }
 0x25b   : > { %6945 = vrot.lane.b32.xlu1 %v9747_v9, %s8065_s8  ;;  %6935 = vrot.lane.b32.xlu0 %v9845_v2, %s8067_s10  ;;  %v1499_v48 = vsel %vm1472_vm8, %v1466_v15, %v6862_v35  ;;  %v1500_v9 = vsel %vm1472_vm8, %v1467_v24, %v6863_v28  ;;  %v1304_v53 = vsel %vm1274_vm2, %v7994_v49, %v6388_v63  ;;  %v6628_v39 = vunpack.i.h.bf16 %v12956_v19 }
 0x25c   : > { %v1848_v8 = vmax.f32 %v1782_v62, 0.0  ;;  %6115 = vmatmul.msk.bf16.gmra.mxu1 %vm1307_vm3, %v3087_v1  ;;  %v1531_v38 = vpack.c.bf16 %v1500_v9, %v1499_v48  ;;  %v1336_v28 = vsel %vm1307_vm3, %v1303_v36, %v6467_v54  ;;  %v1337_v33 = vsel %vm1307_vm3, %v1304_v53, %v6468_v0  ;;  %v12957_v62 = vld [vmem:[#allocation20_spill] sm:$0xff] }
 0x25d   : > { %6930 = vrot.lane.b32.xlu2 %v9855_v21, %s8065_s8  ;;  %v1974_v16 = vld [vmem:[#allocation2 + $0x78] sm:$0xff]  ;;  %v1369_v45 = vsel %vm1340_vm4, %v1336_v28, %v6547_v7  ;;  %v1370_v6 = vsel %vm1340_vm4, %v1337_v33, %v6548_v60  ;;  %v6627_v1 = vunpack.i.l.bf16 %v12956_v19  ;;  %v6708_v61 = vunpack.i.h.bf16 %v12957_v62 }
 0x25e   : > { %1936 = vst.msk [vmem:[#allocation2 + $0x81] sm:$0xff] %vm1307_vm3, %v1848_v8  ;;  %v2166_v24 = vrot.slane %v1974_v16, 2  ;;  %v2086_v50 = vrot.slane %v1974_v16, 1  ;;  %v6788_v22 = vunpack.i.h.bf16 %v9152_v30  ;;  %v6787_v54 = vunpack.i.l.bf16 %v9152_v30 }
 0x25f   : > { %v1695_v46 = vpop.f32.mrf.mxu0  ;;  %v6868_v0 = vunpack.i.h.bf16 %v6866_v31  ;;  %v1402_v49 = vsel %vm1373_vm5, %v1369_v45, %v6627_v1  ;;  %v1403_v53 = vsel %vm1373_vm5, %v1370_v6, %v6628_v39  ;;  %v12960_v1 = vld [vmem:[#allocation10_spill] sm:$0xff] }
 0x260   : > { %v1696_v20 = vadd.f32 %v9480_v41, %v1695_v46  ;;  %v1436_v33 = vsel %vm1406_vm7, %v1403_v53, %v6708_v61 }
 0x261   : > { %v1469_v6 = vsel %vm1439_vm6, %v1436_v33, %v6788_v22  ;;  %v7995_v22 = vld [vmem:[%s8126_s29 + $0x170] sm:$0xff] }
 0x262   : > { %v1785_v35 = vadd.f32 %v9471_v42, %v1696_v20  ;;  %1734 = vmatmul.bf16.gmra.mxu0 %v1531_v38  ;;  %v6707_v42 = vunpack.i.l.bf16 %v12957_v62  ;;  %v6867_v38 = vunpack.i.l.bf16 %v6866_v31  ;;  %v1502_v39 = vsel %vm1472_vm8, %v1469_v6, %v6868_v0  ;;  %v12961_v62 = vld [vmem:[#allocation49_spill] sm:$0xff]  ;;  %v7996_v0 = vld [vmem:[%s8126_s29 + $0x168] sm:$0xff] }
 0x263   : > { %6940 = vrot.lane.b32.xlu0 %v9883_v26, %s8069_s12  ;;  %v6393_v31 = vunpack.i.h.bf16 %v12960_v1  ;;  %v6473_v61 = vunpack.i.h.bf16 %v12961_v62 }
 0x264   : > { %v1849_v40 = vmax.f32 %v1785_v35, 0.0 }
 0x265   : > { %6950 = vrot.lane.b32.xlu2 %v9702_v29, %s8065_s8  ;;  %v1975_v8 = vld [vmem:[#allocation2 + $0x80] sm:$0xff]  ;;  %v1976_v15 = vld [vmem:[#allocation2 + $0x88] sm:$0x3] }
 0x266   : > { %1937 = vst.msk [vmem:[#allocation2 + $0x91] sm:$0xff] %vm1307_vm3, %v1849_v40  ;;  %v9903_v3 = vpack.i.bf16 %v1975_v8, %v1974_v16  ;;  %v2167_v48 = vrot.slane %v1975_v8, 2  ;;  %v2169_v9 = vrot.slane %v1976_v15, 2  ;;  %v2087_v63 = vrot.slane %v1975_v8, 1  ;;  %v9940_v8 = vpop.f32.mrf.mxu1 }
 0x267   : > { %v1697_v43 = vpop.f32.mrf.mxu0  ;;  %v2089_v7 = vrot.slane %v1976_v15, 1  ;;  %v1435_v16 = vsel %vm1406_vm7, %v1402_v49, %v6707_v42  ;;  %v6392_v40 = vunpack.i.l.bf16 %v12960_v1  ;;  %v6472_v42 = vunpack.i.l.bf16 %v12961_v62 }
 0x268   : > { %v1698_v29 = vadd.f32 %v9480_v41, %v1697_v43  ;;  %6955 = vrot.lane.b32.xlu1 %v9903_v3, %s8069_s12  ;;  %v2168_v46 = vsel %vm463_vm1, %v2166_v24, %v2167_v48  ;;  %v2170_v60 = vsel %vm463_vm1, %v2167_v48, %v2169_v9  ;;  %v9913_v20 = vsel %vm382_vm0, %v2086_v50, %v2087_v63  ;;  %v12962_v24 = vld [vmem:[#allocation54_spill] sm:$0xff] }
 0x269   : > { %12958 = vst [vmem:[#allocation32_spill] sm:$0xff] %v9913_v20  ;;  %v3090_v55 = vpack.c.bf16 %v2170_v60, %v2168_v46  ;;  %v9916_v36 = vsel %vm382_vm0, %v2087_v63, %v2089_v7  ;;  %v6979_v30 = vpack.i.bf16 %v2170_v60, %v2168_v46  ;;  %v1468_v45 = vsel %vm1439_vm6, %v1435_v16, %v6787_v54  ;;  %v12964_v16 = vld [vmem:[#allocation19_spill] sm:$0xff] }
 0x26a   : > { %12959 = vst [vmem:[#allocation33_spill] sm:$0xff] %v9916_v36  ;;  %v1787_v28 = vadd.f32 %v9517_v37, %v1698_v29  ;;  %v9923_v35 = vpack.i.bf16 %v9916_v36, %v9913_v20  ;;  %v1501_v37 = vsel %vm1472_vm8, %v1468_v45, %v6867_v38  ;;  %v6553_v50 = vunpack.i.h.bf16 %v12962_v24 }
 0x26b   : > { %v6552_v48 = vunpack.i.l.bf16 %v12962_v24  ;;  %v1533_v63 = vpack.c.bf16 %v1502_v39, %v1501_v37  ;;  %v1306_v54 = vsel %vm1274_vm2, %v7995_v22, %v6393_v31  ;;  %v1305_v43 = vsel %vm1274_vm2, %v7996_v0, %v6392_v40 }
 0x26c   : > { %v1850_v19 = vmax.f32 %v1787_v28, 0.0  ;;  %6116 = vmatmul.msk.bf16.gmra.mxu1 %vm1307_vm3, %v3090_v55  ;;  %6960 = vrot.lane.b32.xlu0 %v9923_v35, %s8065_s8  ;;  %v1338_v29 = vsel %vm1307_vm3, %v1305_v43, %v6472_v42  ;;  %v1339_v46 = vsel %vm1307_vm3, %v1306_v54, %v6473_v61  ;;  %v6712_v33 = vunpack.i.l.bf16 %v12964_v16 }
 0x26d   : > { %6980 = vrot.lane.b32.xlu2 %v6979_v30, %s8065_s8  ;;  %v1977_v60 = vld [vmem:[#allocation2 + $0x90] sm:$0xff]  ;;  %v1371_v38 = vsel %vm1340_vm4, %v1338_v29, %v6552_v48  ;;  %v1372_v55 = vsel %vm1340_vm4, %v1339_v46, %v6553_v50  ;;  %v6793_v40 = vunpack.i.h.bf16 %v9189_v5 }
 0x26e   : > { %1938 = vst.msk [vmem:[#allocation2 + $0x99] sm:$0xff] %vm1307_vm3, %v1850_v19  ;;  %v6871_v19 = vpop.permute.xlu0 %6870  ;;  %v2171_v39 = vrot.slane %v1977_v60, 2  ;;  %v2091_v54 = vrot.slane %v1977_v60, 1 }
 0x26f   : > { %v1700_v15 = vpop.f32.mrf.mxu0 }
 0x270   : > { %v1701_v9 = vadd.f32 %v9480_v41, %v1700_v15  ;;  %6970 = vrot.lane.b32.xlu1 %v6979_v30, %s8067_s10  ;;  %v12963_v30 = vld [vmem:[#allocation64_spill] sm:$0xff]  ;;  %v6873_v15 = vunpack.i.h.bf16 %v6871_v19 }
 0x271   : > { %v6633_v49 = vunpack.i.h.bf16 %v12963_v30  ;;  %v6632_v28 = vunpack.i.l.bf16 %v12963_v30 }
 0x272   : > { %v1790_v7 = vadd.f32 %v9578_v51, %v1701_v9  ;;  %1739 = vmatmul.bf16.gmra.mxu0 %v1533_v63  ;;  %v6713_v51 = vunpack.i.h.bf16 %v12964_v16  ;;  %v6872_v9 = vunpack.i.l.bf16 %v6871_v19  ;;  %v9973_v63 = vpop.f32.mrf.mxu1 }
 0x273   : > { %v1404_v0 = vsel %vm1373_vm5, %v1371_v38, %v6632_v28  ;;  %v1405_v43 = vsel %vm1373_vm5, %v1372_v55, %v6633_v49 }
 0x274   : > { %v1851_v53 = vmax.f32 %v1790_v7, 0.0  ;;  %6965 = vrot.lane.b32.xlu0 %v9784_v12, %s8065_s8  ;;  %v6792_v12 = vunpack.i.l.bf16 %v9189_v5  ;;  %v1438_v29 = vsel %vm1406_vm7, %v1405_v43, %v6713_v51 }
 0x275   : > { %v1978_v45 = vld [vmem:[#allocation2 + $0x98] sm:$0xff]  ;;  %v1979_v6 = vld [vmem:[#allocation2 + $0xa0] sm:$0x3]  ;;  %v1471_v38 = vsel %vm1439_vm6, %v1438_v29, %v6793_v40  ;;  %v6266_v29 = vld [vmem:[%s12652_s3 + $0x28] sm:$0xff] }
 0x276   : > { %1939 = vst.msk [vmem:[#allocation2 + $0xa9] sm:$0xff] %vm1307_vm3, %v1851_v53  ;;  %v9962_v37 = vpack.i.bf16 %v1978_v45, %v1977_v60  ;;  %v2172_v1 = vrot.slane %v1978_v45, 2  ;;  %v2174_v31 = vrot.slane %v1979_v6, 2  ;;  %v2092_v61 = vrot.slane %v1978_v45, 1 }
 0x277   : > { %v1702_v62 = vpop.f32.mrf.mxu0  ;;  %v2094_v42 = vrot.slane %v1979_v6, 1  ;;  %v1504_v55 = vsel %vm1472_vm8, %v1471_v38, %v6873_v15 }
 0x278   : > { %v1703_v24 = vadd.f32 %v9480_v41, %v1702_v62  ;;  %6975 = vrot.lane.b32.xlu1 %v9845_v2, %s8065_s8  ;;  %6985 = vrot.lane.b32.xlu2 %v9962_v37, %s8069_s12  ;;  %v2173_v50 = vsel %vm463_vm1, %v2171_v39, %v2172_v1  ;;  %v2175_v48 = vsel %vm463_vm1, %v2172_v1, %v2174_v31 }
 0x279   : > { %v3093_v5 = vpack.c.bf16 %v2175_v48, %v2173_v50  ;;  %v7004_v22 = vpack.i.bf16 %v2175_v48, %v2173_v50  ;;  %v1437_v2 = vsel %vm1406_vm7, %v1404_v0, %v6712_v33  ;;  %v9981_v46 = vsel %vm382_vm0, %v2091_v54, %v2092_v61 }
 0x27a   : > { %v1792_v7 = vadd.f32 %v9639_v11, %v1703_v24  ;;  %12965 = vst [vmem:[#allocation44_spill] sm:$0xff] %v9981_v46  ;;  %v9984_v30 = vsel %vm382_vm0, %v2092_v61, %v2094_v42  ;;  %v1470_v60 = vsel %vm1439_vm6, %v1437_v2, %v6792_v12  ;;  %v10002_v19 = vpop.f32.mrf.mxu1  ;;  %v6268_v12 = vld [vmem:[%s12652_s3 + $0x38] sm:$0xff] }
 0x27b   : > { %12966 = vst [vmem:[#allocation13_spill] sm:$0xff] %v9984_v30  ;;  %v1503_v11 = vsel %vm1472_vm8, %v1470_v60, %v6872_v9  ;;  %v9995_v49 = vpack.i.bf16 %v9984_v30, %v9981_v46  ;;  %3323 = vmatpush.bf16.msra.mxu2 %v6268_v12  ;;  %v6264_v12 = vld [vmem:[%s12652_s3 + $0x18] sm:$0xff] }
 0x27c   : > { %v1852_v53 = vmax.f32 %v1792_v7, 0.0  ;;  %6117 = vmatmul.msk.bf16.gmra.mxu1 %vm1307_vm3, %v3093_v5  ;;  %7005 = vrot.lane.b32.xlu0 %v7004_v22, %s8065_s8  ;;  %v1535_v51 = vpack.c.bf16 %v1504_v55, %v1503_v11  ;;  %v8003_v46 = vld [vmem:[#allocation2 + $0x38] sm:$0xff] }
 0x27d   : > { %v1980_v45 = vld [vmem:[#allocation2 + $0xa8] sm:$0xff] }
 0x27e   : > { %1940 = vst.msk [vmem:[#allocation2 + $0xb1] sm:$0xff] %vm1307_vm3, %v1852_v53 }
 0x27f   : > { %v1705_v28 = vpop.f32.mrf.mxu0 }
 0x280   : > { %v1706_v16 = vadd.f32 %v9480_v41, %v1705_v28  ;;  %6990 = vrot.lane.b32.xlu1 %v9995_v49, %s8065_s8  ;;  %6995 = vrot.lane.b32.xlu2 %v7004_v22, %s8067_s10  ;;  %v2176_v41 = vrot.slane %v1980_v45, 2  ;;  %v2096_v22 = vrot.slane %v1980_v45, 1 }
 0x282   : > { %v1795_v33 = vadd.f32 %v9676_v44, %v1706_v16  ;;  %1744 = vmatmul.bf16.gmra.mxu0 %v1535_v51  ;;  %v10013_v44 = vld [vmem:[%s12651_s2] ss:$0 sm:$0xff]  ;;  %v10032_v43 = vpop.f32.mrf.mxu1 }
 0x283   : > { %v6265_v51 = vld [vmem:[%s12652_s3 + $0x20] sm:$0xff] }
 0x284   : > { %v1853_v6 = vmax.f32 %v1795_v33, 0.0 }
 0x285   : > { %v1981_v39 = vld [vmem:[#allocation2 + $0xb0] sm:$0xff]  ;;  %v1982_v1 = vld [vmem:[#allocation2 + $0xb8] sm:$0x3]  ;;  %v10051_v55 = vpop.permute.xlu2 %6880 }
 0x286   : > { %1941 = vst.msk [vmem:[#allocation2 + $0xc1] sm:$0xff] %vm1307_vm3, %v1853_v6  ;;  %v10005_v31 = vpack.i.bf16 %v1981_v39, %v1980_v45  ;;  %v2177_v40 = vrot.slane %v1981_v39, 2  ;;  %v2179_v61 = vrot.slane %v1982_v1, 2  ;;  %v2097_v24 = vrot.slane %v1981_v39, 1 }
 0x287   : > { %v1707_v62 = vpop.f32.mrf.mxu0  ;;  %v2099_v50 = vrot.slane %v1982_v1, 1 }
 0x288   : > { %v1708_v42 = vadd.f32 %v10013_v44, %v1707_v62  ;;  %7030 = vrot.lane.b32.xlu1 %v9883_v26, %s8067_s10  ;;  %7010 = vrot.lane.b32.xlu0 %v10005_v31, %s8069_s12  ;;  %v2178_v15 = vsel %vm463_vm1, %v2176_v41, %v2177_v40  ;;  %v2180_v48 = vsel %vm463_vm1, %v2177_v40, %v2179_v61 }
 0x289   : > { %7000 = vrot.lane.b32.xlu2 %v9814_v56, %s8067_s10  ;;  %v3096_v5 = vpack.c.bf16 %v2180_v48, %v2178_v15  ;;  %v10027_v26 = vsel %vm382_vm0, %v2096_v22, %v2097_v24  ;;  %v10030_v0 = vsel %vm382_vm0, %v2097_v24, %v2099_v50  ;;  %v6267_v56 = vld [vmem:[%s12652_s3 + $0x30] sm:$0xff] }
 0x28a   : > { %v1797_v9 = vadd.f32 %v9725_v27, %v1708_v42  ;;  %12967 = vst [vmem:[#allocation30_spill] sm:$0xff] %v10027_v26  ;;  %v7039_v27 = vpack.i.bf16 %v2180_v48, %v2178_v15  ;;  %v10040_v2 = vpack.i.bf16 %v10030_v0, %v10027_v26  ;;  %3324 = vmatpush.bf16.msra.mxu2 %v6267_v56  ;;  %v10059_v1 = vpop.f32.mrf.mxu1  ;;  %v6262_v56 = vld [vmem:[%s12652_s3 + $0x8] sm:$0xff] }
 0x28b   : > { %12968 = vst [vmem:[#allocation31_spill] sm:$0xff] %v10030_v0 }
 0x28c   : > { %v1854_v54 = vmax.f32 %v1797_v9, 0.0  ;;  %6118 = vmatmul.msk.bf16.gmra.mxu1 %vm1307_vm3, %v3096_v5 }
 0x28d   : > { %v1983_v38 = vld [vmem:[#allocation2 + $0xc0] sm:$0xff] }
 0x28e   : > { %1942 = vst.msk [vmem:[#allocation2 + $0xc9] sm:$0xff] %vm1307_vm3, %v1854_v54  ;;  %3325 = vmatpush.bf16.msra.mxu2 %v6266_v29  ;;  %v2181_v45 = vrot.slane %v1983_v38, 2  ;;  %v2101_v24 = vrot.slane %v1983_v38, 1 }
 0x28f   : > { %v1710_v7 = vpop.f32.mrf.mxu0 }
 0x290   : > { %v1711_v53 = vadd.f32 %v10013_v44, %v1710_v7  ;;  %7040 = vrot.lane.b32.xlu1 %v7039_v27, %s8065_s8  ;;  %7020 = vrot.lane.b32.xlu0 %v7039_v27, %s8067_s10 }
 0x291   : > { %7015 = vrot.lane.b32.xlu2 %v10040_v2, %s8065_s8 }
 0x292   : > { %v1800_v60 = vadd.f32 %v9766_v4, %v1711_v53  ;;  %3326 = vmatpush.bf16.msra.mxu2 %v6265_v51  ;;  %v10098_v7 = vpop.f32.mrf.mxu1 }
 0x294   : > { %v1855_v11 = vmax.f32 %v1800_v60, 0.0 }
 0x295   : > { %v1984_v28 = vld [vmem:[#allocation2 + $0xc8] sm:$0xff]  ;;  %v1985_v16 = vld [vmem:[#allocation2 + $0xd0] sm:$0x3] }
 0x296   : > { %1943 = vst.msk [vmem:[#allocation2 + $0xd9] sm:$0xff] %vm1307_vm3, %v1855_v11  ;;  %v10057_v33 = vpack.i.bf16 %v1984_v28, %v1983_v38  ;;  %v2182_v6 = vrot.slane %v1984_v28, 2  ;;  %v2184_v39 = vrot.slane %v1985_v16, 2  ;;  %v2102_v41 = vrot.slane %v1984_v28, 1  ;;  %3327 = vmatpush.bf16.msra.mxu2 %v6264_v12  ;;  %v6261_v28 = vld [vmem:[%s12652_s3] sm:$0xff] }
 0x297   : > { %v1712_v4 = vpop.f32.mrf.mxu0  ;;  %v2104_v40 = vrot.slane %v1985_v16, 1 }
 0x298   : > { %v1713_v62 = vadd.f32 %v10013_v44, %v1712_v4  ;;  %7045 = vrot.lane.b32.xlu1 %v10057_v33, %s8069_s12  ;;  %7025 = vrot.lane.b32.xlu0 %v9825_v10, %s8067_s10  ;;  %v2183_v61 = vsel %vm463_vm1, %v2181_v45, %v2182_v6  ;;  %v2185_v42 = vsel %vm463_vm1, %v2182_v6, %v2184_v39  ;;  %v10081_v10 = vpop.permute.xlu2 %6890 }
 0x299   : > { %7035 = vrot.lane.b32.xlu2 %v9903_v3, %s8067_s10  ;;  %v3099_v15 = vpack.c.bf16 %v2185_v42, %v2183_v61  ;;  %v10075_v48 = vsel %vm382_vm0, %v2101_v24, %v2102_v41  ;;  %v10078_v9 = vsel %vm382_vm0, %v2102_v41, %v2104_v40  ;;  %v6263_v3 = vld [vmem:[%s12652_s3 + $0x10] sm:$0xff]  ;;  %v7059_v22 = vpack.i.bf16 %v2185_v42, %v2183_v61 }
 0x29a   : > { %v1802_v50 = vadd.f32 %v9810_v14, %v1713_v62  ;;  %12969 = vst [vmem:[#allocation38_spill] sm:$0xff] %v10075_v48  ;;  %v10089_v14 = vpack.i.bf16 %v10078_v9, %v10075_v48  ;;  %3328 = vmatpush.bf16.msra.mxu2 %v6263_v3  ;;  %v10120_v24 = vpop.f32.mrf.mxu1 }
 0x29b   : > { %12970 = vst [vmem:[#allocation5_spill] sm:$0xff] %v10078_v9 }
 0x29c   : > { %v1856_v5 = vmax.f32 %v1802_v50, 0.0  ;;  %6119 = vmatmul.msk.bf16.gmra.mxu1 %vm1307_vm3, %v3099_v15 }
 0x29d   : > { %v1986_v53 = vld [vmem:[#allocation2 + $0xd8] sm:$0xff] }
 0x29e   : > { %1944 = vst.msk [vmem:[#allocation2 + $0xe1] sm:$0xff] %vm1307_vm3, %v1856_v5  ;;  %3329 = vmatpush.bf16.msra.mxu2 %v6262_v56  ;;  %v2186_v51 = vrot.slane %v1986_v53, 2  ;;  %v2106_v61 = vrot.slane %v1986_v53, 1 }
 0x29f   : > { %v1715_v54 = vpop.f32.mrf.mxu0 }
 0x2a0   : > { %v1716_v27 = vadd.f32 %v10013_v44, %v1715_v54  ;;  %7060 = vrot.lane.b32.xlu1 %v7059_v22, %s8067_s10  ;;  %7050 = vrot.lane.b32.xlu0 %v10089_v14, %s8065_s8 }
 0x2a1   : > { %7070 = vrot.lane.b32.xlu2 %v7059_v22, %s8065_s8 }
 0x2a2   : > { %v1805_v29 = vadd.f32 %v9859_v13, %v1716_v27  ;;  %3330 = vmatpush.bf16.msra.mxu2 %v6261_v28 }
 0x2a4   : > { %v1857_v60 = vmax.f32 %v1805_v29, 0.0 }
 0x2a5   : > { %v1987_v38 = vld [vmem:[#allocation2 + $0xe0] sm:$0xff]  ;;  %v1988_v11 = vld [vmem:[#allocation2 + $0xe8] sm:$0x3] }
 0x2a6   : > { %1945 = vst.msk [vmem:[#allocation2 + $0xf1] sm:$0xff] %vm1307_vm3, %v1857_v60  ;;  %v10106_v16 = vpack.i.bf16 %v1987_v38, %v1986_v53  ;;  %v2187_v45 = vrot.slane %v1987_v38, 2  ;;  %v2189_v6 = vrot.slane %v1988_v11, 2  ;;  %v2107_v13 = vrot.slane %v1987_v38, 1  ;;  %v10144_v38 = vpop.f32.mrf.mxu1 }
 0x2a7   : > { %v10108_v39 = vpop.permute.xlu2 %6920  ;;  %v1717_v4 = vpop.f32.mrf.mxu0  ;;  %v2109_v41 = vrot.slane %v1988_v11, 1 }
 0x2a8   : > { %v1718_v40 = vadd.f32 %v10013_v44, %v1717_v4  ;;  %7065 = vrot.lane.b32.xlu1 %v10005_v31, %s8067_s10  ;;  %7055 = vrot.lane.b32.xlu0 %v9962_v37, %s8067_s10  ;;  %v2188_v12 = vsel %vm463_vm1, %v2186_v51, %v2187_v45  ;;  %v2190_v62 = vsel %vm463_vm1, %v2187_v45, %v2189_v6  ;;  %v6876_v37 = vpop.permute.xlu1 %6875  ;;  %v6923_v52 = vunpack.i.h.bf16 %v10108_v39 }
 0x2a9   : > { %7075 = vrot.lane.b32.xlu2 %v10106_v16, %s8069_s12  ;;  %v3102_v15 = vpack.c.bf16 %v2190_v62, %v2188_v12  ;;  %v10123_v50 = vsel %vm382_vm0, %v2106_v61, %v2107_v13  ;;  %v10126_v31 = vsel %vm382_vm0, %v2107_v13, %v2109_v41  ;;  %v7094_v22 = vpack.i.bf16 %v2190_v62, %v2188_v12 }
 0x2aa   : > { %v1807_v42 = vadd.f32 %v9898_v59, %v1718_v40  ;;  %12971 = vst [vmem:[#allocation28_spill] sm:$0xff] %v10123_v50  ;;  %v10134_v59 = vpack.i.bf16 %v10126_v31, %v10123_v50  ;;  %v6878_v40 = vunpack.i.h.bf16 %v6876_v37  ;;  %v6877_v12 = vunpack.i.l.bf16 %v6876_v37 }
 0x2ab   : > { %12972 = vst [vmem:[#allocation29_spill] sm:$0xff] %v10126_v31  ;;  %v7999_v31 = vld [vmem:[#allocation2 + $0x8] sm:$0xff] }
 0x2ac   : > { %v1858_v5 = vmax.f32 %v1807_v42, 0.0  ;;  %6120 = vmatmul.msk.bf16.gmra.mxu1 %vm1307_vm3, %v3102_v15 }
 0x2ad   : > { %v1989_v53 = vld [vmem:[#allocation2 + $0xf0] sm:$0xff] }
 0x2ae   : > { %1946 = vst.msk [vmem:[#allocation2 + $0xf9] sm:$0xff] %vm1307_vm3, %v1858_v5  ;;  %v10130_v3 = vpop.permute.xlu0 %6885  ;;  %v2191_v51 = vrot.slane %v1989_v53, 2 }
 0x2af   : > { %v10136_v54 = vpop.permute.xlu2 %6925  ;;  %v1720_v56 = vpop.f32.mrf.mxu0 }
 0x2b0   : > { %v1721_v27 = vadd.f32 %v10013_v44, %v1720_v56  ;;  %7080 = vrot.lane.b32.xlu1 %v10134_v59, %s8065_s8  ;;  %7095 = vrot.lane.b32.xlu0 %v7094_v22, %s8065_s8  ;;  %v10146_v45 = vpop.permute.xlu1 %6900  ;;  %v6892_v56 = vunpack.i.l.bf16 %v10081_v10 }
 0x2b1   : > { %7085 = vrot.lane.b32.xlu2 %v7094_v22, %s8067_s10  ;;  %v6893_v22 = vunpack.i.h.bf16 %v10081_v10 }
 0x2b2   : > { %v1810_v29 = vadd.f32 %v9940_v8, %v1721_v27 }
 0x2b4   : > { %v1859_v60 = vmax.f32 %v1810_v29, 0.0 }
 0x2b5   : > { %v1990_v11 = vld [vmem:[#allocation2 + $0xf8] sm:$0xff]  ;;  %v1991_v28 = vld [vmem:[#allocation2 + $0x100] sm:$0x3] }
 0x2b6   : > { %1947 = vst.msk [vmem:[#allocation2 + $0x109] sm:$0xff] %vm1307_vm3, %v1859_v60  ;;  %v10149_v6 = vpop.permute.xlu0 %6895  ;;  %v7119_v4 = vpack.i.bf16 %v1990_v11, %v1989_v53  ;;  %v2192_v13 = vrot.slane %v1990_v11, 2  ;;  %v2194_v41 = vrot.slane %v1991_v28, 2  ;;  %v2112_v15 = vrot.slane %v1990_v11, 1 }
 0x2b7   : > { %v10151_v62 = vpop.permute.xlu2 %6930  ;;  %v1722_v8 = vpop.f32.mrf.mxu0  ;;  %v2114_v5 = vrot.slane %v1991_v28, 1  ;;  %v2111_v60 = vrot.slane %v1989_v53, 1  ;;  %v2888_v11 = vsel %vm1307_vm3, %v7999_v31, %v6878_v40 }
 0x2b8   : > { %v1723_v61 = vadd.f32 %v10013_v44, %v1722_v8  ;;  %7120 = vrot.lane.b32.xlu1 %v7119_v4, %s8067_s10  ;;  %7100 = vrot.lane.b32.xlu0 %v7119_v4, %s8069_s12  ;;  %v2193_v42 = vsel %vm463_vm1, %v2191_v51, %v2192_v13  ;;  %v2195_v37 = vsel %vm463_vm1, %v2192_v13, %v2194_v41  ;;  %v7998_v8 = vld [vmem:[#allocation2] sm:$0xff] }
 0x2b9   : > { %7090 = vrot.lane.b32.xlu2 %v10057_v33, %s8067_s10  ;;  %v3105_v29 = vpack.c.bf16 %v2195_v37, %v2193_v42  ;;  %v2887_v4 = vsel %vm1307_vm3, %v7998_v8, %v6877_v12  ;;  %v10167_v51 = vsel %vm382_vm0, %v2111_v60, %v2112_v15  ;;  %v10170_v33 = vsel %vm382_vm0, %v2112_v15, %v2114_v5 }
 0x2ba   : > { %v1812_v27 = vadd.f32 %v9973_v63, %v1723_v61  ;;  %v7124_v53 = vpack.i.bf16 %v2195_v37, %v2193_v42  ;;  %v2919_v13 = vsel %vm1373_vm5, %v2887_v4, %v6892_v56  ;;  %v2920_v41 = vsel %vm1373_vm5, %v2888_v11, %v6893_v22  ;;  %v10186_v42 = vpop.f32.mrf.mxu1 }
 0x2bb   : > { %v10179_v61 = vpack.i.bf16 %v10170_v33, %v10167_v51 }
 0x2bc   : > { %v1860_v28 = vmax.f32 %v1812_v27, 0.0  ;;  %6121 = vmatmul.msk.bf16.gmra.mxu1 %vm1307_vm3, %v3105_v29 }
 0x2bd   : > { %v10173_v63 = vpop.permute.xlu1 %6910  ;;  %v10193_v29 = vld [vmem:[#allocation2 + $0x108] sm:$0xff] }
 0x2be   : > { %1948 = vst.msk [vmem:[#allocation2 + $0x111] sm:$0xff] %vm1307_vm3, %v1860_v28  ;;  %v6906_v10 = vpop.permute.xlu0 %6905  ;;  %v2196_v28 = vrot.slane %v10193_v29, 2 }
 0x2bf   : > { %v6908_v31 = vunpack.i.h.bf16 %v6906_v10  ;;  %v6907_v40 = vunpack.i.l.bf16 %v6906_v10  ;;  %v1725_v12 = vpop.f32.mrf.mxu0  ;;  %v10181_v27 = vpop.permute.xlu2 %6950 }
 0x2c0   : > { %v1726_v15 = vadd.f32 %v10013_v44, %v1725_v12  ;;  %7125 = vrot.lane.b32.xlu1 %v7124_v53, %s8065_s8  ;;  %7110 = vrot.lane.b32.xlu0 %v7124_v53, %s8067_s10 }
 0x2c1   : > { %7105 = vrot.lane.b32.xlu2 %v10179_v61, %s8065_s8  ;;  %v2951_v5 = vsel %vm1439_vm6, %v2919_v13, %v6907_v40  ;;  %v2952_v22 = vsel %vm1439_vm6, %v2920_v41, %v6908_v31  ;;  %v6883_v31 = vunpack.i.h.bf16 %v10051_v55 }
 0x2c2   : > { %v1815_v37 = vadd.f32 %v10002_v19, %v1726_v15  ;;  %v3079_v56 = vpack.c.bf16 %v2952_v22, %v2951_v5  ;;  %v6882_v15 = vunpack.i.l.bf16 %v10051_v55 }
 0x2c4   : > { %v1861_v60 = vmax.f32 %v1815_v37, 0.0  ;;  %3331 = vmatmul.bf16.vlgmr.msra.gmra.mxu2 %v3079_v56  ;;  %v2116_v37 = vrot.slane %v10193_v29, 1  ;;  %v6898_v56 = vunpack.i.h.bf16 %v10149_v6 }
 0x2c5   : > { %v10195_v8 = vld [vmem:[#allocation2 + $0x110] sm:$0xff]  ;;  %v1994_v4 = vld [vmem:[#allocation2 + $0x118] sm:$0x3]  ;;  %v6916_v40 = vpop.permute.xlu1 %6915 }
 0x2c6   : > { %1949 = vst.msk [vmem:[#allocation2 + $0x121] sm:$0xff] %vm1307_vm3, %v1861_v60  ;;  %v7129_v11 = vpack.i.bf16 %v10195_v8, %v10193_v29  ;;  %v2197_v53 = vrot.slane %v10195_v8, 2  ;;  %v2199_v13 = vrot.slane %v1994_v4, 2  ;;  %v2117_v19 = vrot.slane %v10195_v8, 1 }
 0x2c7   : > { %v1727_v10 = vpop.f32.mrf.mxu0  ;;  %v2119_v41 = vrot.slane %v1994_v4, 1  ;;  %v6897_v60 = vunpack.i.l.bf16 %v10149_v6  ;;  %v10215_v4 = vpop.permute.xlu2 %6980  ;;  %v6918_v55 = vunpack.i.h.bf16 %v6916_v40  ;;  %v6917_v9 = vunpack.i.l.bf16 %v6916_v40  ;;  %v8000_v6 = vld [vmem:[#allocation2 + $0x18] sm:$0xff] }
 0x2c8   : > { %v1728_v12 = vadd.f32 %v10013_v44, %v1727_v10  ;;  %7130 = vrot.lane.b32.xlu1 %v7129_v11, %s8069_s12  ;;  %7115 = vrot.lane.b32.xlu0 %v10106_v16, %s8067_s10  ;;  %v2198_v5 = vsel %vm463_vm1, %v2196_v28, %v2197_v53  ;;  %v2200_v22 = vsel %vm463_vm1, %v2197_v53, %v2199_v13  ;;  %v10218_v16 = vpop.f32.mrf.mxu1 }
 0x2c9   : > { %7135 = vrot.lane.b32.xlu2 %v7129_v11, %s8067_s10  ;;  %12973 = vst [vmem:[#allocation39_spill] sm:$0xff] %v10215_v4  ;;  %v3108_v50 = vpack.c.bf16 %v2200_v22, %v2198_v5  ;;  %v10221_v11 = vsel %vm382_vm0, %v2116_v37, %v2117_v19  ;;  %v10224_v28 = vsel %vm382_vm0, %v2117_v19, %v2119_v41 }
 0x2ca   : > { %v1817_v10 = vadd.f32 %v10032_v43, %v1728_v12  ;;  %v2889_v48 = vsel %vm1307_vm3, %v8000_v6, %v6882_v15  ;;  %v8001_v43 = vld [vmem:[#allocation2 + $0x20] sm:$0xff]  ;;  %v7149_v40 = vpack.i.bf16 %v2200_v22, %v2198_v5  ;;  %v10234_v37 = vpack.i.bf16 %v10224_v28, %v10221_v11 }
 0x2cb   : > { %v2890_v12 = vsel %vm1307_vm3, %v8001_v43, %v6883_v31  ;;  %v2921_v19 = vsel %vm1373_vm5, %v2889_v48, %v6897_v60 }
 0x2cc   : > { %v1862_v53 = vmax.f32 %v1817_v10, 0.0  ;;  %6122 = vmatmul.msk.bf16.gmra.mxu1 %vm1307_vm3, %v3108_v50  ;;  %v2922_v41 = vsel %vm1373_vm5, %v2890_v12, %v6898_v56  ;;  %v2953_v10 = vsel %vm1439_vm6, %v2921_v19, %v6917_v9  ;;  %v6887_v9 = vunpack.i.l.bf16 %v10130_v3 }
 0x2cd   : > { %v10227_v13 = vpop.permute.xlu0 %6935  ;;  %v2954_v0 = vsel %vm1439_vm6, %v2922_v41, %v6918_v55  ;;  %v10245_v31 = vpop.permute.xlu1 %6945  ;;  %v10250_v56 = vld [vmem:[#allocation2 + $0x120] sm:$0xff] }
 0x2ce   : > { %1950 = vst.msk [vmem:[#allocation2 + $0x129] sm:$0xff] %vm1307_vm3, %v1862_v53  ;;  %v3082_v22 = vpack.c.bf16 %v2954_v0, %v2953_v10  ;;  %v6888_v53 = vunpack.i.h.bf16 %v10130_v3  ;;  %v6903_v3 = vunpack.i.h.bf16 %v10146_v45  ;;  %v2121_v30 = vrot.slane %v10250_v56, 1 }
 0x2cf   : > { %v1730_v50 = vpop.f32.mrf.mxu0  ;;  %12974 = vst [vmem:[#allocation36_spill] sm:$0xff] %v10250_v56 }
 0x2d0   : > { %v1731_v15 = vadd.f32 %v10013_v44, %v1730_v50  ;;  %7150 = vrot.lane.b32.xlu1 %v7149_v40, %s8067_s10  ;;  %7140 = vrot.lane.b32.xlu0 %v10234_v37, %s8065_s8  ;;  %v10253_v55 = vpop.f32.mrf.mxu1 }
 0x2d1   : > { %7155 = vrot.lane.b32.xlu2 %v7149_v40, %s8065_s8 }
 0x2d2   : > { %v1820_v48 = vadd.f32 %v10059_v1, %v1731_v15  ;;  %v10248_v5 = vpop.permute.xlu2 %6985  ;;  %v2201_v1 = vrot.slane %v10250_v56, 2  ;;  %v6902_v15 = vunpack.i.l.bf16 %v10146_v45  ;;  %v2892_v45 = vsel %vm1307_vm3, %v8003_v46, %v6888_v53 }
 0x2d3   : > { %v2924_v46 = vsel %vm1373_vm5, %v2892_v45, %v6903_v3  ;;  %v6927_v53 = vunpack.i.l.bf16 %v10136_v54 }
 0x2d4   : > { %v1863_v60 = vmax.f32 %v1820_v48, 0.0  ;;  %3336 = vmatmul.bf16.gmra.mxu2 %v3082_v22  ;;  %v8002_v22 = vld [vmem:[#allocation2 + $0x30] sm:$0xff] }
 0x2d5   : > { %v10256_v6 = vpop.permute.xlu0 %6940  ;;  %v10258_v43 = vld [vmem:[#allocation2 + $0x128] sm:$0xff]  ;;  %v1997_v12 = vld [vmem:[#allocation2 + $0x130] sm:$0x3] }
 0x2d6   : > { %1951 = vst.msk [vmem:[#allocation2 + $0x139] sm:$0xff] %vm1307_vm3, %v1863_v60  ;;  %v7164_v0 = vpack.i.bf16 %v10258_v43, %v10250_v56  ;;  %v2202_v19 = vrot.slane %v10258_v43, 2  ;;  %v2204_v41 = vrot.slane %v1997_v12, 2  ;;  %v2122_v50 = vrot.slane %v10258_v43, 1 }
 0x2d7   : > { %v1732_v40 = vpop.f32.mrf.mxu0  ;;  %v2124_v10 = vrot.slane %v1997_v12, 1  ;;  %v2891_v60 = vsel %vm1307_vm3, %v8002_v22, %v6887_v9  ;;  %v6943_v23 = vunpack.i.h.bf16 %v10256_v6  ;;  %v6988_v56 = vunpack.i.h.bf16 %v10248_v5 }
 0x2d8   : > { %v1733_v48 = vadd.f32 %v10013_v44, %v1732_v40  ;;  %7165 = vrot.lane.b32.xlu1 %v7164_v0, %s8067_s10  ;;  %7145 = vrot.lane.b32.xlu0 %v9712_v25, %s8069_s12  ;;  %v2203_v26 = vsel %vm463_vm1, %v2201_v1, %v2202_v19  ;;  %v2205_v12 = vsel %vm463_vm1, %v2202_v19, %v2204_v41 }
 0x2d9   : > { %7160 = vrot.lane.b32.xlu2 %v7164_v0, %s8069_s12  ;;  %v3111_v25 = vpack.c.bf16 %v2205_v12, %v2203_v26  ;;  %v10284_v9 = vsel %vm382_vm0, %v2121_v30, %v2122_v50  ;;  %v10287_v0 = vsel %vm382_vm0, %v2122_v50, %v2124_v10  ;;  %v2923_v19 = vsel %vm1373_vm5, %v2891_v60, %v6902_v15  ;;  %v10301_v10 = vpop.f32.mrf.mxu1 }
 0x2da   : > { %v1822_v40 = vadd.f32 %v10098_v7, %v1733_v48  ;;  %v10279_v36 = vpop.permute.xlu1 %6955  ;;  %v10281_v20 = vpop.permute.xlu2 %6995  ;;  %v6928_v7 = vunpack.i.h.bf16 %v10136_v54  ;;  %v10299_v30 = vpack.i.bf16 %v10287_v0, %v10284_v9  ;;  %v7179_v50 = vpack.i.bf16 %v2205_v12, %v2203_v26 }
 0x2db   : > { %v2955_v15 = vsel %vm1439_vm6, %v2923_v19, %v6927_v53  ;;  %v6913_v53 = vunpack.i.h.bf16 %v10173_v63 }
 0x2dc   : > { %v1864_v1 = vmax.f32 %v1822_v40, 0.0  ;;  %6123 = vmatmul.msk.bf16.gmra.mxu1 %vm1307_vm3, %v3111_v25  ;;  %v2956_v3 = vsel %vm1439_vm6, %v2924_v46, %v6928_v7 }
 0x2dd   : > { %v3085_v26 = vpack.c.bf16 %v2956_v3, %v2955_v15  ;;  %v10313_v12 = vld [vmem:[#allocation2 + $0x138] sm:$0xff] }
 0x2de   : > { %1952 = vst.msk [vmem:[#allocation2 + $0x141] sm:$0xff] %vm1307_vm3, %v1864_v1  ;;  %v10295_v41 = vpop.permute.xlu0 %6960  ;;  %v2206_v19 = vrot.slane %v10313_v12, 2 }
 0x2df   : > { %v1735_v48 = vpop.f32.mrf.mxu0  ;;  %12975 = vst [vmem:[#allocation37_spill] sm:$0xff] %v10313_v12 }
 0x2e0   : > { %v1736_v22 = vadd.f32 %v10013_v44, %v1735_v48  ;;  %7170 = vrot.lane.b32.xlu1 %v10299_v30, %s8065_s8  ;;  %7180 = vrot.lane.b32.xlu0 %v7179_v50, %s8065_s8 }
 0x2e1   : > { %7175 = vrot.lane.b32.xlu2 %v7179_v50, %s8067_s10  ;;  %v6912_v50 = vunpack.i.l.bf16 %v10173_v63  ;;  %v10333_v4 = vpop.f32.mrf.mxu1 }
 0x2e2   : > { %v1825_v54 = vadd.f32 %v10120_v24, %v1736_v22  ;;  %v10311_v60 = vpop.permute.xlu1 %6970  ;;  %12977 = vst [vmem:[#allocation34_spill] sm:$0xff] %v10333_v4 }
 0x2e3   : > { %v10315_v45 = vpop.permute.xlu2 %7000 }
 0x2e4   : > { %v1865_v40 = vmax.f32 %v1825_v54, 0.0  ;;  %3341 = vmatmul.bf16.gmra.mxu2 %v3085_v26 }
 0x2e5   : > { %v10317_v25 = vld [vmem:[#allocation2 + $0x140] sm:$0xff]  ;;  %v2000_v1 = vld [vmem:[#allocation2 + $0x148] sm:$0x3] }
 0x2e6   : > { %12976 = vst [vmem:[#allocation6_spill] sm:$0xff] %v10317_v25  ;;  %v7184_v46 = vpack.i.bf16 %v10317_v25, %v10313_v12  ;;  %v2207_v24 = vrot.slane %v10317_v25, 2  ;;  %v2209_v7 = vrot.slane %v2000_v1, 2  ;;  %v2127_v15 = vrot.slane %v10317_v25, 1  ;;  %v10327_v3 = vpop.permute.xlu0 %6965 }
 0x2e7   : > { %1953 = vst.msk [vmem:[#allocation2 + $0x151] sm:$0xff] %vm1307_vm3, %v1865_v40  ;;  %v1737_v48 = vpop.f32.mrf.mxu0  ;;  %v2129_v40 = vrot.slane %v2000_v1, 1  ;;  %v8004_v1 = vld [vmem:[#allocation2 + $0x48] sm:$0xff] }
 0x2e8   : > { %v1738_v22 = vadd.f32 %v10013_v44, %v1737_v48  ;;  %7185 = vrot.lane.b32.xlu0 %v7184_v46, %s8069_s12  ;;  %v2208_v54 = vsel %vm463_vm1, %v2206_v19, %v2207_v24  ;;  %v2210_v26 = vsel %vm463_vm1, %v2207_v24, %v2209_v7  ;;  %v2126_v48 = vrot.slane %v10313_v12, 1  ;;  %v8005_v7 = vld [vmem:[#allocation2 + $0x50] sm:$0xff] }
 0x2e9   : > { %7190 = vrot.lane.b32.xlu2 %v7184_v46, %s8067_s10  ;;  %v3114_v32 = vpack.c.bf16 %v2210_v26, %v2208_v54  ;;  %v7209_v63 = vpack.i.bf16 %v2210_v26, %v2208_v54  ;;  %v6942_v19 = vunpack.i.l.bf16 %v10256_v6  ;;  %v2893_v46 = vsel %vm1307_vm3, %v8004_v1, %v6912_v50 }
 0x2ea   : > { %v1827_v25 = vadd.f32 %v10144_v38, %v1738_v22  ;;  %v10338_v34 = vpop.permute.xlu1 %6975  ;;  %v2894_v54 = vsel %vm1307_vm3, %v8005_v7, %v6913_v53  ;;  %v6922_v38 = vunpack.i.l.bf16 %v10108_v39  ;;  %v10351_v26 = vsel %vm382_vm0, %v2126_v48, %v2127_v15 }
 0x2eb   : > { %12978 = vst [vmem:[#allocation35_spill] sm:$0xff] %v10338_v34  ;;  %v10343_v24 = vpop.permute.xlu2 %7015  ;;  %7210 = vrot.lane.b32.xlu1 %v7209_v63, %s8065_s8  ;;  %v10354_v6 = vsel %vm382_vm0, %v2127_v15, %v2129_v40  ;;  %v2926_v50 = vsel %vm1373_vm5, %v2894_v54, %v6923_v52  ;;  %v6937_v12 = vunpack.i.l.bf16 %v10227_v13 }
 0x2ec   : > { %v1866_v22 = vmax.f32 %v1827_v25, 0.0  ;;  %6124 = vmatmul.msk.bf16.gmra.mxu1 %vm1307_vm3, %v3114_v32  ;;  %v2925_v4 = vsel %vm1373_vm5, %v2893_v46, %v6922_v38  ;;  %v10361_v53 = vpack.i.bf16 %v10354_v6, %v10351_v26  ;;  %v2958_v32 = vsel %vm1439_vm6, %v2926_v50, %v6943_v23  ;;  %v10374_v46 = vpop.f32.mrf.mxu1 }
 0x2ed   : > { %v2957_v39 = vsel %vm1439_vm6, %v2925_v4, %v6942_v19  ;;  %12980 = vst [vmem:[#allocation7_spill] sm:$0xff] %v10374_v46 }
 0x2ee   : > { %1954 = vst.msk [vmem:[#allocation2 + $0x159] sm:$0xff] %vm1307_vm3, %v1866_v22  ;;  %v10369_v15 = vpop.permute.xlu0 %7005  ;;  %v3088_v48 = vpack.c.bf16 %v2958_v32, %v2957_v39  ;;  %v10378_v4 = vld [vmem:[#allocation2 + $0x150] sm:$0xff]  ;;  %v6933_v32 = vunpack.i.h.bf16 %v10151_v62 }
 0x2ef   : > { %v1740_v1 = vpop.f32.mrf.mxu0  ;;  %12979 = vst [vmem:[#allocation4_spill] sm:$0xff] %v10369_v15 }
 0x2f0   : > { %v1741_v25 = vadd.f32 %v10013_v44, %v1740_v1  ;;  %7200 = vrot.lane.b32.xlu0 %v7209_v63, %s8067_s10  ;;  %12982 = vst [vmem:[#allocation58_spill] sm:$0xff] %v10378_v4 }
 0x2f1   : > { %7195 = vrot.lane.b32.xlu2 %v10361_v53, %s8065_s8 }
 0x2f2   : > { %v1830_v52 = vadd.f32 %v10186_v42, %v1741_v25  ;;  %v10372_v40 = vpop.permute.xlu1 %6990  ;;  %v2211_v42 = vrot.slane %v10378_v4, 2 }
 0x2f3   : > { %v10376_v7 = vpop.permute.xlu2 %7035 }
 0x2f4   : > { %12981 = vst [vmem:[#allocation40_spill] sm:$0xff] %v10376_v7  ;;  %v1867_v23 = vmax.f32 %v1830_v52, 0.0  ;;  %3346 = vmatmul.bf16.gmra.mxu2 %v3088_v48 }
 0x2f5   : > { %v10380_v19 = vld [vmem:[#allocation2 + $0x158] sm:$0xff]  ;;  %v2003_v63 = vld [vmem:[#allocation2 + $0x160] sm:$0x3] }
 0x2f6   : > { %12983 = vst [vmem:[#allocation65_spill] sm:$0xff] %v10380_v19  ;;  %v7214_v54 = vpack.i.bf16 %v10380_v19, %v10378_v4  ;;  %v2212_v38 = vrot.slane %v10380_v19, 2  ;;  %v2214_v22 = vrot.slane %v2003_v63, 2  ;;  %v2132_v1 = vrot.slane %v10380_v19, 1 }
 0x2f7   : > { %1955 = vst.msk [vmem:[#allocation2 + $0x169] sm:$0xff] %vm1307_vm3, %v1867_v23  ;;  %v1742_v50 = vpop.f32.mrf.mxu0  ;;  %v2134_v39 = vrot.slane %v2003_v63, 1  ;;  %v6932_v23 = vunpack.i.l.bf16 %v10151_v62  ;;  %v2131_v19 = vrot.slane %v10378_v4, 1  ;;  %v6938_v63 = vunpack.i.h.bf16 %v10227_v13 }
 0x2f8   : > { %v1743_v25 = vadd.f32 %v10013_v44, %v1742_v50  ;;  %7215 = vrot.lane.b32.xlu1 %v7214_v54, %s8069_s12  ;;  %7205 = vrot.lane.b32.xlu0 %v9778_v58, %s8069_s12  ;;  %v2213_v52 = vsel %vm463_vm1, %v2211_v42, %v2212_v38  ;;  %v2215_v48 = vsel %vm463_vm1, %v2212_v38, %v2214_v22  ;;  %v6958_v58 = vunpack.i.h.bf16 %v10279_v36 }
 0x2f9   : > { %v3117_v46 = vpack.c.bf16 %v2215_v48, %v2213_v52  ;;  %v7239_v15 = vpack.i.bf16 %v2215_v48, %v2213_v52  ;;  %v6957_v42 = vunpack.i.l.bf16 %v10279_v36  ;;  %v10410_v62 = vsel %vm382_vm0, %v2131_v19, %v2132_v1  ;;  %v8007_v48 = vld [vmem:[#allocation2 + $0x68] sm:$0xff] }
 0x2fa   : > { %v1832_v50 = vadd.f32 %v10218_v16, %v1743_v25  ;;  %v10400_v7 = vpop.permute.xlu1 %7030  ;;  %v10402_v34 = vpop.permute.xlu0 %7010  ;;  %v10413_v22 = vsel %vm382_vm0, %v2132_v1, %v2134_v39  ;;  %v8006_v25 = vld [vmem:[#allocation2 + $0x60] sm:$0xff]  ;;  %v2896_v36 = vsel %vm1307_vm3, %v8007_v48, %v6933_v32 }
 0x2fb   : > { %v10406_v38 = vpop.permute.xlu2 %7070  ;;  %7240 = vrot.lane.b32.xlu2 %v7239_v15, %s8065_s8  ;;  %v10416_v16 = vpop.f32.mrf.mxu1  ;;  %v2895_v52 = vsel %vm1307_vm3, %v8006_v25, %v6932_v23  ;;  %v10423_v19 = vpack.i.bf16 %v10413_v22, %v10410_v62  ;;  %v2928_v39 = vsel %vm1373_vm5, %v2896_v36, %v6938_v63 }
 0x2fc   : > { %12984 = vst [vmem:[#allocation3_spill] sm:$0xff] %v10406_v38  ;;  %v1868_v13 = vmax.f32 %v1832_v50, 0.0  ;;  %6125 = vmatmul.msk.bf16.gmra.mxu1 %vm1307_vm3, %v3117_v46  ;;  %v2927_v1 = vsel %vm1373_vm5, %v2895_v52, %v6937_v12 }
 0x2fd   : > { %12985 = vst [vmem:[#allocation46_spill] sm:$0xff] %v10416_v16  ;;  %v2959_v46 = vsel %vm1439_vm6, %v2927_v1, %v6957_v42  ;;  %v2960_v16 = vsel %vm1439_vm6, %v2928_v39, %v6958_v58  ;;  %v6963_v58 = vunpack.i.h.bf16 %v10295_v41 }
 0x2fe   : > { %1956 = vst.msk [vmem:[#allocation2 + $0x171] sm:$0xff] %vm1307_vm3, %v1868_v13  ;;  %v3091_v12 = vpack.c.bf16 %v2960_v16, %v2959_v46  ;;  %v10440_v52 = vld [vmem:[#allocation2 + $0x168] sm:$0xff]  ;;  %v6973_v46 = vunpack.i.h.bf16 %v10311_v60 }
 0x2ff   : > { %v1745_v50 = vpop.f32.mrf.mxu0  ;;  %12987 = vst [vmem:[#allocation61_spill] sm:$0xff] %v10440_v52  ;;  %v2216_v36 = vrot.slane %v10440_v52, 2  ;;  %v2136_v4 = vrot.slane %v10440_v52, 1 }
 0x300   : > { %v1746_v23 = vadd.f32 %v10013_v44, %v1745_v50  ;;  %7220 = vrot.lane.b32.xlu1 %v7214_v54, %s8067_s10  ;;  %7225 = vrot.lane.b32.xlu0 %v10423_v19, %s8065_s8  ;;  %v6962_v50 = vunpack.i.l.bf16 %v10295_v41 }
 0x302   : > { %v1835_v32 = vadd.f32 %v10253_v55, %v1746_v23  ;;  %v10434_v13 = vpop.permute.xlu1 %7040  ;;  %v10436_v25 = vpop.permute.xlu0 %7020 }
 0x303   : > { %12986 = vst [vmem:[#allocation51_spill] sm:$0xff] %v10434_v13  ;;  %v10438_v63 = vpop.permute.xlu2 %7075  ;;  %v10450_v39 = vpop.f32.mrf.mxu1 }
 0x304   : > { %v1869_v42 = vmax.f32 %v1835_v32, 0.0  ;;  %3351 = vmatmul.bf16.gmra.mxu2 %v3091_v12  ;;  %12989 = vst [vmem:[#allocation25_spill] sm:$0xff] %v10450_v39 }
 0x305   : > { %v10443_v48 = vld [vmem:[#allocation2 + $0x170] sm:$0xff]  ;;  %v2006_v54 = vld [vmem:[#allocation2 + $0x178] sm:$0x3] }
 0x306   : > { %12988 = vst [vmem:[#allocation14_spill] sm:$0xff] %v10443_v48  ;;  %v7244_v55 = vpack.i.bf16 %v10443_v48, %v10440_v52  ;;  %v2217_v16 = vrot.slane %v10443_v48, 2  ;;  %v2219_v1 = vrot.slane %v2006_v54, 2  ;;  %v2137_v32 = vrot.slane %v10443_v48, 1 }
 0x307   : > { %1957 = vst.msk [vmem:[#allocation2 + $0x181] sm:$0xff] %vm1307_vm3, %v1869_v42  ;;  %v1747_v23 = vpop.f32.mrf.mxu0  ;;  %v2139_v12 = vrot.slane %v2006_v54, 1  ;;  %v6972_v42 = vunpack.i.l.bf16 %v10311_v60 }
 0x308   : > { %v1748_v38 = vadd.f32 %v10013_v44, %v1747_v23  ;;  %7235 = vrot.lane.b32.xlu1 %v7239_v15, %s8067_s10  ;;  %7230 = vrot.lane.b32.xlu0 %v9855_v21, %s8069_s12  ;;  %v2218_v13 = vsel %vm463_vm1, %v2216_v36, %v2217_v16  ;;  %v2220_v39 = vsel %vm463_vm1, %v2217_v16, %v2219_v1  ;;  %v8008_v36 = vld [vmem:[#allocation2 + $0x78] sm:$0xff]  ;;  %v8009_v1 = vld [vmem:[#allocation2 + $0x80] sm:$0xff] }
 0x309   : > { %7245 = vrot.lane.b32.xlu2 %v7244_v55, %s8069_s12  ;;  %v3120_v41 = vpack.c.bf16 %v2220_v39, %v2218_v13  ;;  %v10472_v15 = vsel %vm382_vm0, %v2136_v4, %v2137_v32  ;;  %v10475_v21 = vsel %vm382_vm0, %v2137_v32, %v2139_v12  ;;  %v2897_v16 = vsel %vm1307_vm3, %v8008_v36, %v6962_v50 }
 0x30a   : > { %v1837_v54 = vadd.f32 %v10301_v10, %v1748_v38  ;;  %v10465_v48 = vpop.permute.xlu1 %7045  ;;  %v10467_v60 = vpop.permute.xlu0 %7025  ;;  %12990 = vst [vmem:[#allocation9_spill] sm:$0xff] %v10472_v15  ;;  %v2898_v23 = vsel %vm1307_vm3, %v8009_v1, %v6963_v58  ;;  %v2929_v10 = vsel %vm1373_vm5, %v2897_v16, %v6972_v42  ;;  %v6987_v4 = vunpack.i.l.bf16 %v10248_v5  ;;  %v10497_v5 = vld [vmem:[#allocation2 + $0x198] sm:$0xff]  ;;  %v6275_v1 = vld [vmem:[%s12652_s3 + $0x70] sm:$0xff] }
 0x30b   : > { %v10469_v44 = vpop.permute.xlu2 %7085  ;;  %12991 = vst [vmem:[#allocation11_spill] sm:$0xff] %v10475_v21  ;;  %v2930_v38 = vsel %vm1373_vm5, %v2898_v23, %v6973_v46  ;;  %v10487_v32 = vpack.i.bf16 %v10475_v21, %v10472_v15  ;;  %v7269_v50 = vpack.i.bf16 %v2220_v39, %v2218_v13  ;;  %v10494_v46 = vpop.f32.mrf.mxu1  ;;  %v6276_v13 = vld [vmem:[%s12652_s3 + $0x78] sm:$0xff]  ;;  %v6998_v15 = vunpack.i.h.bf16 %v10281_v20 }
 0x30c   : > { %v1870_v52 = vmax.f32 %v1837_v54, 0.0  ;;  %6126 = vmatmul.msk.bf16.gmra.mxu1 %vm1307_vm3, %v3120_v41  ;;  %v2961_v58 = vsel %vm1439_vm6, %v2929_v10, %v6987_v4  ;;  %v2962_v12 = vsel %vm1439_vm6, %v2930_v38, %v6988_v56  ;;  %12992 = vst [vmem:[#allocation55_spill] sm:$0xff] %v10494_v46  ;;  %3412 = vmatpush.bf16.msra.mxu3 %v6276_v13  ;;  %v6993_v4 = vunpack.i.h.bf16 %v10372_v40  ;;  %v6274_v46 = vld [vmem:[%s12652_s3 + $0x68] sm:$0xff] }
 0x30d   : > { %v3094_v42 = vpack.c.bf16 %v2962_v12, %v2961_v58  ;;  %v6992_v58 = vunpack.i.l.bf16 %v10372_v40  ;;  %v6997_v21 = vunpack.i.l.bf16 %v10281_v20  ;;  %v6272_v20 = vld [vmem:[%s12652_s3 + $0x58] sm:$0xff] }
 0x30e   : > { %1958 = vst.msk [vmem:[#allocation2 + $0x189] sm:$0xff] %vm1307_vm3, %v1870_v52  ;;  %v10499_v52 = vld [vmem:[#allocation2 + $0x1a0] sm:$0xff] }
 0x30f   : > { %v10510_v54 = vld [vmem:[#allocation2 + $0x180] sm:$0xff] }
 0x310   : > { %7255 = vrot.lane.b32.xlu1 %v10487_v32, %s8065_s8  ;;  %7270 = vrot.lane.b32.xlu0 %v7269_v50, %s8065_s8  ;;  %v2261_v23 = vrot.slane %v10510_v54, 2 }
 0x311   : > { %7250 = vrot.lane.b32.xlu2 %v7244_v55, %s8067_s10  ;;  %v7274_v55 = vpack.i.bf16 %v10499_v52, %v10497_v5  ;;  %3413 = vmatpush.bf16.msra.mxu3 %v6275_v1  ;;  %v7013_v1 = vunpack.i.h.bf16 %v10402_v34 }
 0x312   : > { %v10504_v39 = vpop.permute.xlu1 %7060  ;;  %v10506_v56 = vpop.permute.xlu0 %7050 }
 0x313   : > { %v10508_v41 = vpop.permute.xlu2 %7090 }
 0x314   : > { %12993 = vst [vmem:[#allocation59_spill] sm:$0xff] %v10508_v41  ;;  %3356 = vmatmul.bf16.gmra.mxu2 %v3094_v42 }
 0x315   : > { %v10514_v36 = vld [vmem:[#allocation2 + $0x188] sm:$0xff]  ;;  %v10516_v16 = vld [vmem:[#allocation2 + $0x190] sm:$0x3]  ;;  %3414 = vmatpush.bf16.msra.mxu3 %v6274_v46 }
 0x316   : > { %v2262_v10 = vrot.slane %v10514_v36, 2  ;;  %v2264_v38 = vrot.slane %v10516_v16, 2 }
 0x318   : > { %7280 = vrot.lane.b32.xlu1 %v9995_v49, %s8069_s12  ;;  %7275 = vrot.lane.b32.xlu0 %v7274_v55, %s8067_s10  ;;  %v2263_v12 = vsel %vm463_vm1, %v2261_v23, %v2262_v10  ;;  %v2265_v13 = vsel %vm463_vm1, %v2262_v10, %v2264_v38  ;;  %v7012_v49 = vunpack.i.l.bf16 %v10402_v34  ;;  %v8010_v23 = vld [vmem:[#allocation2 + $0x90] sm:$0xff]  ;;  %v8011_v38 = vld [vmem:[#allocation2 + $0x98] sm:$0xff]  ;;  %v6273_v34 = vld [vmem:[%s12652_s3 + $0x60] sm:$0xff] }
 0x319   : > { %7260 = vrot.lane.b32.xlu2 %v7269_v50, %s8067_s10  ;;  %v3123_v42 = vpack.c.bf16 %v2265_v13, %v2263_v12  ;;  %v2899_v10 = vsel %vm1307_vm3, %v8010_v23, %v6992_v58  ;;  %v2900_v50 = vsel %vm1307_vm3, %v8011_v38, %v6993_v4  ;;  %3415 = vmatpush.bf16.msra.mxu3 %v6273_v34  ;;  %v6270_v38 = vld [vmem:[%s12652_s3 + $0x48] sm:$0xff] }
 0x31a   : > { %v10535_v41 = vpop.permute.xlu1 %7065  ;;  %v10537_v40 = vpop.permute.xlu0 %7055  ;;  %v2931_v58 = vsel %vm1373_vm5, %v2899_v10, %v6997_v21  ;;  %v2932_v4 = vsel %vm1373_vm5, %v2900_v50, %v6998_v15  ;;  %v7017_v10 = vunpack.i.l.bf16 %v10343_v24  ;;  %v7023_v50 = vunpack.i.h.bf16 %v10436_v25 }
 0x31b   : > { %12994 = vst [vmem:[#allocation22_spill] sm:$0xff] %v10535_v41  ;;  %v10541_v55 = vpop.permute.xlu2 %7105  ;;  %v10547_v41 = vpop.f32.mrf.mxu1  ;;  %v2963_v46 = vsel %vm1439_vm6, %v2931_v58, %v7012_v49  ;;  %v2964_v23 = vsel %vm1439_vm6, %v2932_v4, %v7013_v1  ;;  %v6271_v1 = vld [vmem:[%s12652_s3 + $0x50] sm:$0xff]  ;;  %v7047_v58 = vunpack.i.l.bf16 %v10465_v48 }
 0x31c   : > { %12995 = vst [vmem:[#allocation17_spill] sm:$0xff] %v10537_v40  ;;  %6127 = vmatmul.msk.bf16.gmra.mxu1 %vm1307_vm3, %v3123_v42  ;;  %v7299_v40 = vpack.i.bf16 %v10514_v36, %v10510_v54  ;;  %v3097_v15 = vpack.c.bf16 %v2964_v23, %v2963_v46  ;;  %v8013_v46 = vld [vmem:[#allocation2 + $0xb0] sm:$0xff] }
 0x31d   : > { %3416 = vmatpush.bf16.msra.mxu3 %v6272_v20 }
 0x320   : > { %7300 = vrot.lane.b32.xlu1 %v7299_v40, %s8067_s10  ;;  %7290 = vrot.lane.b32.xlu0 %v7299_v40, %s8069_s12  ;;  %v7304_v40 = vpack.i.bf16 %v2265_v13, %v2263_v12  ;;  %v7022_v12 = vunpack.i.l.bf16 %v10436_v25 }
 0x321   : > { %7265 = vrot.lane.b32.xlu2 %v9923_v35, %s8069_s12  ;;  %3417 = vmatpush.bf16.msra.mxu3 %v6271_v1  ;;  %v7018_v35 = vunpack.i.h.bf16 %v10343_v24 }
 0x322   : > { %v10566_v42 = vpop.permute.xlu1 %7080  ;;  %v10568_v21 = vpop.permute.xlu0 %7095 }
 0x323   : > { %v7136_v49 = vpop.permute.xlu2 %7135  ;;  %v2902_v23 = vsel %vm1307_vm3, %v8013_v46, %v7018_v35 }
 0x324   : > { %3361 = vmatmul.bf16.gmra.mxu2 %v3097_v15  ;;  %v2934_v25 = vsel %vm1373_vm5, %v2902_v23, %v7023_v50  ;;  %v6269_v15 = vld [vmem:[%s12652_s3 + $0x40] sm:$0xff]  ;;  %v2270_v50 = vrot.slane %v10499_v52, 1 }
 0x325   : > { %3418 = vmatpush.bf16.msra.mxu3 %v6270_v38  ;;  %v2012_v38 = vld [vmem:[#allocation2 + $0x1a8] sm:$0x3] }
 0x326   : > { %v2272_v52 = vrot.slane %v2012_v38, 1 }
 0x328   : > { %7305 = vrot.lane.b32.xlu1 %v7304_v40, %s8065_s8  ;;  %7295 = vrot.lane.b32.xlu0 %v10089_v14, %s8069_s12  ;;  %v7048_v14 = vunpack.i.h.bf16 %v10465_v48 }
 0x329   : > { %7285 = vrot.lane.b32.xlu2 %v10040_v2, %s8069_s12  ;;  %v8012_v2 = vld [vmem:[#allocation2 + $0xa8] sm:$0xff]  ;;  %3419 = vmatpush.bf16.msra.mxu3 %v6269_v15 }
 0x32a   : > { %v10585_v13 = vpop.permute.xlu1 %7120  ;;  %v10587_v34 = vpop.permute.xlu0 %7100  ;;  %v2901_v4 = vsel %vm1307_vm3, %v8012_v2, %v7017_v10  ;;  %v2966_v48 = vsel %vm1439_vm6, %v2934_v25, %v7048_v14  ;;  %v7052_v14 = vunpack.i.l.bf16 %v10506_v56  ;;  %v7138_v2 = vunpack.i.h.bf16 %v7136_v49 }
 0x32b   : > { %v10591_v24 = vpop.permute.xlu2 %7155  ;;  %v2933_v20 = vsel %vm1373_vm5, %v2901_v4, %v7022_v12  ;;  %v7137_v4 = vunpack.i.l.bf16 %v7136_v49  ;;  %v7063_v49 = vunpack.i.h.bf16 %v10504_v39 }
 0x32c   : > { %v2965_v1 = vsel %vm1439_vm6, %v2933_v20, %v7047_v58 }
 0x32d   : > { %v3100_v10 = vpack.c.bf16 %v2966_v48, %v2965_v1  ;;  %v8015_v48 = vld [vmem:[#allocation2 + $0xc8] sm:$0xff] }
 0x330   : > { %7310 = vrot.lane.b32.xlu1 %v10134_v59, %s8069_s12  ;;  %7320 = vrot.lane.b32.xlu0 %v10234_v37, %s8069_s12  ;;  %v2269_v59 = vrot.slane %v10497_v5, 1  ;;  %v7053_v37 = vunpack.i.h.bf16 %v10506_v56  ;;  %v7062_v5 = vunpack.i.l.bf16 %v10504_v39  ;;  %v8014_v56 = vld [vmem:[#allocation2 + $0xc0] sm:$0xff]  ;;  %v2273_v39 = vsel %vm382_vm0, %v2270_v50, %v2272_v52 }
 0x331   : > { %7315 = vrot.lane.b32.xlu2 %v10179_v61, %s8069_s12  ;;  %v2903_v15 = vsel %vm1307_vm3, %v8014_v56, %v7052_v14  ;;  %v7003_v52 = vunpack.i.h.bf16 %v10315_v45 }
 0x332   : > { %v7126_v40 = vpop.permute.xlu1 %7125  ;;  %v10608_v35 = vpop.permute.xlu0 %7110  ;;  %v2271_v1 = vsel %vm382_vm0, %v2269_v59, %v2270_v50 }
 0x333   : > { %v7128_v12 = vunpack.i.h.bf16 %v7126_v40  ;;  %v7127_v58 = vunpack.i.l.bf16 %v7126_v40  ;;  %v10618_v23 = vpop.permute.xlu2 %7160 }
 0x334   : > { %3366 = vmatmul.bf16.gmra.mxu2 %v3100_v10  ;;  %v7349_v10 = vpack.i.bf16 %v2273_v39, %v2271_v1 }
 0x335   : > { %v3002_v61 = vsel %vm1307_vm3, %v10170_v33, %v7128_v12  ;;  %v3001_v46 = vsel %vm1307_vm3, %v10167_v51, %v7127_v58  ;;  %v2225_v51 = vrot.slane %v10514_v36, 1  ;;  %v2227_v33 = vrot.slane %v10516_v16, 1 }
 0x336   : > { %v10621_v20 = vsel %vm1373_vm5, %v3001_v46, %v7137_v4  ;;  %v10624_v25 = vsel %vm1373_vm5, %v3002_v61, %v7138_v2  ;;  %v2224_v36 = vrot.slane %v10510_v54, 1  ;;  %v2935_v16 = vsel %vm1373_vm5, %v2903_v15, %v7062_v5 }
 0x337   : > { %v7078_v12 = vunpack.i.h.bf16 %v10438_v63  ;;  %v7077_v58 = vunpack.i.l.bf16 %v10438_v63  ;;  %v6948_v61 = vunpack.i.h.bf16 %v10245_v31  ;;  %v6947_v46 = vunpack.i.l.bf16 %v10245_v31 }
 0x338   : > { %7325 = vrot.lane.b32.xlu1 %v10299_v30, %s8069_s12  ;;  %7335 = vrot.lane.b32.xlu0 %v10423_v19, %s8069_s12  ;;  %v2904_v30 = vsel %vm1307_vm3, %v8015_v48, %v7053_v37  ;;  %v10647_v38 = vsel %vm382_vm0, %v2224_v36, %v2225_v51  ;;  %v7002_v5 = vunpack.i.l.bf16 %v10315_v45  ;;  %v7103_v45 = vunpack.i.h.bf16 %v10587_v34  ;;  %v8016_v36 = vld [vmem:[#allocation2 + $0xd8] sm:$0xff] }
 0x339   : > { %7330 = vrot.lane.b32.xlu2 %v10361_v53, %s8069_s12  ;;  %v10650_v53 = vsel %vm382_vm0, %v2225_v51, %v2227_v33  ;;  %v2936_v50 = vsel %vm1373_vm5, %v2904_v30, %v7063_v49  ;;  %v2967_v59 = vsel %vm1439_vm6, %v2935_v16, %v7077_v58  ;;  %v7082_v49 = vunpack.i.l.bf16 %v10566_v42  ;;  %v8017_v16 = vld [vmem:[#allocation2 + $0xe0] sm:$0xff] }
 0x33a   : > { %v10640_v40 = vpop.permute.xlu1 %7130  ;;  %v10642_v19 = vpop.permute.xlu0 %7115  ;;  %v7344_v54 = vpack.i.bf16 %v10650_v53, %v10647_v38  ;;  %v2968_v2 = vsel %vm1439_vm6, %v2936_v50, %v7078_v12  ;;  %v7158_v51 = vunpack.i.h.bf16 %v10591_v24  ;;  %v7157_v33 = vunpack.i.l.bf16 %v10591_v24 }
 0x33b   : > { %v10655_v14 = vpop.permute.xlu2 %7175  ;;  %v3103_v63 = vpack.c.bf16 %v2968_v2, %v2967_v59  ;;  %v2983_v56 = vsel %vm1307_vm3, %v9631_v57, %v6947_v46  ;;  %v2984_v15 = vsel %vm1307_vm3, %v9634_v47, %v6948_v61  ;;  %v7102_v48 = vunpack.i.l.bf16 %v10587_v34 }
 0x33c   : > { %v3015_v1 = vsel %vm1373_vm5, %v2983_v56, %v7002_v5  ;;  %v3016_v39 = vsel %vm1373_vm5, %v2984_v15, %v7003_v52  ;;  %v2905_v24 = vsel %vm1307_vm3, %v8016_v36, %v7082_v49  ;;  %v7088_v58 = vunpack.i.h.bf16 %v10469_v44 }
 0x33d   : > { %v3004_v59 = vsel %vm1307_vm3, %v10224_v28, %v7158_v51  ;;  %v3003_v34 = vsel %vm1307_vm3, %v10221_v11, %v7157_v33  ;;  %v7107_v36 = vunpack.i.l.bf16 %v10541_v55 }
 0x340   : > { %7340 = vrot.lane.b32.xlu1 %v10487_v32, %s8069_s12  ;;  %7350 = vrot.lane.b32.xlu0 %v7349_v10, %s8069_s12  ;;  %v7083_v32 = vunpack.i.h.bf16 %v10566_v42 }
 0x341   : > { %7345 = vrot.lane.b32.xlu2 %v7344_v54, %s8069_s12  ;;  %v7087_v54 = vunpack.i.l.bf16 %v10469_v44 }
 0x342   : > { %v10665_v4 = vpop.permute.xlu1 %7150  ;;  %v10667_v37 = vpop.permute.xlu0 %7140  ;;  %v2906_v57 = vsel %vm1307_vm3, %v8017_v16, %v7083_v32 }
 0x343   : > { %v7191_v31 = vpop.permute.xlu2 %7190  ;;  %v2937_v5 = vsel %vm1373_vm5, %v2905_v24, %v7087_v54  ;;  %v2938_v44 = vsel %vm1373_vm5, %v2906_v57, %v7088_v58  ;;  %v7113_v24 = vunpack.i.h.bf16 %v10608_v35  ;;  %v7132_v57 = vunpack.i.l.bf16 %v10640_v40 }
 0x344   : > { %3371 = vmatmul.bf16.gmra.mxu2 %v3103_v63  ;;  %v2969_v28 = vsel %vm1439_vm6, %v2937_v5, %v7102_v48  ;;  %v2970_v32 = vsel %vm1439_vm6, %v2938_v44, %v7103_v45  ;;  %v7193_v15 = vunpack.i.h.bf16 %v7191_v31  ;;  %v6952_v5 = vunpack.i.l.bf16 %v10181_v27 }
 0x345   : > { %v3106_v49 = vpack.c.bf16 %v2970_v32, %v2969_v28  ;;  %v7143_v44 = vunpack.i.h.bf16 %v10667_v37  ;;  %v7142_v28 = vunpack.i.l.bf16 %v10667_v37  ;;  %v7028_v32 = vunpack.i.h.bf16 %v10467_v60 }
 0x347   : > { %v2909_v37 = vsel %vm1307_vm3, %v10193_v29, %v7142_v28 }
 0x34a   : > { %v7166_v42 = vpop.permute.xlu1 %7165  ;;  %v7146_v30 = vpop.permute.xlu0 %7145 }
 0x34b   : > { %v7168_v10 = vunpack.i.h.bf16 %v7166_v42  ;;  %v7167_v50 = vunpack.i.l.bf16 %v7166_v42  ;;  %v7148_v47 = vunpack.i.h.bf16 %v7146_v30  ;;  %v7147_v12 = vunpack.i.l.bf16 %v7146_v30  ;;  %v10705_v51 = vpop.permute.xlu2 %7195 }
 0x34c   : > { %v7108_v30 = vunpack.i.h.bf16 %v10541_v55 }
 0x34d   : > { %v3047_v2 = vsel %vm1439_vm6, %v3015_v1, %v7147_v12  ;;  %v3048_v63 = vsel %vm1439_vm6, %v3016_v39, %v7148_v47  ;;  %v10696_v61 = vsel %vm1373_vm5, %v3003_v34, %v7167_v50  ;;  %v10699_v46 = vsel %vm1373_vm5, %v3004_v59, %v7168_v10  ;;  %v8018_v50 = vld [vmem:[#allocation2 + $0xf8] sm:$0xff]  ;;  %v8019_v12 = vld [vmem:[#allocation2 + $0xf0] sm:$0xff] }
 0x34e   : > { %v3080_v52 = vpack.c.bf16 %v3048_v63, %v3047_v2  ;;  %v7192_v1 = vunpack.i.l.bf16 %v7191_v31  ;;  %v7112_v31 = vunpack.i.l.bf16 %v10608_v35  ;;  %v2908_v47 = vsel %vm1307_vm3, %v8018_v50, %v7108_v30 }
 0x34f   : > { %v2907_v58 = vsel %vm1307_vm3, %v8019_v12, %v7107_v36  ;;  %v2940_v54 = vsel %vm1373_vm5, %v2908_v47, %v7113_v24  ;;  %v7162_v36 = vunpack.i.l.bf16 %v10618_v23 }
 0x350   : > { %3420 = vmatmul.bf16.vlgmr.msra.gmra.mxu3 %v3080_v52  ;;  %v2939_v55 = vsel %vm1373_vm5, %v2907_v58, %v7112_v31  ;;  %v6953_v52 = vunpack.i.h.bf16 %v10181_v27  ;;  %v2910_v27 = vsel %vm1307_vm3, %v10195_v8, %v7143_v44 }
 0x351   : > { %v2971_v35 = vsel %vm1439_vm6, %v2939_v55, %v7132_v57 }
 0x352   : > { %v7181_v11 = vpop.permute.xlu0 %7180  ;;  %v10721_v16 = vpop.permute.xlu1 %7170 }
 0x353   : > { %v7183_v33 = vunpack.i.h.bf16 %v7181_v11  ;;  %v7182_v56 = vunpack.i.l.bf16 %v7181_v11  ;;  %v7027_v11 = vunpack.i.l.bf16 %v10467_v60 }
 0x354   : > { %3376 = vmatmul.bf16.gmra.mxu2 %v3106_v49  ;;  %v7153_v49 = vunpack.i.h.bf16 %v10665_v4 }
 0x355   : > { %v3006_v39 = vsel %vm1307_vm3, %v10287_v0, %v7183_v33  ;;  %v3005_v42 = vsel %vm1307_vm3, %v10284_v9, %v7182_v56  ;;  %v7133_v9 = vunpack.i.h.bf16 %v10640_v40  ;;  %v7241_v10 = vpop.permute.xlu2 %7240  ;;  %v7152_v33 = vunpack.i.l.bf16 %v10665_v4 }
 0x356   : > { %v10712_v48 = vsel %vm1373_vm5, %v3005_v42, %v7192_v1  ;;  %v10715_v45 = vsel %vm1373_vm5, %v3006_v39, %v7193_v15  ;;  %v2985_v56 = vsel %vm1307_vm3, %v9700_v18, %v6952_v5  ;;  %v2986_v15 = vsel %vm1307_vm3, %v9705_v17, %v6953_v52  ;;  %v6296_v52 = vld [vmem:[%s12654_s5 + $0x88] sm:$0xff] }
 0x357   : > { %v2972_v59 = vsel %vm1439_vm6, %v2940_v54, %v7133_v9  ;;  %v7243_v1 = vunpack.i.h.bf16 %v7241_v10  ;;  %v7242_v39 = vunpack.i.l.bf16 %v7241_v10  ;;  %v3017_v30 = vsel %vm1373_vm5, %v2985_v56, %v7027_v11  ;;  %v10761_v10 = vpop.f32.mrf.mxu2  ;;  %5202 = vmatpush.bf16.msrb.mxu3 %v6296_v52 }
 0x358   : > { %v3109_v63 = vpack.c.bf16 %v2972_v59, %v2971_v35  ;;  %v3018_v4 = vsel %vm1373_vm5, %v2986_v15, %v7028_v32  ;;  %v7163_v18 = vunpack.i.h.bf16 %v10618_v23  ;;  %v2941_v29 = vsel %vm1373_vm5, %v2909_v37, %v7152_v33 }
 0x359   : > { %v2942_v57 = vsel %vm1373_vm5, %v2910_v27, %v7153_v49  ;;  %v3010_v50 = vsel %vm1307_vm3, %v10413_v22, %v7243_v1  ;;  %v3009_v47 = vsel %vm1307_vm3, %v10410_v62, %v7242_v39  ;;  %v2973_v35 = vsel %vm1439_vm6, %v2941_v29, %v7162_v36  ;;  %v6294_v62 = vld [vmem:[%s12654_s5 + $0x78] sm:$0xff] }
 0x35a   : > { %v10723_v0 = vpop.permute.xlu0 %7185  ;;  %v2974_v59 = vsel %vm1439_vm6, %v2942_v57, %v7163_v18  ;;  %5107 = vmatpush.bf16.msrb.mxu2 %v6294_v62  ;;  %v6286_v27 = vld [vmem:[%s12654_s5 + $0x38] sm:$0xff]  ;;  %v6968_v37 = vunpack.i.h.bf16 %v10327_v3  ;;  %v6967_v1 = vunpack.i.l.bf16 %v10327_v3  ;;  %v7172_v39 = vunpack.i.l.bf16 %v10721_v16 }
 0x35b   : > { %v3112_v28 = vpack.c.bf16 %v2974_v59, %v2973_v35  ;;  %5018 = vmatpush.bf16.msrb.mxu0 %v6286_v27  ;;  %v12996_v18 = vld [vmem:[#allocation36_spill] sm:$0xff]  ;;  %v7187_v29 = vunpack.i.l.bf16 %v10723_v0 }
 0x35c   : > { %v2911_v36 = vsel %vm1307_vm3, %v12996_v18, %v7172_v39  ;;  %v13000_v27 = vld [vmem:[#allocation40_spill] sm:$0xff] }
 0x35d   : > { %v7211_v34 = vpop.permute.xlu1 %7210 }
 0x35e   : > { %v7212_v22 = vunpack.i.l.bf16 %v7211_v34 }
 0x360   : > { %v3007_v33 = vsel %vm1307_vm3, %v10351_v26, %v7212_v22  ;;  %v10804_v26 = vpop.f32.mrf.mxu2 }
 0x362   : > { %v10733_v2 = vpop.permute.xlu0 %7200 }
 0x363   : > { %v10735_v40 = vpop.permute.xlu2 %7245 }
 0x364   : > { %3381 = vmatmul.bf16.gmra.mxu2 %v3109_v63  ;;  %v7213_v63 = vunpack.i.h.bf16 %v7211_v34 }
 0x366   : > { %v3008_v34 = vsel %vm1307_vm3, %v10354_v6, %v7213_v63  ;;  %v7173_v6 = vunpack.i.h.bf16 %v10721_v16  ;;  %v12998_v16 = vld [vmem:[#allocation23_spill] sm:$0xff] }
 0x368   : > { %v10830_v52 = vpop.f32.mrf.mxu2 }
 0x36a   : > { %v10753_v42 = vpop.permute.xlu1 %7215  ;;  %v7206_v60 = vpop.permute.xlu0 %7205 }
 0x36b   : > { %v7208_v17 = vunpack.i.h.bf16 %v7206_v60  ;;  %v7207_v24 = vunpack.i.l.bf16 %v7206_v60  ;;  %v7251_v31 = vpop.permute.xlu2 %7250  ;;  %v7033_v60 = vunpack.i.h.bf16 %v10400_v7 }
 0x36c   : > { %v7253_v8 = vunpack.i.h.bf16 %v7251_v31  ;;  %v7252_v9 = vunpack.i.l.bf16 %v7251_v31 }
 0x36d   : > { %v3049_v12 = vsel %vm1439_vm6, %v3017_v30, %v7207_v24  ;;  %v3050_v23 = vsel %vm1439_vm6, %v3018_v4, %v7208_v17  ;;  %v7032_v30 = vunpack.i.l.bf16 %v10400_v7  ;;  %v2912_v4 = vsel %vm1307_vm3, %v10258_v43, %v7173_v6  ;;  %v12997_v24 = vld [vmem:[#allocation26_spill] sm:$0xff] }
 0x36e   : > { %v10770_v58 = vsel %vm1373_vm5, %v3009_v47, %v7252_v9  ;;  %v10773_v55 = vsel %vm1373_vm5, %v3010_v50, %v7253_v8  ;;  %v3083_v54 = vpack.c.bf16 %v3050_v23, %v3049_v12  ;;  %v2987_v31 = vsel %vm1307_vm3, %v12997_v24, %v6967_v1 }
 0x36f   : > { %v2988_v8 = vsel %vm1307_vm3, %v12998_v16, %v6968_v37  ;;  %v7188_v9 = vunpack.i.h.bf16 %v10723_v0  ;;  %v7178_v43 = vunpack.i.h.bf16 %v10655_v14  ;;  %v7177_v47 = vunpack.i.l.bf16 %v10655_v14 }
 0x370   : > { %3425 = vmatmul.bf16.gmra.mxu3 %v3083_v54  ;;  %v3019_v12 = vsel %vm1373_vm5, %v2987_v31, %v7032_v30  ;;  %v3020_v23 = vsel %vm1373_vm5, %v2988_v8, %v7033_v60  ;;  %v7038_v37 = vunpack.i.h.bf16 %v13000_v27  ;;  %v7037_v1 = vunpack.i.l.bf16 %v13000_v27  ;;  %v13005_v27 = vld [vmem:[#allocation39_spill] sm:$0xff] }
 0x371   : > { %v2943_v63 = vsel %vm1373_vm5, %v2911_v36, %v7177_v47  ;;  %v2944_v0 = vsel %vm1373_vm5, %v2912_v4, %v7178_v43  ;;  %v7198_v60 = vunpack.i.h.bf16 %v10705_v51  ;;  %v7197_v30 = vunpack.i.l.bf16 %v10705_v51  ;;  %v13001_v4 = vld [vmem:[#allocation24_spill] sm:$0xff]  ;;  %v13002_v36 = vld [vmem:[#allocation42_spill] sm:$0xff] }
 0x372   : > { %v7221_v5 = vpop.permute.xlu1 %7220  ;;  %v10783_v44 = vpop.permute.xlu0 %7225  ;;  %v2975_v22 = vsel %vm1439_vm6, %v2943_v63, %v7187_v29  ;;  %v2976_v62 = vsel %vm1439_vm6, %v2944_v0, %v7188_v9  ;;  %v7203_v24 = vunpack.i.h.bf16 %v10733_v2  ;;  %v7202_v31 = vunpack.i.l.bf16 %v10733_v2  ;;  %v13003_v47 = vld [vmem:[#allocation6_spill] sm:$0xff] }
 0x373   : > { %v7223_v32 = vunpack.i.h.bf16 %v7221_v5  ;;  %v7222_v11 = vunpack.i.l.bf16 %v7221_v5  ;;  %v10785_v49 = vpop.permute.xlu2 %7260  ;;  %v7218_v51 = vunpack.i.h.bf16 %v10753_v42 }
 0x374   : > { %3386 = vmatmul.bf16.gmra.mxu2 %v3112_v28  ;;  %v3115_v28 = vpack.c.bf16 %v2976_v62, %v2975_v22 }
 0x375   : > { %v10792_v56 = vsel %vm1373_vm5, %v3007_v33, %v7222_v11  ;;  %v10795_v15 = vsel %vm1373_vm5, %v3008_v34, %v7223_v32  ;;  %v12999_v11 = vld [vmem:[#allocation35_spill] sm:$0xff] }
 0x376   : > { %v6978_v34 = vunpack.i.h.bf16 %v12999_v11  ;;  %v6977_v33 = vunpack.i.l.bf16 %v12999_v11 }
 0x378   : > { %v2989_v18 = vsel %vm1307_vm3, %v13001_v4, %v6977_v33  ;;  %v13007_v4 = vld [vmem:[#allocation9_spill] sm:$0xff] }
 0x379   : > { %v3021_v9 = vsel %vm1373_vm5, %v2989_v18, %v7037_v1  ;;  %v6982_v1 = vunpack.i.l.bf16 %v13005_v27 }
 0x37a   : > { %v10812_v17 = vpop.permute.xlu1 %7235  ;;  %v7231_v3 = vpop.permute.xlu0 %7230 }
 0x37b   : > { %v7233_v7 = vunpack.i.h.bf16 %v7231_v3  ;;  %v7232_v57 = vunpack.i.l.bf16 %v7231_v3  ;;  %v7266_v50 = vpop.permute.xlu2 %7265  ;;  %v2990_v3 = vsel %vm1307_vm3, %v13002_v36, %v6978_v34 }
 0x37c   : > { %v7268_v6 = vunpack.i.h.bf16 %v7266_v50  ;;  %v7267_v39 = vunpack.i.l.bf16 %v7266_v50  ;;  %v3022_v29 = vsel %vm1373_vm5, %v2990_v3, %v7038_v37  ;;  %v6983_v37 = vunpack.i.h.bf16 %v13005_v27 }
 0x37d   : > { %v3051_v54 = vsel %vm1439_vm6, %v3019_v12, %v7232_v57  ;;  %v3052_v35 = vsel %vm1439_vm6, %v3020_v23, %v7233_v7  ;;  %v10854_v7 = vpop.f32.mrf.mxu2  ;;  %v7217_v57 = vunpack.i.l.bf16 %v10753_v42  ;;  %v2914_v12 = vsel %vm1307_vm3, %v13003_v47, %v7198_v60  ;;  %v13004_v23 = vld [vmem:[#allocation37_spill] sm:$0xff] }
 0x37e   : > { %v3086_v59 = vpack.c.bf16 %v3052_v35, %v3051_v54  ;;  %v3053_v43 = vsel %vm1439_vm6, %v3021_v9, %v7267_v39  ;;  %v3054_v2 = vsel %vm1439_vm6, %v3022_v29, %v7268_v6  ;;  %v2913_v54 = vsel %vm1307_vm3, %v13004_v23, %v7197_v30  ;;  %v13006_v30 = vld [vmem:[#allocation11_spill] sm:$0xff] }
 0x37f   : > { %v2945_v35 = vsel %vm1373_vm5, %v2913_v54, %v7202_v31  ;;  %v3089_v63 = vpack.c.bf16 %v3054_v2, %v3053_v43  ;;  %v13008_v31 = vld [vmem:[#allocation17_spill] sm:$0xff]  ;;  %v7228_v2 = vunpack.i.h.bf16 %v10783_v44  ;;  %v7227_v47 = vunpack.i.l.bf16 %v10783_v44 }
 0x380   : > { %3430 = vmatmul.bf16.gmra.mxu3 %v3086_v59  ;;  %v2946_v59 = vsel %vm1373_vm5, %v2914_v12, %v7203_v24  ;;  %v2977_v0 = vsel %vm1439_vm6, %v2945_v35, %v7217_v57  ;;  %v6285_v24 = vld [vmem:[%s12654_s5 + $0x30] sm:$0xff]  ;;  %v7058_v9 = vunpack.i.h.bf16 %v13008_v31  ;;  %v7057_v29 = vunpack.i.l.bf16 %v13008_v31 }
 0x381   : > { %v2978_v42 = vsel %vm1439_vm6, %v2946_v59, %v7218_v51  ;;  %5019 = vmatpush.bf16.msrb.mxu0 %v6285_v24  ;;  %v7237_v44 = vunpack.i.l.bf16 %v10812_v17  ;;  %v7248_v24 = vunpack.i.h.bf16 %v10735_v40 }
 0x382   : > { %v10832_v14 = vpop.permute.xlu1 %7255  ;;  %v7271_v5 = vpop.permute.xlu0 %7270  ;;  %v3118_v33 = vpack.c.bf16 %v2978_v42, %v2977_v0  ;;  %v13009_v0 = vld [vmem:[#allocation32_spill] sm:$0xff] }
 0x383   : > { %v10834_v32 = vpop.permute.xlu2 %7285  ;;  %v7273_v22 = vunpack.i.h.bf16 %v7271_v5  ;;  %v7272_v62 = vunpack.i.l.bf16 %v7271_v5  ;;  %v2991_v42 = vsel %vm1307_vm3, %v13009_v0, %v6982_v1  ;;  %v13013_v0 = vld [vmem:[#allocation4_spill] sm:$0xff] }
 0x384   : > { %3391 = vmatmul.bf16.gmra.mxu2 %v3115_v28  ;;  %v6293_v28 = vld [vmem:[%s12654_s5 + $0x70] sm:$0xff] }
 0x385   : > { %5108 = vmatpush.bf16.msrb.mxu2 %v6293_v28  ;;  %v3012_v5 = vsel %vm1307_vm3, %v13006_v30, %v7273_v22  ;;  %v3011_v18 = vsel %vm1307_vm3, %v13007_v4, %v7272_v62  ;;  %v10886_v51 = vpop.f32.mrf.mxu2  ;;  %v13011_v28 = vld [vmem:[#allocation65_spill] sm:$0xff] }
 0x38a   : > { %v10848_v16 = vpop.permute.xlu1 %7280  ;;  %v10850_v8 = vpop.permute.xlu0 %7275 }
 0x38b   : > { %v10858_v50 = vpop.permute.xlu2 %7315  ;;  %v7283_v54 = vunpack.i.h.bf16 %v10848_v16  ;;  %v7282_v35 = vunpack.i.l.bf16 %v10848_v16  ;;  %v2916_v16 = vsel %vm1307_vm3, %v13011_v28, %v7228_v2  ;;  %v7278_v27 = vunpack.i.h.bf16 %v10850_v8 }
 0x390   : > { %3435 = vmatmul.bf16.gmra.mxu3 %v3089_v63  ;;  %v7238_v63 = vunpack.i.h.bf16 %v10812_v17  ;;  %v7277_v17 = vunpack.i.l.bf16 %v10850_v8  ;;  %v7247_v8 = vunpack.i.l.bf16 %v10735_v40 }
 0x392   : > { %v7301_v11 = vpop.permute.xlu1 %7300  ;;  %v10873_v34 = vpop.permute.xlu0 %7290 }
 0x393   : > { %v7303_v6 = vunpack.i.h.bf16 %v7301_v11  ;;  %v7302_v39 = vunpack.i.l.bf16 %v7301_v11  ;;  %v7331_v60 = vpop.permute.xlu2 %7330  ;;  %v13012_v11 = vld [vmem:[#allocation58_spill] sm:$0xff] }
 0x394   : > { %v7333_v36 = vunpack.i.h.bf16 %v7331_v60  ;;  %v7332_v3 = vunpack.i.l.bf16 %v7331_v60  ;;  %3396 = vmatmul.bf16.gmra.mxu2 %v3118_v33  ;;  %v2915_v33 = vsel %vm1307_vm3, %v13012_v11, %v7227_v47  ;;  %v7258_v11 = vunpack.i.h.bf16 %v10832_v14 }
 0x395   : > { %v3043_v57 = vsel %vm1373_vm5, %v3011_v18, %v7302_v39  ;;  %v3044_v43 = vsel %vm1373_vm5, %v3012_v5, %v7303_v6  ;;  %v2947_v4 = vsel %vm1373_vm5, %v2915_v33, %v7237_v44  ;;  %v2948_v18 = vsel %vm1373_vm5, %v2916_v16, %v7238_v63 }
 0x396   : > { %v10894_v12 = vsel %vm1439_vm6, %v10712_v48, %v7332_v3  ;;  %v10898_v23 = vsel %vm1439_vm6, %v10715_v45, %v7333_v36  ;;  %v13010_v48 = vld [vmem:[#allocation33_spill] sm:$0xff]  ;;  %v3023_v45 = vsel %vm1373_vm5, %v2991_v42, %v7057_v29  ;;  %v2979_v40 = vsel %vm1439_vm6, %v2947_v4, %v7247_v8 }
 0x397   : > { %v3113_v59 = vpack.c.bf16 %v10898_v23, %v10894_v12  ;;  %v2992_v22 = vsel %vm1307_vm3, %v13010_v48, %v6983_v37  ;;  %v3055_v30 = vsel %vm1439_vm6, %v3023_v45, %v7282_v35  ;;  %v10939_v35 = vpop.f32.mrf.mxu2  ;;  %v2980_v63 = vsel %vm1439_vm6, %v2948_v18, %v7248_v24 }
 0x398   : > { %v3024_v62 = vsel %vm1373_vm5, %v2992_v22, %v7058_v9  ;;  %v3121_v44 = vpack.c.bf16 %v2980_v63, %v2979_v40  ;;  %v7007_v42 = vunpack.i.l.bf16 %v13013_v0  ;;  %v7008_v45 = vunpack.i.h.bf16 %v13013_v0 }
 0x399   : > { %v3056_v5 = vsel %vm1439_vm6, %v3024_v62, %v7283_v54  ;;  %v13014_v62 = vld [vmem:[#allocation22_spill] sm:$0xff]  ;;  %v7257_v33 = vunpack.i.l.bf16 %v10832_v14  ;;  %v7262_v4 = vunpack.i.l.bf16 %v10785_v49  ;;  %v7293_v8 = vunpack.i.h.bf16 %v10873_v34 }
 0x39a   : > { %v7306_v6 = vpop.permute.xlu1 %7305  ;;  %v10918_v39 = vpop.permute.xlu0 %7295  ;;  %v3092_v29 = vpack.c.bf16 %v3056_v5, %v3055_v30  ;;  %v7068_v28 = vunpack.i.h.bf16 %v13014_v62  ;;  %v7067_v16 = vunpack.i.l.bf16 %v13014_v62  ;;  %v13016_v5 = vld [vmem:[#allocation13_spill] sm:$0xff] }
 0x39b   : > { %v7308_v1 = vunpack.i.h.bf16 %v7306_v6  ;;  %v7307_v60 = vunpack.i.l.bf16 %v7306_v6  ;;  %v7346_v37 = vpop.permute.xlu2 %7345  ;;  %v7288_v6 = vunpack.i.h.bf16 %v10834_v32  ;;  %v2994_v14 = vsel %vm1307_vm3, %v13016_v5, %v7008_v45 }
 0x39c   : > { %v7348_v36 = vunpack.i.h.bf16 %v7346_v37  ;;  %v7347_v3 = vunpack.i.l.bf16 %v7346_v37  ;;  %v13015_v37 = vld [vmem:[#allocation44_spill] sm:$0xff]  ;;  %v3026_v24 = vsel %vm1373_vm5, %v2994_v14, %v7068_v28 }
 0x39d   : > { %v3014_v31 = vsel %vm1307_vm3, %v10650_v53, %v7308_v1  ;;  %v3013_v9 = vsel %vm1307_vm3, %v10647_v38, %v7307_v60  ;;  %v7287_v1 = vunpack.i.l.bf16 %v10834_v32  ;;  %v2993_v30 = vsel %vm1307_vm3, %v13015_v37, %v7007_v42 }
 0x39e   : > { %v10931_v2 = vsel %vm1439_vm6, %v3043_v57, %v7347_v3  ;;  %v10934_v47 = vsel %vm1439_vm6, %v3044_v43, %v7348_v36  ;;  %v10937_v54 = vsel %vm1373_vm5, %v3013_v9, %v7277_v17  ;;  %v10946_v38 = vsel %vm1373_vm5, %v3014_v31, %v7278_v27  ;;  %v13018_v3 = vld [vmem:[#allocation61_spill] sm:$0xff] }
 0x39f   : > { %v3122_v53 = vpack.c.bf16 %v10934_v47, %v10931_v2  ;;  %v10974_v18 = vpop.f32.mrf.mxu2  ;;  %v2917_v32 = vsel %vm1307_vm3, %v13018_v3, %v7257_v33  ;;  %v7292_v31 = vunpack.i.l.bf16 %v10873_v34  ;;  %v3058_v63 = vsel %vm1439_vm6, %v3026_v24, %v7288_v6 }
 0x3a0   : > { %3440 = vmatmul.bf16.gmra.mxu3 %v3092_v29 }
 0x3a2   : > { %v10948_v57 = vpop.permute.xlu1 %7310  ;;  %v7321_v43 = vpop.permute.xlu0 %7320 }
 0x3a3   : > { %v7323_v48 = vunpack.i.h.bf16 %v7321_v43  ;;  %v7322_v22 = vunpack.i.l.bf16 %v7321_v43 }
 0x3a4   : > { %3401 = vmatmul.bf16.gmra.mxu2 %v3121_v44 }
 0x3a5   : > { %v10958_v27 = vsel %vm1439_vm6, %v10621_v20, %v7322_v22  ;;  %v10962_v17 = vsel %vm1439_vm6, %v10624_v25, %v7323_v48  ;;  %v3025_v20 = vsel %vm1373_vm5, %v2993_v30, %v7067_v16  ;;  %v13017_v25 = vld [vmem:[#allocation14_spill] sm:$0xff]  ;;  %v7263_v48 = vunpack.i.h.bf16 %v10785_v49 }
 0x3a6   : > { %v3107_v60 = vpack.c.bf16 %v10962_v17, %v10958_v27  ;;  %v2918_v36 = vsel %vm1307_vm3, %v13017_v25, %v7258_v11  ;;  %v3057_v40 = vsel %vm1439_vm6, %v3025_v20, %v7287_v1  ;;  %v2949_v22 = vsel %vm1373_vm5, %v2917_v32, %v7262_v4  ;;  %v13019_v20 = vld [vmem:[#allocation51_spill] sm:$0xff] }
 0x3a7   : > { %v3095_v16 = vpack.c.bf16 %v3058_v63, %v3057_v40  ;;  %v2950_v49 = vsel %vm1373_vm5, %v2918_v36, %v7263_v48  ;;  %v7043_v4 = vunpack.i.h.bf16 %v13019_v20  ;;  %v7042_v25 = vunpack.i.l.bf16 %v13019_v20  ;;  %v11015_v36 = vpop.f32.mrf.mxu2  ;;  %v6284_v48 = vld [vmem:[%s12654_s5 + $0x28] sm:$0xff]  ;;  %v3656_v20 = vld [vmem:[#allocation2 + $0x10] sm:$0x3] }
 0x3a8   : > { %v2982_v33 = vsel %vm1439_vm6, %v2950_v49, %v7293_v8  ;;  %v7297_v63 = vunpack.i.l.bf16 %v10918_v39  ;;  %5020 = vmatpush.bf16.msrb.mxu0 %v6284_v48  ;;  %v13023_v49 = vld [vmem:[#allocation3_spill] sm:$0xff] }
 0x3aa   : > { %v7326_v9 = vpop.permute.xlu1 %7325  ;;  %v7336_v29 = vpop.permute.xlu0 %7335 }
 0x3ab   : > { %v7328_v43 = vunpack.i.h.bf16 %v7326_v9  ;;  %v7327_v44 = vunpack.i.l.bf16 %v7326_v9  ;;  %v7338_v0 = vunpack.i.h.bf16 %v7336_v29  ;;  %v7337_v42 = vunpack.i.l.bf16 %v7336_v29 }
 0x3ad   : > { %v10989_v45 = vsel %vm1439_vm6, %v10696_v61, %v7327_v44  ;;  %v10993_v34 = vsel %vm1439_vm6, %v10699_v46, %v7328_v43  ;;  %v10997_v62 = vsel %vm1439_vm6, %v10792_v56, %v7337_v42  ;;  %v11001_v28 = vsel %vm1439_vm6, %v10795_v15, %v7338_v0  ;;  %v6292_v56 = vld [vmem:[%s12654_s5 + $0x68] sm:$0xff]  ;;  %v13022_v44 = vld [vmem:[#allocation31_spill] sm:$0xff] }
 0x3ae   : > { %v3110_v11 = vpack.c.bf16 %v10993_v34, %v10989_v45  ;;  %v3116_v61 = vpack.c.bf16 %v11001_v28, %v10997_v62  ;;  %v2981_v46 = vsel %vm1439_vm6, %v2949_v22, %v7292_v31  ;;  %5109 = vmatpush.bf16.msrb.mxu2 %v6292_v56  ;;  %v13020_v31 = vld [vmem:[#allocation59_spill] sm:$0xff]  ;;  %v7118_v56 = vunpack.i.h.bf16 %v10642_v19 }
 0x3af   : > { %v3124_v1 = vpack.c.bf16 %v2982_v33, %v2981_v46  ;;  %v7093_v9 = vunpack.i.h.bf16 %v13020_v31  ;;  %v7092_v29 = vunpack.i.l.bf16 %v13020_v31  ;;  %v7072_v46 = vunpack.i.l.bf16 %v13023_v49 }
 0x3b0   : > { %3445 = vmatmul.bf16.gmra.mxu3 %v3095_v16  ;;  %v7073_v33 = vunpack.i.h.bf16 %v13023_v49  ;;  %v7097_v49 = vunpack.i.l.bf16 %v10568_v21 }
 0x3b2   : > { %v7341_v15 = vpop.permute.xlu1 %7340  ;;  %v7351_v6 = vpop.permute.xlu0 %7350 }
 0x3b3   : > { %v7343_v37 = vunpack.i.h.bf16 %v7341_v15  ;;  %v7342_v30 = vunpack.i.l.bf16 %v7341_v15  ;;  %v7353_v5 = vunpack.i.h.bf16 %v7351_v6  ;;  %v7352_v14 = vunpack.i.l.bf16 %v7351_v6 }
 0x3b4   : > { %3406 = vmatmul.bf16.gmra.mxu2 %v3124_v1  ;;  %v7117_v15 = vunpack.i.l.bf16 %v10642_v19  ;;  %v7313_v6 = vunpack.i.h.bf16 %v10948_v57  ;;  %v7312_v1 = vunpack.i.l.bf16 %v10948_v57  ;;  %v3839_v19 = vrot.slane %v3656_v20, 2 }
 0x3b5   : > { %v11019_v3 = vsel %vm1439_vm6, %v10770_v58, %v7342_v30  ;;  %v11023_v32 = vsel %vm1439_vm6, %v10773_v55, %v7343_v37  ;;  %v11027_v24 = vsel %vm1439_vm6, %v10937_v54, %v7352_v14  ;;  %v11031_v8 = vsel %vm1439_vm6, %v10946_v38, %v7353_v5  ;;  %v13021_v54 = vld [vmem:[#allocation30_spill] sm:$0xff]  ;;  %v11060_v5 = vld [vmem:[#allocation2] sm:$0xff] }
 0x3b6   : > { %v3119_v58 = vpack.c.bf16 %v11023_v32, %v11019_v3  ;;  %v3125_v40 = vpack.c.bf16 %v11031_v8, %v11027_v24  ;;  %v7298_v55 = vunpack.i.h.bf16 %v10918_v39  ;;  %v2995_v43 = vsel %vm1307_vm3, %v13021_v54, %v7042_v25  ;;  %v13024_v37 = vld [vmem:[#allocation38_spill] sm:$0xff] }
 0x3b7   : > { %v2996_v38 = vsel %vm1307_vm3, %v13022_v44, %v7043_v4  ;;  %v3027_v0 = vsel %vm1373_vm5, %v2995_v43, %v7092_v29  ;;  %v2997_v30 = vsel %vm1307_vm3, %v13024_v37, %v7072_v46  ;;  %v11062_v14 = vld [vmem:[#allocation2 + $0x8] sm:$0xff]  ;;  %v13025_v4 = vld [vmem:[#allocation5_spill] sm:$0xff]  ;;  %v3836_v31 = vrot.slane %v11060_v5, 2 }
 0x3b8   : > { %v3028_v42 = vsel %vm1373_vm5, %v2996_v38, %v7093_v9  ;;  %v3059_v22 = vsel %vm1439_vm6, %v3027_v0, %v7297_v63  ;;  %v2998_v25 = vsel %vm1307_vm3, %v13025_v4, %v7073_v33  ;;  %v3837_v9 = vrot.slane %v11062_v14, 2  ;;  %v11077_v38 = vld [vmem:[%s12653_s4] ss:$0 sm:$0xff] }
 0x3b9   : > { %v3060_v16 = vsel %vm1439_vm6, %v3028_v42, %v7298_v55  ;;  %v3029_v29 = vsel %vm1373_vm5, %v2997_v30, %v7117_v15  ;;  %v3030_v57 = vsel %vm1373_vm5, %v2998_v25, %v7118_v56  ;;  %v6291_v42 = vld [vmem:[%s12654_s5 + $0x60] sm:$0xff]  ;;  %v3333_v48 = vadd.f32 %v11077_v38, %v10761_v10  ;;  %v13026_v56 = vld [vmem:[#allocation34_spill] sm:$0xff]  ;;  %v13027_v30 = vld [vmem:[#allocation28_spill] sm:$0xff] }
 0x3ba   : > { %v3098_v39 = vpack.c.bf16 %v3060_v16, %v3059_v22  ;;  %v3061_v55 = vsel %vm1439_vm6, %v3029_v29, %v7312_v1  ;;  %v3062_v63 = vsel %vm1439_vm6, %v3030_v57, %v7313_v6  ;;  %v3838_v54 = vsel %vm463_vm1, %v3836_v31, %v3837_v9  ;;  %5110 = vmatpush.bf16.msrb.mxu2 %v6291_v42  ;;  %v13028_v4 = vld [vmem:[#allocation29_spill] sm:$0xff] }
 0x3bb   : > { %v3840_v43 = vsel %vm463_vm1, %v3837_v9, %v3839_v19  ;;  %v3101_v0 = vpack.c.bf16 %v3062_v63, %v3061_v55  ;;  %v7123_v46 = vunpack.i.h.bf16 %v10585_v13  ;;  %v7122_v33 = vunpack.i.l.bf16 %v10585_v13  ;;  %v13029_v55 = vld [vmem:[#allocation7_spill] sm:$0xff] }
 0x3bc   : > { %v7359_v44 = vpack.i.bf16 %v3840_v43, %v3838_v54  ;;  %v7318_v6 = vunpack.i.h.bf16 %v10858_v50  ;;  %v7317_v1 = vunpack.i.l.bf16 %v10858_v50  ;;  %v2999_v10 = vsel %vm1307_vm3, %v13027_v30, %v7097_v49  ;;  %v6283_v50 = vld [vmem:[%s12654_s5 + $0x20] sm:$0xff] }
 0x3bd   : > { %v3031_v13 = vsel %vm1373_vm5, %v2999_v10, %v7122_v33  ;;  %5021 = vmatpush.bf16.msrb.mxu0 %v6283_v50  ;;  %v3756_v43 = vrot.slane %v11060_v5, 1  ;;  %v3759_v42 = vrot.slane %v3656_v20, 1  ;;  %v3338_v50 = vadd.f32 %v11077_v38, %v10830_v52 }
 0x3be   : > { %7360 = vrot.lane.b32.xlu2 %v7359_v44, %s8067_s10  ;;  %v3063_v19 = vsel %vm1439_vm6, %v3031_v13, %v7317_v1  ;;  %v3757_v44 = vrot.slane %v11062_v14, 1  ;;  %v3340_v17 = vadd.f32 %v11077_v38, %v10854_v7 }
 0x3c0   : > { %3450 = vmatmul.bf16.gmra.mxu3 %v3098_v39  ;;  %v7098_v39 = vunpack.i.h.bf16 %v10568_v21  ;;  %v3335_v21 = vadd.f32 %v11077_v38, %v10804_v26 }
 0x3c2   : > { %v3000_v25 = vsel %vm1307_vm3, %v13028_v4, %v7098_v39 }
 0x3c3   : > { %v3032_v31 = vsel %vm1373_vm5, %v3000_v25, %v7123_v46 }
 0x3c4   : > { %v3064_v29 = vsel %vm1439_vm6, %v3032_v31, %v7318_v6  ;;  %v11127_v31 = vpop.f32.mrf.mxu2 }
 0x3c5   : > { %v3104_v26 = vpack.c.bf16 %v3064_v29, %v3063_v19  ;;  %v6295_v19 = vld [vmem:[%s12654_s5 + $0x80] sm:$0xff] }
 0x3c6   : > { %5203 = vmatpush.bf16.msrb.mxu3 %v6295_v19 }
 0x3cc   : > { %v11146_v52 = vpop.f32.mrf.mxu2 }
 0x3d0   : > { %3455 = vmatmul.bf16.gmra.mxu3 %v3101_v0  ;;  %v11110_v0 = vpop.f32.mrf.mxu1 }
 0x3d3   : > { %v3421_v22 = vpop.f32.mrf.mxu3 }
 0x3d4   : > { %v3422_v16 = vadd.f32 %v3421_v22, %v3333_v48  ;;  %v3758_v48 = vsel %vm382_vm0, %v3756_v43, %v3757_v44  ;;  %v3760_v22 = vsel %vm382_vm0, %v3757_v44, %v3759_v42  ;;  %v13031_v42 = vld [vmem:[#allocation25_spill] sm:$0xff] }
 0x3d5   : > { %v7354_v39 = vpack.i.bf16 %v3760_v22, %v3758_v48 }
 0x3d6   : > { %v3511_v15 = vadd.f32 %v13026_v56, %v3422_v16 }
 0x3d7   : > { %7355 = vrot.lane.b32.xlu1 %v7354_v39, %s8065_s8  ;;  %v3343_v39 = vadd.f32 %v11077_v38, %v10886_v51 }
 0x3d8   : > { %v3590_v37 = vmax.f32 %v3511_v15, 0.0  ;;  %v11123_v25 = vpop.f32.mrf.mxu1 }
 0x3da   : > { %3622 = vst.msk [vmem:[#allocation2 + $0x19] sm:$0xff] %vm1307_vm3, %v3590_v37 }
 0x3db   : > { %v3423_v9 = vpop.f32.mrf.mxu3 }
 0x3dc   : > { %v3424_v57 = vadd.f32 %v3423_v9, %v3335_v21  ;;  %v6290_v9 = vld [vmem:[%s12654_s5 + $0x58] sm:$0xff] }
 0x3dd   : > { %5111 = vmatpush.bf16.msrb.mxu2 %v6290_v9 }
 0x3de   : > { %v3513_v63 = vadd.f32 %v13029_v55, %v3424_v57  ;;  %v13030_v55 = vld [vmem:[#allocation46_spill] sm:$0xff] }
 0x3e0   : > { %v3591_v54 = vmax.f32 %v3513_v63, 0.0  ;;  %3460 = vmatmul.bf16.gmra.mxu3 %v3104_v26  ;;  %v11143_v26 = vpop.f32.mrf.mxu1 }
 0x3e1   : > { %v3657_v16 = vld [vmem:[#allocation2 + $0x18] sm:$0xff] }
 0x3e2   : > { %3623 = vst.msk [vmem:[#allocation2 + $0x21] sm:$0xff] %vm1307_vm3, %v3591_v54  ;;  %v3841_v33 = vrot.slane %v3657_v16, 2  ;;  %v3761_v56 = vrot.slane %v3657_v16, 1 }
 0x3e8   : > { %v11159_v7 = vpop.f32.mrf.mxu1 }
 0x3e9   : > { %v3658_v49 = vld [vmem:[#allocation2 + $0x20] sm:$0xff]  ;;  %v3659_v46 = vld [vmem:[#allocation2 + $0x28] sm:$0x3] }
 0x3ea   : > { %v3842_v15 = vrot.slane %v3658_v49, 2  ;;  %v3844_v6 = vrot.slane %v3659_v46, 2  ;;  %v3762_v1 = vrot.slane %v3658_v49, 1  ;;  %v3764_v37 = vrot.slane %v3659_v46, 1  ;;  %v11164_v46 = vpop.f32.mrf.mxu2 }
 0x3eb   : > { %v7379_v44 = vpack.i.bf16 %v3658_v49, %v3657_v16  ;;  %v13032_v49 = vld [vmem:[#allocation55_spill] sm:$0xff] }
 0x3ec   : > { %v3843_v30 = vsel %vm463_vm1, %v3841_v33, %v3842_v15  ;;  %v3845_v20 = vsel %vm463_vm1, %v3842_v15, %v3844_v6  ;;  %v11118_v10 = vsel %vm382_vm0, %v3761_v56, %v3762_v1  ;;  %v11121_v4 = vsel %vm382_vm0, %v3762_v1, %v3764_v37 }
 0x3ed   : > { %v7369_v21 = vpack.i.bf16 %v3845_v20, %v3843_v30  ;;  %v7364_v13 = vpack.i.bf16 %v11121_v4, %v11118_v10  ;;  %v3345_v1 = vadd.f32 %v11077_v38, %v10939_v35 }
 0x3ef   : > { %7370 = vrot.lane.b32.xlu0 %v7369_v21, %s8067_s10  ;;  %7365 = vrot.lane.b32.xlu2 %v7364_v13, %s8065_s8 }
 0x3f0   : > { %3465 = vmatmul.bf16.gmra.mxu3 %v3107_v60  ;;  %v6282_v60 = vld [vmem:[%s12654_s5 + $0x18] sm:$0xff]  ;;  %v11172_v13 = vpop.f32.mrf.mxu1 }
 0x3f1   : > { %5022 = vmatpush.bf16.msrb.mxu0 %v6282_v60 }
 0x3f3   : > { %v3426_v29 = vpop.f32.mrf.mxu3 }
 0x3f4   : > { %v3427_v57 = vadd.f32 %v3426_v29, %v3338_v50 }
 0x3f6   : > { %v3516_v63 = vadd.f32 %v13030_v55, %v3427_v57  ;;  %v11185_v55 = vpop.f32.mrf.mxu2 }
 0x3f7   : > { %7375 = vrot.lane.b32.xlu0 %v7369_v21, %s8065_s8 }
 0x3f8   : > { %v3592_v27 = vmax.f32 %v3516_v63, 0.0 }
 0x3fa   : > { %3624 = vst.msk [vmem:[#allocation2 + $0x31] sm:$0xff] %vm1307_vm3, %v3592_v27 }
 0x3fb   : > { %v3428_v54 = vpop.f32.mrf.mxu3 }
 0x3fc   : > { %v3429_v43 = vadd.f32 %v3428_v54, %v3340_v17 }
 0x3fe   : > { %v3518_v48 = vadd.f32 %v13031_v42, %v3429_v43  ;;  %v3348_v43 = vadd.f32 %v11077_v38, %v10974_v18 }
 0x3ff   : > { %7380 = vrot.lane.b32.xlu0 %v7379_v44, %s8069_s12  ;;  %v6289_v44 = vld [vmem:[%s12654_s5 + $0x50] sm:$0xff] }
 0x400   : > { %v3593_v22 = vmax.f32 %v3518_v48, 0.0  ;;  %3470 = vmatmul.bf16.gmra.mxu3 %v3110_v11  ;;  %5112 = vmatpush.bf16.msrb.mxu2 %v6289_v44 }
 0x401   : > { %v3660_v15 = vld [vmem:[#allocation2 + $0x30] sm:$0xff] }
 0x402   : > { %3625 = vst.msk [vmem:[#allocation2 + $0x39] sm:$0xff] %vm1307_vm3, %v3593_v22  ;;  %v3766_v11 = vrot.slane %v3660_v15, 1  ;;  %v3846_v37 = vrot.slane %v3660_v15, 2  ;;  %v11209_v22 = vpop.f32.mrf.mxu1 }
 0x403   : > { %v3431_v33 = vpop.f32.mrf.mxu3 }
 0x404   : > { %v3432_v16 = vadd.f32 %v3431_v33, %v3343_v39  ;;  %v3350_v39 = vadd.f32 %v11077_v38, %v11015_v36 }
 0x406   : > { %v3521_v56 = vadd.f32 %v13032_v49, %v3432_v16 }
 0x408   : > { %v3594_v6 = vmax.f32 %v3521_v56, 0.0 }
 0x409   : > { %v3661_v45 = vld [vmem:[#allocation2 + $0x38] sm:$0xff]  ;;  %v3662_v34 = vld [vmem:[#allocation2 + $0x40] sm:$0x3] }
 0x40a   : > { %3626 = vst.msk [vmem:[#allocation2 + $0x49] sm:$0xff] %vm1307_vm3, %v3594_v6  ;;  %v11170_v51 = vpack.i.bf16 %v3661_v45, %v3660_v15  ;;  %v3767_v30 = vrot.slane %v3661_v45, 1  ;;  %v3769_v20 = vrot.slane %v3662_v34, 1  ;;  %v3847_v21 = vrot.slane %v3661_v45, 2 }
 0x40b   : > { %v3433_v50 = vpop.f32.mrf.mxu3  ;;  %v3849_v9 = vrot.slane %v3662_v34, 2 }
 0x40c   : > { %v3434_v19 = vadd.f32 %v3433_v50, %v3345_v1  ;;  %7385 = vrot.lane.b32.xlu1 %v11170_v51, %s8067_s10  ;;  %v11177_v35 = vsel %vm382_vm0, %v3766_v11, %v3767_v30  ;;  %v11180_v29 = vsel %vm382_vm0, %v3767_v30, %v3769_v20  ;;  %v11183_v57 = vsel %vm463_vm1, %v3846_v37, %v3847_v21 }
 0x40d   : > { %v7389_v63 = vpack.i.bf16 %v11180_v29, %v11177_v35  ;;  %v11190_v27 = vsel %vm463_vm1, %v3847_v21, %v3849_v9 }
 0x40e   : > { %v3523_v17 = vadd.f32 %v10547_v41, %v3434_v19  ;;  %v4776_v60 = vpack.c.bf16 %v11190_v27, %v11183_v57  ;;  %v7394_v41 = vpack.i.bf16 %v11190_v27, %v11183_v57 }
 0x40f   : > { %7390 = vrot.lane.b32.xlu0 %v7389_v63, %s8065_s8  ;;  %7400 = vrot.lane.b32.xlu2 %v7389_v63, %s8069_s12  ;;  %v11242_v63 = vpop.f32.mrf.mxu1 }
 0x410   : > { %v3595_v54 = vmax.f32 %v3523_v17, 0.0  ;;  %3475 = vmatmul.bf16.gmra.mxu3 %v3113_v59  ;;  %v11212_v59 = vpop.f32.mrf.mxu2 }
 0x411   : > { %v3663_v23 = vld [vmem:[#allocation2 + $0x48] sm:$0xff] }
 0x412   : > { %3627 = vst.msk [vmem:[#allocation2 + $0x51] sm:$0xff] %vm1307_vm3, %v3595_v54  ;;  %v3771_v49 = vrot.slane %v3663_v23, 1  ;;  %v3851_v34 = vrot.slane %v3663_v23, 2 }
 0x413   : > { %v3436_v42 = vpop.f32.mrf.mxu3 }
 0x414   : > { %v3437_v48 = vadd.f32 %v3436_v42, %v3348_v43  ;;  %7395 = vrot.lane.b32.xlu1 %v7394_v41, %s8067_s10  ;;  %v3353_v43 = vadd.f32 %v11077_v38, %v11127_v31  ;;  %v3355_v31 = vadd.f32 %v11077_v38, %v11146_v52 }
 0x416   : > { %v3526_v12 = vadd.f32 %v11110_v0, %v3437_v48  ;;  %v6281_v0 = vld [vmem:[%s12654_s5 + $0x10] sm:$0xff] }
 0x417   : > { %5023 = vmatpush.bf16.msrb.mxu0 %v6281_v0 }
 0x418   : > { %v3596_v18 = vmax.f32 %v3526_v12, 0.0  ;;  %v11248_v54 = vpop.f32.mrf.mxu2 }
 0x419   : > { %v3664_v33 = vld [vmem:[#allocation2 + $0x50] sm:$0xff]  ;;  %v3665_v16 = vld [vmem:[#allocation2 + $0x58] sm:$0x3] }
 0x41a   : > { %3628 = vst.msk [vmem:[#allocation2 + $0x61] sm:$0xff] %vm1307_vm3, %v3596_v18  ;;  %v11217_v56 = vpack.i.bf16 %v3664_v33, %v3663_v23  ;;  %v3772_v15 = vrot.slane %v3664_v33, 1  ;;  %v3774_v6 = vrot.slane %v3665_v16, 1  ;;  %v3852_v1 = vrot.slane %v3664_v33, 2 }
 0x41b   : > { %v3438_v45 = vpop.f32.mrf.mxu3  ;;  %v3854_v11 = vrot.slane %v3665_v16, 2 }
 0x41c   : > { %v3439_v37 = vadd.f32 %v3438_v45, %v3350_v39  ;;  %7405 = vrot.lane.b32.xlu1 %v7394_v41, %s8065_s8  ;;  %7410 = vrot.lane.b32.xlu2 %v11217_v56, %s8067_s10  ;;  %v11226_v36 = vsel %vm382_vm0, %v3771_v49, %v3772_v15  ;;  %v11229_v30 = vsel %vm382_vm0, %v3772_v15, %v3774_v6 }
 0x41d   : > { %v7424_v20 = vpack.i.bf16 %v11229_v30, %v11226_v36  ;;  %v11234_v21 = vsel %vm463_vm1, %v3851_v34, %v3852_v1  ;;  %v11237_v50 = vsel %vm463_vm1, %v3852_v1, %v3854_v11 }
 0x41e   : > { %v3528_v9 = vadd.f32 %v11123_v25, %v3439_v37  ;;  %v4779_v19 = vpack.c.bf16 %v11237_v50, %v11234_v21  ;;  %v7419_v25 = vpack.i.bf16 %v11237_v50, %v11234_v21 }
 0x41f   : > { %7425 = vrot.lane.b32.xlu0 %v7424_v20, %s8069_s12 }
 0x420   : > { %v3597_v17 = vmax.f32 %v3528_v9, 0.0  ;;  %3480 = vmatmul.bf16.gmra.mxu3 %v3116_v61  ;;  %v11258_v61 = vpop.f32.mrf.mxu1  ;;  %v11263_v39 = vpop.f32.mrf.mxu2 }
 0x421   : > { %v3666_v28 = vld [vmem:[#allocation2 + $0x60] sm:$0xff] }
 0x422   : > { %3629 = vst.msk [vmem:[#allocation2 + $0x69] sm:$0xff] %vm1307_vm3, %v3597_v17  ;;  %v3856_v15 = vrot.slane %v3666_v28, 2  ;;  %v3776_v52 = vrot.slane %v3666_v28, 1  ;;  %v6288_v17 = vld [vmem:[%s12654_s5 + $0x48] sm:$0xff] }
 0x423   : > { %v3441_v41 = vpop.f32.mrf.mxu3  ;;  %5113 = vmatpush.bf16.msrb.mxu2 %v6288_v17 }
 0x424   : > { %v3442_v44 = vadd.f32 %v3441_v41, %v3353_v43  ;;  %7415 = vrot.lane.b32.xlu1 %v7424_v20, %s8065_s8  ;;  %7420 = vrot.lane.b32.xlu2 %v7419_v25, %s8067_s10  ;;  %v3358_v20 = vadd.f32 %v11077_v38, %v11164_v46  ;;  %v8020_v46 = vld [vmem:[#allocation2 + $0x1a0] sm:$0xff] }
 0x425   : > { %v2275_v41 = vrot.slane %v8020_v46, 2 }
 0x426   : > { %v3531_v42 = vadd.f32 %v11143_v26, %v3442_v44  ;;  %v8021_v44 = vld [vmem:[#allocation2 + $0x198] sm:$0xff] }
 0x428   : > { %v3598_v62 = vmax.f32 %v3531_v42, 0.0  ;;  %v11297_v43 = vpop.f32.mrf.mxu1  ;;  %v11301_v32 = vpop.f32.mrf.mxu2  ;;  %v2274_v42 = vrot.slane %v8021_v44, 2 }
 0x429   : > { %v3667_v48 = vld [vmem:[#allocation2 + $0x68] sm:$0xff]  ;;  %v3668_v12 = vld [vmem:[#allocation2 + $0x70] sm:$0x3] }
 0x42a   : > { %3630 = vst.msk [vmem:[#allocation2 + $0x79] sm:$0xff] %vm1307_vm3, %v3598_v62  ;;  %v7439_v23 = vpack.i.bf16 %v3667_v48, %v3666_v28  ;;  %v3857_v18 = vrot.slane %v3667_v48, 2  ;;  %v3777_v16 = vrot.slane %v3667_v48, 1  ;;  %v3779_v49 = vrot.slane %v3668_v12, 1 }
 0x42b   : > { %v3443_v33 = vpop.f32.mrf.mxu3  ;;  %v3859_v26 = vrot.slane %v3668_v12, 2 }
 0x42c   : > { %v3444_v6 = vadd.f32 %v3443_v33, %v3355_v31  ;;  %7430 = vrot.lane.b32.xlu1 %v11170_v51, %s8069_s12  ;;  %7440 = vrot.lane.b32.xlu0 %v7439_v23, %s8067_s10  ;;  %v11270_v1 = vsel %vm463_vm1, %v3856_v15, %v3857_v18  ;;  %v11279_v11 = vsel %vm382_vm0, %v3776_v52, %v3777_v16 }
 0x42d   : > { %7435 = vrot.lane.b32.xlu2 %v7419_v25, %s8065_s8  ;;  %v11273_v0 = vsel %vm463_vm1, %v3857_v18, %v3859_v26  ;;  %v11282_v51 = vsel %vm382_vm0, %v3777_v16, %v3779_v49  ;;  %v3360_v31 = vadd.f32 %v11077_v38, %v11185_v55  ;;  %v2276_v52 = vsel %vm463_vm1, %v2274_v42, %v2275_v41 }
 0x42e   : > { %v3533_v45 = vadd.f32 %v11159_v7, %v3444_v6  ;;  %v4782_v34 = vpack.c.bf16 %v11273_v0, %v11270_v1  ;;  %v7449_v7 = vpack.i.bf16 %v11282_v51, %v11279_v11  ;;  %v7459_v9 = vpack.i.bf16 %v11273_v0, %v11270_v1 }
 0x430   : > { %v3599_v37 = vmax.f32 %v3533_v45, 0.0  ;;  %3485 = vmatmul.bf16.gmra.mxu3 %v3119_v58  ;;  %v8022_v45 = vld [vmem:[#allocation2 + $0x1a8] sm:$0x3]  ;;  %v11329_v46 = vpop.f32.mrf.mxu2 }
 0x431   : > { %v3669_v62 = vld [vmem:[#allocation2 + $0x78] sm:$0xff]  ;;  %v2277_v55 = vrot.slane %v8022_v45, 2 }
 0x432   : > { %3631 = vst.msk [vmem:[#allocation2 + $0x81] sm:$0xff] %vm1307_vm3, %v3599_v37  ;;  %v3861_v16 = vrot.slane %v3669_v62, 2 }
 0x433   : > { %v3446_v25 = vpop.f32.mrf.mxu3 }
 0x434   : > { %v3447_v3 = vadd.f32 %v3446_v25, %v3358_v20  ;;  %7450 = vrot.lane.b32.xlu1 %v7449_v7, %s8069_s12  ;;  %7460 = vrot.lane.b32.xlu0 %v7459_v9, %s8065_s8  ;;  %v11317_v20 = vpop.f32.mrf.mxu1 }
 0x435   : > { %7445 = vrot.lane.b32.xlu2 %v7449_v7, %s8065_s8  ;;  %v3781_v7 = vrot.slane %v3669_v62, 1 }
 0x436   : > { %v3536_v58 = vadd.f32 %v11172_v13, %v3447_v3  ;;  %v6280_v13 = vld [vmem:[%s12654_s5 + $0x8] sm:$0xff] }
 0x437   : > { %5024 = vmatpush.bf16.msrb.mxu0 %v6280_v13 }
 0x438   : > { %v3600_v28 = vmax.f32 %v3536_v58, 0.0  ;;  %v2278_v58 = vsel %vm463_vm1, %v2275_v41, %v2277_v55 }
 0x439   : > { %v3670_v48 = vld [vmem:[#allocation2 + $0x80] sm:$0xff]  ;;  %v3671_v12 = vld [vmem:[#allocation2 + $0x88] sm:$0x3] }
 0x43a   : > { %3632 = vst.msk [vmem:[#allocation2 + $0x91] sm:$0xff] %vm1307_vm3, %v3600_v28  ;;  %v11308_v18 = vpack.i.bf16 %v3670_v48, %v3669_v62  ;;  %v3782_v33 = vrot.slane %v3670_v48, 1  ;;  %v3862_v49 = vrot.slane %v3670_v48, 2  ;;  %v3784_v26 = vrot.slane %v3671_v12, 1 }
 0x43b   : > { %v3448_v15 = vpop.f32.mrf.mxu3  ;;  %v3864_v6 = vrot.slane %v3671_v12, 2  ;;  %v11356_v12 = vpop.f32.mrf.mxu2 }
 0x43c   : > { %v3449_v37 = vadd.f32 %v3448_v15, %v3360_v31  ;;  %7470 = vrot.lane.b32.xlu1 %v11308_v18, %s8067_s10  ;;  %7465 = vrot.lane.b32.xlu0 %v7439_v23, %s8069_s12  ;;  %v11322_v17 = vsel %vm463_vm1, %v3861_v16, %v3862_v49  ;;  %v11332_v23 = vsel %vm382_vm0, %v3781_v7, %v3782_v33  ;;  %v11352_v47 = vpop.f32.mrf.mxu1 }
 0x43d   : > { %7455 = vrot.lane.b32.xlu2 %v11217_v56, %s8069_s12  ;;  %v11325_v25 = vsel %vm463_vm1, %v3862_v49, %v3864_v6  ;;  %v11335_v44 = vsel %vm382_vm0, %v3782_v33, %v3784_v26  ;;  %v3126_v56 = vpack.c.bf16 %v2278_v58, %v2276_v52 }
 0x43e   : > { %v3538_v3 = vadd.f32 %v11209_v22, %v3449_v37  ;;  %v4785_v42 = vpack.c.bf16 %v11325_v25, %v11322_v17  ;;  %v3363_v22 = vadd.f32 %v11077_v38, %v11212_v59  ;;  %v7479_v41 = vpack.i.bf16 %v11335_v44, %v11332_v23 }
 0x43f   : > { %6128 = vmatmul.msk.bf16.gmra.mxu1 %vm1307_vm3, %v3126_v56  ;;  %v3365_v59 = vadd.f32 %v11077_v38, %v11248_v54 }
 0x440   : > { %v3601_v62 = vmax.f32 %v3538_v3, 0.0  ;;  %3490 = vmatmul.bf16.gmra.mxu3 %v3122_v53 }
 0x441   : > { %v3672_v53 = vld [vmem:[#allocation2 + $0x90] sm:$0xff] }
 0x442   : > { %3633 = vst.msk [vmem:[#allocation2 + $0x99] sm:$0xff] %vm1307_vm3, %v3601_v62  ;;  %v3866_v6 = vrot.slane %v3672_v53, 2 }
 0x443   : > { %v3451_v28 = vpop.f32.mrf.mxu3 }
 0x444   : > { %v3452_v31 = vadd.f32 %v3451_v28, %v3363_v22  ;;  %7475 = vrot.lane.b32.xlu1 %v7459_v9, %s8067_s10  ;;  %7480 = vrot.lane.b32.xlu0 %v7479_v41, %s8065_s8  ;;  %v11361_v9 = vpack.i.bf16 %v11325_v25, %v11322_v17  ;;  %v3368_v28 = vadd.f32 %v11077_v38, %v11263_v39 }
 0x445   : > { %7485 = vrot.lane.b32.xlu2 %v7479_v41, %s8069_s12  ;;  %v11390_v41 = vpop.f32.mrf.mxu1 }
 0x446   : > { %v3541_v2 = vadd.f32 %v11242_v63, %v3452_v31  ;;  %v3786_v63 = vrot.slane %v3672_v53, 1  ;;  %v11398_v31 = vpop.f32.mrf.mxu2 }
 0x448   : > { %v3602_v48 = vmax.f32 %v3541_v2, 0.0 }
 0x449   : > { %v3673_v33 = vld [vmem:[#allocation2 + $0x98] sm:$0xff]  ;;  %v3674_v16 = vld [vmem:[#allocation2 + $0xa0] sm:$0x3] }
 0x44a   : > { %3634 = vst.msk [vmem:[#allocation2 + $0xa9] sm:$0xff] %vm1307_vm3, %v3602_v48  ;;  %v11363_v49 = vpack.i.bf16 %v3673_v33, %v3672_v53  ;;  %v3787_v13 = vrot.slane %v3673_v33, 1  ;;  %v3789_v26 = vrot.slane %v3674_v16, 1  ;;  %v3867_v52 = vrot.slane %v3673_v33, 2 }
 0x44b   : > { %v3453_v15 = vpop.f32.mrf.mxu3  ;;  %v3869_v45 = vrot.slane %v3674_v16, 2  ;;  %v3370_v48 = vadd.f32 %v11077_v38, %v11301_v32  ;;  %v11420_v32 = vpop.permute.xlu2 %7360 }
 0x44c   : > { %v3454_v54 = vadd.f32 %v3453_v15, %v3365_v59  ;;  %7490 = vrot.lane.b32.xlu1 %v11361_v9, %s8065_s8  ;;  %v11368_v55 = vsel %vm382_vm0, %v3786_v63, %v3787_v13  ;;  %v11373_v37 = vsel %vm382_vm0, %v3787_v13, %v3789_v26  ;;  %v11376_v7 = vsel %vm463_vm1, %v3866_v6, %v3867_v52  ;;  %v6279_v26 = vld [vmem:[%s12654_s5] sm:$0xff] }
 0x44d   : > { %7495 = vrot.lane.b32.xlu2 %v11363_v49, %s8067_s10  ;;  %v11379_v3 = vsel %vm463_vm1, %v3867_v52, %v3869_v45  ;;  %v7509_v56 = vpack.i.bf16 %v11373_v37, %v11368_v55  ;;  %v11418_v6 = vpop.f32.mrf.mxu1  ;;  %5025 = vmatpush.bf16.msrb.mxu0 %v6279_v26  ;;  %v7363_v26 = vunpack.i.h.bf16 %v11420_v32 }
 0x44e   : > { %v3543_v58 = vadd.f32 %v11258_v61, %v3454_v54  ;;  %v6287_v61 = vld [vmem:[%s12654_s5 + $0x40] sm:$0xff]  ;;  %v11406_v8 = vpack.i.bf16 %v11379_v3, %v11376_v7 }
 0x44f   : > { %7510 = vrot.lane.b32.xlu0 %v7509_v56, %s8069_s12  ;;  %5114 = vmatpush.bf16.msrb.mxu2 %v6287_v61 }
 0x450   : > { %v3603_v22 = vmax.f32 %v3543_v58, 0.0  ;;  %3495 = vmatmul.bf16.gmra.mxu3 %v3125_v40 }
 0x451   : > { %v3675_v40 = vld [vmem:[#allocation2 + $0xa8] sm:$0xff] }
 0x452   : > { %3635 = vst.msk [vmem:[#allocation2 + $0xb1] sm:$0xff] %vm1307_vm3, %v3603_v22  ;;  %v3791_v16 = vrot.slane %v3675_v40, 1  ;;  %v3871_v63 = vrot.slane %v3675_v40, 2 }
 0x453   : > { %v3456_v2 = vpop.f32.mrf.mxu3 }
 0x454   : > { %v3457_v53 = vadd.f32 %v3456_v2, %v3368_v28  ;;  %7505 = vrot.lane.b32.xlu1 %v7509_v56, %s8065_s8  ;;  %v11433_v28 = vpop.f32.mrf.mxu2 }
 0x455   : > { %7500 = vrot.lane.b32.xlu2 %v11308_v18, %s8069_s12 }
 0x456   : > { %v3546_v24 = vadd.f32 %v11297_v43, %v3457_v53 }
 0x457   : > { %7515 = vrot.lane.b32.xlu0 %v11406_v8, %s8065_s8 }
 0x458   : > { %v3604_v39 = vmax.f32 %v3546_v24, 0.0 }
 0x459   : > { %v3676_v59 = vld [vmem:[#allocation2 + $0xb0] sm:$0xff]  ;;  %v3677_v33 = vld [vmem:[#allocation2 + $0xb8] sm:$0x3] }
 0x45a   : > { %3636 = vst.msk [vmem:[#allocation2 + $0xc1] sm:$0xff] %vm1307_vm3, %v3604_v39  ;;  %v11413_v18 = vpack.i.bf16 %v3676_v59, %v3675_v40  ;;  %v3792_v43 = vrot.slane %v3676_v59, 1  ;;  %v3794_v13 = vrot.slane %v3677_v33, 1  ;;  %v3872_v15 = vrot.slane %v3676_v59, 2 }
 0x45b   : > { %v3458_v52 = vpop.f32.mrf.mxu3  ;;  %v3874_v45 = vrot.slane %v3677_v33, 2  ;;  %v11457_v33 = vpop.f32.mrf.mxu1 }
 0x45c   : > { %v3459_v54 = vadd.f32 %v3458_v52, %v3370_v48  ;;  %7525 = vrot.lane.b32.xlu1 %v11413_v18, %s8067_s10  ;;  %v11425_v58 = vsel %vm382_vm0, %v3791_v16, %v3792_v43  ;;  %v11428_v56 = vsel %vm382_vm0, %v3792_v43, %v3794_v13  ;;  %v11431_v22 = vsel %vm463_vm1, %v3871_v63, %v3872_v15  ;;  %v11459_v16 = vpop.permute.xlu2 %7365  ;;  %v11462_v27 = vpop.f32.mrf.mxu2 }
 0x45d   : > { %v7534_v61 = vpack.i.bf16 %v11428_v56, %v11425_v58  ;;  %v11439_v53 = vsel %vm463_vm1, %v3872_v15, %v3874_v45  ;;  %v3375_v43 = vadd.f32 %v11077_v38, %v11356_v12 }
 0x45e   : > { %v3548_v2 = vadd.f32 %v11317_v20, %v3459_v54  ;;  %v3373_v20 = vadd.f32 %v11077_v38, %v11329_v46 }
 0x45f   : > { %7535 = vrot.lane.b32.xlu2 %v7534_v61, %s8065_s8  ;;  %7520 = vrot.lane.b32.xlu0 %v11361_v9, %s8067_s10  ;;  %v7356_v9 = vpop.permute.xlu1 %7355 }
 0x460   : > { %v3605_v40 = vmax.f32 %v3548_v2, 0.0  ;;  %6201 = vmatmul.msk.bf16.vlgmr.msrb.gmra.mxu3 %vm1307_vm3, %v4776_v60  ;;  %v7358_v63 = vunpack.i.h.bf16 %v7356_v9  ;;  %v7357_v52 = vunpack.i.l.bf16 %v7356_v9 }
 0x461   : > { %v11450_v39 = vpop.permute.xlu0 %7370  ;;  %v3678_v60 = vld [vmem:[#allocation2 + $0xc0] sm:$0xff] }
 0x462   : > { %3637 = vst.msk [vmem:[#allocation2 + $0xc9] sm:$0xff] %vm1307_vm3, %v3605_v40  ;;  %v3876_v45 = vrot.slane %v3678_v60, 2 }
 0x463   : > { %v3461_v48 = vpop.f32.mrf.mxu3 }
 0x464   : > { %v3462_v59 = vadd.f32 %v3461_v48, %v3373_v20  ;;  %7530 = vrot.lane.b32.xlu1 %v11363_v49, %s8069_s12  ;;  %v7362_v48 = vunpack.i.l.bf16 %v11420_v32 }
 0x466   : > { %v3551_v57 = vadd.f32 %v11352_v47, %v3462_v59  ;;  %v3796_v47 = vrot.slane %v3678_v60, 1  ;;  %v4583_v59 = vsel %vm1307_vm3, %v11062_v14, %v7358_v63  ;;  %v4582_v63 = vsel %vm1307_vm3, %v11060_v5, %v7357_v52  ;;  %v11509_v5 = vpop.f32.mrf.mxu2 }
 0x467   : > { %7540 = vrot.lane.b32.xlu2 %v7534_v61, %s8069_s12  ;;  %v4615_v52 = vsel %vm1373_vm5, %v4583_v59, %v7363_v26 }
 0x468   : > { %v3606_v46 = vmax.f32 %v3551_v57, 0.0 }
 0x469   : > { %v11467_v13 = vpop.permute.xlu0 %7375  ;;  %v3679_v49 = vld [vmem:[#allocation2 + $0xc8] sm:$0xff]  ;;  %v3680_v15 = vld [vmem:[#allocation2 + $0xd0] sm:$0x3]  ;;  %v11489_v32 = vpop.permute.xlu2 %7400 }
 0x46a   : > { %3638 = vst.msk [vmem:[#allocation2 + $0xd9] sm:$0xff] %vm1307_vm3, %v3606_v46  ;;  %v11471_v2 = vpack.i.bf16 %v3679_v49, %v3678_v60  ;;  %v3797_v61 = vrot.slane %v3679_v49, 1  ;;  %v3799_v40 = vrot.slane %v3680_v15, 1  ;;  %v3877_v20 = vrot.slane %v3679_v49, 2 }
 0x46b   : > { %v3463_v54 = vpop.f32.mrf.mxu3  ;;  %v3879_v57 = vrot.slane %v3680_v15, 2  ;;  %v7544_v60 = vpack.i.bf16 %v11439_v53, %v11431_v22 }
 0x46c   : > { %v3464_v12 = vadd.f32 %v3463_v54, %v3375_v43  ;;  %7555 = vrot.lane.b32.xlu0 %v11471_v2, %s8067_s10  ;;  %v11479_v9 = vsel %vm382_vm0, %v3796_v47, %v3797_v61  ;;  %v11482_v46 = vsel %vm382_vm0, %v3797_v61, %v3799_v40  ;;  %v11487_v49 = vsel %vm463_vm1, %v3876_v45, %v3877_v20  ;;  %v11499_v47 = vpop.f32.mrf.mxu1  ;;  %v8024_v45 = vld [vmem:[#allocation2 + $0x20] sm:$0xff] }
 0x46d   : > { %v7569_v43 = vpack.i.bf16 %v11482_v46, %v11479_v9  ;;  %v11497_v15 = vsel %vm463_vm1, %v3877_v20, %v3879_v57  ;;  %v3378_v40 = vadd.f32 %v11077_v38, %v11398_v31 }
 0x46e   : > { %v3553_v14 = vadd.f32 %v11390_v41, %v3464_v12  ;;  %v4614_v41 = vsel %vm1373_vm5, %v4582_v63, %v7362_v48 }
 0x46f   : > { %7545 = vrot.lane.b32.xlu2 %v7544_v60, %s8065_s8  ;;  %7570 = vrot.lane.b32.xlu1 %v7569_v43, %s8069_s12 }
 0x470   : > { %v3607_v54 = vmax.f32 %v3553_v14, 0.0  ;;  %6202 = vmatmul.msk.bf16.gmra.mxu3 %vm1307_vm3, %v4779_v19 }
 0x471   : > { %v7381_v61 = vpop.permute.xlu0 %7380  ;;  %v3681_v31 = vld [vmem:[#allocation2 + $0xd8] sm:$0xff] }
 0x472   : > { %3639 = vst.msk [vmem:[#allocation2 + $0xe1] sm:$0xff] %vm1307_vm3, %v3607_v54  ;;  %v7383_v20 = vunpack.i.h.bf16 %v7381_v61  ;;  %v7382_v12 = vunpack.i.l.bf16 %v7381_v61  ;;  %v11531_v61 = vpop.f32.mrf.mxu2 }
 0x473   : > { %v3466_v57 = vpop.f32.mrf.mxu3 }
 0x474   : > { %v4647_v14 = vsel %vm1439_vm6, %v4615_v52, %v7383_v20  ;;  %v4646_v21 = vsel %vm1439_vm6, %v4614_v41, %v7382_v12  ;;  %v3467_v50 = vadd.f32 %v3466_v57, %v3378_v40  ;;  %7560 = vrot.lane.b32.xlu0 %v11413_v18, %s8069_s12  ;;  %v11526_v63 = vpop.f32.mrf.mxu1  ;;  %v3380_v52 = vadd.f32 %v11077_v38, %v11433_v28 }
 0x475   : > { %v4774_v19 = vpack.c.bf16 %v4647_v14, %v4646_v21  ;;  %v3881_v18 = vrot.slane %v3681_v31, 2  ;;  %v7378_v40 = vunpack.i.h.bf16 %v11467_v13  ;;  %v7403_v28 = vunpack.i.h.bf16 %v11489_v32 }
 0x476   : > { %v3556_v26 = vadd.f32 %v11418_v6, %v3467_v50  ;;  %v11521_v48 = vpop.permute.xlu2 %7410 }
 0x477   : > { %5026 = vmatmul.bf16.vlgmr.msrb.gmra.mxu0 %v4774_v19  ;;  %7550 = vrot.lane.b32.xlu2 %v11406_v8, %s8067_s10  ;;  %v7377_v8 = vunpack.i.l.bf16 %v11467_v13 }
 0x478   : > { %v3608_v59 = vmax.f32 %v3556_v26, 0.0  ;;  %7575 = vrot.lane.b32.xlu1 %v7544_v60, %s8067_s10 }
 0x479   : > { %v3682_v54 = vld [vmem:[#allocation2 + $0xe0] sm:$0xff]  ;;  %v3683_v41 = vld [vmem:[#allocation2 + $0xe8] sm:$0x3] }
 0x47a   : > { %3640 = vst.msk [vmem:[#allocation2 + $0xf1] sm:$0xff] %vm1307_vm3, %v3608_v59  ;;  %v3882_v6 = vrot.slane %v3682_v54, 2  ;;  %v3884_v12 = vrot.slane %v3683_v41, 2  ;;  %v3802_v57 = vrot.slane %v3682_v54, 1  ;;  %v3804_v14 = vrot.slane %v3683_v41, 1 }
 0x47b   : > { %v3468_v20 = vpop.f32.mrf.mxu3  ;;  %v11540_v50 = vpack.i.bf16 %v3682_v54, %v3681_v31  ;;  %v11550_v41 = vpack.i.bf16 %v11497_v15, %v11487_v49  ;;  %v7402_v54 = vunpack.i.l.bf16 %v11489_v32 }
 0x47c   : > { %v3469_v60 = vadd.f32 %v3468_v20, %v3380_v52  ;;  %v11536_v21 = vsel %vm463_vm1, %v3881_v18, %v3882_v6  ;;  %7565 = vrot.lane.b32.xlu0 %v7569_v43, %s8065_s8  ;;  %v11543_v19 = vsel %vm463_vm1, %v3882_v6, %v3884_v12  ;;  %v3801_v52 = vrot.slane %v3681_v31, 1  ;;  %v11580_v0 = vpop.f32.mrf.mxu1 }
 0x47d   : > { %v4679_v43 = vsel %vm1307_vm3, %v11121_v4, %v7378_v40  ;;  %v11571_v32 = vsel %vm382_vm0, %v3802_v57, %v3804_v14 }
 0x47e   : > { %v3558_v26 = vadd.f32 %v11457_v33, %v3469_v60  ;;  %v7386_v13 = vpop.permute.xlu1 %7385  ;;  %v11546_v59 = vpop.permute.xlu2 %7420  ;;  %v4678_v33 = vsel %vm1307_vm3, %v11118_v10, %v7377_v8  ;;  %v11568_v4 = vsel %vm382_vm0, %v3801_v52, %v3802_v57  ;;  %v3383_v10 = vadd.f32 %v11077_v38, %v11462_v27 }
 0x47f   : > { %v7388_v6 = vunpack.i.h.bf16 %v7386_v13  ;;  %v7387_v20 = vunpack.i.l.bf16 %v7386_v13  ;;  %7585 = vrot.lane.b32.xlu2 %v11540_v50, %s8067_s10  ;;  %v7599_v60 = vpack.i.bf16 %v11571_v32, %v11568_v4 }
 0x480   : > { %v3609_v12 = vmax.f32 %v3558_v26, 0.0  ;;  %7580 = vrot.lane.b32.xlu1 %v11550_v41, %s8065_s8  ;;  %6203 = vmatmul.msk.bf16.gmra.mxu3 %vm1307_vm3, %v4782_v34  ;;  %v11584_v26 = vpop.f32.mrf.mxu2 }
 0x481   : > { %v4710_v31 = vsel %vm1373_vm5, %v4678_v33, %v7387_v20  ;;  %v4711_v40 = vsel %vm1373_vm5, %v4679_v43, %v7388_v6  ;;  %v3385_v33 = vadd.f32 %v11077_v38, %v11509_v5 }
 0x482   : > { %3641 = vst.msk [vmem:[#allocation2 + $0xf9] sm:$0xff] %vm1307_vm3, %v3609_v12  ;;  %v4742_v8 = vsel %vm1439_vm6, %v4710_v31, %v7402_v54  ;;  %v4743_v1 = vsel %vm1439_vm6, %v4711_v40, %v7403_v28  ;;  %v3684_v28 = vld [vmem:[#allocation2 + $0xf0] sm:$0xff]  ;;  %v11595_v54 = vpop.permute.xlu0 %7390 }
 0x483   : > { %v3471_v34 = vpop.f32.mrf.mxu3  ;;  %v4775_v57 = vpack.c.bf16 %v4743_v1, %v4742_v8  ;;  %v3806_v12 = vrot.slane %v3684_v28, 1 }
 0x484   : > { %v3472_v14 = vadd.f32 %v3471_v34, %v3383_v10  ;;  %7600 = vrot.lane.b32.xlu0 %v7599_v60, %s8069_s12  ;;  %v3886_v10 = vrot.slane %v3684_v28, 2 }
 0x485   : > { %5115 = vmatmul.bf16.vlgmr.msrb.gmra.mxu2 %v4775_v57  ;;  %v11607_v57 = vpop.f32.mrf.mxu1 }
 0x486   : > { %v3561_v27 = vadd.f32 %v11499_v47, %v3472_v14  ;;  %v11588_v13 = vpop.permute.xlu1 %7395  ;;  %v11602_v47 = vpack.i.bf16 %v11543_v19, %v11536_v21 }
 0x487   : > { %v11590_v52 = vpop.permute.xlu2 %7435  ;;  %7590 = vrot.lane.b32.xlu2 %v11471_v2, %s8069_s12 }
 0x488   : > { %v3610_v43 = vmax.f32 %v3561_v27, 0.0  ;;  %7595 = vrot.lane.b32.xlu1 %v7599_v60, %s8065_s8 }
 0x489   : > { %v3685_v6 = vld [vmem:[#allocation2 + $0xf8] sm:$0xff]  ;;  %v3686_v20 = vld [vmem:[#allocation2 + $0x100] sm:$0x3] }
 0x48a   : > { %3642 = vst.msk [vmem:[#allocation2 + $0x109] sm:$0xff] %vm1307_vm3, %v3610_v43  ;;  %v3807_v31 = vrot.slane %v3685_v6, 1  ;;  %v3809_v40 = vrot.slane %v3686_v20, 1  ;;  %v3887_v8 = vrot.slane %v3685_v6, 2  ;;  %v3889_v1 = vrot.slane %v3686_v20, 2 }
 0x48b   : > { %v3473_v2 = vpop.f32.mrf.mxu3  ;;  %v11621_v20 = vpack.i.bf16 %v3685_v6, %v3684_v28  ;;  %v7412_v28 = vunpack.i.l.bf16 %v11521_v48 }
 0x48c   : > { %v3474_v34 = vadd.f32 %v3473_v2, %v3385_v33  ;;  %v11605_v60 = vsel %vm382_vm0, %v3806_v12, %v3807_v31  ;;  %7605 = vrot.lane.b32.xlu0 %v11602_v47, %s8065_s8  ;;  %v11612_v38 = vsel %vm382_vm0, %v3807_v31, %v3809_v40  ;;  %v11615_v5 = vsel %vm463_vm1, %v3886_v10, %v3887_v8  ;;  %v11625_v12 = vpop.f32.mrf.mxu2 }
 0x48d   : > { %v11618_v14 = vsel %vm463_vm1, %v3887_v8, %v3889_v1  ;;  %v7624_v33 = vpack.i.bf16 %v11612_v38, %v11605_v60 }
 0x48e   : > { %v3563_v27 = vadd.f32 %v11526_v63, %v3474_v34  ;;  %v7406_v43 = vpop.permute.xlu1 %7405  ;;  %v7413_v63 = vunpack.i.h.bf16 %v11521_v48  ;;  %v11647_v34 = vld [vmem:[%s12653_s4] ss:$0 sm:$0xff] }
 0x48f   : > { %v7408_v2 = vunpack.i.h.bf16 %v7406_v43  ;;  %v7407_v18 = vunpack.i.l.bf16 %v7406_v43  ;;  %v11627_v31 = vpop.permute.xlu2 %7445  ;;  %7625 = vrot.lane.b32.xlu2 %v7624_v33, %s8065_s8  ;;  %v3388_v48 = vadd.f32 %v11647_v34, %v11531_v61 }
 0x490   : > { %v3611_v10 = vmax.f32 %v3563_v27, 0.0  ;;  %7615 = vrot.lane.b32.xlu1 %v11621_v20, %s8067_s10  ;;  %6204 = vmatmul.msk.bf16.gmra.mxu3 %vm1307_vm3, %v4785_v42 }
 0x491   : > { %v4681_v6 = vsel %vm1307_vm3, %v11180_v29, %v7408_v2  ;;  %v4680_v8 = vsel %vm1307_vm3, %v11177_v35, %v7407_v18  ;;  %v7426_v1 = vpop.permute.xlu0 %7425 }
 0x492   : > { %3643 = vst.msk [vmem:[#allocation2 + $0x111] sm:$0xff] %vm1307_vm3, %v3611_v10  ;;  %v7428_v29 = vunpack.i.h.bf16 %v7426_v1  ;;  %v7427_v27 = vunpack.i.l.bf16 %v7426_v1  ;;  %v4712_v35 = vsel %vm1373_vm5, %v4680_v8, %v7412_v28  ;;  %v4713_v17 = vsel %vm1373_vm5, %v4681_v6, %v7413_v63  ;;  %v11661_v10 = vpop.f32.mrf.mxu1  ;;  %v3687_v28 = vld [vmem:[#allocation2 + $0x108] sm:$0xff] }
 0x493   : > { %v3476_v43 = vpop.f32.mrf.mxu3  ;;  %v7367_v8 = vunpack.i.l.bf16 %v11459_v16 }
 0x494   : > { %v3477_v25 = vadd.f32 %v3476_v43, %v3388_v48  ;;  %v4744_v42 = vsel %vm1439_vm6, %v4712_v35, %v7427_v27  ;;  %v4745_v18 = vsel %vm1439_vm6, %v4713_v17, %v7428_v29  ;;  %7610 = vrot.lane.b32.xlu0 %v11550_v41, %s8067_s10  ;;  %v3390_v41 = vadd.f32 %v11647_v34, %v11584_v26  ;;  %v3394_v6 = vpop.f32.mrf.mxu2 }
 0x495   : > { %v4778_v2 = vpack.c.bf16 %v4745_v18, %v4744_v42  ;;  %v3811_v43 = vrot.slane %v3687_v28, 1  ;;  %v7372_v26 = vunpack.i.l.bf16 %v11450_v39 }
 0x496   : > { %v3566_v61 = vadd.f32 %v11580_v0, %v3477_v25  ;;  %v11659_v40 = vpop.permute.xlu1 %7415  ;;  %v7368_v0 = vunpack.i.h.bf16 %v11459_v16 }
 0x497   : > { %v11663_v1 = vpop.permute.xlu2 %7455  ;;  %5120 = vmatmul.bf16.gmra.mxu2 %v4778_v2  ;;  %7630 = vrot.lane.b32.xlu2 %v7624_v33, %s8069_s12 }
 0x498   : > { %v3612_v63 = vmax.f32 %v3566_v61, 0.0  ;;  %7620 = vrot.lane.b32.xlu1 %v11540_v50, %s8069_s12  ;;  %v7373_v50 = vunpack.i.h.bf16 %v11450_v39 }
 0x499   : > { %v3688_v48 = vld [vmem:[#allocation2 + $0x110] sm:$0xff]  ;;  %v3689_v29 = vld [vmem:[#allocation2 + $0x118] sm:$0x3] }
 0x49a   : > { %3644 = vst.msk [vmem:[#allocation2 + $0x121] sm:$0xff] %vm1307_vm3, %v3612_v63  ;;  %v11673_v27 = vpack.i.bf16 %v3688_v48, %v3687_v28  ;;  %v3812_v35 = vrot.slane %v3688_v48, 1  ;;  %v3814_v17 = vrot.slane %v3689_v29, 1  ;;  %v3892_v25 = vrot.slane %v3688_v48, 2 }
 0x49b   : > { %v3478_v33 = vpop.f32.mrf.mxu3  ;;  %v3894_v42 = vrot.slane %v3689_v29, 2  ;;  %v3891_v63 = vrot.slane %v3687_v28, 2  ;;  %v4585_v48 = vsel %vm1307_vm3, %v8024_v45, %v7368_v0  ;;  %v8025_v29 = vld [vmem:[#allocation2 + $0x18] sm:$0xff] }
 0x49c   : > { %v3479_v18 = vadd.f32 %v3478_v33, %v3390_v41  ;;  %v11678_v2 = vsel %vm382_vm0, %v3811_v43, %v3812_v35  ;;  %v11681_v16 = vsel %vm382_vm0, %v3812_v35, %v3814_v17  ;;  %7645 = vrot.lane.b32.xlu0 %v11673_v27, %s8067_s10  ;;  %v4584_v39 = vsel %vm1307_vm3, %v8025_v29, %v7367_v8  ;;  %v11707_v8 = vpop.f32.mrf.mxu1 }
 0x49d   : > { %13033 = vst [vmem:[#allocation41_spill] sm:$0xff] %v11678_v2  ;;  %v11687_v61 = vpack.i.bf16 %v11681_v16, %v11678_v2  ;;  %v7634_v35 = vpack.i.bf16 %v11618_v14, %v11615_v5  ;;  %v11697_v2 = vsel %vm463_vm1, %v3891_v63, %v3892_v25  ;;  %v11700_v28 = vsel %vm463_vm1, %v3892_v25, %v3894_v42 }
 0x49e   : > { %v3568_v41 = vadd.f32 %v11607_v57, %v3479_v18  ;;  %v7431_v43 = vpop.permute.xlu1 %7430  ;;  %v7441_v33 = vpop.permute.xlu0 %7440  ;;  %v4616_v45 = vsel %vm1373_vm5, %v4584_v39, %v7372_v26  ;;  %v4617_v0 = vsel %vm1373_vm5, %v4585_v48, %v7373_v50  ;;  %v13034_v18 = vpack.c.bf16 %v11379_v3, %v11376_v7 }
 0x49f   : > { %v7433_v17 = vunpack.i.h.bf16 %v7431_v43  ;;  %v7432_v24 = vunpack.i.l.bf16 %v7431_v43  ;;  %v11694_v62 = vpop.permute.xlu2 %7485  ;;  %7635 = vrot.lane.b32.xlu2 %v7634_v35, %s8065_s8  ;;  %v3393_v50 = vadd.f32 %v11647_v34, %v11625_v12  ;;  %v11720_v48 = vpop.f32.mrf.mxu2  ;;  %v7438_v29 = vunpack.i.h.bf16 %v11590_v52 }
 0x4a0   : > { %v3613_v57 = vmax.f32 %v3568_v41, 0.0  ;;  %7660 = vrot.lane.b32.xlu1 %v11687_v61, %s8069_s12  ;;  %6205 = vmatmul.msk.bf16.gmra.mxu3 %vm1307_vm3, %v13034_v18  ;;  %v7437_v7 = vunpack.i.l.bf16 %v11590_v52  ;;  %v7443_v39 = vunpack.i.h.bf16 %v7441_v33  ;;  %v3395_v43 = vadd.f32 %v11647_v34, %v3394_v6 }
 0x4a1   : > { %v4648_v25 = vsel %vm1439_vm6, %v4616_v45, %v7432_v24  ;;  %v4649_v42 = vsel %vm1439_vm6, %v4617_v0, %v7433_v17  ;;  %v7442_v24 = vunpack.i.l.bf16 %v7441_v33  ;;  %v7393_v12 = vunpack.i.h.bf16 %v11595_v54 }
 0x4a2   : > { %3645 = vst.msk [vmem:[#allocation2 + $0x129] sm:$0xff] %vm1307_vm3, %v3613_v57  ;;  %v4777_v26 = vpack.c.bf16 %v4649_v42, %v4648_v25  ;;  %v7392_v17 = vunpack.i.l.bf16 %v11595_v54  ;;  %v7398_v45 = vunpack.i.h.bf16 %v11588_v13  ;;  %v4683_v33 = vsel %vm1307_vm3, %v11229_v30, %v7438_v29  ;;  %v3690_v30 = vld [vmem:[#allocation2 + $0x120] sm:$0xff] }
 0x4a3   : > { %v3481_v3 = vpop.f32.mrf.mxu3  ;;  %v4682_v6 = vsel %vm1307_vm3, %v11226_v36, %v7437_v7  ;;  %v7457_v29 = vunpack.i.l.bf16 %v11663_v1 }
 0x4a4   : > { %v3482_v41 = vadd.f32 %v3481_v3, %v3393_v50  ;;  %5031 = vmatmul.bf16.gmra.mxu0 %v4777_v26  ;;  %7650 = vrot.lane.b32.xlu0 %v11621_v20, %s8069_s12  ;;  %v7397_v20 = vunpack.i.l.bf16 %v11588_v13  ;;  %v4714_v54 = vsel %vm1373_vm5, %v4682_v6, %v7442_v24  ;;  %v4715_v50 = vsel %vm1373_vm5, %v4683_v33, %v7443_v39  ;;  %v8026_v26 = vld [vmem:[#allocation2 + $0x38] sm:$0xff] }
 0x4a5   : > { %v4587_v36 = vsel %vm1307_vm3, %v8026_v26, %v7393_v12  ;;  %v3896_v12 = vrot.slane %v3690_v30, 2 }
 0x4a6   : > { %v3571_v0 = vadd.f32 %v11661_v10, %v3482_v41  ;;  %v7451_v57 = vpop.permute.xlu1 %7450  ;;  %v11731_v52 = vpop.permute.xlu0 %7460  ;;  %v8027_v41 = vld [vmem:[#allocation2 + $0x30] sm:$0xff] }
 0x4a7   : > { %v7453_v18 = vunpack.i.h.bf16 %v7451_v57  ;;  %v7452_v25 = vunpack.i.l.bf16 %v7451_v57  ;;  %v11737_v42 = vpop.permute.xlu2 %7495  ;;  %7640 = vrot.lane.b32.xlu2 %v11602_v47, %s8067_s10  ;;  %v4586_v39 = vsel %vm1307_vm3, %v8027_v41, %v7392_v17  ;;  %v3399_v63 = vpop.f32.mrf.mxu2 }
 0x4a8   : > { %v3614_v10 = vmax.f32 %v3571_v0, 0.0  ;;  %7665 = vrot.lane.b32.xlu1 %v7634_v35, %s8067_s10  ;;  %v7458_v35 = vunpack.i.h.bf16 %v11663_v1  ;;  %v3575_v0 = vpop.f32.mrf.mxu1  ;;  %v3816_v1 = vrot.slane %v3690_v30, 1 }
 0x4a9   : > { %v4746_v7 = vsel %vm1439_vm6, %v4714_v54, %v7452_v25  ;;  %v4747_v13 = vsel %vm1439_vm6, %v4715_v50, %v7453_v18  ;;  %v3691_v3 = vld [vmem:[#allocation2 + $0x128] sm:$0xff]  ;;  %v3692_v24 = vld [vmem:[#allocation2 + $0x130] sm:$0x3]  ;;  %v4618_v25 = vsel %vm1373_vm5, %v4586_v39, %v7397_v20  ;;  %v4619_v18 = vsel %vm1373_vm5, %v4587_v36, %v7398_v45 }
 0x4aa   : > { %3646 = vst.msk [vmem:[#allocation2 + $0x139] sm:$0xff] %vm1307_vm3, %v3614_v10  ;;  %v4781_v47 = vpack.c.bf16 %v4747_v13, %v4746_v7  ;;  %v3817_v33 = vrot.slane %v3691_v3, 1  ;;  %v3897_v6 = vrot.slane %v3691_v3, 2  ;;  %v3899_v26 = vrot.slane %v3692_v24, 2 }
 0x4ab   : > { %v3483_v57 = vpop.f32.mrf.mxu3  ;;  %v3819_v50 = vrot.slane %v3692_v24, 1  ;;  %v4650_v17 = vsel %vm1439_vm6, %v4618_v25, %v7457_v29  ;;  %v11768_v45 = vpack.i.bf16 %v3691_v3, %v3690_v30  ;;  %v7463_v36 = vunpack.i.h.bf16 %v11731_v52 }
 0x4ac   : > { %v3484_v54 = vadd.f32 %v3483_v57, %v3395_v43  ;;  %5125 = vmatmul.bf16.gmra.mxu2 %v4781_v47  ;;  %7655 = vrot.lane.b32.xlu0 %v11687_v61, %s8065_s8  ;;  %v11758_v10 = vsel %vm463_vm1, %v3896_v12, %v3897_v6  ;;  %v11761_v7 = vsel %vm463_vm1, %v3897_v6, %v3899_v26  ;;  %v7462_v29 = vunpack.i.l.bf16 %v11731_v52 }
 0x4ad   : > { %v11766_v43 = vpack.i.bf16 %v11700_v28, %v11697_v2  ;;  %v4806_v61 = vpack.c.bf16 %v11761_v7, %v11758_v10  ;;  %v11775_v24 = vsel %vm382_vm0, %v3816_v1, %v3817_v33  ;;  %v4651_v41 = vsel %vm1439_vm6, %v4619_v18, %v7458_v35 }
 0x4ae   : > { %v3573_v20 = vadd.f32 %v11707_v8, %v3484_v54  ;;  %v7471_v13 = vpop.permute.xlu1 %7470  ;;  %v11778_v57 = vpop.permute.xlu0 %7465  ;;  %v11785_v30 = vsel %vm382_vm0, %v3817_v33, %v3819_v50  ;;  %v13035_v3 = vpack.c.bf16 %v11439_v53, %v11431_v22  ;;  %v3398_v35 = vadd.f32 %v11647_v34, %v11720_v48 }
 0x4af   : > { %v7473_v39 = vunpack.i.h.bf16 %v7471_v13  ;;  %v7472_v47 = vunpack.i.l.bf16 %v7471_v13  ;;  %7675 = vrot.lane.b32.xlu2 %v11768_v45, %s8067_s10  ;;  %v11787_v52 = vpop.permute.xlu2 %7500  ;;  %v4780_v12 = vpack.c.bf16 %v4651_v41, %v4650_v17  ;;  %v4685_v6 = vsel %vm1307_vm3, %v11282_v51, %v7463_v36 }
 0x4b0   : > { %v3615_v8 = vmax.f32 %v3573_v20, 0.0  ;;  %7670 = vrot.lane.b32.xlu1 %v11766_v43, %s8065_s8  ;;  %6206 = vmatmul.msk.bf16.gmra.mxu3 %vm1307_vm3, %v13035_v3  ;;  %v4684_v33 = vsel %vm1307_vm3, %v11279_v11, %v7462_v29  ;;  %v7689_v25 = vpack.i.bf16 %v11785_v30, %v11775_v24  ;;  %v3577_v48 = vpop.f32.mrf.mxu1  ;;  %v7418_v54 = vunpack.i.h.bf16 %v11659_v40  ;;  %v3402_v20 = vpop.f32.mrf.mxu2 }
 0x4b1   : > { %v4716_v22 = vsel %vm1373_vm5, %v4684_v33, %v7472_v47  ;;  %v4717_v53 = vsel %vm1373_vm5, %v4685_v6, %v7473_v39  ;;  %v7417_v50 = vunpack.i.l.bf16 %v11659_v40  ;;  %v7488_v51 = vunpack.i.h.bf16 %v11694_v62  ;;  %v3693_v29 = vld [vmem:[#allocation2 + $0x138] sm:$0xff]  ;;  %v8029_v39 = vld [vmem:[#allocation2 + $0x48] sm:$0xff] }
 0x4b2   : > { %3647 = vst.msk [vmem:[#allocation2 + $0x141] sm:$0xff] %vm1307_vm3, %v3615_v8  ;;  %v7487_v1 = vunpack.i.l.bf16 %v11694_v62  ;;  %v3400_v41 = vadd.f32 %v11647_v34, %v3399_v63  ;;  %v7422_v8 = vunpack.i.l.bf16 %v11546_v59  ;;  %v8028_v62 = vld [vmem:[#allocation2 + $0x50] sm:$0xff]  ;;  %v7468_v3 = vunpack.i.h.bf16 %v11778_v57 }
 0x4b3   : > { %v3486_v26 = vpop.f32.mrf.mxu3  ;;  %v4749_v36 = vsel %vm1439_vm6, %v4717_v53, %v7488_v51  ;;  %v4588_v47 = vsel %vm1307_vm3, %v8029_v39, %v7417_v50  ;;  %v11825_v63 = vpack.i.bf16 %v11761_v7, %v11758_v10  ;;  %v7467_v33 = vunpack.i.l.bf16 %v11778_v57 }
 0x4b4   : > { %v3487_v18 = vadd.f32 %v3486_v26, %v3398_v35  ;;  %5036 = vmatmul.bf16.gmra.mxu0 %v4780_v12  ;;  %7690 = vrot.lane.b32.xlu0 %v7689_v25, %s8069_s12  ;;  %v4748_v13 = vsel %vm1439_vm6, %v4716_v22, %v7487_v1  ;;  %v7423_v1 = vunpack.i.h.bf16 %v11546_v59 }
 0x4b5   : > { %v4784_v26 = vpack.c.bf16 %v4749_v36, %v4748_v13  ;;  %v4620_v13 = vsel %vm1373_vm5, %v4588_v47, %v7422_v8 }
 0x4b6   : > { %v3576_v11 = vadd.f32 %v3575_v0, %v3487_v18  ;;  %v11809_v17 = vpop.permute.xlu1 %7475  ;;  %v4589_v0 = vsel %vm1307_vm3, %v8028_v62, %v7418_v54  ;;  %v3901_v54 = vrot.slane %v3693_v29, 2  ;;  %v4652_v8 = vsel %vm1439_vm6, %v4620_v13, %v7467_v33 }
 0x4b7   : > { %7680 = vrot.lane.b32.xlu2 %v11673_v27, %s8069_s12  ;;  %v11829_v27 = vpop.permute.xlu0 %7480  ;;  %v13036_v33 = vpack.c.bf16 %v11497_v15, %v11487_v49  ;;  %v7447_v49 = vunpack.i.l.bf16 %v11627_v31 }
 0x4b8   : > { %v3616_v40 = vmax.f32 %v3576_v11, 0.0  ;;  %7685 = vrot.lane.b32.xlu1 %v7689_v25, %s8065_s8  ;;  %v3821_v25 = vrot.slane %v3693_v29, 1 }
 0x4b9   : > { %v11821_v35 = vpop.permute.xlu2 %7535  ;;  %v3694_v12 = vld [vmem:[#allocation2 + $0x140] sm:$0xff]  ;;  %v3695_v6 = vld [vmem:[#allocation2 + $0x148] sm:$0x3] }
 0x4ba   : > { %3648 = vst.msk [vmem:[#allocation2 + $0x151] sm:$0xff] %vm1307_vm3, %v3616_v40  ;;  %v3822_v22 = vrot.slane %v3694_v12, 1  ;;  %v3824_v18 = vrot.slane %v3695_v6, 1  ;;  %v3902_v50 = vrot.slane %v3694_v12, 2  ;;  %v3904_v51 = vrot.slane %v3695_v6, 2 }
 0x4bb   : > { %v3488_v53 = vpop.f32.mrf.mxu3  ;;  %v11847_v39 = vpack.i.bf16 %v3694_v12, %v3693_v29  ;;  %v3404_v29 = vpop.f32.mrf.mxu2 }
 0x4bc   : > { %v3489_v11 = vadd.f32 %v3488_v53, %v3400_v41  ;;  %5130 = vmatmul.bf16.gmra.mxu2 %v4784_v26  ;;  %v11833_v62 = vsel %vm382_vm0, %v3821_v25, %v3822_v22  ;;  %7695 = vrot.lane.b32.xlu0 %v11825_v63, %s8065_s8  ;;  %v11838_v57 = vsel %vm382_vm0, %v3822_v22, %v3824_v18  ;;  %v3580_v25 = vpop.f32.mrf.mxu1 }
 0x4bd   : > { %v11842_v36 = vsel %vm463_vm1, %v3901_v54, %v3902_v50  ;;  %v11845_v40 = vsel %vm463_vm1, %v3902_v50, %v3904_v51  ;;  %v7704_v6 = vpack.i.bf16 %v11838_v57, %v11833_v62  ;;  %v4621_v26 = vsel %vm1373_vm5, %v4589_v0, %v7423_v1 }
 0x4be   : > { %v3578_v59 = vadd.f32 %v3577_v48, %v3489_v11  ;;  %v7491_v41 = vpop.permute.xlu1 %7490  ;;  %v4653_v47 = vsel %vm1439_vm6, %v4621_v26, %v7468_v3  ;;  %v4809_v48 = vpack.c.bf16 %v11845_v40, %v11842_v36  ;;  %v3403_v54 = vadd.f32 %v11647_v34, %v3402_v20 }
 0x4bf   : > { %v7493_v22 = vunpack.i.h.bf16 %v7491_v41  ;;  %v7492_v53 = vunpack.i.l.bf16 %v7491_v41  ;;  %7705 = vrot.lane.b32.xlu2 %v7704_v6, %s8065_s8  ;;  %v7498_v50 = vunpack.i.h.bf16 %v11737_v42  ;;  %v7497_v51 = vunpack.i.l.bf16 %v11737_v42 }
 0x4c0   : > { %v3617_v18 = vmax.f32 %v3578_v59, 0.0  ;;  %7700 = vrot.lane.b32.xlu1 %v11847_v39, %s8067_s10  ;;  %6207 = vmatmul.msk.bf16.gmra.mxu3 %vm1307_vm3, %v13036_v33  ;;  %v7448_v11 = vunpack.i.h.bf16 %v11627_v31  ;;  %v7478_v26 = vunpack.i.h.bf16 %v11809_v17  ;;  %v7477_v42 = vunpack.i.l.bf16 %v11809_v17  ;;  %v8031_v33 = vld [vmem:[#allocation2 + $0x60] sm:$0xff] }
 0x4c1   : > { %v4687_v0 = vsel %vm1307_vm3, %v11335_v44, %v7493_v22  ;;  %v4686_v12 = vsel %vm1307_vm3, %v11332_v23, %v7492_v53  ;;  %v11867_v3 = vpop.permute.xlu2 %7540  ;;  %v7511_v1 = vpop.permute.xlu0 %7510  ;;  %v4783_v44 = vpack.c.bf16 %v4653_v47, %v4652_v8  ;;  %v3696_v8 = vld [vmem:[#allocation2 + $0x150] sm:$0xff]  ;;  %v3405_v17 = vadd.f32 %v11647_v34, %v3404_v29 }
 0x4c2   : > { %3649 = vst.msk [vmem:[#allocation2 + $0x159] sm:$0xff] %vm1307_vm3, %v3617_v18  ;;  %v7513_v23 = vunpack.i.h.bf16 %v7511_v1  ;;  %v7512_v13 = vunpack.i.l.bf16 %v7511_v1  ;;  %v4718_v41 = vsel %vm1373_vm5, %v4686_v12, %v7497_v51  ;;  %v4719_v20 = vsel %vm1373_vm5, %v4687_v0, %v7498_v50  ;;  %v8030_v18 = vld [vmem:[#allocation2 + $0x68] sm:$0xff] }
 0x4c3   : > { %v3491_v59 = vpop.f32.mrf.mxu3  ;;  %v4591_v12 = vsel %vm1307_vm3, %v8030_v18, %v7448_v11  ;;  %v4590_v0 = vsel %vm1307_vm3, %v8031_v33, %v7447_v49  ;;  %v3407_v49 = vpop.f32.mrf.mxu2  ;;  %v7503_v29 = vunpack.i.h.bf16 %v11787_v52 }
 0x4c4   : > { %v3492_v15 = vadd.f32 %v3491_v59, %v3403_v54  ;;  %5041 = vmatmul.bf16.gmra.mxu0 %v4783_v44  ;;  %7715 = vrot.lane.b32.xlu0 %v11766_v43, %s8067_s10  ;;  %v4750_v47 = vsel %vm1439_vm6, %v4718_v41, %v7512_v13  ;;  %v4751_v31 = vsel %vm1439_vm6, %v4719_v20, %v7513_v23  ;;  %v3582_v43 = vpop.f32.mrf.mxu1 }
 0x4c5   : > { %v4622_v50 = vsel %vm1373_vm5, %v4590_v0, %v7477_v42  ;;  %v4623_v51 = vsel %vm1373_vm5, %v4591_v12, %v7478_v26  ;;  %v11905_v42 = vpack.i.bf16 %v11845_v40, %v11842_v36 }
 0x4c6   : > { %v3581_v22 = vadd.f32 %v3580_v25, %v3492_v15  ;;  %v11881_v53 = vpop.permute.xlu1 %7505  ;;  %v7502_v25 = vunpack.i.l.bf16 %v11787_v52 }
 0x4c7   : > { %7710 = vrot.lane.b32.xlu2 %v7704_v6, %s8069_s12  ;;  %v3826_v6 = vrot.slane %v3696_v8, 1 }
 0x4c8   : > { %v3618_v54 = vmax.f32 %v3581_v22, 0.0  ;;  %7720 = vrot.lane.b32.xlu1 %v11768_v45, %s8069_s12  ;;  %v4787_v45 = vpack.c.bf16 %v4751_v31, %v4750_v47  ;;  %v4654_v22 = vsel %vm1439_vm6, %v4622_v50, %v7502_v25  ;;  %v4655_v31 = vsel %vm1439_vm6, %v4623_v51, %v7503_v29 }
 0x4c9   : > { %v11894_v1 = vpop.permute.xlu2 %7545  ;;  %v3697_v44 = vld [vmem:[#allocation2 + $0x158] sm:$0xff]  ;;  %v3698_v11 = vld [vmem:[#allocation2 + $0x160] sm:$0x3]  ;;  %v7516_v23 = vpop.permute.xlu0 %7515  ;;  %v3408_v51 = vadd.f32 %v11647_v34, %v3407_v49 }
 0x4ca   : > { %3650 = vst.msk [vmem:[#allocation2 + $0x169] sm:$0xff] %vm1307_vm3, %v3618_v54  ;;  %v11897_v13 = vpack.i.bf16 %v3697_v44, %v3696_v8  ;;  %v3827_v59 = vrot.slane %v3697_v44, 1  ;;  %v3829_v41 = vrot.slane %v3698_v11, 1  ;;  %v7518_v18 = vunpack.i.h.bf16 %v7516_v23 }
 0x4cb   : > { %v3493_v15 = vpop.f32.mrf.mxu3  ;;  %v7517_v47 = vunpack.i.l.bf16 %v7516_v23  ;;  %v3907_v54 = vrot.slane %v3697_v44, 2  ;;  %v3906_v23 = vrot.slane %v3696_v8, 2  ;;  %v4786_v44 = vpack.c.bf16 %v4655_v31, %v4654_v22 }
 0x4cc   : > { %v3494_v20 = vadd.f32 %v3493_v15, %v3405_v17  ;;  %5135 = vmatmul.bf16.gmra.mxu2 %v4787_v45  ;;  %v11901_v26 = vsel %vm382_vm0, %v3826_v6, %v3827_v59  ;;  %7735 = vrot.lane.b32.xlu0 %v11897_v13, %s8067_s10  ;;  %v11911_v52 = vsel %vm382_vm0, %v3827_v59, %v3829_v41  ;;  %v3909_v17 = vrot.slane %v3698_v11, 2  ;;  %v3585_v11 = vpop.f32.mrf.mxu1 }
 0x4cd   : > { %v11916_v0 = vpack.i.bf16 %v11911_v52, %v11901_v26  ;;  %v4689_v59 = vsel %vm1307_vm3, %v11373_v37, %v7518_v18  ;;  %v4688_v29 = vsel %vm1307_vm3, %v11368_v55, %v7517_v47  ;;  %v11935_v8 = vsel %vm463_vm1, %v3906_v23, %v3907_v54  ;;  %v3409_v55 = vpop.f32.mrf.mxu2 }
 0x4ce   : > { %v3583_v12 = vadd.f32 %v3582_v43, %v3494_v20  ;;  %v7526_v33 = vpop.permute.xlu1 %7525  ;;  %v13037_v43 = vpack.c.bf16 %v11543_v19, %v11536_v21  ;;  %v11938_v49 = vsel %vm463_vm1, %v3907_v54, %v3909_v17  ;;  %v7543_v41 = vunpack.i.h.bf16 %v11867_v3 }
 0x4cf   : > { %v7528_v45 = vunpack.i.h.bf16 %v7526_v33  ;;  %v7527_v25 = vunpack.i.l.bf16 %v7526_v33  ;;  %7725 = vrot.lane.b32.xlu2 %v11905_v42, %s8065_s8  ;;  %v7542_v37 = vunpack.i.l.bf16 %v11867_v3  ;;  %v11950_v31 = vpack.i.bf16 %v11938_v49, %v11935_v8 }
 0x4d0   : > { %v3619_v50 = vmax.f32 %v3583_v12, 0.0  ;;  %7750 = vrot.lane.b32.xlu1 %v11916_v0, %s8069_s12  ;;  %6208 = vmatmul.msk.bf16.gmra.mxu3 %vm1307_vm3, %v13037_v43  ;;  %v3410_v54 = vadd.f32 %v11647_v34, %v3409_v55  ;;  %v7483_v17 = vunpack.i.h.bf16 %v11829_v27 }
 0x4d1   : > { %v11927_v6 = vpop.permute.xlu2 %7550  ;;  %v4720_v21 = vsel %vm1373_vm5, %v4688_v29, %v7527_v25  ;;  %v4721_v19 = vsel %vm1373_vm5, %v4689_v59, %v7528_v45  ;;  %v7521_v18 = vpop.permute.xlu0 %7520  ;;  %v3699_v3 = vld [vmem:[#allocation2 + $0x168] sm:$0xff] }
 0x4d2   : > { %3651 = vst.msk [vmem:[#allocation2 + $0x171] sm:$0xff] %vm1307_vm3, %v3619_v50  ;;  %v4752_v12 = vsel %vm1439_vm6, %v4720_v21, %v7542_v37  ;;  %v4753_v33 = vsel %vm1439_vm6, %v4721_v19, %v7543_v41  ;;  %v7523_v50 = vunpack.i.h.bf16 %v7521_v18  ;;  %v7522_v23 = vunpack.i.l.bf16 %v7521_v18 }
 0x4d3   : > { %v3496_v15 = vpop.f32.mrf.mxu3  ;;  %v4790_v43 = vpack.c.bf16 %v4753_v33, %v4752_v12  ;;  %v3831_v34 = vrot.slane %v3699_v3, 1  ;;  %v3911_v29 = vrot.slane %v3699_v3, 2  ;;  %v8033_v33 = vld [vmem:[#allocation2 + $0x78] sm:$0xff] }
 0x4d4   : > { %v3497_v20 = vadd.f32 %v3496_v15, %v3408_v51  ;;  %5046 = vmatmul.bf16.gmra.mxu0 %v4786_v44  ;;  %7740 = vrot.lane.b32.xlu0 %v11847_v39, %s8069_s12  ;;  %v7482_v39 = vunpack.i.l.bf16 %v11829_v27  ;;  %v3587_v41 = vpop.f32.mrf.mxu1 }
 0x4d6   : > { %v3586_v47 = vadd.f32 %v3585_v11, %v3497_v20  ;;  %v7531_v25 = vpop.permute.xlu1 %7530 }
 0x4d7   : > { %7730 = vrot.lane.b32.xlu2 %v11825_v63, %s8067_s10  ;;  %v7533_v21 = vunpack.i.h.bf16 %v7531_v25  ;;  %v7532_v19 = vunpack.i.l.bf16 %v7531_v25  ;;  %v8032_v63 = vld [vmem:[#allocation2 + $0x80] sm:$0xff] }
 0x4d8   : > { %v3620_v45 = vmax.f32 %v3586_v47, 0.0  ;;  %7755 = vrot.lane.b32.xlu1 %v11950_v31, %s8065_s8  ;;  %v4593_v55 = vsel %vm1307_vm3, %v8032_v63, %v7483_v17 }
 0x4d9   : > { %v11961_v51 = vpop.permute.xlu2 %7585  ;;  %v3700_v44 = vld [vmem:[#allocation2 + $0x170] sm:$0xff]  ;;  %v3701_v11 = vld [vmem:[#allocation2 + $0x178] sm:$0x3] }
 0x4da   : > { %3652 = vst.msk [vmem:[#allocation2 + $0x181] sm:$0xff] %vm1307_vm3, %v3620_v45  ;;  %v3832_v59 = vrot.slane %v3700_v44, 1  ;;  %v3834_v27 = vrot.slane %v3701_v11, 1  ;;  %v3912_v37 = vrot.slane %v3700_v44, 2  ;;  %v3914_v20 = vrot.slane %v3701_v11, 2 }
 0x4db   : > { %v3498_v15 = vpop.f32.mrf.mxu3  ;;  %v4592_v45 = vsel %vm1307_vm3, %v8033_v33, %v7482_v39 }
 0x4dc   : > { %v3499_v18 = vadd.f32 %v3498_v15, %v3410_v54  ;;  %5140 = vmatmul.bf16.gmra.mxu2 %v4790_v43  ;;  %v11966_v47 = vsel %vm382_vm0, %v3831_v34, %v3832_v59  ;;  %v11969_v12 = vsel %vm382_vm0, %v3832_v59, %v3834_v27  ;;  %7745 = vrot.lane.b32.xlu0 %v11916_v0, %s8065_s8 }
 0x4dd   : > { %v7764_v25 = vpack.i.bf16 %v11969_v12, %v11966_v47  ;;  %v11977_v11 = vsel %vm463_vm1, %v3911_v29, %v3912_v37  ;;  %v11980_v54 = vsel %vm463_vm1, %v3912_v37, %v3914_v20  ;;  %v4624_v17 = vsel %vm1373_vm5, %v4592_v45, %v7522_v23  ;;  %v8036_v29 = vld [vmem:[#allocation2 + $0xb0] sm:$0xff] }
 0x4de   : > { %v4625_v43 = vsel %vm1373_vm5, %v4593_v55, %v7523_v50  ;;  %v3588_v34 = vadd.f32 %v3587_v41, %v3499_v18  ;;  %v11984_v59 = vpack.i.bf16 %v3700_v44, %v3699_v3  ;;  %v7556_v39 = vpop.permute.xlu0 %7555  ;;  %v4656_v27 = vsel %vm1439_vm6, %v4624_v17, %v7532_v19 }
 0x4df   : > { %v4657_v0 = vsel %vm1439_vm6, %v4625_v43, %v7533_v21  ;;  %v7548_v23 = vunpack.i.h.bf16 %v11894_v1  ;;  %v7547_v50 = vunpack.i.l.bf16 %v11894_v1  ;;  %v13038_v3 = vpack.c.bf16 %v11618_v14, %v11615_v5 }
 0x4e0   : > { %v3621_v15 = vmax.f32 %v3588_v34, 0.0  ;;  %7765 = vrot.lane.b32.xlu1 %v7764_v25, %s8065_s8  ;;  %7760 = vrot.lane.b32.xlu2 %v11984_v59, %s8067_s10  ;;  %v7558_v21 = vunpack.i.h.bf16 %v7556_v39  ;;  %v7557_v19 = vunpack.i.l.bf16 %v7556_v39  ;;  %v4789_v37 = vpack.c.bf16 %v4657_v0, %v4656_v27 }
 0x4e1   : > { %6209 = vmatmul.msk.bf16.gmra.mxu3 %vm1307_vm3, %v13038_v3  ;;  %v11999_v44 = vpop.permute.xlu2 %7590  ;;  %v7571_v41 = vpop.permute.xlu1 %7570  ;;  %v7508_v1 = vunpack.i.h.bf16 %v11881_v53  ;;  %v4691_v5 = vsel %vm1307_vm3, %v11428_v56, %v7548_v23  ;;  %v4690_v14 = vsel %vm1307_vm3, %v11425_v58, %v7547_v50  ;;  %v7507_v45 = vunpack.i.l.bf16 %v11881_v53  ;;  %v3702_v39 = vld [vmem:[#allocation2 + $0x180] sm:$0xff]  ;;  %v8034_v58 = vld [vmem:[#allocation2 + $0x98] sm:$0xff] }
 0x4e2   : > { %3653 = vst.msk [vmem:[#allocation2 + $0x189] sm:$0xff] %vm1307_vm3, %v3621_v15  ;;  %v7573_v20 = vunpack.i.h.bf16 %v7571_v41  ;;  %v7572_v63 = vunpack.i.l.bf16 %v7571_v41  ;;  %v4722_v18 = vsel %vm1373_vm5, %v4690_v14, %v7557_v19  ;;  %v4723_v33 = vsel %vm1373_vm5, %v4691_v5, %v7558_v21  ;;  %v8035_v19 = vld [vmem:[#allocation2 + $0x90] sm:$0xff] }
 0x4e3   : > { %v12002_v55 = vpop.f32.mrf.mxu3  ;;  %v4595_v56 = vsel %vm1307_vm3, %v8034_v58, %v7508_v1  ;;  %v7552_v27 = vunpack.i.l.bf16 %v11927_v6  ;;  %v3919_v3 = vrot.slane %v3702_v39, 1  ;;  %v3956_v5 = vrot.slane %v3702_v39, 2 }
 0x4e4   : > { %5051 = vmatmul.bf16.gmra.mxu0 %v4789_v37  ;;  %7770 = vrot.lane.b32.xlu0 %v7764_v25, %s8069_s12  ;;  %v4754_v43 = vsel %vm1439_vm6, %v4722_v18, %v7572_v63  ;;  %v4755_v34 = vsel %vm1439_vm6, %v4723_v33, %v7573_v20  ;;  %v7553_v25 = vunpack.i.h.bf16 %v11927_v6  ;;  %v12031_v6 = vpack.i.bf16 %v11980_v54, %v11977_v11 }
 0x4e5   : > { %v4793_v50 = vpack.c.bf16 %v4755_v34, %v4754_v43 }
 0x4e6   : > { %v7561_v17 = vpop.permute.xlu0 %7560  ;;  %v4627_v18 = vsel %vm1373_vm5, %v4595_v56, %v7553_v25  ;;  %v13039_v25 = vpack.c.bf16 %v11700_v28, %v11697_v2  ;;  %v7538_v2 = vunpack.i.h.bf16 %v11821_v35 }
 0x4e7   : > { %v7563_v41 = vunpack.i.h.bf16 %v7561_v17  ;;  %v7562_v37 = vunpack.i.l.bf16 %v7561_v17 }
 0x4e8   : > { %7775 = vrot.lane.b32.xlu1 %v11905_v42, %s8067_s10  ;;  %7780 = vrot.lane.b32.xlu2 %v11897_v13, %s8069_s12  ;;  %v4594_v13 = vsel %vm1307_vm3, %v8035_v19, %v7507_v45  ;;  %v3707_v19 = vld [vmem:[#allocation2 + $0x1a8] sm:$0x3] }
 0x4e9   : > { %v3703_v53 = vld [vmem:[#allocation2 + $0x188] sm:$0xff]  ;;  %v3704_v0 = vld [vmem:[#allocation2 + $0x190] sm:$0x3]  ;;  %v12024_v23 = vpop.permute.xlu2 %7625  ;;  %v4626_v33 = vsel %vm1373_vm5, %v4594_v13, %v7552_v27  ;;  %v4659_v56 = vsel %vm1439_vm6, %v4627_v18, %v7563_v41 }
 0x4ea   : > { %v12022_v15 = vpop.permute.xlu1 %7575  ;;  %v3920_v21 = vrot.slane %v3703_v53, 1  ;;  %v3922_v42 = vrot.slane %v3704_v0, 1  ;;  %v3957_v14 = vrot.slane %v3703_v53, 2  ;;  %v12043_v45 = vpack.i.bf16 %v3703_v53, %v3702_v39 }
 0x4eb   : > { %v12027_v20 = vpop.f32.mrf.mxu3  ;;  %v3959_v34 = vrot.slane %v3704_v0, 2 }
 0x4ec   : > { %5145 = vmatmul.bf16.gmra.mxu2 %v4793_v50  ;;  %v12034_v63 = vsel %vm382_vm0, %v3919_v3, %v3920_v21  ;;  %v12037_v1 = vsel %vm382_vm0, %v3920_v21, %v3922_v42  ;;  %7785 = vrot.lane.b32.xlu0 %v12031_v6, %s8065_s8  ;;  %v12048_v43 = vsel %vm463_vm1, %v3956_v5, %v3957_v14  ;;  %v12068_v21 = vld [vmem:[#allocation2 + $0x198] sm:$0xff]  ;;  %v12070_v42 = vld [vmem:[#allocation2 + $0x1a0] sm:$0xff] }
 0x4ed   : > { %v7794_v17 = vpack.i.bf16 %v12037_v1, %v12034_v63  ;;  %v4658_v50 = vsel %vm1439_vm6, %v4626_v33, %v7562_v37  ;;  %v12058_v39 = vsel %vm463_vm1, %v3957_v14, %v3959_v34  ;;  %v3965_v28 = vrot.slane %v12070_v42, 1 }
 0x4ee   : > { %v12050_v58 = vpop.permute.xlu0 %7565  ;;  %v4792_v3 = vpack.c.bf16 %v4659_v56, %v4658_v50  ;;  %v3964_v5 = vrot.slane %v12068_v21, 1  ;;  %v3967_v14 = vrot.slane %v3707_v19, 1  ;;  %v7537_v34 = vunpack.i.l.bf16 %v11821_v35 }
 0x4ef   : > { %v7588_v50 = vunpack.i.h.bf16 %v11961_v51 }
 0x4f0   : > { %7790 = vrot.lane.b32.xlu1 %v12043_v45, %s8067_s10  ;;  %7795 = vrot.lane.b32.xlu2 %v7794_v17, %s8069_s12  ;;  %v7814_v17 = vpack.i.bf16 %v12058_v39, %v12048_v43 }
 0x4f1   : > { %6210 = vmatmul.msk.bf16.gmra.mxu3 %vm1307_vm3, %v13039_v25  ;;  %v12066_v0 = vpop.permute.xlu2 %7630  ;;  %v7809_v25 = vpack.i.bf16 %v12070_v42, %v12068_v21 }
 0x4f2   : > { %v7581_v53 = vpop.permute.xlu1 %7580 }
 0x4f3   : > { %v7583_v13 = vunpack.i.h.bf16 %v7581_v53  ;;  %v7582_v41 = vunpack.i.l.bf16 %v7581_v53  ;;  %v12072_v37 = vpop.f32.mrf.mxu3  ;;  %v7578_v53 = vunpack.i.h.bf16 %v12022_v15 }
 0x4f4   : > { %5056 = vmatmul.bf16.gmra.mxu0 %v4792_v3  ;;  %7800 = vrot.lane.b32.xlu0 %v11950_v31, %s8067_s10  ;;  %v7587_v31 = vunpack.i.l.bf16 %v11961_v51  ;;  %v3966_v51 = vsel %vm382_vm0, %v3964_v5, %v3965_v28 }
 0x4f5   : > { %v4693_v18 = vsel %vm1307_vm3, %v11482_v46, %v7583_v13  ;;  %v4692_v33 = vsel %vm1307_vm3, %v11479_v9, %v7582_v41  ;;  %v7577_v46 = vunpack.i.l.bf16 %v12022_v15  ;;  %v3968_v13 = vsel %vm382_vm0, %v3965_v28, %v3967_v14 }
 0x4f6   : > { %v7601_v56 = vpop.permute.xlu0 %7600  ;;  %v4724_v9 = vsel %vm1373_vm5, %v4692_v33, %v7587_v31  ;;  %v4725_v35 = vsel %vm1373_vm5, %v4693_v18, %v7588_v50  ;;  %v7819_v28 = vpack.i.bf16 %v3968_v13, %v3966_v51  ;;  %v7593_v14 = vunpack.i.h.bf16 %v11999_v44 }
 0x4f7   : > { %v7603_v3 = vunpack.i.h.bf16 %v7601_v56  ;;  %v7602_v19 = vunpack.i.l.bf16 %v7601_v56  ;;  %v7592_v31 = vunpack.i.l.bf16 %v11999_v44  ;;  %v7633_v13 = vunpack.i.h.bf16 %v12066_v0 }
 0x4f8   : > { %7805 = vrot.lane.b32.xlu1 %v11984_v59, %s8069_s12  ;;  %7815 = vrot.lane.b32.xlu2 %v7814_v17, %s8065_s8  ;;  %v4597_v59 = vsel %vm1307_vm3, %v8036_v29, %v7538_v2  ;;  %v8037_v17 = vld [vmem:[#allocation2 + $0xa8] sm:$0xff] }
 0x4f9   : > { %v12101_v27 = vpop.permute.xlu2 %7635  ;;  %v4756_v15 = vsel %vm1439_vm6, %v4724_v9, %v7602_v19  ;;  %v4757_v56 = vsel %vm1439_vm6, %v4725_v35, %v7603_v3  ;;  %v4596_v33 = vsel %vm1307_vm3, %v8037_v17, %v7537_v34  ;;  %v4629_v5 = vsel %vm1373_vm5, %v4597_v59, %v7578_v53  ;;  %v5027_v34 = vpop.f32.mrf.mxu0  ;;  %v12128_v9 = vld [vmem:[%s12655_s6] ss:$0 sm:$0xff] }
 0x4fa   : > { %v12099_v41 = vpop.permute.xlu1 %7595  ;;  %v4628_v18 = vsel %vm1373_vm5, %v4596_v33, %v7577_v46  ;;  %v4796_v50 = vpack.c.bf16 %v4757_v56, %v4756_v15  ;;  %v4661_v2 = vsel %vm1439_vm6, %v4629_v5, %v7593_v14  ;;  %v7632_v15 = vunpack.i.l.bf16 %v12066_v0 }
 0x4fb   : > { %v12111_v22 = vpop.f32.mrf.mxu3  ;;  %v4660_v29 = vsel %vm1439_vm6, %v4628_v18, %v7592_v31  ;;  %v5028_v56 = vadd.f32 %v12128_v9, %v5027_v34 }
 0x4fc   : > { %7810 = vrot.lane.b32.xlu0 %v7809_v25, %s8067_s10  ;;  %5150 = vmatmul.bf16.gmra.mxu2 %v4796_v50  ;;  %v4795_v19 = vpack.c.bf16 %v4661_v2, %v4660_v29 }
 0x4fe   : > { %v7606_v3 = vpop.permute.xlu0 %7605 }
 0x4ff   : > { %v7608_v53 = vunpack.i.h.bf16 %v7606_v3  ;;  %v7607_v46 = vunpack.i.l.bf16 %v7606_v3 }
 0x500   : > { %7820 = vrot.lane.b32.xlu1 %v7819_v28, %s8069_s12  ;;  %7825 = vrot.lane.b32.xlu2 %v12031_v6, %s8067_s10  ;;  %s6251_s10 = sshll.u32 %s13051_s25, 8 }
 0x501   : > { %6211 = vmatmul.msk.bf16.gmra.mxu3 %vm1307_vm3, %v4806_v61  ;;  %v12123_v25 = vpop.permute.xlu2 %7640  ;;  %v4695_v6 = vsel %vm1307_vm3, %v11571_v32, %v7608_v53  ;;  %v4694_v10 = vsel %vm1307_vm3, %v11568_v4, %v7607_v46  ;;  %v7568_v32 = vunpack.i.h.bf16 %v12050_v58  ;;  %v7567_v4 = vunpack.i.l.bf16 %v12050_v58  ;;  %v5029_v2 = vpop.f32.mrf.mxu0  ;;  %v8038_v53 = vld [vmem:[#allocation2 + $0xc8] sm:$0xff]  ;;  %v8039_v58 = vld [vmem:[#allocation2 + $0xc0] sm:$0xff]  ;;  %s12224_s23 = scalar_lea.vmem %s12656_s7, %s6251_s10 }
 0x502   : > { %v7616_v44 = vpop.permute.xlu1 %7615 }
 0x503   : > { %v7618_v35 = vunpack.i.h.bf16 %v7616_v44  ;;  %v7617_v51 = vunpack.i.l.bf16 %v7616_v44  ;;  %v12141_v59 = vpop.f32.mrf.mxu3  ;;  %v4599_v46 = vsel %vm1307_vm3, %v8038_v53, %v7568_v32  ;;  %v4598_v44 = vsel %vm1307_vm3, %v8039_v58, %v7567_v4 }
 0x504   : > { %5061 = vmatmul.bf16.gmra.mxu0 %v4795_v19  ;;  %7830 = vrot.lane.b32.xlu0 %v12043_v45, %s8069_s12  ;;  %v7637_v4 = vunpack.i.l.bf16 %v12101_v27 }
 0x505   : > { %v4726_v7 = vsel %vm1373_vm5, %v4694_v10, %v7617_v51  ;;  %v4727_v61 = vsel %vm1373_vm5, %v4695_v6, %v7618_v35  ;;  %v5030_v6 = vadd.f32 %v12128_v9, %v5029_v2  ;;  %v7597_v2 = vunpack.i.l.bf16 %v12099_v41 }
 0x506   : > { %v7611_v17 = vpop.permute.xlu0 %7610  ;;  %v4758_v45 = vsel %vm1439_vm6, %v4726_v7, %v7632_v15  ;;  %v4759_v5 = vsel %vm1439_vm6, %v4727_v61, %v7633_v13 }
 0x507   : > { %v7613_v50 = vunpack.i.h.bf16 %v7611_v17  ;;  %v7612_v28 = vunpack.i.l.bf16 %v7611_v17  ;;  %v4799_v34 = vpack.c.bf16 %v4759_v5, %v4758_v45 }
 0x508   : > { %v5116_v33 = vpop.f32.mrf.mxu2 }
 0x509   : > { %v5117_v18 = vadd.f32 %v5116_v33, %v5028_v56  ;;  %v12147_v31 = vpop.permute.xlu2 %7675  ;;  %v4630_v35 = vsel %vm1373_vm5, %v4598_v44, %v7612_v28  ;;  %v4631_v51 = vsel %vm1373_vm5, %v4599_v46, %v7613_v50  ;;  %v7638_v33 = vunpack.i.h.bf16 %v12101_v27 }
 0x50a   : > { %v7621_v14 = vpop.permute.xlu1 %7620 }
 0x50b   : > { %v5206_v0 = vadd.f32 %v12002_v55, %v5117_v18  ;;  %v7623_v3 = vunpack.i.h.bf16 %v7621_v14  ;;  %v7622_v29 = vunpack.i.l.bf16 %v7621_v14  ;;  %v12157_v13 = vpop.f32.mrf.mxu3  ;;  %v4697_v40 = vsel %vm1307_vm3, %v11612_v38, %v7638_v33 }
 0x50c   : > { %5155 = vmatmul.bf16.gmra.mxu2 %v4799_v34  ;;  %v7643_v38 = vunpack.i.h.bf16 %v12123_v25  ;;  %v7628_v33 = vunpack.i.h.bf16 %v12024_v23 }
 0x50d   : > { %v6217_v19 = vmul.f32 -1.442695, %v5206_v0  ;;  %v4662_v10 = vsel %vm1439_vm6, %v4630_v35, %v7622_v29  ;;  %v4663_v7 = vsel %vm1439_vm6, %v4631_v51, %v7623_v3  ;;  %v7598_v29 = vunpack.i.h.bf16 %v12099_v41 }
 0x50e   : > { %v7646_v55 = vpop.permute.xlu0 %7645  ;;  %v4798_v32 = vpack.c.bf16 %v4663_v7, %v4662_v10  ;;  %v8041_v10 = vld [vmem:[#allocation2 + $0xd8] sm:$0xff] }
 0x50f   : > { %7837 = vpow2.f32 %v6217_v19  ;;  %v7648_v45 = vunpack.i.h.bf16 %v7646_v55  ;;  %v7647_v5 = vunpack.i.l.bf16 %v7646_v55  ;;  %v8040_v55 = vld [vmem:[#allocation2 + $0xe0] sm:$0xff]  ;;  %v4600_v7 = vsel %vm1307_vm3, %v8041_v10, %v7597_v2  ;;  %v8042_v2 = vld [vmem:[#allocation2 + $0xf8] sm:$0xff] }
 0x510   : > { %v5118_v61 = vpop.f32.mrf.mxu2  ;;  %v4601_v41 = vsel %vm1307_vm3, %v8040_v55, %v7598_v29 }
 0x511   : > { %v5119_v15 = vadd.f32 %v5118_v61, %v5030_v6  ;;  %6212 = vmatmul.msk.bf16.gmra.mxu3 %vm1307_vm3, %v4809_v48  ;;  %v12163_v17 = vpop.permute.xlu2 %7680  ;;  %v4696_v48 = vsel %vm1307_vm3, %v11605_v60, %v7637_v4  ;;  %v4729_v27 = vsel %vm1373_vm5, %v4697_v40, %v7648_v45  ;;  %v7642_v60 = vunpack.i.l.bf16 %v12123_v25 }
 0x512   : > { %v7661_v56 = vpop.permute.xlu1 %7660  ;;  %v4633_v25 = vsel %vm1373_vm5, %v4601_v41, %v7643_v38  ;;  %v7627_v40 = vunpack.i.l.bf16 %v12024_v23  ;;  %v13043_v41 = vld [vmem:[#allocation41_spill] sm:$0xff] }
 0x513   : > { %v5208_v18 = vadd.f32 %v12027_v20, %v5119_v15  ;;  %v7663_v14 = vunpack.i.h.bf16 %v7661_v56  ;;  %v7662_v0 = vunpack.i.l.bf16 %v7661_v56  ;;  %v4728_v20 = vsel %vm1373_vm5, %v4696_v48, %v7647_v5  ;;  %v12187_v35 = vpop.f32.mrf.mxu3 }
 0x514   : > { %5066 = vmatmul.bf16.gmra.mxu0 %v4798_v32  ;;  %v4632_v56 = vsel %vm1373_vm5, %v4600_v7, %v7642_v60 }
 0x515   : > { %v7838_v50 = vpop.eup %7837  ;;  %v6218_v28 = vmul.f32 -1.442695, %v5208_v18  ;;  %v4760_v34 = vsel %vm1439_vm6, %v4728_v20, %v7662_v0  ;;  %v4761_v53 = vsel %vm1439_vm6, %v4729_v27, %v7663_v14  ;;  %v13040_v14 = vpack.c.bf16 %v11938_v49, %v11935_v8 }
 0x516   : > { %v12168_v36 = vadd.f32 1.0, %v7838_v50  ;;  %v7651_v3 = vpop.permute.xlu0 %7650  ;;  %v4802_v51 = vpack.c.bf16 %v4761_v53, %v4760_v34  ;;  %v4603_v34 = vsel %vm1307_vm3, %v8042_v2, %v7628_v33  ;;  %v7678_v49 = vunpack.i.h.bf16 %v12147_v31 }
 0x517   : > { %7839 = vpow2.f32 %v6218_v28  ;;  %v7653_v44 = vunpack.i.h.bf16 %v7651_v3  ;;  %v7652_v19 = vunpack.i.l.bf16 %v7651_v3 }
 0x518   : > { %7841 = vrcp.f32 %v12168_v36  ;;  %v5422_v28 = vand.u32 2147483647, %v12168_v36  ;;  %v5424_v48 = vand.u32 2147483648, %v12168_v36  ;;  %vm5418_vm12 = vweird.f32 %v12168_v36 }
 0x519   : > { %v12185_v58 = vpop.permute.xlu2 %7705  ;;  %v4664_v45 = vsel %vm1439_vm6, %v4632_v56, %v7652_v19  ;;  %v4665_v5 = vsel %vm1439_vm6, %v4633_v25, %v7653_v44  ;;  %v7677_v19 = vunpack.i.l.bf16 %v12147_v31 }
 0x51a   : > { %v12183_v46 = vpop.permute.xlu1 %7665  ;;  %v5121_v61 = vpop.f32.mrf.mxu2  ;;  %v4801_v29 = vpack.c.bf16 %v4665_v5, %v4664_v45  ;;  %vm12216_vm13 = vcmp.eq.f32.partialorder %v5422_v28, 8.507059e+37 }
 0x51b   : > { %v12226_v55 = vpop.f32.mrf.mxu3  ;;  %v7668_v25 = vunpack.i.h.bf16 %v12183_v46  ;;  %v7667_v56 = vunpack.i.l.bf16 %v12183_v46 }
 0x51c   : > { %5160 = vmatmul.bf16.gmra.mxu2 %v4802_v51 }
 0x51d   : > { %v7840_v6 = vpop.eup %7839 }
 0x51e   : > { %v7842_v15 = vpop.eup %7841  ;;  %v12193_v32 = vadd.f32 1.0, %v7840_v6  ;;  %v12197_v18 = vpop.permute.xlu0 %7655  ;;  %v5425_v6 = vor.u32 1.1754944e-38, %v5424_v48 }
 0x51f   : > { %v5414_v4 = vmul.f32 %v7842_v15, %v12168_v36  ;;  %vm5419_vm10 = vweird.f32 %v7842_v15 }
 0x520   : > { %7843 = vrcp.f32 %v12193_v32  ;;  %vm5420_vm14 = vmor %vm5418_vm12, %vm5419_vm10  ;;  %vm5433_vm0 = vweird.f32 %v12193_v32 }
 0x521   : > { %v5415_v50 = vsub.f32 1.0, %v5414_v4  ;;  %6213 = vmatmul.msk.bf16.gmra.mxu3 %vm1307_vm3, %v13040_v14  ;;  %v5032_v0 = vpop.f32.mrf.mxu0  ;;  %v12209_v20 = vpop.permute.xlu2 %7710 }
 0x522   : > { %v7671_v3 = vpop.permute.xlu1 %7670  ;;  %v5033_v27 = vadd.f32 %v12128_v9, %v5032_v0  ;;  %v5123_v33 = vpop.f32.mrf.mxu2 }
 0x523   : > { %v5416_v53 = vmul.f32 %v7842_v15, %v5415_v50  ;;  %v7673_v8 = vunpack.i.h.bf16 %v7671_v3  ;;  %v7672_v38 = vunpack.i.l.bf16 %v7671_v3 }
 0x524   : > { %v5122_v23 = vadd.f32 %v5121_v61, %v5033_v27  ;;  %5071 = vmatmul.bf16.gmra.mxu0 %v4801_v29  ;;  %v8043_v29 = vld [vmem:[#allocation2 + $0xf0] sm:$0xff] }
 0x525   : > { %v5417_v60 = vadd.f32 %v7842_v15, %v5416_v53  ;;  %v4699_v36 = vsel %vm1307_vm3, %v11681_v16, %v7673_v8  ;;  %v4698_v10 = vsel %vm1307_vm3, %v13043_v41, %v7672_v38  ;;  %v4602_v2 = vsel %vm1307_vm3, %v8043_v29, %v7627_v40 }
 0x526   : > { %v7844_v51 = vpop.eup %7843  ;;  %v5211_v7 = vadd.f32 %v12072_v37, %v5122_v23  ;;  %v7691_v4 = vpop.permute.xlu0 %7690  ;;  %v5439_v37 = vand.u32 2147483648, %v12193_v32  ;;  %v4730_v14 = vsel %vm1373_vm5, %v4698_v10, %v7677_v19  ;;  %v4731_v0 = vsel %vm1373_vm5, %v4699_v36, %v7678_v49 }
 0x527   : > { %v5421_v31 = vsel %vm5420_vm14, %v7842_v15, %v5417_v60  ;;  %v5429_v61 = vmul.f32 %v7844_v51, %v12193_v32  ;;  %v7693_v50 = vunpack.i.h.bf16 %v7691_v4  ;;  %v7692_v16 = vunpack.i.l.bf16 %v7691_v4 }
 0x528   : > { %v5426_v45 = vsel %vm12216_vm13, %v5425_v6, %v5421_v31  ;;  %v6219_v5 = vmul.f32 -1.442695, %v5211_v7  ;;  %vm5434_vm15 = vweird.f32 %v7844_v51  ;;  %v5437_v8 = vand.u32 2147483647, %v12193_v32 }
 0x529   : > { %5894 = vst.msk [vmem:[%s12224_s23] sm:$0xff] %vm5893_vm11, %v5426_v45  ;;  %v5430_v28 = vsub.f32 1.0, %v5429_v61  ;;  %v5034_v15 = vpop.f32.mrf.mxu0  ;;  %v4762_v3 = vsel %vm1439_vm6, %v4730_v14, %v7692_v16  ;;  %v4763_v27 = vsel %vm1439_vm6, %v4731_v0, %v7693_v50  ;;  %v4634_v38 = vsel %vm1373_vm5, %v4602_v2, %v7667_v56  ;;  %v12252_v23 = vpop.permute.xlu2 %7725  ;;  %vm5435_vm2 = vmor %vm5433_vm0, %vm5434_vm15 }
 0x52a   : > { %7845 = vpow2.f32 %v6219_v5  ;;  %v12243_v46 = vpop.permute.xlu1 %7685  ;;  %v5035_v48 = vadd.f32 %v12128_v9, %v5034_v15  ;;  %v4635_v49 = vsel %vm1373_vm5, %v4603_v34, %v7668_v25  ;;  %v4805_v44 = vpack.c.bf16 %v4763_v27, %v4762_v3  ;;  %v12260_v56 = vpop.f32.mrf.mxu3 }
 0x52b   : > { %v5431_v53 = vmul.f32 %v7844_v51, %v5430_v28  ;;  %v7683_v6 = vunpack.i.h.bf16 %v12163_v17  ;;  %v7682_v40 = vunpack.i.l.bf16 %v12163_v17  ;;  %v5440_v36 = vor.u32 1.1754944e-38, %v5439_v37 }
 0x52c   : > { %v5124_v60 = vadd.f32 %v5123_v33, %v5035_v48  ;;  %5165 = vmatmul.bf16.gmra.mxu2 %v4805_v44  ;;  %vm5438_vm4 = vcmp.eq.f32.partialorder %v5437_v8, 8.507059e+37  ;;  %v7712_v0 = vunpack.i.l.bf16 %v12209_v20  ;;  %v7658_v29 = vunpack.i.h.bf16 %v12197_v18 }
 0x52d   : > { %v5432_v19 = vadd.f32 %v7844_v51, %v5431_v53  ;;  %v4666_v31 = vsel %vm1439_vm6, %v4634_v38, %v7682_v40  ;;  %v4667_v61 = vsel %vm1439_vm6, %v4635_v49, %v7683_v6 }
 0x52e   : > { %v5213_v41 = vadd.f32 %v12111_v22, %v5124_v60  ;;  %v7696_v34 = vpop.permute.xlu0 %7695  ;;  %v4804_v16 = vpack.c.bf16 %v4667_v61, %v4666_v31 }
 0x52f   : > { %v5436_v10 = vsel %vm5435_vm2, %v7844_v51, %v5432_v19  ;;  %v5126_v7 = vpop.f32.mrf.mxu2  ;;  %v7698_v4 = vunpack.i.h.bf16 %v7696_v34  ;;  %v7697_v22 = vunpack.i.l.bf16 %v7696_v34  ;;  %v13044_v51 = vpack.c.bf16 %v11980_v54, %v11977_v11 }
 0x530   : > { %v7846_v25 = vpop.eup %7845  ;;  %v5441_v32 = vsel %vm5438_vm4, %v5440_v36, %v5436_v10  ;;  %v6220_v33 = vmul.f32 -1.442695, %v5213_v41  ;;  %v7713_v54 = vunpack.i.h.bf16 %v12209_v20  ;;  %v7657_v20 = vunpack.i.l.bf16 %v12197_v18  ;;  %v8044_v10 = vld [vmem:[#allocation2 + $0x110] sm:$0xff] }
 0x531   : > { %5895 = vst.msk [vmem:[%s12224_s23 + $0x8] sm:$0xff] %vm5893_vm11, %v5441_v32  ;;  %v12264_v17 = vadd.f32 1.0, %v7846_v25  ;;  %6214 = vmatmul.msk.bf16.gmra.mxu3 %vm1307_vm3, %v13044_v51  ;;  %v5037_v45 = vpop.f32.mrf.mxu0  ;;  %v4701_v15 = vsel %vm1307_vm3, %v11785_v30, %v7698_v4  ;;  %v4700_v14 = vsel %vm1307_vm3, %v11775_v24, %v7697_v22  ;;  %v12280_v27 = vpop.permute.xlu2 %7730  ;;  %v4605_v34 = vsel %vm1307_vm3, %v8044_v10, %v7658_v29  ;;  %v8045_v25 = vld [vmem:[#allocation2 + $0x108] sm:$0xff] }
 0x532   : > { %7847 = vpow2.f32 %v6220_v33  ;;  %v7701_v5 = vpop.permute.xlu1 %7700  ;;  %v5038_v50 = vadd.f32 %v12128_v9, %v5037_v45  ;;  %v12290_v40 = vpop.f32.mrf.mxu3  ;;  %v4604_v32 = vsel %vm1307_vm3, %v8045_v25, %v7657_v20  ;;  %v13045_v29 = vpack.c.bf16 %v12058_v39, %v12048_v43 }
 0x533   : > { %7849 = vrcp.f32 %v12264_v17  ;;  %v7703_v28 = vunpack.i.h.bf16 %v7701_v5  ;;  %v7702_v37 = vunpack.i.l.bf16 %v7701_v5  ;;  %v5452_v33 = vand.u32 2147483647, %v12264_v17 }
 0x534   : > { %5076 = vmatmul.bf16.gmra.mxu0 %v4804_v16  ;;  %v5127_v11 = vadd.f32 %v5126_v7, %v5038_v50  ;;  %v5454_v4 = vand.u32 2147483648, %v12264_v17  ;;  %vm5448_vm8 = vweird.f32 %v12264_v17 }
 0x535   : > { %v4732_v48 = vsel %vm1373_vm5, %v4700_v14, %v7702_v37  ;;  %v4733_v3 = vsel %vm1373_vm5, %v4701_v15, %v7703_v28  ;;  %vm5453_vm10 = vcmp.eq.f32.partialorder %v5452_v33, 8.507059e+37 }
 0x536   : > { %v5216_v2 = vadd.f32 %v12141_v59, %v5127_v11  ;;  %v7716_v53 = vpop.permute.xlu0 %7715  ;;  %v4764_v24 = vsel %vm1439_vm6, %v4732_v48, %v7712_v0  ;;  %v4765_v38 = vsel %vm1439_vm6, %v4733_v3, %v7713_v54  ;;  %v5455_v54 = vor.u32 1.1754944e-38, %v5454_v4 }
 0x537   : > { %v5128_v30 = vpop.f32.mrf.mxu2  ;;  %v7718_v36 = vunpack.i.h.bf16 %v7716_v53  ;;  %v7717_v59 = vunpack.i.l.bf16 %v7716_v53  ;;  %v4808_v7 = vpack.c.bf16 %v4765_v38, %v4764_v24  ;;  %v7688_v0 = vunpack.i.h.bf16 %v12243_v46 }
 0x538   : > { %v7848_v8 = vpop.eup %7847  ;;  %v6221_v44 = vmul.f32 -1.442695, %v5216_v2  ;;  %v7687_v48 = vunpack.i.l.bf16 %v12243_v46 }
 0x539   : > { %v7850_v49 = vpop.eup %7849  ;;  %v12287_v60 = vadd.f32 1.0, %v7848_v8  ;;  %v5039_v19 = vpop.f32.mrf.mxu0  ;;  %v4636_v51 = vsel %vm1373_vm5, %v4604_v32, %v7717_v59  ;;  %v4637_v45 = vsel %vm1373_vm5, %v4605_v34, %v7718_v36 }
 0x53a   : > { %v5444_v6 = vmul.f32 %v7850_v49, %v12264_v17  ;;  %v7721_v41 = vpop.permute.xlu1 %7720  ;;  %vm5449_vm7 = vweird.f32 %v7850_v49  ;;  %v5040_v5 = vadd.f32 %v12128_v9, %v5039_v19  ;;  %v12306_v3 = vpop.permute.xlu2 %7760  ;;  %v7727_v19 = vunpack.i.l.bf16 %v12252_v23 }
 0x53b   : > { %7851 = vrcp.f32 %v12287_v60  ;;  %v7723_v18 = vunpack.i.h.bf16 %v7721_v41  ;;  %v7722_v61 = vunpack.i.l.bf16 %v7721_v41  ;;  %vm5450_vm9 = vmor %vm5448_vm8, %vm5449_vm7  ;;  %v12320_v39 = vpop.f32.mrf.mxu3  ;;  %vm5463_vm13 = vweird.f32 %v12287_v60 }
 0x53c   : > { %v5445_v31 = vsub.f32 1.0, %v5444_v6  ;;  %7853 = vpow2.f32 %v6221_v44  ;;  %5170 = vmatmul.bf16.gmra.mxu2 %v4808_v7  ;;  %v5129_v14 = vadd.f32 %v5128_v30, %v5040_v5  ;;  %v7728_v44 = vunpack.i.h.bf16 %v12252_v23 }
 0x53d   : > { %v4668_v28 = vsel %vm1439_vm6, %v4636_v51, %v7722_v61  ;;  %v4669_v37 = vsel %vm1439_vm6, %v4637_v45, %v7723_v18  ;;  %v5467_v23 = vand.u32 2147483647, %v12287_v60  ;;  %v7733_v18 = vunpack.i.h.bf16 %v12280_v27 }
 0x53e   : > { %v5446_v22 = vmul.f32 %v7850_v49, %v5445_v31  ;;  %v7736_v50 = vpop.permute.xlu0 %7735  ;;  %v5218_v8 = vadd.f32 %v12157_v13, %v5129_v14  ;;  %v4807_v38 = vpack.c.bf16 %v4669_v37, %v4668_v28  ;;  %v5469_v13 = vand.u32 2147483648, %v12287_v60 }
 0x53f   : > { %v5131_v16 = vpop.f32.mrf.mxu2  ;;  %v7737_v59 = vunpack.i.l.bf16 %v7736_v50  ;;  %v4703_v7 = vsel %vm1307_vm3, %v11838_v57, %v7728_v44  ;;  %v4702_v31 = vsel %vm1307_vm3, %v11833_v62, %v7727_v19  ;;  %vm5468_vm15 = vcmp.eq.f32.partialorder %v5467_v23, 8.507059e+37 }
 0x540   : > { %v5447_v15 = vadd.f32 %v7850_v49, %v5446_v22  ;;  %v6222_v36 = vmul.f32 -1.442695, %v5218_v8  ;;  %v5470_v51 = vor.u32 1.1754944e-38, %v5469_v13  ;;  %v7732_v28 = vunpack.i.l.bf16 %v12280_v27  ;;  %v8047_v8 = vld [vmem:[#allocation2 + $0x120] sm:$0xff] }
 0x541   : > { %v7852_v11 = vpop.eup %7851  ;;  %6215 = vmatmul.msk.bf16.gmra.mxu3 %vm1307_vm3, %v13045_v29  ;;  %v5042_v2 = vpop.f32.mrf.mxu0  ;;  %v4734_v4 = vsel %vm1373_vm5, %v4702_v31, %v7737_v59  ;;  %v7707_v23 = vunpack.i.l.bf16 %v12185_v58 }
 0x542   : > { %v7854_v17 = vpop.eup %7853  ;;  %v5451_v53 = vsel %vm5450_vm9, %v7850_v49, %v5447_v15  ;;  %v5459_v30 = vmul.f32 %v7852_v11, %v12287_v60  ;;  %v7751_v24 = vpop.permute.xlu1 %7750  ;;  %v7738_v49 = vunpack.i.h.bf16 %v7736_v50  ;;  %vm5464_vm12 = vweird.f32 %v7852_v11 }
 0x543   : > { %v5456_v20 = vsel %vm5453_vm10, %v5455_v54, %v5451_v53  ;;  %v12316_v6 = vadd.f32 1.0, %v7854_v17  ;;  %v7753_v41 = vunpack.i.h.bf16 %v7751_v24  ;;  %v7752_v10 = vunpack.i.l.bf16 %v7751_v24  ;;  %vm5465_vm14 = vmor %vm5463_vm13, %vm5464_vm12  ;;  %v12340_v54 = vpop.permute.xlu2 %7780  ;;  %v8046_v53 = vld [vmem:[#allocation2 + $0x128] sm:$0xff] }
 0x544   : > { %5896 = vst.msk [vmem:[%s12224_s23 + $0x10] sm:$0xff] %vm5893_vm11, %v5456_v20  ;;  %v5460_v43 = vsub.f32 1.0, %v5459_v30  ;;  %5081 = vmatmul.bf16.gmra.mxu0 %v4807_v38  ;;  %v5043_v61 = vadd.f32 %v12128_v9, %v5042_v2  ;;  %v4735_v22 = vsel %vm1373_vm5, %v4703_v7, %v7738_v49  ;;  %v4607_v30 = vsel %vm1307_vm3, %v8046_v53, %v7688_v0 }
 0x545   : > { %7855 = vrcp.f32 %v12316_v6  ;;  %v4766_v5 = vsel %vm1439_vm6, %v4734_v4, %v7752_v10  ;;  %v4767_v62 = vsel %vm1439_vm6, %v4735_v22, %v7753_v41  ;;  %v4606_v24 = vsel %vm1307_vm3, %v8047_v8, %v7687_v48 }
 0x546   : > { %v5461_v34 = vmul.f32 %v7852_v11, %v5460_v43  ;;  %7857 = vpow2.f32 %v6222_v36  ;;  %v7741_v25 = vpop.permute.xlu0 %7740  ;;  %v5132_v45 = vadd.f32 %v5131_v16, %v5043_v61  ;;  %v4639_v38 = vsel %vm1373_vm5, %v4607_v30, %v7733_v18  ;;  %v12355_v43 = vpop.f32.mrf.mxu3 }
 0x547   : > { %v5133_v32 = vpop.f32.mrf.mxu2  ;;  %v7743_v29 = vunpack.i.h.bf16 %v7741_v25  ;;  %v7742_v2 = vunpack.i.l.bf16 %v7741_v25  ;;  %v4638_v44 = vsel %vm1373_vm5, %v4606_v24, %v7732_v28  ;;  %v5482_v0 = vand.u32 2147483647, %v12316_v6 }
 0x548   : > { %v5462_v33 = vadd.f32 %v7852_v11, %v5461_v34  ;;  %v5221_v16 = vadd.f32 %v12187_v35, %v5132_v45  ;;  %v5484_v49 = vand.u32 2147483648, %v12316_v6  ;;  %v7708_v34 = vunpack.i.h.bf16 %v12185_v58  ;;  %v8048_v45 = vld [vmem:[#allocation2 + $0x140] sm:$0xff] }
 0x549   : > { %v5044_v57 = vpop.f32.mrf.mxu0  ;;  %v4670_v59 = vsel %vm1439_vm6, %v4638_v44, %v7742_v2  ;;  %v4671_v13 = vsel %vm1439_vm6, %v4639_v38, %v7743_v29  ;;  %vm5478_vm2 = vweird.f32 %v12316_v6  ;;  %vm5483_vm7 = vcmp.eq.f32.partialorder %v5482_v0, 8.507059e+37 }
 0x54a   : > { %v5466_v50 = vsel %vm5465_vm14, %v7852_v11, %v5462_v33  ;;  %v12337_v37 = vpop.permute.xlu1 %7755  ;;  %v5045_v60 = vadd.f32 %v12128_v9, %v5044_v57  ;;  %v4811_v11 = vpack.c.bf16 %v4767_v62, %v4766_v5  ;;  %v6223_v35 = vmul.f32 -1.442695, %v5221_v16  ;;  %v8049_v5 = vld [vmem:[#allocation2 + $0x138] sm:$0xff] }
 0x54b   : > { %v7856_v15 = vpop.eup %7855  ;;  %v5471_v14 = vsel %vm5468_vm15, %v5470_v51, %v5466_v50  ;;  %v3970_v33 = vrot.slane %v12070_v42, 2  ;;  %v7757_v22 = vunpack.i.l.bf16 %v12337_v37  ;;  %v3969_v51 = vrot.slane %v12068_v21, 2  ;;  %v12379_v28 = vpop.permute.xlu2 %7795  ;;  %v12534_v42 = vld [vmem:[%s12655_s6] ss:$0 sm:$0xff] }
 0x54c   : > { %v7858_v17 = vpop.eup %7857  ;;  %5897 = vst.msk [vmem:[%s12224_s23 + $0x18] sm:$0xff] %vm5893_vm11, %v5471_v14  ;;  %v5474_v27 = vmul.f32 %v7856_v15, %v12316_v6  ;;  %v5134_v36 = vadd.f32 %v5133_v32, %v5045_v60  ;;  %5175 = vmatmul.bf16.gmra.mxu2 %v4811_v11  ;;  %vm5479_vm0 = vweird.f32 %v7856_v15  ;;  %v4810_v32 = vpack.c.bf16 %v4671_v13, %v4670_v59 }
 0x54d   : > { %v12351_v20 = vadd.f32 1.0, %v7858_v17  ;;  %vm5480_vm4 = vmor %vm5478_vm2, %vm5479_vm0  ;;  %v12374_v57 = vsel %vm1307_vm3, %v8048_v45, %v7708_v34  ;;  %v12377_v62 = vsel %vm1307_vm3, %v8049_v5, %v7707_v23  ;;  %v7762_v14 = vunpack.i.l.bf16 %v12306_v3 }
 0x54e   : > { %v5475_v19 = vsub.f32 1.0, %v5474_v27  ;;  %v12359_v46 = vpop.permute.xlu0 %7745  ;;  %v5223_v10 = vadd.f32 %v12226_v55, %v5134_v36  ;;  %v5485_v55 = vor.u32 1.1754944e-38, %v5484_v49  ;;  %v7783_v2 = vunpack.i.h.bf16 %v12340_v54  ;;  %v12392_v24 = vpop.f32.mrf.mxu3 }
 0x54f   : > { %7859 = vrcp.f32 %v12351_v20  ;;  %v5136_v48 = vpop.f32.mrf.mxu2  ;;  %v7782_v17 = vunpack.i.l.bf16 %v12340_v54  ;;  %v7758_v30 = vunpack.i.h.bf16 %v12337_v37  ;;  %v7798_v38 = vunpack.i.h.bf16 %v12379_v28 }
 0x550   : > { %v5476_v41 = vmul.f32 %v7856_v15, %v5475_v19  ;;  %7861 = vpow2.f32 %v6223_v35  ;;  %v6224_v18 = vmul.f32 -1.442695, %v5223_v10  ;;  %v5499_v44 = vand.u32 2147483648, %v12351_v20 }
 0x551   : > { %v5047_v7 = vpop.f32.mrf.mxu0  ;;  %v7797_v19 = vunpack.i.l.bf16 %v12379_v28  ;;  %vm5493_vm9 = vweird.f32 %v12351_v20  ;;  %v7748_v10 = vunpack.i.h.bf16 %v12359_v46 }
 0x552   : > { %v5477_v31 = vadd.f32 %v7856_v15, %v5476_v41  ;;  %v12367_v61 = vpop.permute.xlu1 %7765  ;;  %v5048_v25 = vadd.f32 %v12128_v9, %v5047_v7  ;;  %7863 = vpow2.f32 %v6224_v18  ;;  %v5500_v7 = vor.u32 1.1754944e-38, %v5499_v44 }
 0x554   : > { %v5481_v4 = vsel %vm5480_vm4, %v7856_v15, %v5477_v31  ;;  %v5137_v58 = vadd.f32 %v5136_v48, %v5048_v25  ;;  %5086 = vmatmul.bf16.gmra.mxu0 %v4810_v32  ;;  %v7763_v15 = vunpack.i.h.bf16 %v12306_v3  ;;  %v4704_v3 = vsel %vm1307_vm3, %v11901_v26, %v7757_v22 }
 0x555   : > { %v7860_v6 = vpop.eup %7859  ;;  %v5486_v50 = vsel %vm5483_vm7, %v5485_v55, %v5481_v4  ;;  %v4705_v26 = vsel %vm1307_vm3, %v11911_v52, %v7758_v30  ;;  %v4736_v13 = vsel %vm1373_vm5, %v4704_v3, %v7762_v14  ;;  %v7747_v4 = vunpack.i.l.bf16 %v12359_v46 }
 0x556   : > { %v7862_v60 = vpop.eup %7861  ;;  %5898 = vst.msk [vmem:[%s12224_s23 + $0x20] sm:$0xff] %vm5893_vm11, %v5486_v50  ;;  %v5489_v16 = vmul.f32 %v7860_v6, %v12351_v20  ;;  %v5226_v29 = vadd.f32 %v12260_v56, %v5137_v58  ;;  %v7771_v27 = vpop.permute.xlu0 %7770  ;;  %v5497_v56 = vand.u32 2147483647, %v12351_v20  ;;  %vm5494_vm8 = vweird.f32 %v7860_v6 }
 0x557   : > { %v12389_v53 = vadd.f32 1.0, %v7862_v60  ;;  %v5138_v11 = vpop.f32.mrf.mxu2  ;;  %v7772_v49 = vunpack.i.l.bf16 %v7771_v27  ;;  %v7773_v34 = vunpack.i.h.bf16 %v7771_v27  ;;  %vm5495_vm10 = vmor %vm5493_vm9, %vm5494_vm8  ;;  %v4737_v58 = vsel %vm1373_vm5, %v4705_v26, %v7763_v15  ;;  %v12427_v3 = vpop.f32.mrf.mxu3 }
 0x558   : > { %v5490_v8 = vsub.f32 1.0, %v5489_v16  ;;  %v6225_v35 = vmul.f32 -1.442695, %v5226_v29  ;;  %v7864_v0 = vpop.eup %7863  ;;  %vm5498_vm12 = vcmp.eq.f32.partialorder %v5497_v56, 8.507059e+37  ;;  %v7767_v46 = vunpack.i.l.bf16 %v12367_v61 }
 0x559   : > { %7865 = vrcp.f32 %v12389_v53  ;;  %v5049_v37 = vpop.f32.mrf.mxu0  ;;  %v12404_v59 = vadd.f32 1.0, %v7864_v0  ;;  %v5512_v31 = vand.u32 2147483647, %v12389_v53  ;;  %v5514_v20 = vand.u32 2147483648, %v12389_v53 }
 0x55a   : > { %v5491_v36 = vmul.f32 %v7860_v6, %v5490_v8  ;;  %7867 = vpow2.f32 %v6225_v35  ;;  %v7776_v48 = vpop.permute.xlu1 %7775  ;;  %v5050_v23 = vadd.f32 %v12128_v9, %v5049_v37  ;;  %v4768_v25 = vsel %vm1439_vm6, %v4736_v13, %v7772_v49 }
 0x55b   : > { %7869 = vrcp.f32 %v12404_v59  ;;  %v7777_v18 = vunpack.i.l.bf16 %v7776_v48  ;;  %v7778_v22 = vunpack.i.h.bf16 %v7776_v48  ;;  %vm5508_vm13 = vweird.f32 %v12389_v53 }
 0x55c   : > { %v5492_v41 = vadd.f32 %v7860_v6, %v5491_v36  ;;  %v4769_v14 = vsel %vm1439_vm6, %v4737_v58, %v7773_v34  ;;  %vm12420_vm14 = vcmp.eq.f32.partialorder %v5512_v31, 8.507059e+37  ;;  %v5515_v29 = vor.u32 1.1754944e-38, %v5514_v20 }
 0x55d   : > { %v4814_v15 = vpack.c.bf16 %v4769_v14, %v4768_v25  ;;  %vm5523_vm15 = vweird.f32 %v12404_v59  ;;  %v4640_v35 = vsel %vm1373_vm5, %v12377_v62, %v7777_v18  ;;  %v5527_v37 = vand.u32 2147483647, %v12404_v59 }
 0x55e   : > { %v5496_v52 = vsel %vm5495_vm10, %v7860_v6, %v5492_v41  ;;  %v7786_v45 = vpop.permute.xlu0 %7785  ;;  %v5139_v6 = vadd.f32 %v5138_v11, %v5050_v23  ;;  %v4641_v0 = vsel %vm1373_vm5, %v12374_v57, %v7778_v22  ;;  %v5529_v62 = vand.u32 2147483648, %v12404_v59 }
 0x55f   : > { %v7866_v32 = vpop.eup %7865  ;;  %v5501_v55 = vsel %vm5498_vm12, %v5500_v7, %v5496_v52  ;;  %v5141_v5 = vpop.f32.mrf.mxu2  ;;  %5180 = vmatmul.bf16.gmra.mxu2 %v4814_v15  ;;  %v7787_v13 = vunpack.i.l.bf16 %v7786_v45  ;;  %v4672_v41 = vsel %vm1439_vm6, %v4640_v35, %v7782_v17  ;;  %v4673_v20 = vsel %vm1439_vm6, %v4641_v0, %v7783_v2  ;;  %v8050_v0 = vld [vmem:[#allocation2 + $0x158] sm:$0xff] }
 0x560   : > { %v7868_v50 = vpop.eup %7867  ;;  %5899 = vst.msk [vmem:[%s12224_s23 + $0x28] sm:$0xff] %vm5893_vm11, %v5501_v55  ;;  %v5504_v60 = vmul.f32 %v7866_v32, %v12389_v53  ;;  %v5228_v11 = vadd.f32 %v12290_v40, %v5139_v6  ;;  %vm5509_vm0 = vweird.f32 %v7866_v32  ;;  %v7788_v40 = vunpack.i.h.bf16 %v7786_v45 }
 0x561   : > { %v12424_v30 = vadd.f32 1.0, %v7868_v50  ;;  %v5052_v27 = vpop.f32.mrf.mxu0  ;;  %v7870_v44 = vpop.eup %7869  ;;  %vm5510_vm2 = vmor %vm5508_vm13, %vm5509_vm0  ;;  %v12452_v17 = vsel %vm463_vm1, %v3969_v51, %v3970_v33  ;;  %v4813_v53 = vpack.c.bf16 %v4673_v20, %v4672_v41  ;;  %vm12456_vm7 = vcmp.eq.f32.partialorder %v5527_v37, 8.507059e+37  ;;  %v8051_v20 = vld [vmem:[#allocation2 + $0x150] sm:$0xff] }
 0x562   : > { %v5505_v8 = vsub.f32 1.0, %v5504_v60  ;;  %v7791_v56 = vpop.permute.xlu1 %7790  ;;  %v5053_v36 = vadd.f32 %v12128_v9, %v5052_v27  ;;  %v5519_v48 = vmul.f32 %v7870_v44, %v12404_v59  ;;  %v6226_v26 = vmul.f32 -1.442695, %v5228_v11  ;;  %v12475_v27 = vpop.f32.mrf.mxu3 }
 0x563   : > { %7871 = vrcp.f32 %v12424_v30  ;;  %v7793_v57 = vunpack.i.h.bf16 %v7791_v56  ;;  %v7792_v7 = vunpack.i.l.bf16 %v7791_v56  ;;  %vm5524_vm4 = vweird.f32 %v7870_v44 }
 0x564   : > { %v5506_v49 = vmul.f32 %v7866_v32, %v5505_v8  ;;  %v5520_v23 = vsub.f32 1.0, %v5519_v48  ;;  %7873 = vpow2.f32 %v6226_v26  ;;  %v5142_v31 = vadd.f32 %v5141_v5, %v5053_v36  ;;  %5091 = vmatmul.bf16.gmra.mxu0 %v4813_v53  ;;  %vm5525_vm8 = vmor %vm5523_vm15, %vm5524_vm4 }
 0x565   : > { %v4707_v2 = vsel %vm1307_vm3, %v11969_v12, %v7788_v40  ;;  %v5530_v45 = vor.u32 1.1754944e-38, %v5529_v62  ;;  %v4706_v50 = vsel %vm1307_vm3, %v11966_v47, %v7787_v13  ;;  %v5542_v12 = vand.u32 2147483647, %v12424_v30  ;;  %v12495_v62 = vpop.permute.xlu2 %7815 }
 0x566   : > { %v5507_v34 = vadd.f32 %v7866_v32, %v5506_v49  ;;  %v5521_v25 = vmul.f32 %v7870_v44, %v5520_v23  ;;  %v5231_v21 = vadd.f32 %v12320_v39, %v5142_v31  ;;  %v7801_v58 = vpop.permute.xlu0 %7800  ;;  %v4738_v39 = vsel %vm1373_vm5, %v4706_v50, %v7792_v7 }
 0x567   : > { %v5143_v52 = vpop.f32.mrf.mxu2  ;;  %v4739_v60 = vsel %vm1373_vm5, %v4707_v2, %v7793_v57  ;;  %v5544_v15 = vand.u32 2147483648, %v12424_v30  ;;  %v4611_v36 = vsel %vm1307_vm3, %v8050_v0, %v7748_v10  ;;  %v7768_v49 = vunpack.i.h.bf16 %v12367_v61  ;;  %v8052_v2 = vld [vmem:[#allocation2 + $0x1a8] sm:$0x3] }
 0x568   : > { %v5511_v18 = vsel %vm5510_vm2, %v7866_v32, %v5507_v34  ;;  %v5522_v32 = vadd.f32 %v7870_v44, %v5521_v25  ;;  %v6227_v6 = vmul.f32 -1.442695, %v5231_v21  ;;  %v4771_v37 = vsel %vm1439_vm6, %v4739_v60, %v7798_v38 }
 0x569   : > { %v7872_v55 = vpop.eup %7871  ;;  %v5516_v22 = vsel %vm12420_vm14, %v5515_v29, %v5511_v18  ;;  %v5054_v51 = vpop.f32.mrf.mxu0  ;;  %v7803_v48 = vunpack.i.h.bf16 %v7801_v58  ;;  %vm5538_vm10 = vweird.f32 %v12424_v30  ;;  %v5545_v38 = vor.u32 1.1754944e-38, %v5544_v15 }
 0x56a   : > { %5900 = vst.msk [vmem:[%s12224_s23 + $0x30] sm:$0xff] %vm5893_vm11, %v5516_v22  ;;  %v5534_v5 = vmul.f32 %v7872_v55, %v12424_v30  ;;  %v7874_v14 = vpop.eup %7873  ;;  %v5526_v16 = vsel %vm5525_vm8, %v7870_v44, %v5522_v32  ;;  %v7806_v47 = vpop.permute.xlu1 %7805  ;;  %v5055_v8 = vadd.f32 %v12128_v9, %v5054_v51  ;;  %vm5539_vm9 = vweird.f32 %v7872_v55 }
 0x56b   : > { %v5531_v59 = vsel %vm12456_vm7, %v5530_v45, %v5526_v16  ;;  %v12480_v35 = vadd.f32 1.0, %v7874_v14  ;;  %7875 = vpow2.f32 %v6227_v6  ;;  %v4770_v44 = vsel %vm1439_vm6, %v4738_v39, %v7797_v19  ;;  %vm5540_vm12 = vmor %vm5538_vm10, %vm5539_vm9 }
 0x56c   : > { %v5535_v29 = vsub.f32 1.0, %v5534_v5  ;;  %5901 = vst.msk [vmem:[%s12224_s23 + $0x38] sm:$0xff] %vm5893_vm11, %v5531_v59  ;;  %v5144_v56 = vadd.f32 %v5143_v52, %v5055_v8  ;;  %v7802_v19 = vunpack.i.l.bf16 %v7801_v58  ;;  %v7808_v13 = vunpack.i.h.bf16 %v7806_v47  ;;  %v8053_v58 = vld [vmem:[#allocation2 + $0x170] sm:$0xff]  ;;  %v12519_v5 = vpop.f32.mrf.mxu3 }
 0x56d   : > { %7877 = vrcp.f32 %v12480_v35  ;;  %v7807_v10 = vunpack.i.l.bf16 %v7806_v47  ;;  %v4817_v41 = vpack.c.bf16 %v4771_v37, %v4770_v44  ;;  %vm5543_vm13 = vcmp.eq.f32.partialorder %v5542_v12, 8.507059e+37 }
 0x56e   : > { %v5536_v11 = vmul.f32 %v7872_v55, %v5535_v29  ;;  %v5233_v28 = vadd.f32 %v12355_v43, %v5144_v56  ;;  %v4610_v30 = vsel %vm1307_vm3, %v8051_v20, %v7747_v4  ;;  %v7818_v43 = vunpack.i.h.bf16 %v12495_v62  ;;  %v7811_v25 = vpop.permute.xlu0 %7810 }
 0x56f   : > { %v5146_v26 = vpop.f32.mrf.mxu2  ;;  %v4643_v18 = vsel %vm1373_vm5, %v4611_v36, %v7803_v48  ;;  %5185 = vmatmul.bf16.gmra.mxu2 %v4817_v41  ;;  %v3972_v21 = vrot.slane %v8052_v2, 2  ;;  %v12515_v51 = vsel %vm1307_vm3, %v8053_v58, %v7768_v49  ;;  %v7817_v32 = vunpack.i.l.bf16 %v12495_v62  ;;  %v7826_v49 = vpop.permute.xlu2 %7825 }
 0x570   : > { %v5537_v40 = vadd.f32 %v7872_v55, %v5536_v11  ;;  %v6228_v57 = vmul.f32 -1.442695, %v5233_v28  ;;  %v4675_v54 = vsel %vm1439_vm6, %v4643_v18, %v7808_v13  ;;  %v4709_v12 = vsel %vm1307_vm3, %v12037_v1, %v7818_v43 }
 0x571   : > { %v5057_v34 = vpop.f32.mrf.mxu0  ;;  %v7876_v31 = vpop.eup %7875  ;;  %v5557_v39 = vand.u32 2147483647, %v12480_v35  ;;  %v3973_v14 = vsel %vm463_vm1, %v3970_v33, %v3972_v21  ;;  %v5559_v29 = vand.u32 2147483648, %v12480_v35  ;;  %v7813_v8 = vunpack.i.h.bf16 %v7811_v25 }
 0x572   : > { %v5541_v23 = vsel %vm5540_vm12, %v7872_v55, %v5537_v40  ;;  %v5058_v7 = vadd.f32 %v12128_v9, %v5057_v34  ;;  %v12508_v53 = vadd.f32 1.0, %v7876_v31  ;;  %v4642_v55 = vsel %vm1373_vm5, %v4610_v30, %v7802_v19  ;;  %v7821_v50 = vpop.permute.xlu1 %7820 }
 0x573   : > { %v5546_v52 = vsel %vm5543_vm13, %v5545_v38, %v5541_v23  ;;  %7879 = vpow2.f32 %v6228_v57  ;;  %v7878_v22 = vpop.eup %7877  ;;  %v4674_v4 = vsel %vm1439_vm6, %v4642_v55, %v7807_v10  ;;  %v4821_v47 = vpack.c.bf16 %v3973_v14, %v12452_v17 }
 0x574   : > { %5902 = vst.msk [vmem:[%s12224_s23 + $0x40] sm:$0xff] %vm5893_vm11, %v5546_v52  ;;  %v5147_v9 = vadd.f32 %v5146_v26, %v5058_v7  ;;  %v5549_v45 = vmul.f32 %v7878_v22, %v12480_v35  ;;  %7881 = vrcp.f32 %v12508_v53  ;;  %v4816_v15 = vpack.c.bf16 %v4675_v54, %v4674_v4  ;;  %v12555_v20 = vpop.f32.mrf.mxu3 }
 0x575   : > { %v7812_v59 = vunpack.i.l.bf16 %v7811_v25  ;;  %v7823_v11 = vunpack.i.h.bf16 %v7821_v50  ;;  %vm5554_vm14 = vweird.f32 %v7878_v22  ;;  %6216 = vmatmul.msk.bf16.gmra.mxu3 %vm1307_vm3, %v4821_v47  ;;  %v4708_v17 = vsel %vm1307_vm3, %v12034_v63, %v7817_v32 }
 0x576   : > { %v5236_v60 = vadd.f32 %v12392_v24, %v5147_v9  ;;  %v5550_v16 = vsub.f32 1.0, %v5549_v45  ;;  %v7822_v24 = vunpack.i.l.bf16 %v7821_v50  ;;  %5096 = vmatmul.bf16.gmra.mxu0 %v4816_v15  ;;  %vm5553_vm1 = vweird.f32 %v12480_v35  ;;  %v7831_v19 = vpop.permute.xlu0 %7830 }
 0x577   : > { %v5148_v6 = vpop.f32.mrf.mxu2  ;;  %vm5558_vm15 = vcmp.eq.f32.partialorder %v5557_v39, 8.507059e+37  ;;  %v5560_v26 = vor.u32 1.1754944e-38, %v5559_v29  ;;  %vm5555_vm0 = vmor %vm5553_vm1, %vm5554_vm14  ;;  %v4740_v63 = vsel %vm1373_vm5, %v4708_v17, %v7812_v59  ;;  %v4741_v35 = vsel %vm1373_vm5, %v4709_v12, %v7813_v8 }
 0x578   : > { %v6229_v56 = vmul.f32 -1.442695, %v5236_v60  ;;  %v5551_v37 = vmul.f32 %v7878_v22, %v5550_v16  ;;  %v4772_v13 = vsel %vm1439_vm6, %v4740_v63, %v7822_v24  ;;  %v4773_v10 = vsel %vm1439_vm6, %v4741_v35, %v7823_v11 }
 0x579   : > { %v5059_v1 = vpop.f32.mrf.mxu0  ;;  %v7880_v44 = vpop.eup %7879  ;;  %v7828_v41 = vunpack.i.h.bf16 %v7826_v49  ;;  %v7827_v34 = vunpack.i.l.bf16 %v7826_v49  ;;  %v5572_v7 = vand.u32 2147483647, %v12508_v53  ;;  %v5574_v31 = vand.u32 2147483648, %v12508_v53 }
 0x57a   : > { %v5060_v33 = vadd.f32 %v12534_v42, %v5059_v1  ;;  %v12541_v0 = vadd.f32 1.0, %v7880_v44  ;;  %7883 = vpow2.f32 %v6229_v56  ;;  %v7882_v36 = vpop.eup %7881  ;;  %v5552_v48 = vadd.f32 %v7878_v22, %v5551_v37 }
 0x57b   : > { %v5564_v40 = vmul.f32 %v7882_v36, %v12508_v53  ;;  %v7833_v30 = vunpack.i.h.bf16 %v7831_v19  ;;  %vm5569_vm2 = vweird.f32 %v7882_v36  ;;  %v7832_v18 = vunpack.i.l.bf16 %v7831_v19 }
 0x57c   : > { %v5149_v62 = vadd.f32 %v5148_v6, %v5060_v33  ;;  %7885 = vrcp.f32 %v12541_v0  ;;  %v5556_v28 = vsel %vm5555_vm0, %v7878_v22, %v5552_v48  ;;  %v4820_v25 = vpack.c.bf16 %v4773_v10, %v4772_v13  ;;  %v8055_v22 = vld [vmem:[#allocation2 + $0x168] sm:$0xff]  ;;  %v12578_v37 = vpop.f32.mrf.mxu3 }
 0x57d   : > { %v5561_v23 = vsel %vm5558_vm15, %v5560_v26, %v5556_v28  ;;  %v5565_v57 = vsub.f32 1.0, %v5564_v40  ;;  %v4612_v4 = vsel %vm1307_vm3, %v8055_v22, %v7767_v46  ;;  %v4645_v58 = vsel %vm1373_vm5, %v12515_v51, %v7828_v41 }
 0x57e   : > { %v5238_v38 = vadd.f32 %v12427_v3, %v5149_v62  ;;  %5903 = vst.msk [vmem:[%s12224_s23 + $0x48] sm:$0xff] %vm5893_vm11, %v5561_v23  ;;  %v4644_v32 = vsel %vm1373_vm5, %v4612_v4, %v7827_v34  ;;  %vm5568_vm4 = vweird.f32 %v12508_v53  ;;  %vm5573_vm8 = vcmp.eq.f32.partialorder %v5572_v7, 8.507059e+37 }
 0x57f   : > { %v5566_v3 = vmul.f32 %v7882_v36, %v5565_v57  ;;  %v5151_v55 = vpop.f32.mrf.mxu2  ;;  %5190 = vmatmul.bf16.gmra.mxu2 %v4820_v25  ;;  %vm5570_vm7 = vmor %vm5568_vm4, %vm5569_vm2  ;;  %v5575_v61 = vor.u32 1.1754944e-38, %v5574_v31  ;;  %v4676_v39 = vsel %vm1439_vm6, %v4644_v32, %v7832_v18  ;;  %v4677_v51 = vsel %vm1439_vm6, %v4645_v58, %v7833_v30 }
 0x580   : > { %v6230_v43 = vmul.f32 -1.442695, %v5238_v38  ;;  %v7884_v52 = vpop.eup %7883  ;;  %v5589_v53 = vand.u32 2147483648, %v12541_v0  ;;  %v5587_v15 = vand.u32 2147483647, %v12541_v0  ;;  %v4819_v47 = vpack.c.bf16 %v4677_v51, %v4676_v39 }
 0x581   : > { %v5062_v9 = vpop.f32.mrf.mxu0  ;;  %v12560_v54 = vadd.f32 1.0, %v7884_v52  ;;  %v5567_v45 = vadd.f32 %v7882_v36, %v5566_v3  ;;  %vm5583_vm5 = vweird.f32 %v12541_v0 }
 0x582   : > { %7887 = vpow2.f32 %v6230_v43  ;;  %v5063_v2 = vadd.f32 %v12534_v42, %v5062_v9  ;;  %v7886_v21 = vpop.eup %7885  ;;  %v5590_v24 = vor.u32 1.1754944e-38, %v5589_v53  ;;  %vm5588_vm9 = vcmp.eq.f32.partialorder %v5587_v15, 8.507059e+37 }
 0x583   : > { %v5579_v46 = vmul.f32 %v7886_v21, %v12541_v0  ;;  %7889 = vrcp.f32 %v12560_v54  ;;  %v5571_v50 = vsel %vm5570_vm7, %v7882_v36, %v5567_v45  ;;  %vm5584_vm3 = vweird.f32 %v7886_v21 }
 0x584   : > { %v5152_v12 = vadd.f32 %v5151_v55, %v5063_v2  ;;  %v5576_v60 = vsel %vm5573_vm8, %v5575_v61, %v5571_v50  ;;  %vm5585_vm6 = vmor %vm5583_vm5, %vm5584_vm3  ;;  %v5604_v0 = vand.u32 2147483648, %v12560_v54  ;;  %v5602_v62 = vand.u32 2147483647, %v12560_v54 }
 0x585   : > { %v5580_v6 = vsub.f32 1.0, %v5579_v46  ;;  %5904 = vst.msk [vmem:[%s12224_s23 + $0x50] sm:$0xff] %vm5893_vm11, %v5576_v60  ;;  %vm5598_vm12 = vweird.f32 %v12560_v54 }
 0x586   : > { %v5241_v14 = vadd.f32 %v12475_v27, %v5152_v12  ;;  %5101 = vmatmul.bf16.gmra.mxu0 %v4819_v47  ;;  %v5605_v10 = vor.u32 1.1754944e-38, %v5604_v0  ;;  %vm5603_vm14 = vcmp.eq.f32.partialorder %v5602_v62, 8.507059e+37 }
 0x587   : > { %v5581_v29 = vmul.f32 %v7886_v21, %v5580_v6  ;;  %v5153_v11 = vpop.f32.mrf.mxu2 }
 0x588   : > { %v7888_v16 = vpop.eup %7887  ;;  %v6231_v59 = vmul.f32 -1.442695, %v5241_v14 }
 0x589   : > { %v5394_v8 = vadd.f32 1.0, %v7888_v16  ;;  %v5064_v56 = vpop.f32.mrf.mxu0  ;;  %v7890_v1 = vpop.eup %7889  ;;  %v5582_v44 = vadd.f32 %v7886_v21, %v5581_v29 }
 0x58a   : > { %v5065_v27 = vadd.f32 %v12534_v42, %v5064_v56  ;;  %v5594_v33 = vmul.f32 %v7890_v1, %v12560_v54  ;;  %vm5599_vm10 = vweird.f32 %v7890_v1 }
 0x58b   : > { %7891 = vrcp.f32 %v5394_v8  ;;  %v5586_v17 = vsel %vm5585_vm6, %v7886_v21, %v5582_v44  ;;  %vm5600_vm13 = vmor %vm5598_vm12, %vm5599_vm10  ;;  %v5617_v43 = vand.u32 2147483647, %v5394_v8  ;;  %v5619_v52 = vand.u32 2147483648, %v5394_v8 }
 0x58c   : > { %7893 = vpow2.f32 %v6231_v59  ;;  %v5591_v36 = vsel %vm5588_vm9, %v5590_v24, %v5586_v17  ;;  %v5595_v49 = vsub.f32 1.0, %v5594_v33  ;;  %v5154_v48 = vadd.f32 %v5153_v11, %v5065_v27 }
 0x58d   : > { %5905 = vst.msk [vmem:[%s12224_s23 + $0x58] sm:$0xff] %vm5893_vm11, %v5591_v36  ;;  %vm5613_vm15 = vweird.f32 %v5394_v8  ;;  %vm5618_vm2 = vcmp.eq.f32.partialorder %v5617_v43, 8.507059e+37  ;;  %v5620_v22 = vor.u32 1.1754944e-38, %v5619_v52 }
 0x58e   : > { %v5596_v26 = vmul.f32 %v7890_v1, %v5595_v49  ;;  %v5243_v40 = vadd.f32 %v12519_v5, %v5154_v48  ;;  %v5250_v5 = vpop.f32.mrf.mxu3 }
 0x58f   : > { %v5156_v28 = vpop.f32.mrf.mxu2 }
 0x590   : > { %v5597_v35 = vadd.f32 %v7890_v1, %v5596_v26  ;;  %v6232_v19 = vmul.f32 -1.442695, %v5243_v40 }
 0x591   : > { %v7892_v63 = vpop.eup %7891  ;;  %v5067_v38 = vpop.f32.mrf.mxu0 }
 0x592   : > { %v7894_v13 = vpop.eup %7893  ;;  %v5609_v41 = vmul.f32 %v7892_v63, %v5394_v8  ;;  %v5068_v34 = vadd.f32 %v12534_v42, %v5067_v38  ;;  %v5601_v23 = vsel %vm5600_vm13, %v7890_v1, %v5597_v35  ;;  %7895 = vpow2.f32 %v6232_v19 }
 0x593   : > { %v5395_v57 = vadd.f32 1.0, %v7894_v13  ;;  %v5606_v7 = vsel %vm5603_vm14, %v5605_v10, %v5601_v23  ;;  %vm5614_vm1 = vweird.f32 %v7892_v63 }
 0x594   : > { %v5610_v31 = vsub.f32 1.0, %v5609_v41  ;;  %v5157_v30 = vadd.f32 %v5156_v28, %v5068_v34  ;;  %5906 = vst.msk [vmem:[%s12224_s23 + $0x60] sm:$0xff] %vm5893_vm11, %v5606_v7  ;;  %vm5615_vm0 = vmor %vm5613_vm15, %vm5614_vm1 }
 0x595   : > { %7897 = vrcp.f32 %v5395_v57  ;;  %v5634_v12 = vand.u32 2147483648, %v5395_v57  ;;  %v5632_v6 = vand.u32 2147483647, %v5395_v57  ;;  %vm5628_vm7 = vweird.f32 %v5395_v57 }
 0x596   : > { %v5611_v3 = vmul.f32 %v7892_v63, %v5610_v31  ;;  %v5246_v18 = vadd.f32 %v12555_v20, %v5157_v30  ;;  %v5252_v46 = vpop.f32.mrf.mxu3 }
 0x597   : > { %v5158_v4 = vpop.f32.mrf.mxu2  ;;  %v5635_v59 = vor.u32 1.1754944e-38, %v5634_v12  ;;  %vm5633_vm3 = vcmp.eq.f32.partialorder %v5632_v6, 8.507059e+37 }
 0x598   : > { %v5612_v25 = vadd.f32 %v7892_v63, %v5611_v3  ;;  %v6233_v55 = vmul.f32 -1.442695, %v5246_v18  ;;  %v7896_v9 = vpop.eup %7895 }
 0x599   : > { %v5069_v54 = vpop.f32.mrf.mxu0  ;;  %v5396_v21 = vadd.f32 1.0, %v7896_v9 }
 0x59a   : > { %v5616_v2 = vsel %vm5615_vm0, %v7892_v63, %v5612_v25  ;;  %7899 = vpow2.f32 %v6233_v55  ;;  %v5070_v58 = vadd.f32 %v12534_v42, %v5069_v54 }
 0x59b   : > { %v7898_v32 = vpop.eup %7897  ;;  %v5621_v45 = vsel %vm5618_vm2, %v5620_v22, %v5616_v2  ;;  %7901 = vrcp.f32 %v5396_v21  ;;  %v5649_v27 = vand.u32 2147483648, %v5396_v21  ;;  %v5647_v33 = vand.u32 2147483647, %v5396_v21 }
 0x59c   : > { %5907 = vst.msk [vmem:[%s12224_s23 + $0x68] sm:$0xff] %vm5893_vm11, %v5621_v45  ;;  %v5624_v20 = vmul.f32 %v7898_v32, %v5395_v57  ;;  %v5159_v61 = vadd.f32 %v5158_v4, %v5070_v58  ;;  %vm5629_vm4 = vweird.f32 %v7898_v32  ;;  %vm5643_vm6 = vweird.f32 %v5396_v21 }
 0x59d   : > { %vm5630_vm8 = vmor %vm5628_vm7, %vm5629_vm4  ;;  %v5650_v63 = vor.u32 1.1754944e-38, %v5649_v27  ;;  %vm5648_vm10 = vcmp.eq.f32.partialorder %v5647_v33, 8.507059e+37 }
 0x59e   : > { %v5625_v50 = vsub.f32 1.0, %v5624_v20  ;;  %v5248_v39 = vadd.f32 %v12578_v37, %v5159_v61  ;;  %v5255_v36 = vpop.f32.mrf.mxu3 }
 0x59f   : > { %v5161_v16 = vpop.f32.mrf.mxu2 }
 0x5a0   : > { %v7900_v51 = vpop.eup %7899  ;;  %v5626_v60 = vmul.f32 %v7898_v32, %v5625_v50  ;;  %v6234_v14 = vmul.f32 -1.442695, %v5248_v39 }
 0x5a1   : > { %v5397_v53 = vadd.f32 1.0, %v7900_v51  ;;  %v5072_v29 = vpop.f32.mrf.mxu0  ;;  %v7902_v15 = vpop.eup %7901 }
 0x5a2   : > { %v5627_v47 = vadd.f32 %v7898_v32, %v5626_v60  ;;  %v5073_v8 = vadd.f32 %v12534_v42, %v5072_v29  ;;  %v5639_v11 = vmul.f32 %v7902_v15, %v5396_v21  ;;  %vm5644_vm5 = vweird.f32 %v7902_v15 }
 0x5a3   : > { %7903 = vrcp.f32 %v5397_v53  ;;  %vm5645_vm9 = vmor %vm5643_vm6, %vm5644_vm5  ;;  %v5662_v34 = vand.u32 2147483647, %v5397_v53  ;;  %v5664_v23 = vand.u32 2147483648, %v5397_v53  ;;  %vm5658_vm13 = vweird.f32 %v5397_v53 }
 0x5a4   : > { %v5631_v56 = vsel %vm5630_vm8, %v7898_v32, %v5627_v47  ;;  %7905 = vpow2.f32 %v6234_v14  ;;  %v5640_v44 = vsub.f32 1.0, %v5639_v11  ;;  %v5162_v37 = vadd.f32 %v5161_v16, %v5073_v8 }
 0x5a5   : > { %v5636_v1 = vsel %vm5633_vm3, %v5635_v59, %v5631_v56  ;;  %vm5663_vm1 = vcmp.eq.f32.partialorder %v5662_v34, 8.507059e+37  ;;  %v5665_v43 = vor.u32 1.1754944e-38, %v5664_v23 }
 0x5a6   : > { %5908 = vst.msk [vmem:[%s12224_s23 + $0x70] sm:$0xff] %vm5893_vm11, %v5636_v1  ;;  %v5641_v24 = vmul.f32 %v7902_v15, %v5640_v44  ;;  %v5251_v17 = vadd.f32 %v5250_v5, %v5162_v37  ;;  %v5257_v18 = vpop.f32.mrf.mxu3 }
 0x5a7   : > { %v5163_v26 = vpop.f32.mrf.mxu2 }
 0x5a8   : > { %v5642_v48 = vadd.f32 %v7902_v15, %v5641_v24  ;;  %v6235_v0 = vmul.f32 -1.442695, %v5251_v17 }
 0x5a9   : > { %v7904_v49 = vpop.eup %7903  ;;  %v5074_v62 = vpop.f32.mrf.mxu0 }
 0x5aa   : > { %v7906_v40 = vpop.eup %7905  ;;  %v5654_v35 = vmul.f32 %v7904_v49, %v5397_v53  ;;  %v5075_v19 = vadd.f32 %v12534_v42, %v5074_v62  ;;  %v5646_v28 = vsel %vm5645_vm9, %v7902_v15, %v5642_v48  ;;  %7907 = vpow2.f32 %v6235_v0 }
 0x5ab   : > { %v5398_v38 = vadd.f32 1.0, %v7906_v40  ;;  %v5651_v13 = vsel %vm5648_vm10, %v5650_v63, %v5646_v28  ;;  %vm5659_vm12 = vweird.f32 %v7904_v49 }
 0x5ac   : > { %v5655_v10 = vsub.f32 1.0, %v5654_v35  ;;  %v5164_v41 = vadd.f32 %v5163_v26, %v5075_v19  ;;  %5909 = vst.msk [vmem:[%s12224_s23 + $0x78] sm:$0xff] %vm5893_vm11, %v5651_v13  ;;  %vm5660_vm14 = vmor %vm5658_vm13, %vm5659_vm12 }
 0x5ad   : > { %7909 = vrcp.f32 %v5398_v38  ;;  %v5679_v58 = vand.u32 2147483648, %v5398_v38  ;;  %v5677_v61 = vand.u32 2147483647, %v5398_v38  ;;  %vm5673_vm0 = vweird.f32 %v5398_v38 }
 0x5ae   : > { %v5656_v57 = vmul.f32 %v7904_v49, %v5655_v10  ;;  %v5253_v7 = vadd.f32 %v5252_v46, %v5164_v41  ;;  %v5260_v16 = vpop.f32.mrf.mxu3 }
 0x5af   : > { %v5166_v52 = vpop.f32.mrf.mxu2  ;;  %v5680_v53 = vor.u32 1.1754944e-38, %v5679_v58  ;;  %vm5678_vm4 = vcmp.eq.f32.partialorder %v5677_v61, 8.507059e+37 }
 0x5b0   : > { %v5657_v5 = vadd.f32 %v7904_v49, %v5656_v57  ;;  %v6236_v31 = vmul.f32 -1.442695, %v5253_v7  ;;  %v7908_v30 = vpop.eup %7907 }
 0x5b1   : > { %v5077_v3 = vpop.f32.mrf.mxu0  ;;  %v5399_v55 = vadd.f32 1.0, %v7908_v30 }
 0x5b2   : > { %v5661_v25 = vsel %vm5660_vm14, %v7904_v49, %v5657_v5  ;;  %7911 = vpow2.f32 %v6236_v31  ;;  %v5078_v9 = vadd.f32 %v12534_v42, %v5077_v3 }
 0x5b3   : > { %v7910_v22 = vpop.eup %7909  ;;  %v5666_v4 = vsel %vm5663_vm1, %v5665_v43, %v5661_v25  ;;  %7913 = vrcp.f32 %v5399_v55  ;;  %v5694_v59 = vand.u32 2147483648, %v5399_v55  ;;  %v5692_v56 = vand.u32 2147483647, %v5399_v55 }
 0x5b4   : > { %5910 = vst.msk [vmem:[%s12224_s23 + $0x80] sm:$0xff] %vm5893_vm11, %v5666_v4  ;;  %v5669_v54 = vmul.f32 %v7910_v22, %v5398_v38  ;;  %v5167_v2 = vadd.f32 %v5166_v52, %v5078_v9  ;;  %vm5674_vm15 = vweird.f32 %v7910_v22  ;;  %vm5688_vm8 = vweird.f32 %v5399_v55 }
 0x5b5   : > { %vm5675_vm2 = vmor %vm5673_vm0, %vm5674_vm15  ;;  %vm5693_vm5 = vcmp.eq.f32.partialorder %v5692_v56, 8.507059e+37 }
 0x5b6   : > { %v5670_v21 = vsub.f32 1.0, %v5669_v54  ;;  %v5256_v32 = vadd.f32 %v5255_v36, %v5167_v2  ;;  %v5695_v36 = vor.u32 1.1754944e-38, %v5694_v59  ;;  %v5262_v28 = vpop.f32.mrf.mxu3 }
 0x5b7   : > { %v5168_v12 = vpop.f32.mrf.mxu2 }
 0x5b8   : > { %v7912_v45 = vpop.eup %7911  ;;  %v5671_v20 = vmul.f32 %v7910_v22, %v5670_v21  ;;  %v6237_v50 = vmul.f32 -1.442695, %v5256_v32 }
 0x5b9   : > { %v5400_v46 = vadd.f32 1.0, %v7912_v45  ;;  %v5079_v39 = vpop.f32.mrf.mxu0  ;;  %v7914_v51 = vpop.eup %7913 }
 0x5ba   : > { %v5672_v60 = vadd.f32 %v7910_v22, %v5671_v20  ;;  %v5080_v6 = vadd.f32 %v12534_v42, %v5079_v39  ;;  %v5684_v14 = vmul.f32 %v7914_v51, %v5399_v55  ;;  %vm5689_vm7 = vweird.f32 %v7914_v51 }
 0x5bb   : > { %7915 = vrcp.f32 %v5400_v46  ;;  %vm5690_vm3 = vmor %vm5688_vm8, %vm5689_vm7  ;;  %v5707_v35 = vand.u32 2147483647, %v5400_v46  ;;  %v5709_v19 = vand.u32 2147483648, %v5400_v46  ;;  %vm5703_vm9 = vweird.f32 %v5400_v46 }
 0x5bc   : > { %v5676_v29 = vsel %vm5675_vm2, %v7910_v22, %v5672_v60  ;;  %7917 = vpow2.f32 %v6237_v50  ;;  %v5685_v47 = vsub.f32 1.0, %v5684_v14  ;;  %v5169_v8 = vadd.f32 %v5168_v12, %v5080_v6 }
 0x5bd   : > { %v5681_v15 = vsel %vm5678_vm4, %v5680_v53, %v5676_v29  ;;  %vm5708_vm12 = vcmp.eq.f32.partialorder %v5707_v35, 8.507059e+37  ;;  %v5710_v23 = vor.u32 1.1754944e-38, %v5709_v19 }
 0x5be   : > { %5911 = vst.msk [vmem:[%s12224_s23 + $0x88] sm:$0xff] %vm5893_vm11, %v5681_v15  ;;  %v5686_v11 = vmul.f32 %v7914_v51, %v5685_v47  ;;  %v5258_v1 = vadd.f32 %v5257_v18, %v5169_v8  ;;  %v5265_v4 = vpop.f32.mrf.mxu3 }
 0x5bf   : > { %v5171_v24 = vpop.f32.mrf.mxu2 }
 0x5c0   : > { %v5687_v37 = vadd.f32 %v7914_v51, %v5686_v11  ;;  %v6238_v27 = vmul.f32 -1.442695, %v5258_v1 }
 0x5c1   : > { %v7916_v44 = vpop.eup %7915  ;;  %v5082_v33 = vpop.f32.mrf.mxu0 }
 0x5c2   : > { %v7918_v17 = vpop.eup %7917  ;;  %v5699_v49 = vmul.f32 %v7916_v44, %v5400_v46  ;;  %v5083_v48 = vadd.f32 %v12534_v42, %v5082_v33  ;;  %v5691_v0 = vsel %vm5690_vm3, %v7914_v51, %v5687_v37  ;;  %7919 = vpow2.f32 %v6238_v27 }
 0x5c3   : > { %v5401_v26 = vadd.f32 1.0, %v7918_v17  ;;  %v5696_v62 = vsel %vm5693_vm5, %v5695_v36, %v5691_v0  ;;  %vm5704_vm6 = vweird.f32 %v7916_v44 }
 0x5c4   : > { %v5700_v40 = vsub.f32 1.0, %v5699_v49  ;;  %v5172_v63 = vadd.f32 %v5171_v24, %v5083_v48  ;;  %5912 = vst.msk [vmem:[%s12224_s23 + $0x90] sm:$0xff] %vm5893_vm11, %v5696_v62  ;;  %vm5705_vm10 = vmor %vm5703_vm9, %vm5704_vm6 }
 0x5c5   : > { %7921 = vrcp.f32 %v5401_v26  ;;  %v5724_v55 = vand.u32 2147483648, %v5401_v26  ;;  %v5722_v2 = vand.u32 2147483647, %v5401_v26  ;;  %vm5718_vm14 = vweird.f32 %v5401_v26 }
 0x5c6   : > { %v5701_v38 = vmul.f32 %v7916_v44, %v5700_v40  ;;  %v5261_v13 = vadd.f32 %v5260_v16, %v5172_v63  ;;  %v5267_v37 = vpop.f32.mrf.mxu3 }
 0x5c7   : > { %v5173_v57 = vpop.f32.mrf.mxu2  ;;  %v5725_v50 = vor.u32 1.1754944e-38, %v5724_v55  ;;  %vm5723_vm15 = vcmp.eq.f32.partialorder %v5722_v2, 8.507059e+37 }
 0x5c8   : > { %v5702_v10 = vadd.f32 %v7916_v44, %v5701_v38  ;;  %v6239_v41 = vmul.f32 -1.442695, %v5261_v13  ;;  %v7920_v34 = vpop.eup %7919 }
 0x5c9   : > { %v5084_v7 = vpop.f32.mrf.mxu0  ;;  %v5402_v31 = vadd.f32 1.0, %v7920_v34 }
 0x5ca   : > { %v5706_v5 = vsel %vm5705_vm10, %v7916_v44, %v5702_v10  ;;  %7923 = vpow2.f32 %v6239_v41  ;;  %v5085_v30 = vadd.f32 %v12534_v42, %v5084_v7 }
 0x5cb   : > { %v7922_v43 = vpop.eup %7921  ;;  %v5711_v52 = vsel %vm5708_vm12, %v5710_v23, %v5706_v5  ;;  %7925 = vrcp.f32 %v5402_v31  ;;  %v5739_v53 = vand.u32 2147483648, %v5402_v31  ;;  %v5737_v16 = vand.u32 2147483647, %v5402_v31 }
 0x5cc   : > { %5913 = vst.msk [vmem:[%s12224_s23 + $0x98] sm:$0xff] %vm5893_vm11, %v5711_v52  ;;  %v5714_v3 = vmul.f32 %v7922_v43, %v5401_v26  ;;  %v5174_v18 = vadd.f32 %v5173_v57, %v5085_v30  ;;  %vm5719_vm13 = vweird.f32 %v7922_v43  ;;  %vm5733_vm2 = vweird.f32 %v5402_v31 }
 0x5cd   : > { %vm5720_vm1 = vmor %vm5718_vm14, %vm5719_vm13  ;;  %v5740_v56 = vor.u32 1.1754944e-38, %v5739_v53  ;;  %vm5738_vm7 = vcmp.eq.f32.partialorder %v5737_v16, 8.507059e+37 }
 0x5ce   : > { %v5715_v25 = vsub.f32 1.0, %v5714_v3  ;;  %v5263_v9 = vadd.f32 %v5262_v28, %v5174_v18  ;;  %v5270_v34 = vpop.f32.mrf.mxu3 }
 0x5cf   : > { %v5176_v32 = vpop.f32.mrf.mxu2 }
 0x5d0   : > { %v7924_v22 = vpop.eup %7923  ;;  %v5716_v54 = vmul.f32 %v7922_v43, %v5715_v25  ;;  %v6240_v58 = vmul.f32 -1.442695, %v5263_v9 }
 0x5d1   : > { %v5403_v21 = vadd.f32 1.0, %v7924_v22  ;;  %v5087_v45 = vpop.f32.mrf.mxu0  ;;  %v7926_v20 = vpop.eup %7925 }
 0x5d2   : > { %v5717_v61 = vadd.f32 %v7922_v43, %v5716_v54  ;;  %v5088_v46 = vadd.f32 %v12534_v42, %v5087_v45  ;;  %v5729_v12 = vmul.f32 %v7926_v20, %v5402_v31  ;;  %vm5734_vm0 = vweird.f32 %v7926_v20 }
 0x5d3   : > { %7927 = vrcp.f32 %v5403_v21  ;;  %vm5735_vm4 = vmor %vm5733_vm2, %vm5734_vm0  ;;  %v5754_v48 = vand.u32 2147483648, %v5403_v21  ;;  %v5752_v26 = vand.u32 2147483647, %v5403_v21  ;;  %vm5748_vm3 = vweird.f32 %v5403_v21 }
 0x5d4   : > { %v5721_v39 = vsel %vm5720_vm1, %v7922_v43, %v5717_v61  ;;  %7929 = vpow2.f32 %v6240_v58  ;;  %v5730_v60 = vsub.f32 1.0, %v5729_v12  ;;  %v5177_v6 = vadd.f32 %v5176_v32, %v5088_v46 }
 0x5d5   : > { %v5726_v51 = vsel %vm5723_vm15, %v5725_v50, %v5721_v39  ;;  %v5755_v19 = vor.u32 1.1754944e-38, %v5754_v48  ;;  %vm5753_vm6 = vcmp.eq.f32.partialorder %v5752_v26, 8.507059e+37 }
 0x5d6   : > { %5914 = vst.msk [vmem:[%s12224_s23 + $0xa0] sm:$0xff] %vm5893_vm11, %v5726_v51  ;;  %v5731_v14 = vmul.f32 %v7926_v20, %v5730_v60  ;;  %v5266_v29 = vadd.f32 %v5265_v4, %v5177_v6 }
 0x5d7   : > { %v5178_v33 = vpop.f32.mrf.mxu2 }
 0x5d8   : > { %v5732_v47 = vadd.f32 %v7926_v20, %v5731_v14  ;;  %v6241_v8 = vmul.f32 -1.442695, %v5266_v29 }
 0x5d9   : > { %v7928_v15 = vpop.eup %7927  ;;  %v5089_v59 = vpop.f32.mrf.mxu0 }
 0x5da   : > { %v7930_v11 = vpop.eup %7929  ;;  %v5744_v1 = vmul.f32 %v7928_v15, %v5403_v21  ;;  %v5090_v44 = vadd.f32 %v12534_v42, %v5089_v59  ;;  %v5736_v27 = vsel %vm5735_vm4, %v7926_v20, %v5732_v47  ;;  %7931 = vpow2.f32 %v6241_v8  ;;  %v5272_v20 = vpop.f32.mrf.mxu3 }
 0x5db   : > { %v5404_v24 = vadd.f32 1.0, %v7930_v11  ;;  %v5741_v17 = vsel %vm5738_vm7, %v5740_v56, %v5736_v27  ;;  %vm5749_vm8 = vweird.f32 %v7928_v15 }
 0x5dc   : > { %v5745_v36 = vsub.f32 1.0, %v5744_v1  ;;  %v5179_v49 = vadd.f32 %v5178_v33, %v5090_v44  ;;  %5915 = vst.msk [vmem:[%s12224_s23 + $0xa8] sm:$0xff] %vm5893_vm11, %v5741_v17  ;;  %vm5750_vm5 = vmor %vm5748_vm3, %vm5749_vm8 }
 0x5dd   : > { %7933 = vrcp.f32 %v5404_v24  ;;  %v5769_v7 = vand.u32 2147483648, %v5404_v24  ;;  %v5767_v43 = vand.u32 2147483647, %v5404_v24  ;;  %vm5763_vm10 = vweird.f32 %v5404_v24 }
 0x5de   : > { %v5746_v0 = vmul.f32 %v7928_v15, %v5745_v36  ;;  %v5268_v62 = vadd.f32 %v5267_v37, %v5179_v49 }
 0x5df   : > { %v5770_v9 = vor.u32 1.1754944e-38, %v5769_v7  ;;  %vm5768_vm13 = vcmp.eq.f32.partialorder %v5767_v43, 8.507059e+37 }
 0x5e0   : > { %v5747_v40 = vadd.f32 %v7928_v15, %v5746_v0  ;;  %v6242_v63 = vmul.f32 -1.442695, %v5268_v62  ;;  %v7932_v35 = vpop.eup %7931 }
 0x5e1   : > { %v5405_v38 = vadd.f32 1.0, %v7932_v35  ;;  %v5092_v5 = vpop.f32.mrf.mxu0 }
 0x5e2   : > { %v5751_v28 = vsel %vm5750_vm5, %v7928_v15, %v5747_v40  ;;  %7935 = vpow2.f32 %v6242_v63  ;;  %v5181_v57 = vpop.f32.mrf.mxu2  ;;  %v5093_v52 = vadd.f32 %v12534_v42, %v5092_v5  ;;  %v5275_v33 = vpop.f32.mrf.mxu3 }
 0x5e3   : > { %v7934_v13 = vpop.eup %7933  ;;  %v5756_v10 = vsel %vm5753_vm6, %v5755_v19, %v5751_v28  ;;  %7937 = vrcp.f32 %v5405_v38  ;;  %v5784_v58 = vand.u32 2147483648, %v5405_v38  ;;  %v5782_v46 = vand.u32 2147483647, %v5405_v38 }
 0x5e4   : > { %5916 = vst.msk [vmem:[%s12224_s23 + $0xb0] sm:$0xff] %vm5893_vm11, %v5756_v10  ;;  %v5759_v41 = vmul.f32 %v7934_v13, %v5404_v24  ;;  %vm5764_vm9 = vweird.f32 %v7934_v13  ;;  %v5182_v55 = vadd.f32 %v5181_v57, %v5093_v52  ;;  %vm5778_vm1 = vweird.f32 %v5405_v38 }
 0x5e5   : > { %vm5765_vm12 = vmor %vm5763_vm10, %vm5764_vm9  ;;  %v5785_v60 = vor.u32 1.1754944e-38, %v5784_v58  ;;  %vm5783_vm0 = vcmp.eq.f32.partialorder %v5782_v46, 8.507059e+37 }
 0x5e6   : > { %v5760_v23 = vsub.f32 1.0, %v5759_v41  ;;  %v5271_v54 = vadd.f32 %v5270_v34, %v5182_v55 }
 0x5e8   : > { %v7936_v31 = vpop.eup %7935  ;;  %v5761_v30 = vmul.f32 %v7934_v13, %v5760_v23  ;;  %v6243_v32 = vmul.f32 -1.442695, %v5271_v54 }
 0x5e9   : > { %v5406_v3 = vadd.f32 1.0, %v7936_v31  ;;  %v7938_v18 = vpop.eup %7937  ;;  %v5094_v50 = vpop.f32.mrf.mxu0 }
 0x5ea   : > { %v5762_v25 = vadd.f32 %v7934_v13, %v5761_v30  ;;  %v5774_v22 = vmul.f32 %v7938_v18, %v5405_v38  ;;  %v5183_v45 = vpop.f32.mrf.mxu2  ;;  %vm5779_vm14 = vweird.f32 %v7938_v18  ;;  %v5095_v12 = vadd.f32 %v12534_v42, %v5094_v50  ;;  %v5277_v41 = vpop.f32.mrf.mxu3 }
 0x5eb   : > { %7939 = vrcp.f32 %v5406_v3  ;;  %vm5780_vm15 = vmor %vm5778_vm1, %vm5779_vm14  ;;  %v5799_v47 = vand.u32 2147483648, %v5406_v3  ;;  %v5797_v11 = vand.u32 2147483647, %v5406_v3  ;;  %vm5793_vm4 = vweird.f32 %v5406_v3 }
 0x5ec   : > { %v5766_v4 = vsel %vm5765_vm12, %v7934_v13, %v5762_v25  ;;  %v5775_v21 = vsub.f32 1.0, %v5774_v22  ;;  %7941 = vpow2.f32 %v6243_v32  ;;  %v5184_v53 = vadd.f32 %v5183_v45, %v5095_v12 }
 0x5ed   : > { %v5771_v2 = vsel %vm5768_vm13, %v5770_v9, %v5766_v4  ;;  %v5800_v17 = vor.u32 1.1754944e-38, %v5799_v47  ;;  %vm5798_vm8 = vcmp.eq.f32.partialorder %v5797_v11, 8.507059e+37 }
 0x5ee   : > { %5917 = vst.msk [vmem:[%s12224_s23 + $0xb8] sm:$0xff] %vm5893_vm11, %v5771_v2  ;;  %v5776_v61 = vmul.f32 %v7938_v18, %v5775_v21  ;;  %v5273_v15 = vadd.f32 %v5272_v20, %v5184_v53 }
 0x5f0   : > { %v5777_v51 = vadd.f32 %v7938_v18, %v5776_v61  ;;  %v6244_v56 = vmul.f32 -1.442695, %v5273_v15 }
 0x5f1   : > { %v7940_v39 = vpop.eup %7939 }
 0x5f2   : > { %v5789_v6 = vmul.f32 %v7940_v39, %v5406_v3  ;;  %v5781_v14 = vsel %vm5780_vm15, %v7938_v18, %v5777_v51  ;;  %v7942_v8 = vpop.eup %7941  ;;  %vm5794_vm2 = vweird.f32 %v7940_v39  ;;  %v5186_v1 = vpop.f32.mrf.mxu2  ;;  %7943 = vpow2.f32 %v6244_v56 }
 0x5f3   : > { %v5786_v16 = vsel %vm5783_vm0, %v5785_v60, %v5781_v14  ;;  %v5407_v44 = vadd.f32 1.0, %v7942_v8  ;;  %v5097_v37 = vpop.f32.mrf.mxu0  ;;  %vm5795_vm7 = vmor %vm5793_vm4, %vm5794_vm2 }
 0x5f4   : > { %v5790_v29 = vsub.f32 1.0, %v5789_v6  ;;  %5918 = vst.msk [vmem:[%s12224_s23 + $0xc0] sm:$0xff] %vm5893_vm11, %v5786_v16  ;;  %v5098_v24 = vadd.f32 %v12534_v42, %v5097_v37 }
 0x5f5   : > { %7945 = vrcp.f32 %v5407_v44  ;;  %v5814_v34 = vand.u32 2147483648, %v5407_v44  ;;  %v5812_v57 = vand.u32 2147483647, %v5407_v44  ;;  %vm5808_vm5 = vweird.f32 %v5407_v44 }
 0x5f6   : > { %v5791_v59 = vmul.f32 %v7940_v39, %v5790_v29  ;;  %v5187_v49 = vadd.f32 %v5186_v1, %v5098_v24 }
 0x5f7   : > { %v5815_v52 = vor.u32 1.1754944e-38, %v5814_v34  ;;  %vm5813_vm9 = vcmp.eq.f32.partialorder %v5812_v57, 8.507059e+37 }
 0x5f8   : > { %v5792_v27 = vadd.f32 %v7940_v39, %v5791_v59  ;;  %v5276_v0 = vadd.f32 %v5275_v33, %v5187_v49  ;;  %v7944_v26 = vpop.eup %7943  ;;  %v5280_v21 = vpop.f32.mrf.mxu3 }
 0x5f9   : > { %v5408_v63 = vadd.f32 1.0, %v7944_v26 }
 0x5fa   : > { %v5796_v36 = vsel %vm5795_vm7, %v7940_v39, %v5792_v27  ;;  %v6245_v62 = vmul.f32 -1.442695, %v5276_v0  ;;  %v5188_v35 = vpop.f32.mrf.mxu2 }
 0x5fb   : > { %v5801_v48 = vsel %vm5798_vm8, %v5800_v17, %v5796_v36  ;;  %v7946_v40 = vpop.eup %7945  ;;  %v5099_v19 = vpop.f32.mrf.mxu0  ;;  %v5829_v2 = vand.u32 2147483648, %v5408_v63  ;;  %v5827_v32 = vand.u32 2147483647, %v5408_v63  ;;  %vm5823_vm12 = vweird.f32 %v5408_v63 }
 0x5fc   : > { %5919 = vst.msk [vmem:[%s12224_s23 + $0xc8] sm:$0xff] %vm5893_vm11, %v5801_v48  ;;  %v5804_v28 = vmul.f32 %v7946_v40, %v5407_v44  ;;  %7947 = vpow2.f32 %v6245_v62  ;;  %v5100_v38 = vadd.f32 %v12534_v42, %v5099_v19  ;;  %vm5809_vm3 = vweird.f32 %v7946_v40 }
 0x5fd   : > { %7949 = vrcp.f32 %v5408_v63  ;;  %vm5810_vm6 = vmor %vm5808_vm5, %vm5809_vm3  ;;  %v5830_v12 = vor.u32 1.1754944e-38, %v5829_v2  ;;  %vm5828_vm14 = vcmp.eq.f32.partialorder %v5827_v32, 8.507059e+37 }
 0x5fe   : > { %v5805_v13 = vsub.f32 1.0, %v5804_v28  ;;  %v5189_v10 = vadd.f32 %v5188_v35, %v5100_v38 }
 0x600   : > { %v5806_v23 = vmul.f32 %v7946_v40, %v5805_v13  ;;  %v5278_v7 = vadd.f32 %v5277_v41, %v5189_v10  ;;  %v5282_v56 = vpop.f32.mrf.mxu3 }
 0x602   : > { %v7948_v5 = vpop.eup %7947  ;;  %v5807_v31 = vadd.f32 %v7946_v40, %v5806_v23  ;;  %v6246_v30 = vmul.f32 -1.442695, %v5278_v7  ;;  %v5191_v22 = vpop.f32.mrf.mxu2 }
 0x603   : > { %v7950_v43 = vpop.eup %7949  ;;  %v5409_v3 = vadd.f32 1.0, %v7948_v5  ;;  %v5102_v18 = vpop.f32.mrf.mxu0 }
 0x604   : > { %v5811_v25 = vsel %vm5810_vm6, %v7946_v40, %v5807_v31  ;;  %v5819_v55 = vmul.f32 %v7950_v43, %v5408_v63  ;;  %7951 = vpow2.f32 %v6246_v30  ;;  %v5103_v54 = vadd.f32 %v12534_v42, %v5102_v18 }
 0x605   : > { %v5816_v9 = vsel %vm5813_vm9, %v5815_v52, %v5811_v25  ;;  %7953 = vrcp.f32 %v5409_v3  ;;  %vm5824_vm10 = vweird.f32 %v7950_v43  ;;  %v5844_v15 = vand.u32 2147483648, %v5409_v3 }
 0x606   : > { %5920 = vst.msk [vmem:[%s12224_s23 + $0xd0] sm:$0xff] %vm5893_vm11, %v5816_v9  ;;  %v5820_v4 = vsub.f32 1.0, %v5819_v55  ;;  %v5192_v45 = vadd.f32 %v5191_v22, %v5103_v54  ;;  %vm5825_vm13 = vmor %vm5823_vm12, %vm5824_vm10  ;;  %v5842_v59 = vand.u32 2147483647, %v5409_v3  ;;  %vm5838_vm15 = vweird.f32 %v5409_v3 }
 0x607   : > { %v5845_v27 = vor.u32 1.1754944e-38, %v5844_v15 }
 0x608   : > { %v5821_v58 = vmul.f32 %v7950_v43, %v5820_v4  ;;  %v5281_v46 = vadd.f32 %v5280_v21, %v5192_v45  ;;  %vm5843_vm2 = vcmp.eq.f32.partialorder %v5842_v59, 8.507059e+37 }
 0x60a   : > { %v7952_v20 = vpop.eup %7951  ;;  %v5822_v61 = vadd.f32 %v7950_v43, %v5821_v58  ;;  %v6247_v53 = vmul.f32 -1.442695, %v5281_v46  ;;  %v5193_v47 = vpop.f32.mrf.mxu2 }
 0x60b   : > { %v7954_v50 = vpop.eup %7953  ;;  %v5410_v39 = vadd.f32 1.0, %v7952_v20  ;;  %v5104_v51 = vpop.f32.mrf.mxu0 }
 0x60c   : > { %v5826_v60 = vsel %vm5825_vm13, %v7950_v43, %v5822_v61  ;;  %v5834_v6 = vmul.f32 %v7954_v50, %v5409_v3  ;;  %v5105_v29 = vadd.f32 %v12534_v42, %v5104_v51  ;;  %vm5839_vm1 = vweird.f32 %v7954_v50 }
 0x60d   : > { %v5831_v14 = vsel %vm5828_vm14, %v5830_v12, %v5826_v60  ;;  %7955 = vrcp.f32 %v5410_v39  ;;  %vm5840_vm0 = vmor %vm5838_vm15, %vm5839_vm1  ;;  %v5859_v0 = vand.u32 2147483648, %v5410_v39  ;;  %v5857_v62 = vand.u32 2147483647, %v5410_v39 }
 0x60e   : > { %5921 = vst.msk [vmem:[%s12224_s23 + $0xd8] sm:$0xff] %vm5893_vm11, %v5831_v14  ;;  %v5835_v16 = vsub.f32 1.0, %v5834_v6  ;;  %7957 = vpow2.f32 %v6247_v53  ;;  %v5194_v11 = vadd.f32 %v5193_v47, %v5105_v29  ;;  %vm5853_vm7 = vweird.f32 %v5410_v39 }
 0x60f   : > { %v5860_v63 = vor.u32 1.1754944e-38, %v5859_v0  ;;  %vm5858_vm3 = vcmp.eq.f32.partialorder %v5857_v62, 8.507059e+37 }
 0x610   : > { %v5836_v8 = vmul.f32 %v7954_v50, %v5835_v16  ;;  %v5283_v44 = vadd.f32 %v5282_v56, %v5194_v11 }
 0x612   : > { %v5837_v1 = vadd.f32 %v7954_v50, %v5836_v8  ;;  %v6248_v36 = vmul.f32 -1.442695, %v5283_v44 }
 0x613   : > { %v7956_v37 = vpop.eup %7955 }
 0x614   : > { %v7958_v24 = vpop.eup %7957  ;;  %v5841_v33 = vsel %vm5840_vm0, %v7954_v50, %v5837_v1  ;;  %v5849_v17 = vmul.f32 %v7956_v37, %v5410_v39  ;;  %7959 = vpow2.f32 %v6248_v36  ;;  %vm5854_vm4 = vweird.f32 %v7956_v37 }
 0x615   : > { %v5846_v42 = vsel %vm5843_vm2, %v5845_v27, %v5841_v33  ;;  %v5411_v49 = vadd.f32 1.0, %v7958_v24  ;;  %vm5855_vm8 = vmor %vm5853_vm7, %vm5854_vm4 }
 0x616   : > { %5922 = vst.msk [vmem:[%s12224_s23 + $0xe0] sm:$0xff] %vm5893_vm11, %v5846_v42  ;;  %v5850_v48 = vsub.f32 1.0, %v5849_v17 }
 0x617   : > { %7961 = vrcp.f32 %v5411_v49  ;;  %v5874_v34 = vand.u32 2147483648, %v5411_v49  ;;  %v5872_v57 = vand.u32 2147483647, %v5411_v49  ;;  %vm5868_vm6 = vweird.f32 %v5411_v49 }
 0x618   : > { %v5851_v26 = vmul.f32 %v7956_v37, %v5850_v48 }
 0x619   : > { %v5875_v31 = vor.u32 1.1754944e-38, %v5874_v34  ;;  %vm5873_vm10 = vcmp.eq.f32.partialorder %v5872_v57, 8.507059e+37 }
 0x61a   : > { %v5852_v40 = vadd.f32 %v7956_v37, %v5851_v26  ;;  %v7960_v35 = vpop.eup %7959 }
 0x61b   : > { %v5412_v13 = vadd.f32 1.0, %v7960_v35 }
 0x61c   : > { %v5856_v19 = vsel %vm5855_vm8, %v7956_v37, %v5852_v40 }
 0x61d   : > { %v7962_v28 = vpop.eup %7961  ;;  %v5861_v38 = vsel %vm5858_vm3, %v5860_v63, %v5856_v19  ;;  %7963 = vrcp.f32 %v5412_v13  ;;  %v5889_v18 = vand.u32 2147483648, %v5412_v13  ;;  %v5887_v55 = vand.u32 2147483647, %v5412_v13 }
 0x61e   : > { %5923 = vst.msk [vmem:[%s12224_s23 + $0xe8] sm:$0xff] %vm5893_vm11, %v5861_v38  ;;  %v5864_v10 = vmul.f32 %v7962_v28, %v5411_v49  ;;  %vm5869_vm5 = vweird.f32 %v7962_v28  ;;  %vm5883_vm13 = vweird.f32 %v5412_v13 }
 0x61f   : > { %vm5870_vm9 = vmor %vm5868_vm6, %vm5869_vm5  ;;  %v5890_v22 = vor.u32 1.1754944e-38, %v5889_v18  ;;  %vm5888_vm1 = vcmp.eq.f32.partialorder %v5887_v55, 8.507059e+37 }
 0x620   : > { %v5865_v41 = vsub.f32 1.0, %v5864_v10 }
 0x622   : > { %v5866_v23 = vmul.f32 %v7962_v28, %v5865_v41 }
 0x623   : > { %v7964_v5 = vpop.eup %7963 }
 0x624   : > { %v5867_v7 = vadd.f32 %v7962_v28, %v5866_v23  ;;  %v5879_v43 = vmul.f32 %v7964_v5, %v5412_v13  ;;  %vm5884_vm12 = vweird.f32 %v7964_v5 }
 0x625   : > { %vm5885_vm14 = vmor %vm5883_vm13, %vm5884_vm12 }
 0x626   : > { %v5871_v30 = vsel %vm5870_vm9, %v7962_v28, %v5867_v7  ;;  %v5880_v3 = vsub.f32 1.0, %v5879_v43 }
 0x627   : > { %v5876_v52 = vsel %vm5873_vm10, %v5875_v31, %v5871_v30 }
 0x628   : > { %5924 = vst.msk [vmem:[%s12224_s23 + $0xf0] sm:$0xff] %vm5893_vm11, %v5876_v52  ;;  %v5881_v25 = vmul.f32 %v7964_v5, %v5880_v3 }
 0x62a   : > { %v5882_v9 = vadd.f32 %v7964_v5, %v5881_v25 }
 0x62c   : > { %v5886_v4 = vsel %vm5885_vm14, %v7964_v5, %v5882_v9 }
 0x62d   : > { %v5891_v54 = vsel %vm5888_vm1, %v5890_v22, %v5886_v4 }
 0x62e   : > { %5925 = vst.msk [vmem:[%s12224_s23 + $0xf8] sm:$0xff] %vm5893_vm11, %v5891_v54 }
 0x62f PF: > { %s17_s24 = sadd.s32 1, %s8062_s24  }
 0x630   : > { %p14_p4 = scmp.ge.s32.totalorder %s17_s24, 4  }
 0x632   :  { %16 = sbr.rel (!%p14_p4) target bundleno = 1 (0x1), region = 79 }

</bundles_post_ra>
